<compile_context>
chip_gen: v7x
topology: tpu7x:2x2x1
jax: 0.10.0
libtpu: 0.0.40
codegen_flags: <defaults>
</compile_context>

<pallas_src>
import functools

import jax
import jax.numpy as jnp
from jax.experimental import pallas as pl
from jax.experimental.pallas import tpu as pltpu

BN_EPS = 1e-5
LEAKY_SLOPE = 0.2
VMEM_LIMIT = 48 << 20   # stays under v7x's 64 MiB physical VMEM; ample on v5e/v6e


def _round_up(x, m):
    return (x + m - 1) // m * m


# ---------------------------------------------------------------------------
# Kernels
# ---------------------------------------------------------------------------
def _conv_stats_kernel(x_ref, w_ref, gamma_ref, beta_ref, y_ref, ss_ref,
                       stat_ref, *, ws, inv_count):
    """Phase 1: 4-tap conv (space-to-depth form) + BN batch statistics.

    x_ref   : (PXIN, 4*Cin_pad)  bf16  flattened s2d image (one batch element)
    w_ref   : (4, 4*Cin_pad, CT) bf16  tap weight matrices for this Cout block
    y_ref   : (PF, CT)           bf16  pre-BN activation (PF = Ho*Ws, Ws-wide grid)
    ss_ref  : (2, CT)            f32   [scale; shift], written once at the last step
    stat_ref: (2, CT)            f32   VMEM scratch: [sum; sum_sq] accumulator
    """
    n = pl.program_id(1)
    pf = y_ref.shape[0]

    # 4 tap matmuls over offset slices of the same VMEM block (f32 accumulation).
    acc = jnp.dot(x_ref[0:pf, :], w_ref[0], preferred_element_type=jnp.float32)
    for t, off in ((1, 1), (2, ws), (3, ws + 1)):
        acc += jnp.dot(x_ref[off:off + pf, :], w_ref[t],
                       preferred_element_type=jnp.float32)

    y_ref[...] = acc.astype(y_ref.dtype)

    # BN statistics from the f32 accumulator; pixels with (p mod Ws) == Ws-1
    # wrap a row boundary (garbage column) and are excluded from the stats.
    row = jax.lax.broadcasted_iota(jnp.int32, (pf, 1), 0)
    valid = (row % ws) != (ws - 1)
    yv = jnp.where(valid, acc, 0.0)

    @pl.when(n == 0)
    def _():
        stat_ref[...] = jnp.zeros_like(stat_ref)

    stat_ref[0:1, :] += jnp.sum(yv, axis=0, keepdims=True)
    stat_ref[1:2, :] += jnp.sum(yv * acc, axis=0, keepdims=True)

    @pl.when(n == pl.num_programs(1) - 1)
    def _():
        mean = stat_ref[0:1, :] * inv_count
        var = jnp.maximum(stat_ref[1:2, :] * inv_count - mean * mean, 0.0)
        scale = gamma_ref[...] * jax.lax.rsqrt(var + BN_EPS)
        ss_ref[0:1, :] = scale
        ss_ref[1:2, :] = beta_ref[...] - mean * scale


def _bn_lrelu_kernel(y_ref, ss_ref, o_ref):
    """Phase 2: per-channel FMA (folded BN, training-mode stats) + LeakyReLU(0.2)."""
    z = y_ref[...].astype(jnp.float32) * ss_ref[0:1, :] + ss_ref[1:2, :]
    o_ref[...] = jnp.where(z >= 0, z, LEAKY_SLOPE * z).astype(o_ref.dtype)


def _head_kernel(x_ref, w_ref, b_ref, o_ref):
    """conv5 (4x4 valid conv on a 4x4 map == one matmul) + bias + sigmoid."""
    y = jnp.dot(x_ref[...], w_ref[...], preferred_element_type=jnp.float32)
    y = y + b_ref[...]
    o_ref[...] = 1.0 / (1.0 + jnp.exp(-y))


# ---------------------------------------------------------------------------
# Per-layer wrappers
# ---------------------------------------------------------------------------
def _conv_bn_lrelu(x_nhwc, w_taps, gamma, beta):
    """4x4 stride-2 pad-1 conv (bias cancelled by BN) + BN(train) + LeakyReLU(0.2)."""
    n, h, w = x_nhwc.shape[:3]
    assert h % 2 == 0 and w % 2 == 0, (h, w)
    cin_pad = w_taps.shape[1] // 4
    cout_pad = w_taps.shape[2]
    if x_nhwc.shape[-1] != cin_pad:
        x_nhwc = jnp.pad(
            x_nhwc, ((0, 0), (0, 0), (0, 0), (0, cin_pad - x_nhwc.shape[-1])))

    ho, wo = h // 2, w // 2
    hs, ws = ho + 1, wo + 1
    k4 = 4 * cin_pad
    pf = ho * ws                   # output pixels computed on the Ws-wide grid
    pxin = hs * ws + ws            # + one garbage s2d row covering the tap offsets

    # Zero-pad ring + 2x2 space-to-depth + flatten pixels.  Pure layout pass,
    # no data duplication (contrast with im2col's 4x read amplification).
    xp = jnp.pad(x_nhwc, ((0, 0), (1, 1), (1, 1), (0, 0)))
    xs = xp.reshape(n, hs, 2, ws, 2, cin_pad).transpose(0, 1, 3, 2, 4, 5)
    xflat = xs.reshape(n, hs * ws, k4)
    xflat = jnp.pad(xflat, ((0, 0), (0, pxin - hs * ws), (0, 0)))
    xflat = xflat.astype(jnp.bfloat16)

    ct = 256 if cout_pad % 256 == 0 else 128     # lane-dense Cout tile
    ncb = cout_pad // ct
    grid = (ncb, n)                              # batch (BN reduction) innermost

    cost = pl.CostEstimate(
        flops=8 * n * pf * k4 * cout_pad,
        transcendentals=0,
        bytes_accessed=2 * (ncb * n * pxin * k4 + 4 * k4 * cout_pad
                            + n * pf * cout_pad))

    y, ss = pl.pallas_call(
        functools.partial(_conv_stats_kernel, ws=ws,
                          inv_count=1.0 / (n * ho * wo)),
        out_shape=(jax.ShapeDtypeStruct((n, pf, cout_pad), jnp.bfloat16),
                   jax.ShapeDtypeStruct((2, cout_pad), jnp.float32)),
        grid=grid,
        in_specs=[pl.BlockSpec((None, pxin, k4), lambda cb, i: (i, 0, 0)),
                  pl.BlockSpec((4, k4, ct), lambda cb, i: (0, 0, cb)),
                  pl.BlockSpec((1, ct), lambda cb, i: (0, cb)),
                  pl.BlockSpec((1, ct), lambda cb, i: (0, cb))],
        out_specs=(pl.BlockSpec((None, pf, ct), lambda cb, i: (i, 0, cb)),
                   pl.BlockSpec((2, ct), lambda cb, i: (0, cb))),
        scratch_shapes=[pltpu.VMEM((2, ct), jnp.float32)],
        compiler_params=pltpu.CompilerParams(
            dimension_semantics=("parallel", "arbitrary"),
            vmem_limit_bytes=VMEM_LIMIT),
        cost_estimate=cost,
    )(xflat, w_taps, gamma, beta)

    act = pl.pallas_call(
        _bn_lrelu_kernel,
        out_shape=jax.ShapeDtypeStruct((n, pf, cout_pad), jnp.bfloat16),
        grid=grid,
        in_specs=[pl.BlockSpec((None, pf, ct), lambda cb, i: (i, 0, cb)),
                  pl.BlockSpec((2, ct), lambda cb, i: (0, cb))],
        out_specs=pl.BlockSpec((None, pf, ct), lambda cb, i: (i, 0, cb)),
        compiler_params=pltpu.CompilerParams(
            dimension_semantics=("parallel", "parallel"),
            vmem_limit_bytes=VMEM_LIMIT),
    )(y, ss)

    # Drop the Ws-grid garbage column; keep padded channels (exact zeros feeding
    # the next layer's zero weight rows, so no slice/re-pad round trip).
    return act.reshape(n, ho, ws, cout_pad)[:, :, :wo, :]


def _conv_head_sigmoid(x_nhwc, w, b):
    """conv5: 4x4 valid conv (stride 1) + bias + sigmoid on the final 4x4 map."""
    n, h, wdt, c = x_nhwc.shape
    # TODO(synk): general spatial sizes would need a patch loop; the DCD
    # architecture always reaches conv5 with a 4x4 feature map.
    assert h == 4 and wdt == 4, (h, wdt)
    k = 16 * c
    xf = x_nhwc.reshape(n, k).astype(jnp.bfloat16)

    full = lambda shape: pl.BlockSpec(shape, lambda: (0,) * len(shape))
    out = pl.pallas_call(
        _head_kernel,
        out_shape=jax.ShapeDtypeStruct((n, 1), jnp.float32),
        grid=(),
        in_specs=[full((n, k)), full((k, 1)), full((1, 1))],
        out_specs=full((n, 1)),
        compiler_params=pltpu.CompilerParams(vmem_limit_bytes=VMEM_LIMIT),
    )(xf, w, b)
    return out.reshape(n, 1, 1, 1)


# ---------------------------------------------------------------------------
# Parameters + forward
# ---------------------------------------------------------------------------
def _taps_from_torch(w_torch, cin_pad, cout_pad):
    """PyTorch Conv2d weight (Cout, Cin, 4, 4) -> (4, 4*cin_pad, cout_pad) bf16.

    Tap t = dh*2 + dw (dh, dw in {0,1}); row index = sh*(2*cin_pad) + sw*cin_pad + c,
    matching the (sh, sw, c) feature order of the 2x2 space-to-depth packing of
    the zero-padded input.  Padded cin/cout positions are zero.
    """
    cout, cin = w_torch.shape[:2]
    wp = jnp.zeros((cout_pad, cin_pad, 4, 4), jnp.float32)
    wp = wp.at[:cout, :cin].set(w_torch)
    wp = wp.transpose(2, 3, 1, 0)                      # (kh, kw, cin_pad, cout_pad)
    wp = wp.reshape(2, 2, 2, 2, cin_pad, cout_pad)     # (dh, sh, dw, sw, c, co)
    wp = wp.transpose(0, 2, 1, 3, 4, 5)                # (dh, dw, sh, sw, c, co)
    return wp.reshape(4, 4 * cin_pad, cout_pad).astype(jnp.bfloat16)


def _head_from_torch(w_torch, cin_pad):
    """PyTorch Conv2d weight (1, Cin, 4, 4) -> (16*cin_pad, 1) bf16, (kh,kw,c) order."""
    cin = w_torch.shape[1]
    wp = jnp.zeros((1, cin_pad, 4, 4), jnp.float32).at[:, :cin].set(w_torch)
    return wp.transpose(2, 3, 1, 0).reshape(16 * cin_pad, 1).astype(jnp.bfloat16)


def init_params(key, input_nc=3, hidden=128, out_64=False):
    """Fresh DCDiscriminator parameters (BatchNorm training mode: gamma=1, beta=0).

    Conv weights are drawn in PyTorch Conv2d layout (Cout, Cin, 4, 4) and then
    converted to the padded tap-matrix layout used by the kernels, so real
    checkpoints can be imported through the same path.  Conv1-4 biases are
    omitted: a bias followed by BN mean subtraction cancels exactly.
    """
    if out_64:
        convs = [(input_nc, hidden), (hidden, hidden * 2)]
    else:
        convs = [(input_nc, hidden * 2)]
    convs += [(hidden * 2, hidden * 4), (hidden * 4, hidden * 8)]

    keys = jax.random.split(key, len(convs) + 2)
    blocks = []
    cin_pad = _round_up(input_nc, 32)            # 4*cin_pad is a multiple of 128
    for (cin, cout), k in zip(convs, keys[:len(convs)]):
        cout_pad = _round_up(cout, 128)
        w_t = jax.random.normal(k, (cout, cin, 4, 4), jnp.float32) * 0.02
        blocks.append({
            "w_taps": _taps_from_torch(w_t, cin_pad, cout_pad),
            "gamma": jnp.ones((1, cout_pad), jnp.float32),
            "beta": jnp.zeros((1, cout_pad), jnp.float32),
        })
        cin_pad = cout_pad

    w5 = jax.random.normal(keys[-2], (1, convs[-1][1], 4, 4), jnp.float32) * 0.02
    head = {"w": _head_from_torch(w5, cin_pad),
            "b": jax.random.normal(keys[-1], (1, 1), jnp.float32) * 0.02}
    return {"blocks": blocks, "head": head}


@jax.jit
def dc_discriminator(x_nchw, params):
    """DCDiscriminator.forward: [conv+BN+LeakyReLU]*n  ->  conv5 + sigmoid."""
    x = jnp.transpose(x_nchw, (0, 2, 3, 1)).astype(jnp.bfloat16)    # NCHW -> NHWC
    for layer in params["blocks"]:
        x = _conv_bn_lrelu(x, layer["w_taps"], layer["gamma"], layer["beta"])
    y = _conv_head_sigmoid(x, params["head"]["w"], params["head"]["b"])
    return jnp.transpose(y, (0, 3, 1, 2))                            # NHWC -> NCHW


if __name__ == "__main__":
    key = jax.random.PRNGKey(0)
    k_x, k_p = jax.random.split(key)

    # Default path (out_64=False) needs a 32x32 input so conv5 (4x4 valid)
    # sees a 4x4 feature map: 32 -> 16 -> 8 -> 4 -> 1.
    N, INPUT_NC, H, W = 2, 3, 32, 32
    HIDDEN = 32

    x = jax.random.normal(k_x, (N, INPUT_NC, H, W), jnp.float32)
    params = init_params(k_p, INPUT_NC, HIDDEN, out_64=False)

    y = dc_discriminator(x, params)
    jax.block_until_ready(y)
    assert y.shape == (N, 1, 1, 1), y.shape
    assert bool(jnp.all((y >= 0.0) & (y <= 1.0))), "sigmoid output out of range"
    print("KERNEL_OK")
</pallas_src>

<mosaic_0001>
module attributes {stable_mosaic.version = 11 : i64} {
  func.func @_conv_stats_kernel(%arg0: i32, %arg1: i32, %arg2: memref<1x306x128xbf16, #tpu.memory_space<vmem>>, %arg3: memref<4x128x128xbf16, #tpu.memory_space<vmem>>, %arg4: memref<1x128xf32, #tpu.memory_space<vmem>>, %arg5: memref<1x128xf32, #tpu.memory_space<vmem>>, %arg6: memref<1x272x128xbf16, #tpu.memory_space<vmem>>, %arg7: memref<2x128xf32, #tpu.memory_space<vmem>>, %arg8: memref<2x128xf32, #tpu.memory_space<vmem>>) attributes {dimension_semantics = [#tpu.dimension_semantics<parallel>, #tpu.dimension_semantics<arbitrary>], iteration_bounds = array<i64: 1, 2>, scalar_prefetch = 0 : i64, scratch_operands = 1 : i64, tpu.core_type = #tpu.core_type<tc>, window_params = [{transform_indices = @transform_0, window_bounds = array<i64: 1, 306, 128>}, {transform_indices = @transform_1, window_bounds = array<i64: 4, 128, 128>}, {transform_indices = @transform_2, window_bounds = array<i64: 1, 128>}, {transform_indices = @transform_3, window_bounds = array<i64: 1, 128>}, {transform_indices = @transform_4, window_bounds = array<i64: 1, 272, 128>}, {transform_indices = @transform_5, window_bounds = array<i64: 2, 128>}]} {
    %c0 = arith.constant 0 : index
    %c0_0 = arith.constant 0 : index
    %c0_1 = arith.constant 0 : index
    %0 = vector.load %arg2[%c0, %c0_0, %c0_1] : memref<1x306x128xbf16, #tpu.memory_space<vmem>>, vector<1x272x128xbf16>
    %1 = vector.shape_cast %0 : vector<1x272x128xbf16> to vector<272x128xbf16>
    %c0_2 = arith.constant 0 : index
    %c0_3 = arith.constant 0 : index
    %c0_4 = arith.constant 0 : index
    %2 = vector.load %arg3[%c0_2, %c0_3, %c0_4] : memref<4x128x128xbf16, #tpu.memory_space<vmem>>, vector<1x128x128xbf16>
    %3 = vector.shape_cast %2 : vector<1x128x128xbf16> to vector<128x128xbf16>
    %cst = arith.constant dense<0.000000e+00> : vector<272x128xf32>
    %4 = tpu.matmul %1, %3, %cst {dimension_numbers = #tpu.dot_dimension_numbers<[1], [0], [0], [1], [0, 0, 1, 1], [], []>} : vector<272x128xbf16>, vector<128x128xbf16>, vector<272x128xf32> -> vector<272x128xf32>
    %c0_5 = arith.constant 0 : index
    %c1 = arith.constant 1 : index
    %c0_6 = arith.constant 0 : index
    %5 = vector.load %arg2[%c0_5, %c1, %c0_6] : memref<1x306x128xbf16, #tpu.memory_space<vmem>>, vector<1x272x128xbf16>
    %6 = vector.shape_cast %5 : vector<1x272x128xbf16> to vector<272x128xbf16>
    %c1_7 = arith.constant 1 : index
    %c0_8 = arith.constant 0 : index
    %c0_9 = arith.constant 0 : index
    %7 = vector.load %arg3[%c1_7, %c0_8, %c0_9] : memref<4x128x128xbf16, #tpu.memory_space<vmem>>, vector<1x128x128xbf16>
    %8 = vector.shape_cast %7 : vector<1x128x128xbf16> to vector<128x128xbf16>
    %cst_10 = arith.constant dense<0.000000e+00> : vector<272x128xf32>
    %9 = tpu.matmul %6, %8, %cst_10 {dimension_numbers = #tpu.dot_dimension_numbers<[1], [0], [0], [1], [0, 0, 1, 1], [], []>} : vector<272x128xbf16>, vector<128x128xbf16>, vector<272x128xf32> -> vector<272x128xf32>
    %10 = arith.addf %4, %9 : vector<272x128xf32>
    %c0_11 = arith.constant 0 : index
    %c17 = arith.constant 17 : index
    %c0_12 = arith.constant 0 : index
    %11 = vector.load %arg2[%c0_11, %c17, %c0_12] : memref<1x306x128xbf16, #tpu.memory_space<vmem>>, vector<1x272x128xbf16>
    %12 = vector.shape_cast %11 : vector<1x272x128xbf16> to vector<272x128xbf16>
    %c2 = arith.constant 2 : index
    %c0_13 = arith.constant 0 : index
    %c0_14 = arith.constant 0 : index
    %13 = vector.load %arg3[%c2, %c0_13, %c0_14] : memref<4x128x128xbf16, #tpu.memory_space<vmem>>, vector<1x128x128xbf16>
    %14 = vector.shape_cast %13 : vector<1x128x128xbf16> to vector<128x128xbf16>
    %cst_15 = arith.constant dense<0.000000e+00> : vector<272x128xf32>
    %15 = tpu.matmul %12, %14, %cst_15 {dimension_numbers = #tpu.dot_dimension_numbers<[1], [0], [0], [1], [0, 0, 1, 1], [], []>} : vector<272x128xbf16>, vector<128x128xbf16>, vector<272x128xf32> -> vector<272x128xf32>
    %16 = arith.addf %10, %15 : vector<272x128xf32>
    %c0_16 = arith.constant 0 : index
    %c18 = arith.constant 18 : index
    %c0_17 = arith.constant 0 : index
    %17 = vector.load %arg2[%c0_16, %c18, %c0_17] : memref<1x306x128xbf16, #tpu.memory_space<vmem>>, vector<1x272x128xbf16>
    %18 = vector.shape_cast %17 : vector<1x272x128xbf16> to vector<272x128xbf16>
    %c3 = arith.constant 3 : index
    %c0_18 = arith.constant 0 : index
    %c0_19 = arith.constant 0 : index
    %19 = vector.load %arg3[%c3, %c0_18, %c0_19] : memref<4x128x128xbf16, #tpu.memory_space<vmem>>, vector<1x128x128xbf16>
    %20 = vector.shape_cast %19 : vector<1x128x128xbf16> to vector<128x128xbf16>
    %cst_20 = arith.constant dense<0.000000e+00> : vector<272x128xf32>
    %21 = tpu.matmul %18, %20, %cst_20 {dimension_numbers = #tpu.dot_dimension_numbers<[1], [0], [0], [1], [0, 0, 1, 1], [], []>} : vector<272x128xbf16>, vector<128x128xbf16>, vector<272x128xf32> -> vector<272x128xf32>
    %22 = arith.addf %16, %21 : vector<272x128xf32>
    %23 = arith.truncf %22 : vector<272x128xf32> to vector<272x128xbf16>
    %c0_21 = arith.constant 0 : index
    %c0_22 = arith.constant 0 : index
    %c0_23 = arith.constant 0 : index
    %24 = vector.load %arg6[%c0_21, %c0_22, %c0_23] : memref<1x272x128xbf16, #tpu.memory_space<vmem>>, vector<1x272x128xbf16>
    %25 = vector.shape_cast %24 : vector<1x272x128xbf16> to vector<272x128xbf16>
    %26 = vector.shape_cast %23 : vector<272x128xbf16> to vector<1x272x128xbf16>
    tpu.vector_store %arg6[%c0_21, %c0_22, %c0_23], %26 {strides = array<i32>} : memref<1x272x128xbf16, #tpu.memory_space<vmem>>, vector<1x272x128xbf16>,
    %27 = tpu.iota {dimensions = array<i32: 0>} : vector<272x1xi32>
    %c17_i32 = arith.constant 17 : i32
    %c0_i32 = arith.constant 0 : i32
    %28 = arith.cmpi eq, %c17_i32, %c0_i32 : i32
    %c1_i32 = arith.constant 1 : i32
    %29 = arith.select %28, %c1_i32, %c17_i32 : i32
    %30 = vector.broadcast %29 : i32 to vector<272x1xi32>
    %31 = arith.remsi %27, %30 : vector<272x1xi32>
    %c0_i32_24 = arith.constant 0 : i32
    %32 = vector.broadcast %c0_i32_24 : i32 to vector<272x1xi32>
    %33 = arith.cmpi ne, %31, %32 : vector<272x1xi32>
    %c0_i32_25 = arith.constant 0 : i32
    %34 = vector.broadcast %c0_i32_25 : i32 to vector<272x1xi32>
    %35 = arith.cmpi slt, %31, %34 : vector<272x1xi32>
    %c0_i32_26 = arith.constant 0 : i32
    %36 = arith.cmpi slt, %29, %c0_i32_26 : i32
    %37 = vector.broadcast %36 : i1 to vector<272x1xi1>
    %38 = vector.broadcast %37 : vector<272x1xi1> to vector<272x1xi1>
    %39 = arith.xori %35, %38 : vector<272x1xi1>
    %40 = arith.andi %39, %33 : vector<272x1xi1>
    %41 = vector.broadcast %29 : i32 to vector<272x1xi32>
    %42 = arith.addi %31, %41 : vector<272x1xi32>
    %43 = arith.select %40, %42, %31 : vector<272x1xi1>, vector<272x1xi32>
    %c16_i32 = arith.constant 16 : i32
    %44 = vector.broadcast %c16_i32 : i32 to vector<272x1xi32>
    %45 = arith.cmpi ne, %43, %44 : vector<272x1xi32>
    %cst_27 = arith.constant 0.000000e+00 : f32
    %46 = vector.shape_cast %45 : vector<272x1xi1> to vector<272x1xi1>
    %47 = vector.broadcast %46 : vector<272x1xi1> to vector<272x128xi1>
    %48 = vector.broadcast %cst_27 : f32 to vector<272x128xf32>
    %49 = arith.select %47, %22, %48 : vector<272x128xi1>, vector<272x128xf32>
    %c0_i32_28 = arith.constant 0 : i32
    %50 = arith.cmpi eq, %arg1, %c0_i32_28 : i32
    %51 = arith.extui %50 : i1 to i32
    %c0_i32_29 = arith.constant 0 : i32
    %52 = arith.cmpi ne, %51, %c0_i32_29 : i32
    scf.if %52 {
      %cst_42 = arith.constant 0.000000e+00 : f32
      %67 = vector.broadcast %cst_42 : f32 to vector<2x128xf32>
      %c0_43 = arith.constant 0 : index
      %c0_44 = arith.constant 0 : index
      %68 = vector.load %arg8[%c0_43, %c0_44] : memref<2x128xf32, #tpu.memory_space<vmem>>, vector<2x128xf32>
      tpu.vector_store %arg8[%c0_43, %c0_44], %67 {strides = array<i32>} : memref<2x128xf32, #tpu.memory_space<vmem>>, vector<2x128xf32>,
    } else {
    }
    %c0_30 = arith.constant 0 : index
    %c0_31 = arith.constant 0 : index
    %53 = vector.load %arg8[%c0_30, %c0_31] : memref<2x128xf32, #tpu.memory_space<vmem>>, vector<1x128xf32>
    %cst_32 = arith.constant dense<0.000000e+00> : vector<128xf32>
    %54 = vector.multi_reduction <add>, %49, %cst_32 [0] : vector<272x128xf32> to vector<128xf32>
    %55 = vector.shape_cast %54 : vector<128xf32> to vector<1x128xf32>
    %56 = arith.addf %53, %55 : vector<1x128xf32>
    %c0_33 = arith.constant 0 : index
    %c0_34 = arith.constant 0 : index
    %57 = vector.load %arg8[%c0_33, %c0_34] : memref<2x128xf32, #tpu.memory_space<vmem>>, vector<1x128xf32>
    tpu.vector_store %arg8[%c0_33, %c0_34], %56 {strides = array<i32>} : memref<2x128xf32, #tpu.memory_space<vmem>>, vector<1x128xf32>,
    %c1_35 = arith.constant 1 : index
    %c0_36 = arith.constant 0 : index
    %58 = vector.load %arg8[%c1_35, %c0_36] : memref<2x128xf32, #tpu.memory_space<vmem>>, vector<1x128xf32>
    %59 = arith.mulf %49, %22 : vector<272x128xf32>
    %cst_37 = arith.constant dense<0.000000e+00> : vector<128xf32>
    %60 = vector.multi_reduction <add>, %59, %cst_37 [0] : vector<272x128xf32> to vector<128xf32>
    %61 = vector.shape_cast %60 : vector<128xf32> to vector<1x128xf32>
    %62 = arith.addf %58, %61 : vector<1x128xf32>
    %c1_38 = arith.constant 1 : index
    %c0_39 = arith.constant 0 : index
    %63 = vector.load %arg8[%c1_38, %c0_39] : memref<2x128xf32, #tpu.memory_space<vmem>>, vector<1x128xf32>
    tpu.vector_store %arg8[%c1_38, %c0_39], %62 {strides = array<i32>} : memref<2x128xf32, #tpu.memory_space<vmem>>, vector<1x128xf32>,
    %c1_i32_40 = arith.constant 1 : i32
    %64 = arith.cmpi eq, %arg1, %c1_i32_40 : i32
    %65 = arith.extui %64 : i1 to i32
    %c0_i32_41 = arith.constant 0 : i32
    %66 = arith.cmpi ne, %65, %c0_i32_41 : i32
    scf.if %66 {
      %c0_42 = arith.constant 0 : index
      %c0_43 = arith.constant 0 : index
      %67 = vector.load %arg8[%c0_42, %c0_43] : memref<2x128xf32, #tpu.memory_space<vmem>>, vector<1x128xf32>
      %cst_44 = arith.constant 0.001953125 : f32
      %68 = vector.broadcast %cst_44 : f32 to vector<1x128xf32>
      %69 = arith.mulf %67, %68 : vector<1x128xf32>
      %c1_45 = arith.constant 1 : index
      %c0_46 = arith.constant 0 : index
      %70 = vector.load %arg8[%c1_45, %c0_46] : memref<2x128xf32, #tpu.memory_space<vmem>>, vector<1x128xf32>
      %cst_47 = arith.constant 0.001953125 : f32
      %71 = vector.broadcast %cst_47 : f32 to vector<1x128xf32>
      %72 = arith.mulf %70, %71 : vector<1x128xf32>
      %73 = arith.mulf %69, %69 : vector<1x128xf32>
      %74 = arith.subf %72, %73 : vector<1x128xf32>
      %cst_48 = arith.constant 0.000000e+00 : f32
      %75 = vector.broadcast %cst_48 : f32 to vector<1x128xf32>
      %76 = arith.maximumf %74, %75 : vector<1x128xf32>
      %c0_49 = arith.constant 0 : index
      %c0_50 = arith.constant 0 : index
      %77 = vector.load %arg4[%c0_49, %c0_50] : memref<1x128xf32, #tpu.memory_space<vmem>>, vector<1x128xf32>
      %cst_51 = arith.constant 9.99999974E-6 : f32
      %78 = vector.broadcast %cst_51 : f32 to vector<1x128xf32>
      %79 = arith.addf %76, %78 : vector<1x128xf32>
      %80 = math.rsqrt %79 : vector<1x128xf32>
      %81 = arith.mulf %77, %80 : vector<1x128xf32>
      %c0_52 = arith.constant 0 : index
      %c0_53 = arith.constant 0 : index
      %82 = vector.load %arg7[%c0_52, %c0_53] : memref<2x128xf32, #tpu.memory_space<vmem>>, vector<1x128xf32>
      tpu.vector_store %arg7[%c0_52, %c0_53], %81 {strides = array<i32>} : memref<2x128xf32, #tpu.memory_space<vmem>>, vector<1x128xf32>,
      %c0_54 = arith.constant 0 : index
      %c0_55 = arith.constant 0 : index
      %83 = vector.load %arg5[%c0_54, %c0_55] : memref<1x128xf32, #tpu.memory_space<vmem>>, vector<1x128xf32>
      %84 = arith.mulf %69, %81 : vector<1x128xf32>
      %85 = arith.subf %83, %84 : vector<1x128xf32>
      %c1_56 = arith.constant 1 : index
      %c0_57 = arith.constant 0 : index
      %86 = vector.load %arg7[%c1_56, %c0_57] : memref<2x128xf32, #tpu.memory_space<vmem>>, vector<1x128xf32>
      tpu.vector_store %arg7[%c1_56, %c0_57], %85 {strides = array<i32>} : memref<2x128xf32, #tpu.memory_space<vmem>>, vector<1x128xf32>,
    } else {
    }
    return
  }
  func.func @transform_0(%arg0: i32, %arg1: i32) -> (i32, i32, i32) {
    %c0_i32 = arith.constant 0 : i32
    %c0_i32_0 = arith.constant 0 : i32
    %c0_i32_1 = arith.constant 0 : i32
    return %arg1, %c0_i32, %c0_i32_0 : i32, i32, i32
  }
  func.func @transform_1(%arg0: i32, %arg1: i32) -> (i32, i32, i32) {
    %c0_i32 = arith.constant 0 : i32
    %c0_i32_0 = arith.constant 0 : i32
    %c0_i32_1 = arith.constant 0 : i32
    return %c0_i32, %c0_i32_0, %arg0 : i32, i32, i32
  }
  func.func @transform_2(%arg0: i32, %arg1: i32) -> (i32, i32) {
    %c0_i32 = arith.constant 0 : i32
    %c0_i32_0 = arith.constant 0 : i32
    return %c0_i32, %arg0 : i32, i32
  }
  func.func @transform_3(%arg0: i32, %arg1: i32) -> (i32, i32) {
    %c0_i32 = arith.constant 0 : i32
    %c0_i32_0 = arith.constant 0 : i32
    return %c0_i32, %arg0 : i32, i32
  }
  func.func @transform_4(%arg0: i32, %arg1: i32) -> (i32, i32, i32) {
    %c0_i32 = arith.constant 0 : i32
    %c0_i32_0 = arith.constant 0 : i32
    return %arg1, %c0_i32, %arg0 : i32, i32, i32
  }
  func.func @transform_5(%arg0: i32, %arg1: i32) -> (i32, i32) {
    %c0_i32 = arith.constant 0 : i32
    %c0_i32_0 = arith.constant 0 : i32
    return %c0_i32, %arg0 : i32, i32
  }
}

module attributes {stable_mosaic.version = 11 : i64} {
  func.func @_bn_lrelu_kernel(%arg0: i32, %arg1: i32, %arg2: memref<1x272x128xbf16, #tpu.memory_space<vmem>>, %arg3: memref<2x128xf32, #tpu.memory_space<vmem>>, %arg4: memref<1x272x128xbf16, #tpu.memory_space<vmem>>) attributes {dimension_semantics = [#tpu.dimension_semantics<parallel>, #tpu.dimension_semantics<parallel>], iteration_bounds = array<i64: 1, 2>, scalar_prefetch = 0 : i64, scratch_operands = 0 : i64, tpu.core_type = #tpu.core_type<tc>, window_params = [{transform_indices = @transform_0, window_bounds = array<i64: 1, 272, 128>}, {transform_indices = @transform_1, window_bounds = array<i64: 2, 128>}, {transform_indices = @transform_2, window_bounds = array<i64: 1, 272, 128>}]} {
    %c0 = arith.constant 0 : index
    %c0_0 = arith.constant 0 : index
    %c0_1 = arith.constant 0 : index
    %0 = vector.load %arg2[%c0, %c0_0, %c0_1] : memref<1x272x128xbf16, #tpu.memory_space<vmem>>, vector<1x272x128xbf16>
    %1 = vector.shape_cast %0 : vector<1x272x128xbf16> to vector<272x128xbf16>
    %2 = arith.extf %1 : vector<272x128xbf16> to vector<272x128xf32>
    %c0_2 = arith.constant 0 : index
    %c0_3 = arith.constant 0 : index
    %3 = vector.load %arg3[%c0_2, %c0_3] : memref<2x128xf32, #tpu.memory_space<vmem>>, vector<1x128xf32>
    %4 = vector.broadcast %3 : vector<1x128xf32> to vector<272x128xf32>
    %5 = arith.mulf %2, %4 : vector<272x128xf32>
    %c1 = arith.constant 1 : index
    %c0_4 = arith.constant 0 : index
    %6 = vector.load %arg3[%c1, %c0_4] : memref<2x128xf32, #tpu.memory_space<vmem>>, vector<1x128xf32>
    %7 = vector.broadcast %6 : vector<1x128xf32> to vector<272x128xf32>
    %8 = arith.addf %5, %7 : vector<272x128xf32>
    %cst = arith.constant 0.000000e+00 : f32
    %9 = vector.broadcast %cst : f32 to vector<272x128xf32>
    %10 = arith.cmpf oge, %8, %9 : vector<272x128xf32>
    %cst_5 = arith.constant 2.000000e-01 : f32
    %11 = vector.broadcast %cst_5 : f32 to vector<272x128xf32>
    %12 = arith.mulf %11, %8 : vector<272x128xf32>
    %13 = arith.select %10, %8, %12 : vector<272x128xi1>, vector<272x128xf32>
    %14 = arith.truncf %13 : vector<272x128xf32> to vector<272x128xbf16>
    %c0_6 = arith.constant 0 : index
    %c0_7 = arith.constant 0 : index
    %c0_8 = arith.constant 0 : index
    %15 = vector.load %arg4[%c0_6, %c0_7, %c0_8] : memref<1x272x128xbf16, #tpu.memory_space<vmem>>, vector<1x272x128xbf16>
    %16 = vector.shape_cast %15 : vector<1x272x128xbf16> to vector<272x128xbf16>
    %17 = vector.shape_cast %14 : vector<272x128xbf16> to vector<1x272x128xbf16>
    tpu.vector_store %arg4[%c0_6, %c0_7, %c0_8], %17 {strides = array<i32>} : memref<1x272x128xbf16, #tpu.memory_space<vmem>>, vector<1x272x128xbf16>,
    return
  }
  func.func @transform_0(%arg0: i32, %arg1: i32) -> (i32, i32, i32) {
    %c0_i32 = arith.constant 0 : i32
    %c0_i32_0 = arith.constant 0 : i32
    return %arg1, %c0_i32, %arg0 : i32, i32, i32
  }
  func.func @transform_1(%arg0: i32, %arg1: i32) -> (i32, i32) {
    %c0_i32 = arith.constant 0 : i32
    %c0_i32_0 = arith.constant 0 : i32
    return %c0_i32, %arg0 : i32, i32
  }
  func.func @transform_2(%arg0: i32, %arg1: i32) -> (i32, i32, i32) {
    %c0_i32 = arith.constant 0 : i32
    %c0_i32_0 = arith.constant 0 : i32
    return %arg1, %c0_i32, %arg0 : i32, i32, i32
  }
}

module attributes {stable_mosaic.version = 11 : i64} {
  func.func @_conv_stats_kernel(%arg0: i32, %arg1: i32, %arg2: memref<1x90x512xbf16, #tpu.memory_space<vmem>>, %arg3: memref<4x512x128xbf16, #tpu.memory_space<vmem>>, %arg4: memref<1x128xf32, #tpu.memory_space<vmem>>, %arg5: memref<1x128xf32, #tpu.memory_space<vmem>>, %arg6: memref<1x72x128xbf16, #tpu.memory_space<vmem>>, %arg7: memref<2x128xf32, #tpu.memory_space<vmem>>, %arg8: memref<2x128xf32, #tpu.memory_space<vmem>>) attributes {dimension_semantics = [#tpu.dimension_semantics<parallel>, #tpu.dimension_semantics<arbitrary>], iteration_bounds = array<i64: 1, 2>, scalar_prefetch = 0 : i64, scratch_operands = 1 : i64, tpu.core_type = #tpu.core_type<tc>, window_params = [{transform_indices = @transform_0, window_bounds = array<i64: 1, 90, 512>}, {transform_indices = @transform_1, window_bounds = array<i64: 4, 512, 128>}, {transform_indices = @transform_2, window_bounds = array<i64: 1, 128>}, {transform_indices = @transform_3, window_bounds = array<i64: 1, 128>}, {transform_indices = @transform_4, window_bounds = array<i64: 1, 72, 128>}, {transform_indices = @transform_5, window_bounds = array<i64: 2, 128>}]} {
    %c0 = arith.constant 0 : index
    %c0_0 = arith.constant 0 : index
    %c0_1 = arith.constant 0 : index
    %0 = vector.load %arg2[%c0, %c0_0, %c0_1] : memref<1x90x512xbf16, #tpu.memory_space<vmem>>, vector<1x72x512xbf16>
    %1 = vector.shape_cast %0 : vector<1x72x512xbf16> to vector<72x512xbf16>
    %c0_2 = arith.constant 0 : index
    %c0_3 = arith.constant 0 : index
    %c0_4 = arith.constant 0 : index
    %2 = vector.load %arg3[%c0_2, %c0_3, %c0_4] : memref<4x512x128xbf16, #tpu.memory_space<vmem>>, vector<1x512x128xbf16>
    %3 = vector.shape_cast %2 : vector<1x512x128xbf16> to vector<512x128xbf16>
    %cst = arith.constant dense<0.000000e+00> : vector<72x128xf32>
    %4 = tpu.matmul %1, %3, %cst {dimension_numbers = #tpu.dot_dimension_numbers<[1], [0], [0], [1], [0, 0, 1, 1], [], []>} : vector<72x512xbf16>, vector<512x128xbf16>, vector<72x128xf32> -> vector<72x128xf32>
    %c0_5 = arith.constant 0 : index
    %c1 = arith.constant 1 : index
    %c0_6 = arith.constant 0 : index
    %5 = vector.load %arg2[%c0_5, %c1, %c0_6] : memref<1x90x512xbf16, #tpu.memory_space<vmem>>, vector<1x72x512xbf16>
    %6 = vector.shape_cast %5 : vector<1x72x512xbf16> to vector<72x512xbf16>
    %c1_7 = arith.constant 1 : index
    %c0_8 = arith.constant 0 : index
    %c0_9 = arith.constant 0 : index
    %7 = vector.load %arg3[%c1_7, %c0_8, %c0_9] : memref<4x512x128xbf16, #tpu.memory_space<vmem>>, vector<1x512x128xbf16>
    %8 = vector.shape_cast %7 : vector<1x512x128xbf16> to vector<512x128xbf16>
    %cst_10 = arith.constant dense<0.000000e+00> : vector<72x128xf32>
    %9 = tpu.matmul %6, %8, %cst_10 {dimension_numbers = #tpu.dot_dimension_numbers<[1], [0], [0], [1], [0, 0, 1, 1], [], []>} : vector<72x512xbf16>, vector<512x128xbf16>, vector<72x128xf32> -> vector<72x128xf32>
    %10 = arith.addf %4, %9 : vector<72x128xf32>
    %c0_11 = arith.constant 0 : index
    %c9 = arith.constant 9 : index
    %c0_12 = arith.constant 0 : index
    %11 = vector.load %arg2[%c0_11, %c9, %c0_12] : memref<1x90x512xbf16, #tpu.memory_space<vmem>>, vector<1x72x512xbf16>
    %12 = vector.shape_cast %11 : vector<1x72x512xbf16> to vector<72x512xbf16>
    %c2 = arith.constant 2 : index
    %c0_13 = arith.constant 0 : index
    %c0_14 = arith.constant 0 : index
    %13 = vector.load %arg3[%c2, %c0_13, %c0_14] : memref<4x512x128xbf16, #tpu.memory_space<vmem>>, vector<1x512x128xbf16>
    %14 = vector.shape_cast %13 : vector<1x512x128xbf16> to vector<512x128xbf16>
    %cst_15 = arith.constant dense<0.000000e+00> : vector<72x128xf32>
    %15 = tpu.matmul %12, %14, %cst_15 {dimension_numbers = #tpu.dot_dimension_numbers<[1], [0], [0], [1], [0, 0, 1, 1], [], []>} : vector<72x512xbf16>, vector<512x128xbf16>, vector<72x128xf32> -> vector<72x128xf32>
    %16 = arith.addf %10, %15 : vector<72x128xf32>
    %c0_16 = arith.constant 0 : index
    %c10 = arith.constant 10 : index
    %c0_17 = arith.constant 0 : index
    %17 = vector.load %arg2[%c0_16, %c10, %c0_17] : memref<1x90x512xbf16, #tpu.memory_space<vmem>>, vector<1x72x512xbf16>
    %18 = vector.shape_cast %17 : vector<1x72x512xbf16> to vector<72x512xbf16>
    %c3 = arith.constant 3 : index
    %c0_18 = arith.constant 0 : index
    %c0_19 = arith.constant 0 : index
    %19 = vector.load %arg3[%c3, %c0_18, %c0_19] : memref<4x512x128xbf16, #tpu.memory_space<vmem>>, vector<1x512x128xbf16>
    %20 = vector.shape_cast %19 : vector<1x512x128xbf16> to vector<512x128xbf16>
    %cst_20 = arith.constant dense<0.000000e+00> : vector<72x128xf32>
    %21 = tpu.matmul %18, %20, %cst_20 {dimension_numbers = #tpu.dot_dimension_numbers<[1], [0], [0], [1], [0, 0, 1, 1], [], []>} : vector<72x512xbf16>, vector<512x128xbf16>, vector<72x128xf32> -> vector<72x128xf32>
    %22 = arith.addf %16, %21 : vector<72x128xf32>
    %23 = arith.truncf %22 : vector<72x128xf32> to vector<72x128xbf16>
    %c0_21 = arith.constant 0 : index
    %c0_22 = arith.constant 0 : index
    %c0_23 = arith.constant 0 : index
    %24 = vector.load %arg6[%c0_21, %c0_22, %c0_23] : memref<1x72x128xbf16, #tpu.memory_space<vmem>>, vector<1x72x128xbf16>
    %25 = vector.shape_cast %24 : vector<1x72x128xbf16> to vector<72x128xbf16>
    %26 = vector.shape_cast %23 : vector<72x128xbf16> to vector<1x72x128xbf16>
    tpu.vector_store %arg6[%c0_21, %c0_22, %c0_23], %26 {strides = array<i32>} : memref<1x72x128xbf16, #tpu.memory_space<vmem>>, vector<1x72x128xbf16>,
    %27 = tpu.iota {dimensions = array<i32: 0>} : vector<72x1xi32>
    %c9_i32 = arith.constant 9 : i32
    %c0_i32 = arith.constant 0 : i32
    %28 = arith.cmpi eq, %c9_i32, %c0_i32 : i32
    %c1_i32 = arith.constant 1 : i32
    %29 = arith.select %28, %c1_i32, %c9_i32 : i32
    %30 = vector.broadcast %29 : i32 to vector<72x1xi32>
    %31 = arith.remsi %27, %30 : vector<72x1xi32>
    %c0_i32_24 = arith.constant 0 : i32
    %32 = vector.broadcast %c0_i32_24 : i32 to vector<72x1xi32>
    %33 = arith.cmpi ne, %31, %32 : vector<72x1xi32>
    %c0_i32_25 = arith.constant 0 : i32
    %34 = vector.broadcast %c0_i32_25 : i32 to vector<72x1xi32>
    %35 = arith.cmpi slt, %31, %34 : vector<72x1xi32>
    %c0_i32_26 = arith.constant 0 : i32
    %36 = arith.cmpi slt, %29, %c0_i32_26 : i32
    %37 = vector.broadcast %36 : i1 to vector<72x1xi1>
    %38 = vector.broadcast %37 : vector<72x1xi1> to vector<72x1xi1>
    %39 = arith.xori %35, %38 : vector<72x1xi1>
    %40 = arith.andi %39, %33 : vector<72x1xi1>
    %41 = vector.broadcast %29 : i32 to vector<72x1xi32>
    %42 = arith.addi %31, %41 : vector<72x1xi32>
    %43 = arith.select %40, %42, %31 : vector<72x1xi1>, vector<72x1xi32>
    %c8_i32 = arith.constant 8 : i32
    %44 = vector.broadcast %c8_i32 : i32 to vector<72x1xi32>
    %45 = arith.cmpi ne, %43, %44 : vector<72x1xi32>
    %cst_27 = arith.constant 0.000000e+00 : f32
    %46 = vector.shape_cast %45 : vector<72x1xi1> to vector<72x1xi1>
    %47 = vector.broadcast %46 : vector<72x1xi1> to vector<72x128xi1>
    %48 = vector.broadcast %cst_27 : f32 to vector<72x128xf32>
    %49 = arith.select %47, %22, %48 : vector<72x128xi1>, vector<72x128xf32>
    %c0_i32_28 = arith.constant 0 : i32
    %50 = arith.cmpi eq, %arg1, %c0_i32_28 : i32
    %51 = arith.extui %50 : i1 to i32
    %c0_i32_29 = arith.constant 0 : i32
    %52 = arith.cmpi ne, %51, %c0_i32_29 : i32
    scf.if %52 {
      %cst_42 = arith.constant 0.000000e+00 : f32
      %67 = vector.broadcast %cst_42 : f32 to vector<2x128xf32>
      %c0_43 = arith.constant 0 : index
      %c0_44 = arith.constant 0 : index
      %68 = vector.load %arg8[%c0_43, %c0_44] : memref<2x128xf32, #tpu.memory_space<vmem>>, vector<2x128xf32>
      tpu.vector_store %arg8[%c0_43, %c0_44], %67 {strides = array<i32>} : memref<2x128xf32, #tpu.memory_space<vmem>>, vector<2x128xf32>,
    } else {
    }
    %c0_30 = arith.constant 0 : index
    %c0_31 = arith.constant 0 : index
    %53 = vector.load %arg8[%c0_30, %c0_31] : memref<2x128xf32, #tpu.memory_space<vmem>>, vector<1x128xf32>
    %cst_32 = arith.constant dense<0.000000e+00> : vector<128xf32>
    %54 = vector.multi_reduction <add>, %49, %cst_32 [0] : vector<72x128xf32> to vector<128xf32>
    %55 = vector.shape_cast %54 : vector<128xf32> to vector<1x128xf32>
    %56 = arith.addf %53, %55 : vector<1x128xf32>
    %c0_33 = arith.constant 0 : index
    %c0_34 = arith.constant 0 : index
    %57 = vector.load %arg8[%c0_33, %c0_34] : memref<2x128xf32, #tpu.memory_space<vmem>>, vector<1x128xf32>
    tpu.vector_store %arg8[%c0_33, %c0_34], %56 {strides = array<i32>} : memref<2x128xf32, #tpu.memory_space<vmem>>, vector<1x128xf32>,
    %c1_35 = arith.constant 1 : index
    %c0_36 = arith.constant 0 : index
    %58 = vector.load %arg8[%c1_35, %c0_36] : memref<2x128xf32, #tpu.memory_space<vmem>>, vector<1x128xf32>
    %59 = arith.mulf %49, %22 : vector<72x128xf32>
    %cst_37 = arith.constant dense<0.000000e+00> : vector<128xf32>
    %60 = vector.multi_reduction <add>, %59, %cst_37 [0] : vector<72x128xf32> to vector<128xf32>
    %61 = vector.shape_cast %60 : vector<128xf32> to vector<1x128xf32>
    %62 = arith.addf %58, %61 : vector<1x128xf32>
    %c1_38 = arith.constant 1 : index
    %c0_39 = arith.constant 0 : index
    %63 = vector.load %arg8[%c1_38, %c0_39] : memref<2x128xf32, #tpu.memory_space<vmem>>, vector<1x128xf32>
    tpu.vector_store %arg8[%c1_38, %c0_39], %62 {strides = array<i32>} : memref<2x128xf32, #tpu.memory_space<vmem>>, vector<1x128xf32>,
    %c1_i32_40 = arith.constant 1 : i32
    %64 = arith.cmpi eq, %arg1, %c1_i32_40 : i32
    %65 = arith.extui %64 : i1 to i32
    %c0_i32_41 = arith.constant 0 : i32
    %66 = arith.cmpi ne, %65, %c0_i32_41 : i32
    scf.if %66 {
      %c0_42 = arith.constant 0 : index
      %c0_43 = arith.constant 0 : index
      %67 = vector.load %arg8[%c0_42, %c0_43] : memref<2x128xf32, #tpu.memory_space<vmem>>, vector<1x128xf32>
      %cst_44 = arith.constant 7.812500e-03 : f32
      %68 = vector.broadcast %cst_44 : f32 to vector<1x128xf32>
      %69 = arith.mulf %67, %68 : vector<1x128xf32>
      %c1_45 = arith.constant 1 : index
      %c0_46 = arith.constant 0 : index
      %70 = vector.load %arg8[%c1_45, %c0_46] : memref<2x128xf32, #tpu.memory_space<vmem>>, vector<1x128xf32>
      %cst_47 = arith.constant 7.812500e-03 : f32
      %71 = vector.broadcast %cst_47 : f32 to vector<1x128xf32>
      %72 = arith.mulf %70, %71 : vector<1x128xf32>
      %73 = arith.mulf %69, %69 : vector<1x128xf32>
      %74 = arith.subf %72, %73 : vector<1x128xf32>
      %cst_48 = arith.constant 0.000000e+00 : f32
      %75 = vector.broadcast %cst_48 : f32 to vector<1x128xf32>
      %76 = arith.maximumf %74, %75 : vector<1x128xf32>
      %c0_49 = arith.constant 0 : index
      %c0_50 = arith.constant 0 : index
      %77 = vector.load %arg4[%c0_49, %c0_50] : memref<1x128xf32, #tpu.memory_space<vmem>>, vector<1x128xf32>
      %cst_51 = arith.constant 9.99999974E-6 : f32
      %78 = vector.broadcast %cst_51 : f32 to vector<1x128xf32>
      %79 = arith.addf %76, %78 : vector<1x128xf32>
      %80 = math.rsqrt %79 : vector<1x128xf32>
      %81 = arith.mulf %77, %80 : vector<1x128xf32>
      %c0_52 = arith.constant 0 : index
      %c0_53 = arith.constant 0 : index
      %82 = vector.load %arg7[%c0_52, %c0_53] : memref<2x128xf32, #tpu.memory_space<vmem>>, vector<1x128xf32>
      tpu.vector_store %arg7[%c0_52, %c0_53], %81 {strides = array<i32>} : memref<2x128xf32, #tpu.memory_space<vmem>>, vector<1x128xf32>,
      %c0_54 = arith.constant 0 : index
      %c0_55 = arith.constant 0 : index
      %83 = vector.load %arg5[%c0_54, %c0_55] : memref<1x128xf32, #tpu.memory_space<vmem>>, vector<1x128xf32>
      %84 = arith.mulf %69, %81 : vector<1x128xf32>
      %85 = arith.subf %83, %84 : vector<1x128xf32>
      %c1_56 = arith.constant 1 : index
      %c0_57 = arith.constant 0 : index
      %86 = vector.load %arg7[%c1_56, %c0_57] : memref<2x128xf32, #tpu.memory_space<vmem>>, vector<1x128xf32>
      tpu.vector_store %arg7[%c1_56, %c0_57], %85 {strides = array<i32>} : memref<2x128xf32, #tpu.memory_space<vmem>>, vector<1x128xf32>,
    } else {
    }
    return
  }
  func.func @transform_0(%arg0: i32, %arg1: i32) -> (i32, i32, i32) {
    %c0_i32 = arith.constant 0 : i32
    %c0_i32_0 = arith.constant 0 : i32
    %c0_i32_1 = arith.constant 0 : i32
    return %arg1, %c0_i32, %c0_i32_0 : i32, i32, i32
  }
  func.func @transform_1(%arg0: i32, %arg1: i32) -> (i32, i32, i32) {
    %c0_i32 = arith.constant 0 : i32
    %c0_i32_0 = arith.constant 0 : i32
    %c0_i32_1 = arith.constant 0 : i32
    return %c0_i32, %c0_i32_0, %arg0 : i32, i32, i32
  }
  func.func @transform_2(%arg0: i32, %arg1: i32) -> (i32, i32) {
    %c0_i32 = arith.constant 0 : i32
    %c0_i32_0 = arith.constant 0 : i32
    return %c0_i32, %arg0 : i32, i32
  }
  func.func @transform_3(%arg0: i32, %arg1: i32) -> (i32, i32) {
    %c0_i32 = arith.constant 0 : i32
    %c0_i32_0 = arith.constant 0 : i32
    return %c0_i32, %arg0 : i32, i32
  }
  func.func @transform_4(%arg0: i32, %arg1: i32) -> (i32, i32, i32) {
    %c0_i32 = arith.constant 0 : i32
    %c0_i32_0 = arith.constant 0 : i32
    return %arg1, %c0_i32, %arg0 : i32, i32, i32
  }
  func.func @transform_5(%arg0: i32, %arg1: i32) -> (i32, i32) {
    %c0_i32 = arith.constant 0 : i32
    %c0_i32_0 = arith.constant 0 : i32
    return %c0_i32, %arg0 : i32, i32
  }
}

module attributes {stable_mosaic.version = 11 : i64} {
  func.func @_bn_lrelu_kernel(%arg0: i32, %arg1: i32, %arg2: memref<1x72x128xbf16, #tpu.memory_space<vmem>>, %arg3: memref<2x128xf32, #tpu.memory_space<vmem>>, %arg4: memref<1x72x128xbf16, #tpu.memory_space<vmem>>) attributes {dimension_semantics = [#tpu.dimension_semantics<parallel>, #tpu.dimension_semantics<parallel>], iteration_bounds = array<i64: 1, 2>, scalar_prefetch = 0 : i64, scratch_operands = 0 : i64, tpu.core_type = #tpu.core_type<tc>, window_params = [{transform_indices = @transform_0, window_bounds = array<i64: 1, 72, 128>}, {transform_indices = @transform_1, window_bounds = array<i64: 2, 128>}, {transform_indices = @transform_2, window_bounds = array<i64: 1, 72, 128>}]} {
    %c0 = arith.constant 0 : index
    %c0_0 = arith.constant 0 : index
    %c0_1 = arith.constant 0 : index
    %0 = vector.load %arg2[%c0, %c0_0, %c0_1] : memref<1x72x128xbf16, #tpu.memory_space<vmem>>, vector<1x72x128xbf16>
    %1 = vector.shape_cast %0 : vector<1x72x128xbf16> to vector<72x128xbf16>
    %2 = arith.extf %1 : vector<72x128xbf16> to vector<72x128xf32>
    %c0_2 = arith.constant 0 : index
    %c0_3 = arith.constant 0 : index
    %3 = vector.load %arg3[%c0_2, %c0_3] : memref<2x128xf32, #tpu.memory_space<vmem>>, vector<1x128xf32>
    %4 = vector.broadcast %3 : vector<1x128xf32> to vector<72x128xf32>
    %5 = arith.mulf %2, %4 : vector<72x128xf32>
    %c1 = arith.constant 1 : index
    %c0_4 = arith.constant 0 : index
    %6 = vector.load %arg3[%c1, %c0_4] : memref<2x128xf32, #tpu.memory_space<vmem>>, vector<1x128xf32>
    %7 = vector.broadcast %6 : vector<1x128xf32> to vector<72x128xf32>
    %8 = arith.addf %5, %7 : vector<72x128xf32>
    %cst = arith.constant 0.000000e+00 : f32
    %9 = vector.broadcast %cst : f32 to vector<72x128xf32>
    %10 = arith.cmpf oge, %8, %9 : vector<72x128xf32>
    %cst_5 = arith.constant 2.000000e-01 : f32
    %11 = vector.broadcast %cst_5 : f32 to vector<72x128xf32>
    %12 = arith.mulf %11, %8 : vector<72x128xf32>
    %13 = arith.select %10, %8, %12 : vector<72x128xi1>, vector<72x128xf32>
    %14 = arith.truncf %13 : vector<72x128xf32> to vector<72x128xbf16>
    %c0_6 = arith.constant 0 : index
    %c0_7 = arith.constant 0 : index
    %c0_8 = arith.constant 0 : index
    %15 = vector.load %arg4[%c0_6, %c0_7, %c0_8] : memref<1x72x128xbf16, #tpu.memory_space<vmem>>, vector<1x72x128xbf16>
    %16 = vector.shape_cast %15 : vector<1x72x128xbf16> to vector<72x128xbf16>
    %17 = vector.shape_cast %14 : vector<72x128xbf16> to vector<1x72x128xbf16>
    tpu.vector_store %arg4[%c0_6, %c0_7, %c0_8], %17 {strides = array<i32>} : memref<1x72x128xbf16, #tpu.memory_space<vmem>>, vector<1x72x128xbf16>,
    return
  }
  func.func @transform_0(%arg0: i32, %arg1: i32) -> (i32, i32, i32) {
    %c0_i32 = arith.constant 0 : i32
    %c0_i32_0 = arith.constant 0 : i32
    return %arg1, %c0_i32, %arg0 : i32, i32, i32
  }
  func.func @transform_1(%arg0: i32, %arg1: i32) -> (i32, i32) {
    %c0_i32 = arith.constant 0 : i32
    %c0_i32_0 = arith.constant 0 : i32
    return %c0_i32, %arg0 : i32, i32
  }
  func.func @transform_2(%arg0: i32, %arg1: i32) -> (i32, i32, i32) {
    %c0_i32 = arith.constant 0 : i32
    %c0_i32_0 = arith.constant 0 : i32
    return %arg1, %c0_i32, %arg0 : i32, i32, i32
  }
}

module attributes {stable_mosaic.version = 11 : i64} {
  func.func @_conv_stats_kernel(%arg0: i32, %arg1: i32, %arg2: memref<1x30x512xbf16, #tpu.memory_space<vmem>>, %arg3: memref<4x512x256xbf16, #tpu.memory_space<vmem>>, %arg4: memref<1x256xf32, #tpu.memory_space<vmem>>, %arg5: memref<1x256xf32, #tpu.memory_space<vmem>>, %arg6: memref<1x20x256xbf16, #tpu.memory_space<vmem>>, %arg7: memref<2x256xf32, #tpu.memory_space<vmem>>, %arg8: memref<2x256xf32, #tpu.memory_space<vmem>>) attributes {dimension_semantics = [#tpu.dimension_semantics<parallel>, #tpu.dimension_semantics<arbitrary>], iteration_bounds = array<i64: 1, 2>, scalar_prefetch = 0 : i64, scratch_operands = 1 : i64, tpu.core_type = #tpu.core_type<tc>, window_params = [{transform_indices = @transform_0, window_bounds = array<i64: 1, 30, 512>}, {transform_indices = @transform_1, window_bounds = array<i64: 4, 512, 256>}, {transform_indices = @transform_2, window_bounds = array<i64: 1, 256>}, {transform_indices = @transform_3, window_bounds = array<i64: 1, 256>}, {transform_indices = @transform_4, window_bounds = array<i64: 1, 20, 256>}, {transform_indices = @transform_5, window_bounds = array<i64: 2, 256>}]} {
    %c0 = arith.constant 0 : index
    %c0_0 = arith.constant 0 : index
    %c0_1 = arith.constant 0 : index
    %0 = vector.load %arg2[%c0, %c0_0, %c0_1] : memref<1x30x512xbf16, #tpu.memory_space<vmem>>, vector<1x20x512xbf16>
    %1 = vector.shape_cast %0 : vector<1x20x512xbf16> to vector<20x512xbf16>
    %c0_2 = arith.constant 0 : index
    %c0_3 = arith.constant 0 : index
    %c0_4 = arith.constant 0 : index
    %2 = vector.load %arg3[%c0_2, %c0_3, %c0_4] : memref<4x512x256xbf16, #tpu.memory_space<vmem>>, vector<1x512x256xbf16>
    %3 = vector.shape_cast %2 : vector<1x512x256xbf16> to vector<512x256xbf16>
    %cst = arith.constant dense<0.000000e+00> : vector<20x256xf32>
    %4 = tpu.matmul %1, %3, %cst {dimension_numbers = #tpu.dot_dimension_numbers<[1], [0], [0], [1], [0, 0, 1, 1], [], []>} : vector<20x512xbf16>, vector<512x256xbf16>, vector<20x256xf32> -> vector<20x256xf32>
    %c0_5 = arith.constant 0 : index
    %c1 = arith.constant 1 : index
    %c0_6 = arith.constant 0 : index
    %5 = vector.load %arg2[%c0_5, %c1, %c0_6] : memref<1x30x512xbf16, #tpu.memory_space<vmem>>, vector<1x20x512xbf16>
    %6 = vector.shape_cast %5 : vector<1x20x512xbf16> to vector<20x512xbf16>
    %c1_7 = arith.constant 1 : index
    %c0_8 = arith.constant 0 : index
    %c0_9 = arith.constant 0 : index
    %7 = vector.load %arg3[%c1_7, %c0_8, %c0_9] : memref<4x512x256xbf16, #tpu.memory_space<vmem>>, vector<1x512x256xbf16>
    %8 = vector.shape_cast %7 : vector<1x512x256xbf16> to vector<512x256xbf16>
    %cst_10 = arith.constant dense<0.000000e+00> : vector<20x256xf32>
    %9 = tpu.matmul %6, %8, %cst_10 {dimension_numbers = #tpu.dot_dimension_numbers<[1], [0], [0], [1], [0, 0, 1, 1], [], []>} : vector<20x512xbf16>, vector<512x256xbf16>, vector<20x256xf32> -> vector<20x256xf32>
    %10 = arith.addf %4, %9 : vector<20x256xf32>
    %c0_11 = arith.constant 0 : index
    %c5 = arith.constant 5 : index
    %c0_12 = arith.constant 0 : index
    %11 = vector.load %arg2[%c0_11, %c5, %c0_12] : memref<1x30x512xbf16, #tpu.memory_space<vmem>>, vector<1x20x512xbf16>
    %12 = vector.shape_cast %11 : vector<1x20x512xbf16> to vector<20x512xbf16>
    %c2 = arith.constant 2 : index
    %c0_13 = arith.constant 0 : index
    %c0_14 = arith.constant 0 : index
    %13 = vector.load %arg3[%c2, %c0_13, %c0_14] : memref<4x512x256xbf16, #tpu.memory_space<vmem>>, vector<1x512x256xbf16>
    %14 = vector.shape_cast %13 : vector<1x512x256xbf16> to vector<512x256xbf16>
    %cst_15 = arith.constant dense<0.000000e+00> : vector<20x256xf32>
    %15 = tpu.matmul %12, %14, %cst_15 {dimension_numbers = #tpu.dot_dimension_numbers<[1], [0], [0], [1], [0, 0, 1, 1], [], []>} : vector<20x512xbf16>, vector<512x256xbf16>, vector<20x256xf32> -> vector<20x256xf32>
    %16 = arith.addf %10, %15 : vector<20x256xf32>
    %c0_16 = arith.constant 0 : index
    %c6 = arith.constant 6 : index
    %c0_17 = arith.constant 0 : index
    %17 = vector.load %arg2[%c0_16, %c6, %c0_17] : memref<1x30x512xbf16, #tpu.memory_space<vmem>>, vector<1x20x512xbf16>
    %18 = vector.shape_cast %17 : vector<1x20x512xbf16> to vector<20x512xbf16>
    %c3 = arith.constant 3 : index
    %c0_18 = arith.constant 0 : index
    %c0_19 = arith.constant 0 : index
    %19 = vector.load %arg3[%c3, %c0_18, %c0_19] : memref<4x512x256xbf16, #tpu.memory_space<vmem>>, vector<1x512x256xbf16>
    %20 = vector.shape_cast %19 : vector<1x512x256xbf16> to vector<512x256xbf16>
    %cst_20 = arith.constant dense<0.000000e+00> : vector<20x256xf32>
    %21 = tpu.matmul %18, %20, %cst_20 {dimension_numbers = #tpu.dot_dimension_numbers<[1], [0], [0], [1], [0, 0, 1, 1], [], []>} : vector<20x512xbf16>, vector<512x256xbf16>, vector<20x256xf32> -> vector<20x256xf32>
    %22 = arith.addf %16, %21 : vector<20x256xf32>
    %23 = arith.truncf %22 : vector<20x256xf32> to vector<20x256xbf16>
    %c0_21 = arith.constant 0 : index
    %c0_22 = arith.constant 0 : index
    %c0_23 = arith.constant 0 : index
    %24 = vector.load %arg6[%c0_21, %c0_22, %c0_23] : memref<1x20x256xbf16, #tpu.memory_space<vmem>>, vector<1x20x256xbf16>
    %25 = vector.shape_cast %24 : vector<1x20x256xbf16> to vector<20x256xbf16>
    %26 = vector.shape_cast %23 : vector<20x256xbf16> to vector<1x20x256xbf16>
    tpu.vector_store %arg6[%c0_21, %c0_22, %c0_23], %26 {strides = array<i32>} : memref<1x20x256xbf16, #tpu.memory_space<vmem>>, vector<1x20x256xbf16>,
    %27 = tpu.iota {dimensions = array<i32: 0>} : vector<20x1xi32>
    %c5_i32 = arith.constant 5 : i32
    %c0_i32 = arith.constant 0 : i32
    %28 = arith.cmpi eq, %c5_i32, %c0_i32 : i32
    %c1_i32 = arith.constant 1 : i32
    %29 = arith.select %28, %c1_i32, %c5_i32 : i32
    %30 = vector.broadcast %29 : i32 to vector<20x1xi32>
    %31 = arith.remsi %27, %30 : vector<20x1xi32>
    %c0_i32_24 = arith.constant 0 : i32
    %32 = vector.broadcast %c0_i32_24 : i32 to vector<20x1xi32>
    %33 = arith.cmpi ne, %31, %32 : vector<20x1xi32>
    %c0_i32_25 = arith.constant 0 : i32
    %34 = vector.broadcast %c0_i32_25 : i32 to vector<20x1xi32>
    %35 = arith.cmpi slt, %31, %34 : vector<20x1xi32>
    %c0_i32_26 = arith.constant 0 : i32
    %36 = arith.cmpi slt, %29, %c0_i32_26 : i32
    %37 = vector.broadcast %36 : i1 to vector<20x1xi1>
    %38 = vector.broadcast %37 : vector<20x1xi1> to vector<20x1xi1>
    %39 = arith.xori %35, %38 : vector<20x1xi1>
    %40 = arith.andi %39, %33 : vector<20x1xi1>
    %41 = vector.broadcast %29 : i32 to vector<20x1xi32>
    %42 = arith.addi %31, %41 : vector<20x1xi32>
    %43 = arith.select %40, %42, %31 : vector<20x1xi1>, vector<20x1xi32>
    %c4_i32 = arith.constant 4 : i32
    %44 = vector.broadcast %c4_i32 : i32 to vector<20x1xi32>
    %45 = arith.cmpi ne, %43, %44 : vector<20x1xi32>
    %cst_27 = arith.constant 0.000000e+00 : f32
    %46 = vector.shape_cast %45 : vector<20x1xi1> to vector<20x1xi1>
    %47 = vector.broadcast %46 : vector<20x1xi1> to vector<20x256xi1>
    %48 = vector.broadcast %cst_27 : f32 to vector<20x256xf32>
    %49 = arith.select %47, %22, %48 : vector<20x256xi1>, vector<20x256xf32>
    %c0_i32_28 = arith.constant 0 : i32
    %50 = arith.cmpi eq, %arg1, %c0_i32_28 : i32
    %51 = arith.extui %50 : i1 to i32
    %c0_i32_29 = arith.constant 0 : i32
    %52 = arith.cmpi ne, %51, %c0_i32_29 : i32
    scf.if %52 {
      %cst_42 = arith.constant 0.000000e+00 : f32
      %67 = vector.broadcast %cst_42 : f32 to vector<2x256xf32>
      %c0_43 = arith.constant 0 : index
      %c0_44 = arith.constant 0 : index
      %68 = vector.load %arg8[%c0_43, %c0_44] : memref<2x256xf32, #tpu.memory_space<vmem>>, vector<2x256xf32>
      tpu.vector_store %arg8[%c0_43, %c0_44], %67 {strides = array<i32>} : memref<2x256xf32, #tpu.memory_space<vmem>>, vector<2x256xf32>,
    } else {
    }
    %c0_30 = arith.constant 0 : index
    %c0_31 = arith.constant 0 : index
    %53 = vector.load %arg8[%c0_30, %c0_31] : memref<2x256xf32, #tpu.memory_space<vmem>>, vector<1x256xf32>
    %cst_32 = arith.constant dense<0.000000e+00> : vector<256xf32>
    %54 = vector.multi_reduction <add>, %49, %cst_32 [0] : vector<20x256xf32> to vector<256xf32>
    %55 = vector.shape_cast %54 : vector<256xf32> to vector<1x256xf32>
    %56 = arith.addf %53, %55 : vector<1x256xf32>
    %c0_33 = arith.constant 0 : index
    %c0_34 = arith.constant 0 : index
    %57 = vector.load %arg8[%c0_33, %c0_34] : memref<2x256xf32, #tpu.memory_space<vmem>>, vector<1x256xf32>
    tpu.vector_store %arg8[%c0_33, %c0_34], %56 {strides = array<i32>} : memref<2x256xf32, #tpu.memory_space<vmem>>, vector<1x256xf32>,
    %c1_35 = arith.constant 1 : index
    %c0_36 = arith.constant 0 : index
    %58 = vector.load %arg8[%c1_35, %c0_36] : memref<2x256xf32, #tpu.memory_space<vmem>>, vector<1x256xf32>
    %59 = arith.mulf %49, %22 : vector<20x256xf32>
    %cst_37 = arith.constant dense<0.000000e+00> : vector<256xf32>
    %60 = vector.multi_reduction <add>, %59, %cst_37 [0] : vector<20x256xf32> to vector<256xf32>
    %61 = vector.shape_cast %60 : vector<256xf32> to vector<1x256xf32>
    %62 = arith.addf %58, %61 : vector<1x256xf32>
    %c1_38 = arith.constant 1 : index
    %c0_39 = arith.constant 0 : index
    %63 = vector.load %arg8[%c1_38, %c0_39] : memref<2x256xf32, #tpu.memory_space<vmem>>, vector<1x256xf32>
    tpu.vector_store %arg8[%c1_38, %c0_39], %62 {strides = array<i32>} : memref<2x256xf32, #tpu.memory_space<vmem>>, vector<1x256xf32>,
    %c1_i32_40 = arith.constant 1 : i32
    %64 = arith.cmpi eq, %arg1, %c1_i32_40 : i32
    %65 = arith.extui %64 : i1 to i32
    %c0_i32_41 = arith.constant 0 : i32
    %66 = arith.cmpi ne, %65, %c0_i32_41 : i32
    scf.if %66 {
      %c0_42 = arith.constant 0 : index
      %c0_43 = arith.constant 0 : index
      %67 = vector.load %arg8[%c0_42, %c0_43] : memref<2x256xf32, #tpu.memory_space<vmem>>, vector<1x256xf32>
      %cst_44 = arith.constant 3.125000e-02 : f32
      %68 = vector.broadcast %cst_44 : f32 to vector<1x256xf32>
      %69 = arith.mulf %67, %68 : vector<1x256xf32>
      %c1_45 = arith.constant 1 : index
      %c0_46 = arith.constant 0 : index
      %70 = vector.load %arg8[%c1_45, %c0_46] : memref<2x256xf32, #tpu.memory_space<vmem>>, vector<1x256xf32>
      %cst_47 = arith.constant 3.125000e-02 : f32
      %71 = vector.broadcast %cst_47 : f32 to vector<1x256xf32>
      %72 = arith.mulf %70, %71 : vector<1x256xf32>
      %73 = arith.mulf %69, %69 : vector<1x256xf32>
      %74 = arith.subf %72, %73 : vector<1x256xf32>
      %cst_48 = arith.constant 0.000000e+00 : f32
      %75 = vector.broadcast %cst_48 : f32 to vector<1x256xf32>
      %76 = arith.maximumf %74, %75 : vector<1x256xf32>
      %c0_49 = arith.constant 0 : index
      %c0_50 = arith.constant 0 : index
      %77 = vector.load %arg4[%c0_49, %c0_50] : memref<1x256xf32, #tpu.memory_space<vmem>>, vector<1x256xf32>
      %cst_51 = arith.constant 9.99999974E-6 : f32
      %78 = vector.broadcast %cst_51 : f32 to vector<1x256xf32>
      %79 = arith.addf %76, %78 : vector<1x256xf32>
      %80 = math.rsqrt %79 : vector<1x256xf32>
      %81 = arith.mulf %77, %80 : vector<1x256xf32>
      %c0_52 = arith.constant 0 : index
      %c0_53 = arith.constant 0 : index
      %82 = vector.load %arg7[%c0_52, %c0_53] : memref<2x256xf32, #tpu.memory_space<vmem>>, vector<1x256xf32>
      tpu.vector_store %arg7[%c0_52, %c0_53], %81 {strides = array<i32>} : memref<2x256xf32, #tpu.memory_space<vmem>>, vector<1x256xf32>,
      %c0_54 = arith.constant 0 : index
      %c0_55 = arith.constant 0 : index
      %83 = vector.load %arg5[%c0_54, %c0_55] : memref<1x256xf32, #tpu.memory_space<vmem>>, vector<1x256xf32>
      %84 = arith.mulf %69, %81 : vector<1x256xf32>
      %85 = arith.subf %83, %84 : vector<1x256xf32>
      %c1_56 = arith.constant 1 : index
      %c0_57 = arith.constant 0 : index
      %86 = vector.load %arg7[%c1_56, %c0_57] : memref<2x256xf32, #tpu.memory_space<vmem>>, vector<1x256xf32>
      tpu.vector_store %arg7[%c1_56, %c0_57], %85 {strides = array<i32>} : memref<2x256xf32, #tpu.memory_space<vmem>>, vector<1x256xf32>,
    } else {
    }
    return
  }
  func.func @transform_0(%arg0: i32, %arg1: i32) -> (i32, i32, i32) {
    %c0_i32 = arith.constant 0 : i32
    %c0_i32_0 = arith.constant 0 : i32
    %c0_i32_1 = arith.constant 0 : i32
    return %arg1, %c0_i32, %c0_i32_0 : i32, i32, i32
  }
  func.func @transform_1(%arg0: i32, %arg1: i32) -> (i32, i32, i32) {
    %c0_i32 = arith.constant 0 : i32
    %c0_i32_0 = arith.constant 0 : i32
    %c0_i32_1 = arith.constant 0 : i32
    return %c0_i32, %c0_i32_0, %arg0 : i32, i32, i32
  }
  func.func @transform_2(%arg0: i32, %arg1: i32) -> (i32, i32) {
    %c0_i32 = arith.constant 0 : i32
    %c0_i32_0 = arith.constant 0 : i32
    return %c0_i32, %arg0 : i32, i32
  }
  func.func @transform_3(%arg0: i32, %arg1: i32) -> (i32, i32) {
    %c0_i32 = arith.constant 0 : i32
    %c0_i32_0 = arith.constant 0 : i32
    return %c0_i32, %arg0 : i32, i32
  }
  func.func @transform_4(%arg0: i32, %arg1: i32) -> (i32, i32, i32) {
    %c0_i32 = arith.constant 0 : i32
    %c0_i32_0 = arith.constant 0 : i32
    return %arg1, %c0_i32, %arg0 : i32, i32, i32
  }
  func.func @transform_5(%arg0: i32, %arg1: i32) -> (i32, i32) {
    %c0_i32 = arith.constant 0 : i32
    %c0_i32_0 = arith.constant 0 : i32
    return %c0_i32, %arg0 : i32, i32
  }
}

module attributes {stable_mosaic.version = 11 : i64} {
  func.func @_bn_lrelu_kernel(%arg0: i32, %arg1: i32, %arg2: memref<1x20x256xbf16, #tpu.memory_space<vmem>>, %arg3: memref<2x256xf32, #tpu.memory_space<vmem>>, %arg4: memref<1x20x256xbf16, #tpu.memory_space<vmem>>) attributes {dimension_semantics = [#tpu.dimension_semantics<parallel>, #tpu.dimension_semantics<parallel>], iteration_bounds = array<i64: 1, 2>, scalar_prefetch = 0 : i64, scratch_operands = 0 : i64, tpu.core_type = #tpu.core_type<tc>, window_params = [{transform_indices = @transform_0, window_bounds = array<i64: 1, 20, 256>}, {transform_indices = @transform_1, window_bounds = array<i64: 2, 256>}, {transform_indices = @transform_2, window_bounds = array<i64: 1, 20, 256>}]} {
    %c0 = arith.constant 0 : index
    %c0_0 = arith.constant 0 : index
    %c0_1 = arith.constant 0 : index
    %0 = vector.load %arg2[%c0, %c0_0, %c0_1] : memref<1x20x256xbf16, #tpu.memory_space<vmem>>, vector<1x20x256xbf16>
    %1 = vector.shape_cast %0 : vector<1x20x256xbf16> to vector<20x256xbf16>
    %2 = arith.extf %1 : vector<20x256xbf16> to vector<20x256xf32>
    %c0_2 = arith.constant 0 : index
    %c0_3 = arith.constant 0 : index
    %3 = vector.load %arg3[%c0_2, %c0_3] : memref<2x256xf32, #tpu.memory_space<vmem>>, vector<1x256xf32>
    %4 = vector.broadcast %3 : vector<1x256xf32> to vector<20x256xf32>
    %5 = arith.mulf %2, %4 : vector<20x256xf32>
    %c1 = arith.constant 1 : index
    %c0_4 = arith.constant 0 : index
    %6 = vector.load %arg3[%c1, %c0_4] : memref<2x256xf32, #tpu.memory_space<vmem>>, vector<1x256xf32>
    %7 = vector.broadcast %6 : vector<1x256xf32> to vector<20x256xf32>
    %8 = arith.addf %5, %7 : vector<20x256xf32>
    %cst = arith.constant 0.000000e+00 : f32
    %9 = vector.broadcast %cst : f32 to vector<20x256xf32>
    %10 = arith.cmpf oge, %8, %9 : vector<20x256xf32>
    %cst_5 = arith.constant 2.000000e-01 : f32
    %11 = vector.broadcast %cst_5 : f32 to vector<20x256xf32>
    %12 = arith.mulf %11, %8 : vector<20x256xf32>
    %13 = arith.select %10, %8, %12 : vector<20x256xi1>, vector<20x256xf32>
    %14 = arith.truncf %13 : vector<20x256xf32> to vector<20x256xbf16>
    %c0_6 = arith.constant 0 : index
    %c0_7 = arith.constant 0 : index
    %c0_8 = arith.constant 0 : index
    %15 = vector.load %arg4[%c0_6, %c0_7, %c0_8] : memref<1x20x256xbf16, #tpu.memory_space<vmem>>, vector<1x20x256xbf16>
    %16 = vector.shape_cast %15 : vector<1x20x256xbf16> to vector<20x256xbf16>
    %17 = vector.shape_cast %14 : vector<20x256xbf16> to vector<1x20x256xbf16>
    tpu.vector_store %arg4[%c0_6, %c0_7, %c0_8], %17 {strides = array<i32>} : memref<1x20x256xbf16, #tpu.memory_space<vmem>>, vector<1x20x256xbf16>,
    return
  }
  func.func @transform_0(%arg0: i32, %arg1: i32) -> (i32, i32, i32) {
    %c0_i32 = arith.constant 0 : i32
    %c0_i32_0 = arith.constant 0 : i32
    return %arg1, %c0_i32, %arg0 : i32, i32, i32
  }
  func.func @transform_1(%arg0: i32, %arg1: i32) -> (i32, i32) {
    %c0_i32 = arith.constant 0 : i32
    %c0_i32_0 = arith.constant 0 : i32
    return %c0_i32, %arg0 : i32, i32
  }
  func.func @transform_2(%arg0: i32, %arg1: i32) -> (i32, i32, i32) {
    %c0_i32 = arith.constant 0 : i32
    %c0_i32_0 = arith.constant 0 : i32
    return %arg1, %c0_i32, %arg0 : i32, i32, i32
  }
}

module attributes {stable_mosaic.version = 11 : i64} {
  func.func @_head_kernel(%arg0: memref<2x4096xbf16, #tpu.memory_space<vmem>>, %arg1: memref<4096x1xbf16, #tpu.memory_space<vmem>>, %arg2: memref<1x1xf32, #tpu.memory_space<vmem>>, %arg3: memref<2x1xf32, #tpu.memory_space<vmem>>) attributes {dimension_semantics = [], scalar_prefetch = 0 : i64, scratch_operands = 0 : i64, tpu.core_type = #tpu.core_type<tc>} {
    %c0 = arith.constant 0 : index
    %c0_0 = arith.constant 0 : index
    %0 = vector.load %arg0[%c0, %c0_0] : memref<2x4096xbf16, #tpu.memory_space<vmem>>, vector<2x4096xbf16>
    %c0_1 = arith.constant 0 : index
    %c0_2 = arith.constant 0 : index
    %1 = vector.load %arg1[%c0_1, %c0_2] : memref<4096x1xbf16, #tpu.memory_space<vmem>>, vector<4096x1xbf16>
    %cst = arith.constant dense<0.000000e+00> : vector<2x1xf32>
    %2 = tpu.matmul %0, %1, %cst {dimension_numbers = #tpu.dot_dimension_numbers<[1], [0], [0], [1], [0, 0, 1, 1], [], []>} : vector<2x4096xbf16>, vector<4096x1xbf16>, vector<2x1xf32> -> vector<2x1xf32>
    %c0_3 = arith.constant 0 : index
    %c0_4 = arith.constant 0 : index
    %3 = vector.load %arg2[%c0_3, %c0_4] : memref<1x1xf32, #tpu.memory_space<vmem>>, vector<1x1xf32>
    %4 = vector.broadcast %3 : vector<1x1xf32> to vector<2x1xf32>
    %5 = arith.addf %2, %4 : vector<2x1xf32>
    %cst_5 = arith.constant 0.000000e+00 : f32
    %6 = vector.broadcast %cst_5 : f32 to vector<2x1xf32>
    %7 = arith.subf %6, %5 : vector<2x1xf32>
    %8 = math.exp %7 : vector<2x1xf32>
    %cst_6 = arith.constant 1.000000e+00 : f32
    %9 = vector.broadcast %cst_6 : f32 to vector<2x1xf32>
    %10 = arith.addf %9, %8 : vector<2x1xf32>
    %cst_7 = arith.constant 1.000000e+00 : f32
    %11 = vector.broadcast %cst_7 : f32 to vector<2x1xf32>
    %12 = arith.divf %11, %10 : vector<2x1xf32>
    %c0_8 = arith.constant 0 : index
    %c0_9 = arith.constant 0 : index
    %13 = vector.load %arg3[%c0_8, %c0_9] : memref<2x1xf32, #tpu.memory_space<vmem>>, vector<2x1xf32>
    tpu.vector_store %arg3[%c0_8, %c0_9], %12 {strides = array<i32>} : memref<2x1xf32, #tpu.memory_space<vmem>>, vector<2x1xf32>,
    return
  }
}

</mosaic_0001>

<bundles_post_ra>
// kernel: dc_discriminator.7
= control target key start
LH: loop header
LB: loop body
LE: loop exit
PB: predicated region body
PF: predicated region fallthrough
CT: control target
= control target key end

     0   :  { %s4245_s18 = smov 0   ;;  %s4247_s19 = smov 0   ;;  %s5845_s0 = inlined_call_operand.vmem [shape: bf16[2,306,128], index: 0, kind: input, shape index: {}]   ;;  %s5846_s1 = inlined_call_operand.vmem [shape: bf16[4,128,128], index: 1, kind: input, shape index: {}]   ;;  %s5847_s2 = inlined_call_operand.vmem [shape: f32[1,128], index: 2, kind: input, shape index: {}]   ;;  %s5848_s3 = inlined_call_operand.vmem [shape: f32[1,128], index: 3, kind: input, shape index: {}]   ;;  %s5849_s4 = inlined_call_operand.vmem [shape: bf16[2,272,128], index: 4, kind: output, shape index: {0}]   ;;  %s5850_s5 = inlined_call_operand.vmem [shape: f32[2,128], index: 5, kind: output, shape index: {1}]  }
   0x1   :  { %s4249_s20 = smov 0  }
   0x2 LB: > { %s25_s21 = sadd.s32 1, %s4206_s19  ;;  %p3120_p0 = scmp.ge.s32.totalorder %s4210_s20, 1  ;;  %s4210_s20 = sphi %s4249_s20, %s16_s20   ;;  %s4206_s19 = sphi %s4247_s19, %s5995_s19   ;;  %s4202_s18 = sphi %s4245_s18, %s5994_s18  }
   0x3   : > { %p26_p1 = scmp.ge.s32.totalorder %s25_s21, 2  ;;  %p229_p2 = scmp.lt.s32.totalorder %s4210_s20, 3 }
   0x5   : > { %s5997_s21 = smov (%p26_p1, %s25_s21), 0  ;;  %p230_p3 = pnand %p3120_p0, %p229_p2 }
   0x7   : > { %233 = sbr.rel (%p230_p3) target bundleno = 647 (0x287), region = 36 }
   0xe   : > { %v4117_v0 = vld [vmem:[%s5846_s1 + $0x40] sm:$0xff]   ;;  %v4212_v1 = vmov 0.0   ;;  %v4119_v3 = vld [vmem:[%s5846_s1 + $0x48] sm:$0xff]   ;;  %vm4213_vm0 = vmmov 0   ;;  %p274_p4 = scmp.lt.s32.totalorder %s4202_s18, 1  ;;  %v4121_v5 = vld [vmem:[%s5846_s1 + $0x50] sm:$0xff]  }
   0xf   : > { %3514 = vmatprep.subr.bf16.mxu1 %v4212_v1  ;;  %3682 = vmatprep.subr.bf16.mxu0 %v4212_v1  ;;  %v4118_v2 = vld [vmem:[%s5846_s1 + $0x80] sm:$0xff]   ;;  %v4120_v4 = vld [vmem:[%s5846_s1 + $0x88] sm:$0xff]   ;;  %v4122_v6 = vld [vmem:[%s5846_s1 + $0x90] sm:$0xff]   ;;  %vm458_vm1 = vsmask.f32 7424  ;;  %vm1636_vm2 = vcmask 1046528  }
  0x10   : > { %3515 = vmatpush3.bf16.msra.mxu1 %v4117_v0  ;;  %3530 = vmatprep.mubr.msk.bf16.mxu1 %vm4213_vm0, %v4212_v1  ;;  %s4290_s7 = scalar_select %p274_p4, %s4202_s18, 1  ;;  %v4123_v7 = vld [vmem:[%s5846_s1 + $0x58] sm:$0xff]   ;;  %v4125_v9 = vld [vmem:[%s5846_s1 + $0x60] sm:$0xff]   ;;  %v4127_v11 = vld [vmem:[%s5846_s1 + $0x68] sm:$0xff]  }
  0x11   : > { %3683 = vmatpush3.bf16.msra.mxu0 %v4118_v2  ;;  %3516 = vmatprep.subr.bf16.mxu1 %v4212_v1  ;;  %v4124_v8 = vld [vmem:[%s5846_s1 + $0x98] sm:$0xff]   ;;  %v4126_v10 = vld [vmem:[%s5846_s1 + $0xa0] sm:$0xff]   ;;  %v4128_v16 = vld [vmem:[%s5846_s1 + $0xa8] sm:$0xff]   ;;  %p3274_p5 = scmp.ne.s32.totalorder %s4202_s18, 0 }
  0x12   : > { %3684 = vmatprep.subr.bf16.mxu0 %v4212_v1  ;;  %3698 = vmatprep.mubr.msk.bf16.mxu0 %vm4213_vm0, %v4212_v1  ;;  %s4020_s12 = smul.u32 156, %s4290_s7  ;;  %v4129_v20 = vld [vmem:[%s5846_s1 + $0x70] sm:$0xff]   ;;  %v4131_v29 = vld [vmem:[%s5846_s1 + $0x78] sm:$0xff]   ;;  %v4137_v37 = vld [vmem:[%s5846_s1] sm:$0xff]  }
  0x13   : > { %v4130_v21 = vld [vmem:[%s5846_s1 + $0xb0] sm:$0xff]   ;;  %v4132_v30 = vld [vmem:[%s5846_s1 + $0xb8] sm:$0xff]   ;;  %v4138_v42 = vld [vmem:[%s5846_s1 + $0xc0] sm:$0xff]  }
  0x14   : > { %3517 = vmatpush3.bf16.msra.mxu1 %v4119_v3  ;;  %s4312_s23 = scalar_lea.vmem %s5845_s0, %s4020_s12  ;;  %v4143_v49 = vld [vmem:[%s5846_s1 + $0x8] sm:$0xff]   ;;  %v4149_v60 = vld [vmem:[%s5846_s1 + $0x10] sm:$0xff]  }
  0x15   : > { %3685 = vmatpush3.bf16.msra.mxu0 %v4120_v4  ;;  %3518 = vmatprep.subr.bf16.mxu1 %v4212_v1  ;;  %v4323_v12 = vld [vmem:[%s4312_s23] sm:$0xff]   ;;  %v4326_v13 = vld [vmem:[%s4312_s23 + $0x8] sm:$0xff]   ;;  %v4339_v19 = vld [vmem:[%s4312_s23 + $0x10] sm:$0xff]  }
  0x16   : > { %3686 = vmatprep.subr.bf16.mxu0 %v4212_v1  ;;  %v1067_v14 = vld [vmem:[%s4312_s23 + $0x8] sm:$0xf]  ;;  %v4330_v15 = vld [vmem:[%s4312_s23 + $0xc] sm:$0xf]  ;;  %v462_v17 = vshll.u32 %v4323_v12, 16  ;;  %v460_v22 = vshrl.u32 %v4323_v12, 16 }
  0x17   : > { %v3189_v18 = vcombine.low %v1067_v14, %v4330_v15  ;;  %v467_v23 = vshll.u32 %v4326_v13, 16  ;;  %v1215_v28 = vshll.u32 %v4339_v19, 16  ;;  %v4360_v33 = vld [vmem:[%s4312_s23 + $0x10] sm:$0xff]   ;;  %v4364_v36 = vld [vmem:[%s4312_s23 + $0x18] sm:$0xff]   ;;  %v471_v39 = vshrl.u32 %v4326_v13, 16  ;;  %v4385_v48 = vld [vmem:[%s4312_s23 + $0x20] sm:$0xff]  }
  0x18   : > { %3519 = vmatpush3.bf16.msra.mxu1 %v4121_v5  ;;  %v464_v25 = vrot.slane %v462_v17, 1  ;;  %v475_v40 = vshll.u32 %v4360_v33, 16  ;;  %v1219_v43 = vshrl.u32 %v4339_v19, 16  ;;  %v1223_v44 = vshll.u32 %v4364_v36, 16  ;;  %v4382_v45 = vld [vmem:[%s4312_s23 + $0x18] sm:$0xff]   ;;  %v4144_v52 = vld [vmem:[%s5846_s1 + $0xc8] sm:$0xff]  }
  0x19   : > { %3687 = vmatpush3.bf16.msra.mxu0 %v4122_v6  ;;  %3520 = vmatprep.subr.bf16.mxu1 %v4212_v1  ;;  %v1210_v24 = vshll.u32 %v3189_v18, 16  ;;  %v1208_v26 = vshrl.u32 %v3189_v18, 16  ;;  %v469_v32 = vrot.slane %v467_v23, 1  ;;  %v1217_v35 = vrot.slane %v1215_v28, 1  ;;  %v4404_v57 = vld [vmem:[%s4312_s23 + $0x20] sm:$0xff]   ;;  %v4150_v61 = vld [vmem:[%s5846_s1 + $0xd0] sm:$0xff]  }
  0x1a   : > { %3688 = vmatprep.subr.bf16.mxu0 %v4212_v1  ;;  %v465_v31 = vor.u32 %v464_v25, %v460_v22  ;;  %v477_v47 = vrot.slane %v475_v40, 1  ;;  %v1225_v51 = vrot.slane %v1223_v44, 1  ;;  %v479_v54 = vshrl.u32 %v4360_v33, 16  ;;  %v4419_v0 = vld [vmem:[%s4312_s23 + $0x28] sm:$0xff]   ;;  %v4155_v4 = vld [vmem:[%s5846_s1 + $0x18] sm:$0xff]   ;;  %v4161_v22 = vld [vmem:[%s5846_s1 + $0x20] sm:$0xff]  }
  0x1b   : > { %v1212_v27 = vrot.slane %v1210_v24, 1  ;;  %v473_v46 = vor.u32 %v471_v39, %v469_v32  ;;  %v1221_v50 = vor.u32 %v1219_v43, %v1217_v35  ;;  %v483_v55 = vshll.u32 %v4382_v45, 16  ;;  %v4156_v6 = vld [vmem:[%s5846_s1 + $0xd8] sm:$0xff]   ;;  %v4453_v24 = vld [vmem:[%s4312_s23 + $0x30] sm:$0xff]  }
  0x1c   : > { %3521 = vmatpush3.bf16.msra.mxu1 %v4123_v7  ;;  %v470_v38 = vsel %vm458_vm1, %v465_v31, %v469_v32  ;;  %v1227_v56 = vshrl.u32 %v4364_v36, 16  ;;  %v1231_v59 = vshll.u32 %v4385_v48, 16  ;;  %v481_v62 = vor.u32 %v479_v54, %v477_v47 }
  0x1d   : > { %3689 = vmatpush3.bf16.msra.mxu0 %v4124_v8  ;;  %3522 = vmatprep.subr.bf16.mxu1 %v4212_v1  ;;  %v1213_v34 = vor.u32 %v1212_v27, %v1208_v26  ;;  %v478_v53 = vsel %vm458_vm1, %v473_v46, %v477_v47  ;;  %v1226_v58 = vsel %vm458_vm1, %v1221_v50, %v1225_v51  ;;  %v485_v63 = vrot.slane %v483_v55, 1  ;;  %v4434_v8 = vld [vmem:[%s4312_s23 + $0x48] sm:$0xff]   ;;  %v4162_v27 = vld [vmem:[%s5846_s1 + $0xe0] sm:$0xff]  }
  0x1e   : > { %3690 = vmatprep.subr.bf16.mxu0 %v4212_v1  ;;  %v1229_v2 = vor.u32 %v1227_v56, %v1225_v51  ;;  %v1233_v3 = vrot.slane %v1231_v59, 1  ;;  %v491_v5 = vshll.u32 %v4404_v57, 16  ;;  %v487_v7 = vshrl.u32 %v4382_v45, 16  ;;  %v4484_v46 = vld [vmem:[%s4312_s23 + $0x60] sm:$0xff]   ;;  %v4497_v56 = vld [vmem:[%s4312_s23 + $0x30] sm:$0xff]  }
  0x1f   : > { %v1218_v41 = vsel %vm458_vm1, %v1213_v34, %v1217_v35  ;;  %v1271_v17 = vshll.u32 %v4434_v8, 16  ;;  %v4469_v34 = vld [vmem:[%s4312_s23 + $0x58] sm:$0xff]   ;;  %v1247_v39 = vshll.u32 %v4453_v24, 16  ;;  %v1243_v44 = vshrl.u32 %v4419_v0, 16 }
  0x20   : > { %3523 = vmatpush3.bf16.msra.mxu1 %v4125_v9  ;;  %v486_v9 = vsel %vm458_vm1, %v481_v62, %v485_v63  ;;  %v1234_v14 = vsel %vm458_vm1, %v1229_v2, %v1233_v3  ;;  %v493_v18 = vrot.slane %v491_v5, 1  ;;  %v489_v23 = vor.u32 %v487_v7, %v485_v63  ;;  %v4508_v63 = vld [vmem:[%s4312_s23 + $0x68] sm:$0xff]  }
  0x21   : > { %3691 = vmatpush3.bf16.msra.mxu0 %v4126_v10  ;;  %3524 = vmatprep.subr.bf16.mxu1 %v4212_v1  ;;  %v1235_v10 = vshrl.u32 %v4385_v48, 16  ;;  %v4455_v25 = vrot.slane %v1271_v17, 1  ;;  %v1291_v47 = vshrl.u32 %v4469_v34, 16  ;;  %v1249_v55 = vrot.slane %v1247_v39, 1 }
  0x22   : > { %3692 = vmatprep.subr.bf16.mxu0 %v4212_v1  ;;  %v1299_v2 = vshrl.u32 %v4484_v46, 16 }
  0x23   : > { %v1237_v28 = vor.u32 %v1235_v10, %v1233_v3  ;;  %v1251_v10 = vshrl.u32 %v4453_v24, 16 }
  0x24   : > { %3525 = vmatpush3.bf16.msra.mxu1 %v4127_v11  ;;  %v4439_v11 = vld [vmem:[%s4312_s23 + $0x28] sm:$0xff]  }
  0x25   : > { %3693 = vmatpush3.bf16.msra.mxu0 %v4128_v16  ;;  %3526 = vmatprep.subr.bf16.mxu1 %v4212_v1  ;;  %v1239_v16 = vshll.u32 %v4419_v0, 16  ;;  %v499_v31 = vshll.u32 %v4439_v11, 16  ;;  %v503_v3 = vshrl.u32 %v4439_v11, 16 }
  0x26   : > { %3694 = vmatprep.subr.bf16.mxu0 %v4212_v1 }
  0x27   : > { %v501_v50 = vrot.slane %v499_v31, 1  ;;  %v511_v31 = vshrl.u32 %v4497_v56, 16 }
  0x28   : > { %3527 = vmatpush3.bf16.msra.mxu1 %v4129_v20  ;;  %v4445_v20 = vld [vmem:[%s4312_s23 + $0x50] sm:$0xff]  }
  0x29   : > { %3695 = vmatpush3.bf16.msra.mxu0 %v4130_v21  ;;  %3528 = vmatprep.subr.bf16.mxu1 %v4212_v1  ;;  %v1275_v21 = vshrl.u32 %v4434_v8, 16  ;;  %v1279_v26 = vshll.u32 %v4445_v20, 16  ;;  %v1283_v35 = vshrl.u32 %v4445_v20, 16 }
  0x2a   : > { %3696 = vmatprep.subr.bf16.mxu0 %v4212_v1 }
  0x2b   : > { %v1281_v32 = vrot.slane %v1279_v26, 1  ;;  %v505_v26 = vor.u32 %v503_v3, %v501_v50  ;;  %v1615_v3 = vld [vmem:[%s4312_s23 + $0x8] sm:$0xe] }
  0x2c   : > { %3529 = vmatpush3.bf16.msra.mxu1 %v4131_v29  ;;  %v1241_v29 = vrot.slane %v1239_v16, 1  ;;  %v4173_v16 = vld [vmem:[%s5846_s1 + $0x30] sm:$0xff]  }
  0x2d   : > { %3697 = vmatpush3.bf16.msra.mxu0 %v4132_v30  ;;  %3598 = vmatprep.subr.bf16.mxu1 %v4212_v1  ;;  %v1277_v30 = vor.u32 %v1275_v21, %v4455_v25 }
  0x2e   : > { %3766 = vmatprep.subr.bf16.mxu0 %v4212_v1  ;;  %v1242_v43 = vsel %vm458_vm1, %v1237_v28, %v1241_v29  ;;  %v4542_v28 = vld [vmem:[%s4312_s23 + $0x40] sm:$0xff]  }
  0x2f   : > { %3531 = vmatmul.mubr.bf16.vlgmr.msra.gmra.mrb[0].mxu1 %v470_v38  ;;  %v495_v38 = vshrl.u32 %v4404_v57, 16  ;;  %v4478_v40 = vsel %vm458_vm1, %v1277_v30, %v1281_v32  ;;  %v1263_v39 = vshll.u32 %v4542_v28, 16 }
  0x30   : > { %3699 = vmatmul.mubr.bf16.vlgmr.msra.gmra.mrb[0].mxu0 %v1218_v41  ;;  %3599 = vmatpush3.bf16.msra.mxu1 %v4137_v37  ;;  %v494_v37 = vsel %vm458_vm1, %v489_v23, %v493_v18  ;;  %v1285_v41 = vor.u32 %v1283_v35, %v1281_v32  ;;  %v4550_v35 = vld [vmem:[%s4312_s23 + $0x80] sm:$0xff]  }
  0x31   : > { %3767 = vmatpush3.bf16.msra.mxu0 %v4138_v42  ;;  %3534 = vmatprep.mubr.msk.bf16.mxu1 %vm4213_vm0, %v4212_v1  ;;  %v1287_v42 = vshll.u32 %v4469_v34, 16  ;;  %v497_v54 = vor.u32 %v495_v38, %v493_v18 }
  0x32   : > { %3702 = vmatprep.mubr.msk.bf16.mxu0 %vm4213_vm0, %v4212_v1  ;;  %3600 = vmatprep.subr.bf16.mxu1 %v4212_v1 }
  0x33   : > { %3768 = vmatprep.subr.bf16.mxu0 %v4212_v1  ;;  %v1289_v51 = vrot.slane %v1287_v42, 1  ;;  %v502_v7 = vsel %vm458_vm1, %v497_v54, %v501_v50  ;;  %v591_v54 = vshrl.u32 %v4550_v35, 16 }
  0x34   : > { %3601 = vmatpush3.bf16.msra.mxu1 %v4143_v49  ;;  %v4167_v49 = vld [vmem:[%s5846_s1 + $0x28] sm:$0xff]  }
  0x35   : > { %3769 = vmatpush3.bf16.msra.mxu0 %v4144_v52  ;;  %3602 = vmatprep.subr.bf16.mxu1 %v4212_v1  ;;  %v1295_v52 = vshll.u32 %v4484_v46, 16  ;;  %v1293_v59 = vor.u32 %v1291_v47, %v1289_v51 }
  0x36   : > { %3770 = vmatprep.subr.bf16.mxu0 %v4212_v1 }
  0x37   : > { %3535 = vmatmul.mubr.bf16.gmra.mrb[4].mxu1 %v478_v53  ;;  %v4168_v53 = vld [vmem:[%s5846_s1 + $0xe8] sm:$0xff]   ;;  %v1297_v62 = vrot.slane %v1295_v52, 1 }
  0x38   : > { %3703 = vmatmul.mubr.bf16.gmra.mrb[4].mxu0 %v1226_v58  ;;  %3538 = vmatprep.mubr.msk.bf16.mxu1 %vm4213_vm0, %v4212_v1  ;;  %v4500_v58 = vsel %vm458_vm1, %v1285_v41, %v1289_v51  ;;  %v4180_v41 = vld [vmem:[%s5846_s1 + $0x38] sm:$0xff]   ;;  %v1265_v51 = vrot.slane %v1263_v39, 1 }
  0x39   : > { %3706 = vmatprep.mubr.msk.bf16.mxu0 %vm4213_vm0, %v4212_v1  ;;  %3603 = vmatpush3.bf16.msra.mxu1 %v4149_v60  ;;  %v1245_v60 = vor.u32 %v1243_v44, %v1241_v29  ;;  %v1301_v5 = vor.u32 %v1299_v2, %v1297_v62  ;;  %v1253_v29 = vor.u32 %v1251_v10, %v1249_v55 }
  0x3a   : > { %3771 = vmatpush3.bf16.msra.mxu0 %v4150_v61  ;;  %3604 = vmatprep.subr.bf16.mxu1 %v4212_v1  ;;  %v4505_v61 = vld [vmem:[%s4312_s23 + $0x38] sm:$0xff]  }
  0x3b   : > { %3772 = vmatprep.subr.bf16.mxu0 %v4212_v1  ;;  %v1250_v17 = vsel %vm458_vm1, %v1245_v60, %v1249_v55  ;;  %v1255_v18 = vshll.u32 %v4505_v61, 16  ;;  %v1259_v38 = vshrl.u32 %v4505_v61, 16  ;;  %v4183_v55 = vld [vmem:[%s4312_s23 + $0x88] ss:$0 sps:$4 sm:$0x11]  }
  0x3d   : > { %3605 = vmatpush3.bf16.msra.mxu1 %v4155_v4  ;;  %v4514_v4 = vsel %vm458_vm1, %v1293_v59, %v1297_v62  ;;  %v1257_v30 = vrot.slane %v1255_v18, 1  ;;  %v1267_v62 = vshrl.u32 %v4542_v28, 16 }
  0x3e   : > { %3773 = vmatpush3.bf16.msra.mxu0 %v4156_v6  ;;  %3606 = vmatprep.subr.bf16.mxu1 %v4212_v1  ;;  %v1303_v6 = vshll.u32 %v4508_v63, 16 }
  0x3f   : > { %3539 = vmatmul.mubr.bf16.gmra.mrb[8].mxu1 %v486_v9  ;;  %3774 = vmatprep.subr.bf16.mxu0 %v4212_v1  ;;  %v507_v9 = vshll.u32 %v4497_v56, 16  ;;  %v1258_v42 = vsel %vm458_vm1, %v1253_v29, %v1257_v30  ;;  %v1261_v50 = vor.u32 %v1259_v38, %v1257_v30 }
  0x40   : > { %3707 = vmatmul.mubr.bf16.gmra.mrb[8].mxu0 %v1234_v14  ;;  %3542 = vmatprep.mubr.msk.bf16.mxu1 %vm4213_vm0, %v4212_v1  ;;  %v4522_v14 = vld [vmem:[%s4312_s23 + $0x38] sm:$0xff]   ;;  %v4529_v21 = vrot.slane %v1303_v6, 1  ;;  %v3231_v6 = vcombine.low %v1615_v3, %v4330_v15 }
  0x41   : > { %3710 = vmatprep.mubr.msk.bf16.mxu0 %vm4213_vm0, %v4212_v1  ;;  %3607 = vmatpush3.bf16.msra.mxu1 %v4161_v22  ;;  %v4174_v22 = vld [vmem:[%s5846_s1 + $0xf0] sm:$0xff]   ;;  %v515_v32 = vshll.u32 %v4522_v14, 16  ;;  %v519_v60 = vshrl.u32 %v4522_v14, 16  ;;  %v1266_v10 = vsel %vm458_vm1, %v1261_v50, %v1265_v51 }
  0x42   : > { %3775 = vmatpush3.bf16.msra.mxu0 %v4162_v27  ;;  %3608 = vmatprep.subr.bf16.mxu1 %v4212_v1  ;;  %v4536_v23 = vsel %vm458_vm1, %v1301_v5, %v4529_v21  ;;  %v509_v27 = vrot.slane %v507_v9, 1  ;;  %v595_v5 = vshll.u32 %v4183_v55, 16  ;;  %v1640_v9 = vrot.slane %v4364_v36, 1 }
  0x43   : > { %3776 = vmatprep.subr.bf16.mxu0 %v4212_v1  ;;  %v517_v47 = vrot.slane %v515_v32, 1  ;;  %v1648_v36 = vrot.slane %v4505_v61, 1  ;;  %v4606_v32 = vld [vmem:[%s4312_s23 + $0x48] sm:$0xff]  }
  0x44   : > { %v513_v44 = vor.u32 %v511_v31, %v509_v27  ;;  %v597_v18 = vrot.slane %v595_v5, 1  ;;  %v1654_v5 = vrot.slane %v4445_v20, 1 }
  0x45   : > { %3609 = vmatpush3.bf16.msra.mxu1 %v4167_v49  ;;  %v4561_v49 = vld [vmem:[%s4312_s23 + $0x40] sm:$0xff]  }
  0x46   : > { %3777 = vmatpush3.bf16.msra.mxu0 %v4168_v53  ;;  %3610 = vmatprep.subr.bf16.mxu1 %v4212_v1  ;;  %v4182_v53 = vld [vmem:[%s5846_s1 + $0xf8] sm:$0xff]   ;;  %v518_v59 = vsel %vm458_vm1, %v513_v44, %v517_v47  ;;  %v527_v39 = vshrl.u32 %v4561_v49, 16 }
  0x47   : > { %3543 = vmatmul.mubr.bf16.gmra.mrb[12].mxu1 %v494_v37  ;;  %3778 = vmatprep.subr.bf16.mxu0 %v4212_v1  ;;  %v510_v37 = vsel %vm458_vm1, %v505_v26, %v509_v27  ;;  %v1644_v27 = vrot.slane %v4419_v0, 1  ;;  %v521_v0 = vor.u32 %v519_v60, %v517_v47 }
  0x48   : > { %3711 = vmatmul.mubr.bf16.gmra.mrb[12].mxu0 %v1242_v43  ;;  %3546 = vmatprep.mubr.msk.bf16.mxu1 %vm4213_vm0, %v4212_v1  ;;  %v587_v43 = vshll.u32 %v4550_v35, 16 }
  0x49   : > { %3714 = vmatprep.mubr.msk.bf16.mxu0 %vm4213_vm0, %v4212_v1  ;;  %3611 = vmatpush3.bf16.msra.mxu1 %v4173_v16  ;;  %v523_v16 = vshll.u32 %v4561_v49, 16 }
  0x4a   : > { %3612 = vmatprep.subr.bf16.mxu1 %v4212_v1  ;;  %3779 = vmatpush3.bf16.msra.mxu0 %v4174_v22  ;;  %v4565_v52 = vrot.slane %v587_v43, 1  ;;  %v1637_v22 = vrot.slane %v3231_v6, 1  ;;  %v1650_v43 = vrot.slane %v4542_v28, 1  ;;  %v535_v28 = vshrl.u32 %v4606_v32, 16 }
  0x4b   : > { %3780 = vmatprep.subr.bf16.mxu0 %v4212_v1  ;;  %v525_v31 = vrot.slane %v523_v16, 1 }
  0x4c   : > { %v593_v2 = vor.u32 %v591_v54, %v4565_v52  ;;  %v4623_v44 = vsel %vm1636_vm2, %v1648_v36, %v1650_v43  ;;  %v1652_v54 = vrot.slane %v4434_v8, 1 }
  0x4d   : > { %3613 = vmatpush3.bf16.msra.mxu1 %v4180_v41  ;;  %v526_v38 = vsel %vm458_vm1, %v521_v0, %v525_v31  ;;  %v531_v41 = vshll.u32 %v4606_v32, 16  ;;  %v529_v47 = vor.u32 %v527_v39, %v525_v31  ;;  %v1307_v0 = vshrl.u32 %v4508_v63, 16 }
  0x4e   : > { %3781 = vmatpush3.bf16.msra.mxu0 %v4182_v53  ;;  %v4595_v29 = vsel %vm458_vm1, %v593_v2, %v597_v18  ;;  %v4637_v55 = vsel %vm1636_vm2, %v1650_v43, %v1652_v54 }
  0x4f   : > { %3547 = vmatmul.mubr.bf16.gmra.mrb[16].mxu1 %v502_v7  ;;  %v1638_v7 = vrot.slane %v4339_v19, 1  ;;  %v1646_v19 = vrot.slane %v4453_v24, 1  ;;  %v533_v50 = vrot.slane %v531_v41, 1  ;;  %v1309_v43 = vor.u32 %v1307_v0, %v4529_v21 }
  0x50   : > { %3715 = vmatmul.mubr.bf16.gmra.mrb[16].mxu0 %v1250_v17  ;;  %3550 = vmatprep.mubr.msk.bf16.mxu1 %vm4213_vm0, %v4212_v1  ;;  %v1642_v17 = vrot.slane %v4385_v48, 1 }
  0x51   : > { %3718 = vmatprep.mubr.msk.bf16.mxu0 %vm4213_vm0, %v4212_v1  ;;  %v4586_v26 = vsel %vm1636_vm2, %v1638_v7, %v1640_v9  ;;  %v4598_v48 = vsel %vm1636_vm2, %v1637_v22, %v1638_v7  ;;  %v4609_v24 = vsel %vm1636_vm2, %v1644_v27, %v1646_v19  ;;  %v4612_v61 = vsel %vm1636_vm2, %v1646_v19, %v1648_v36  ;;  %v4678_v19 = vld [vmem:[%s4312_s23 + $0x70] sm:$0xff]  }
  0x52   : > { %v4590_v15 = vsel %vm1636_vm2, %v1640_v9, %v1642_v17  ;;  %v4601_v30 = vsel %vm1636_vm2, %v1642_v17, %v1644_v27  ;;  %v4658_v9 = vld [vmem:[%s4312_s23 + $0x60] sm:$0xff]   ;;  %v4673_v27 = vld [vmem:[%s4312_s23 + $0x68] sm:$0xff]   ;;  %v1311_v31 = vshll.u32 %v4678_v19, 16 }
  0x53   : > { %v555_v16 = vshll.u32 %v4658_v9, 16  ;;  %v559_v36 = vshrl.u32 %v4658_v9, 16 }
  0x55   : > { %v557_v22 = vrot.slane %v555_v16, 1 }
  0x57   : > { %3551 = vmatmul.mubr.bf16.gmra.mrb[20].mxu1 %v510_v37  ;;  %v1269_v37 = vor.u32 %v1267_v62, %v1265_v51  ;;  %v4628_v51 = vld [vmem:[%s4312_s23 + $0x50] sm:$0xff]   ;;  %v4643_v62 = vld [vmem:[%s4312_s23 + $0x58] sm:$0xff]   ;;  %v561_v39 = vor.u32 %v559_v36, %v557_v22 }
  0x58   : > { %3719 = vmatmul.mubr.bf16.gmra.mrb[20].mxu0 %v1258_v42  ;;  %3554 = vmatprep.mubr.msk.bf16.mxu1 %vm4213_vm0, %v4212_v1  ;;  %v539_v53 = vshll.u32 %v4628_v51, 16  ;;  %v543_v8 = vshrl.u32 %v4628_v51, 16  ;;  %v547_v3 = vshll.u32 %v4643_v62, 16 }
  0x59   : > { %3722 = vmatprep.mubr.msk.bf16.mxu0 %vm4213_vm0, %v4212_v1  ;;  %v1274_v42 = vsel %vm458_vm1, %v1269_v37, %v4455_v25  ;;  %v534_v25 = vsel %vm458_vm1, %v529_v47, %v533_v50  ;;  %v1658_v37 = vrot.slane %v4484_v46, 1  ;;  %v1313_v47 = vrot.slane %v1311_v31, 1 }
  0x5a   : > { %v541_v60 = vrot.slane %v539_v53, 1  ;;  %v549_v7 = vrot.slane %v547_v3, 1 }
  0x5b   : > { %v1314_v53 = vsel %vm458_vm1, %v1309_v43, %v1313_v47 }
  0x5c   : > { %v545_v6 = vor.u32 %v543_v8, %v541_v60 }
  0x5e   : > { %v550_v20 = vsel %vm458_vm1, %v545_v6, %v549_v7 }
  0x5f   : > { %3555 = vmatmul.mubr.bf16.gmra.mrb[24].mxu1 %v518_v59  ;;  %v537_v59 = vor.u32 %v535_v28, %v533_v50  ;;  %v4701_v50 = vld [vmem:[%s4312_s23 + $0x78] sm:$0xff]  }
  0x60   : > { %3723 = vmatmul.mubr.bf16.gmra.mrb[24].mxu0 %v1266_v10  ;;  %3558 = vmatprep.mubr.msk.bf16.mxu1 %vm4213_vm0, %v4212_v1  ;;  %v551_v10 = vshrl.u32 %v4643_v62, 16  ;;  %v1323_v16 = vshrl.u32 %v4701_v50, 16 }
  0x61   : > { %3726 = vmatprep.mubr.msk.bf16.mxu0 %vm4213_vm0, %v4212_v1  ;;  %v542_v2 = vsel %vm458_vm1, %v537_v59, %v541_v60  ;;  %v1319_v59 = vshll.u32 %v4701_v50, 16 }
  0x62   : > { %v553_v18 = vor.u32 %v551_v10, %v549_v7 }
  0x63   : > { %v1321_v3 = vrot.slane %v1319_v59, 1 }
  0x67   : > { %3559 = vmatmul.mubr.bf16.gmra.mrb[28].mxu1 %v526_v38 }
  0x68   : > { %3727 = vmatmul.mubr.bf16.gmra.mrb[28].mxu0 %v1274_v42  ;;  %3562 = vmatprep.mubr.msk.bf16.mxu1 %vm4213_vm0, %v4212_v1  ;;  %v4695_v42 = vld [vmem:[%s4312_s23 + $0x70] sm:$0xff]  }
  0x69   : > { %3730 = vmatprep.mubr.msk.bf16.mxu0 %vm4213_vm0, %v4212_v1  ;;  %v571_v28 = vshll.u32 %v4695_v42, 16  ;;  %v575_v7 = vshrl.u32 %v4695_v42, 16 }
  0x6b   : > { %v573_v60 = vrot.slane %v571_v28, 1  ;;  %v4742_v28 = vld [vmem:[%s4312_s23 + $0x90] ss:$0 sps:$4 sm:$0x11]  }
  0x6f   : > { %3563 = vmatmul.mubr.bf16.gmra.mrb[32].mxu1 %v534_v25 }
  0x70   : > { %3731 = vmatmul.mubr.bf16.gmra.mrb[32].mxu0 %v4478_v40  ;;  %3566 = vmatprep.mubr.msk.bf16.mxu1 %vm4213_vm0, %v4212_v1  ;;  %v4652_v40 = vsel %vm1636_vm2, %v1652_v54, %v1654_v5  ;;  %v1315_v54 = vshrl.u32 %v4678_v19, 16 }
  0x71   : > { %3734 = vmatprep.mubr.msk.bf16.mxu0 %vm4213_vm0, %v4212_v1 }
  0x72   : > { %v1317_v8 = vor.u32 %v1315_v54, %v1313_v47 }
  0x74   : > { %v1322_v10 = vsel %vm458_vm1, %v1317_v8, %v1321_v3 }
  0x77   : > { %3567 = vmatmul.mubr.bf16.gmra.mrb[36].mxu1 %v542_v2  ;;  %v4712_v2 = vld [vmem:[%s4312_s23 + $0x78] sm:$0xff]  }
  0x78   : > { %3735 = vmatmul.mubr.bf16.gmra.mrb[36].mxu0 %v4500_v58  ;;  %3570 = vmatprep.mubr.msk.bf16.mxu1 %vm4213_vm0, %v4212_v1  ;;  %v1656_v58 = vrot.slane %v4469_v34, 1  ;;  %v558_v34 = vsel %vm458_vm1, %v553_v18, %v557_v22  ;;  %v577_v18 = vor.u32 %v575_v7, %v573_v60  ;;  %v583_v31 = vshrl.u32 %v4712_v2, 16 }
  0x79   : > { %3738 = vmatprep.mubr.msk.bf16.mxu0 %vm4213_vm0, %v4212_v1 }
  0x7a   : > { %v4667_v17 = vsel %vm1636_vm2, %v1654_v5, %v1656_v58  ;;  %v4689_v38 = vsel %vm1636_vm2, %v1656_v58, %v1658_v37  ;;  %v4717_v5 = vld [vmem:[%s4312_s23 + $0x80] sm:$0xff]  }
  0x7b   : > { %v1327_v58 = vshll.u32 %v4717_v5, 16  ;;  %v1666_v46 = vrot.slane %v4717_v5, 1 }
  0x7d   : > { %v1329_v36 = vrot.slane %v1327_v58, 1 }
  0x7f   : > { %3571 = vmatmul.mubr.bf16.gmra.mrb[40].mxu1 %v550_v20  ;;  %v579_v20 = vshll.u32 %v4712_v2, 16 }
  0x80   : > { %3739 = vmatmul.mubr.bf16.gmra.mrb[40].mxu0 %v4514_v4  ;;  %3574 = vmatprep.mubr.msk.bf16.mxu1 %vm4213_vm0, %v4212_v1  ;;  %v563_v4 = vshll.u32 %v4673_v27, 16 }
  0x81   : > { %3742 = vmatprep.mubr.msk.bf16.mxu0 %vm4213_vm0, %v4212_v1  ;;  %v581_v22 = vrot.slane %v579_v20, 1 }
  0x82   : > { %v565_v41 = vrot.slane %v563_v4, 1  ;;  %v4730_v4 = vld [vmem:[%s4312_s23 + $0x88] sm:$0xff]   ;;  %s4021_s23 = smul.u32 136, %s4290_s7 }
  0x83   : > { %v582_v0 = vsel %vm458_vm1, %v577_v18, %v581_v22  ;;  %v1335_v43 = vshll.u32 %v4730_v4, 16  ;;  %v585_v47 = vor.u32 %v583_v31, %v581_v22  ;;  %v1339_v59 = vshrl.u32 %v4730_v4, 16 }
  0x84   : > { %v566_v25 = vsel %vm458_vm1, %v561_v39, %v565_v41  ;;  %s4961_s9 = scalar_lea.vmem %s5849_s4, %s4021_s23 }
  0x87   : > { %3575 = vmatmul.mubr.bf16.gmra.mrb[44].mxu1 %v558_v34  ;;  %v1325_v34 = vor.u32 %v1323_v16, %v1321_v3 }
  0x88   : > { %3743 = vmatmul.mubr.bf16.gmra.mrb[44].mxu0 %v4536_v23  ;;  %3578 = vmatprep.mubr.msk.bf16.mxu1 %vm4213_vm0, %v4212_v1  ;;  %v567_v23 = vshrl.u32 %v4673_v27, 16 }
  0x89   : > { %3746 = vmatprep.mubr.msk.bf16.mxu0 %vm4213_vm0, %v4212_v1  ;;  %v1330_v39 = vsel %vm458_vm1, %v1325_v34, %v1329_v36 }
  0x8a   : > { %v569_v21 = vor.u32 %v567_v23, %v565_v41  ;;  %v1331_v41 = vshrl.u32 %v4717_v5, 16  ;;  %v1337_v23 = vrot.slane %v1335_v43, 1 }
  0x8c   : > { %v574_v6 = vsel %vm458_vm1, %v569_v21, %v573_v60  ;;  %v1343_v21 = vshll.u32 %v4742_v28, 16  ;;  %v1341_v60 = vor.u32 %v1339_v59, %v1337_v23 }
  0x8e   : > { %v1345_v8 = vrot.slane %v1343_v21, 1 }
  0x8f   : > { %3579 = vmatmul.mubr.bf16.gmra.mrb[48].mxu1 %v566_v25  ;;  %v1333_v25 = vor.u32 %v1331_v41, %v1329_v36 }
  0x90   : > { %3747 = vmatmul.mubr.bf16.gmra.mrb[48].mxu0 %v1314_v53  ;;  %3582 = vmatprep.mubr.msk.bf16.mxu1 %vm4213_vm0, %v4212_v1  ;;  %v590_v53 = vsel %vm458_vm1, %v585_v47, %v4565_v52  ;;  %v1346_v3 = vsel %vm458_vm1, %v1341_v60, %v1345_v8 }
  0x91   : > { %3750 = vmatprep.mubr.msk.bf16.mxu0 %vm4213_vm0, %v4212_v1  ;;  %v1338_v54 = vsel %vm458_vm1, %v1333_v25, %v1337_v23 }
  0x97   : > { %3583 = vmatmul.mubr.bf16.gmra.mrb[52].mxu1 %v574_v6 }
  0x98   : > { %3751 = vmatmul.mubr.bf16.gmra.mrb[52].mxu0 %v1322_v10  ;;  %3586 = vmatprep.mubr.msk.bf16.mxu1 %vm4213_vm0, %v4212_v1 }
  0x99   : > { %3754 = vmatprep.mubr.msk.bf16.mxu0 %vm4213_vm0, %v4212_v1 }
  0x9f   : > { %3587 = vmatmul.mubr.bf16.gmra.mrb[56].mxu1 %v582_v0 }
  0xa0   : > { %3755 = vmatmul.mubr.bf16.gmra.mrb[56].mxu0 %v1330_v39  ;;  %3590 = vmatprep.mubr.msk.bf16.mxu1 %vm4213_vm0, %v4212_v1 }
  0xa1   : > { %3758 = vmatprep.mubr.msk.bf16.mxu0 %vm4213_vm0, %v4212_v1 }
  0xa7   : > { %3591 = vmatmul.mubr.bf16.gmra.mrb[60].mxu1 %v590_v53 }
  0xa8   : > { %3759 = vmatmul.mubr.bf16.gmra.mrb[60].mxu0 %v1338_v54  ;;  %3594 = vmatprep.mubr.msk.bf16.mxu1 %vm4213_vm0, %v4212_v1 }
  0xa9   : > { %3762 = vmatprep.mubr.msk.bf16.mxu0 %vm4213_vm0, %v4212_v1 }
  0xaf   : > { %3595 = vmatmul.mubr.bf16.gmra.mrb[64].mxu1 %v4595_v29 }
  0xb0   : > { %3763 = vmatmul.mubr.bf16.gmra.mrb[64].mxu0 %v1346_v3  ;;  %3614 = vmatprep.mubr.msk.bf16.mxu1 %vm4213_vm0, %v4212_v1 }
  0xb1   : > { %3782 = vmatprep.mubr.msk.bf16.mxu0 %vm4213_vm0, %v4212_v1 }
  0xb7   : > { %3615 = vmatmul.mubr.bf16.vlgmr.msra.gmra.mrb[0].mxu1 %v4323_v12  ;;  %v1660_v12 = vrot.slane %v4508_v63, 1  ;;  %v1668_v63 = vrot.slane %v4730_v4, 1 }
  0xb8   : > { %3783 = vmatmul.mubr.bf16.vlgmr.msra.gmra.mrb[0].mxu0 %v4598_v48  ;;  %3618 = vmatprep.mubr.msk.bf16.mxu1 %vm4213_vm0, %v4212_v1 }
  0xb9   : > { %3786 = vmatprep.mubr.msk.bf16.mxu0 %vm4213_vm0, %v4212_v1 }
  0xbf   : > { %3619 = vmatmul.mubr.bf16.gmra.mrb[4].mxu1 %v4326_v13  ;;  %v1661_v13 = vsel %vm1636_vm2, %v1658_v37, %v1660_v12 }
  0xc0   : > { %3787 = vmatmul.mubr.bf16.gmra.mrb[4].mxu0 %v4586_v26  ;;  %3622 = vmatprep.mubr.msk.bf16.mxu1 %vm4213_vm0, %v4212_v1  ;;  %v2110_v26 = vlaneseq }
  0xc1   : > { %3790 = vmatprep.mubr.msk.bf16.mxu0 %vm4213_vm0, %v4212_v1 }
  0xc7   : > { %3623 = vmatmul.mubr.bf16.gmra.mrb[8].mxu1 %v4360_v33  ;;  %v1662_v33 = vrot.slane %v4678_v19, 1 }
  0xc8   : > { %3791 = vmatmul.mubr.bf16.gmra.mrb[8].mxu0 %v4590_v15  ;;  %3626 = vmatprep.mubr.msk.bf16.mxu1 %vm4213_vm0, %v4212_v1  ;;  %v4865_v15 = vshrl.u32 %v2110_v26, 7 }
  0xc9   : > { %3794 = vmatprep.mubr.msk.bf16.mxu0 %vm4213_vm0, %v4212_v1 }
  0xca   : > { %v2112_v29 = vadd.s32 8, %v4865_v15  ;;  %v4900_v10 = vadd.s32 48, %v4865_v15  ;;  %v4903_v16 = vadd.s32 56, %v4865_v15  ;;  %v4926_v53 = vadd.s32 64, %v4865_v15 }
  0xcc   : > { %v4911_v0 = vmul.u32.u64.low 4042322161, %v4900_v10  ;;  %v4912_v31 = vmul.u32.u64.high 4042322161, %v4900_v10, %v4911_v0  ;;  %v4920_v43 = vmul.u32.u64.low 4042322161, %v4903_v16  ;;  %v4921_v47 = vmul.u32.u64.high 4042322161, %v4903_v16, %v4920_v43 }
  0xcf   : > { %3627 = vmatmul.mubr.bf16.gmra.mrb[12].mxu1 %v4382_v45  ;;  %v1663_v45 = vsel %vm1636_vm2, %v1660_v12, %v1662_v33 }
  0xd0   : > { %3795 = vmatmul.mubr.bf16.gmra.mrb[12].mxu0 %v4601_v30  ;;  %3630 = vmatprep.mubr.msk.bf16.mxu1 %vm4213_vm0, %v4212_v1  ;;  %v4869_v48 = vmul.u32.u64.low 4042322161, %v4865_v15  ;;  %v4870_v30 = vmul.u32.u64.high 4042322161, %v4865_v15, %v4869_v48 }
  0xd1   : > { %3798 = vmatprep.mubr.msk.bf16.mxu0 %vm4213_vm0, %v4212_v1 }
  0xd7   : > { %3631 = vmatmul.mubr.bf16.gmra.mrb[16].mxu1 %v4404_v57  ;;  %v1664_v57 = vrot.slane %v4701_v50, 1 }
  0xd8   : > { %3799 = vmatmul.mubr.bf16.gmra.mrb[16].mxu0 %v4609_v24  ;;  %3634 = vmatprep.mubr.msk.bf16.mxu1 %vm4213_vm0, %v4212_v1 }
  0xd9   : > { %3802 = vmatprep.mubr.msk.bf16.mxu0 %vm4213_vm0, %v4212_v1 }
  0xdf   : > { %3635 = vmatmul.mubr.bf16.gmra.mrb[20].mxu1 %v4439_v11  ;;  %v1665_v11 = vsel %vm1636_vm2, %v1662_v33, %v1664_v57 }
  0xe0   : > { %3803 = vmatmul.mubr.bf16.gmra.mrb[20].mxu0 %v4612_v61  ;;  %3638 = vmatprep.mubr.msk.bf16.mxu1 %vm4213_vm0, %v4212_v1  ;;  %v2114_v61 = vadd.s32 24, %v4865_v15 }
  0xe1   : > { %3806 = vmatprep.mubr.msk.bf16.mxu0 %vm4213_vm0, %v4212_v1 }
  0xe7   : > { %3639 = vmatmul.mubr.bf16.gmra.mrb[24].mxu1 %v4497_v56  ;;  %v1667_v56 = vsel %vm1636_vm2, %v1664_v57, %v1666_v46 }
  0xe8   : > { %3807 = vmatmul.mubr.bf16.gmra.mrb[24].mxu0 %v4623_v44  ;;  %3642 = vmatprep.mubr.msk.bf16.mxu1 %vm4213_vm0, %v4212_v1 }
  0xe9   : > { %3810 = vmatprep.mubr.msk.bf16.mxu0 %vm4213_vm0, %v4212_v1 }
  0xef   : > { %3643 = vmatmul.mubr.bf16.gmra.mrb[28].mxu1 %v4522_v14  ;;  %v1669_v14 = vsel %vm1636_vm2, %v1666_v46, %v1668_v63 }
  0xf0   : > { %3811 = vmatmul.mubr.bf16.gmra.mrb[28].mxu0 %v4637_v55  ;;  %3646 = vmatprep.mubr.msk.bf16.mxu1 %vm4213_vm0, %v4212_v1 }
  0xf1   : > { %3814 = vmatprep.mubr.msk.bf16.mxu0 %vm4213_vm0, %v4212_v1 }
  0xf7   : > { %3647 = vmatmul.mubr.bf16.gmra.mrb[32].mxu1 %v4561_v49  ;;  %v1670_v49 = vrot.slane %v4742_v28, 1 }
  0xf8   : > { %3815 = vmatmul.mubr.bf16.gmra.mrb[32].mxu0 %v4652_v40  ;;  %3650 = vmatprep.mubr.msk.bf16.mxu1 %vm4213_vm0, %v4212_v1 }
  0xf9   : > { %3818 = vmatprep.mubr.msk.bf16.mxu0 %vm4213_vm0, %v4212_v1  ;;  %v1671_v52 = vsel %vm1636_vm2, %v1668_v63, %v1670_v49 }
  0xff   : > { %3651 = vmatmul.mubr.bf16.gmra.mrb[36].mxu1 %v4606_v32  ;;  %v4872_v32 = vmul.u32.u64.low 4042322161, %v2112_v29  ;;  %v4873_v24 = vmul.u32.u64.high 4042322161, %v2112_v29, %v4872_v32 }
 0x100   : > { %3819 = vmatmul.mubr.bf16.gmra.mrb[36].mxu0 %v4667_v17  ;;  %3654 = vmatprep.mubr.msk.bf16.mxu1 %vm4213_vm0, %v4212_v1 }
 0x101   : > { %3822 = vmatprep.mubr.msk.bf16.mxu0 %vm4213_vm0, %v4212_v1  ;;  %v2162_v55 = vshrl.u32 %v4873_v24, 4 }
 0x103   : > { %v2163_v19 = vmul.u32 17, %v2162_v55 }
 0x105   : > { %v2164_v6 = vsub.s32 %v2112_v29, %v2163_v19 }
 0x107   : > { %3655 = vmatmul.mubr.bf16.gmra.mrb[40].mxu1 %v4628_v51  ;;  %vm2520_vm5 = vcmp.ne.s32.totalorder %v2164_v6, 0  ;;  %vm2554_vm6 = vcmp.lt.s32.totalorder %v2164_v6, 0  ;;  %v2622_v4 = vadd.s32 17, %v2164_v6 }
 0x108   : > { %3823 = vmatmul.mubr.bf16.gmra.mrb[40].mxu0 %v4689_v38  ;;  %3658 = vmatprep.mubr.msk.bf16.mxu1 %vm4213_vm0, %v4212_v1  ;;  %vm4914_vm8 = vmand %vm2554_vm6, %vm2520_vm5 }
 0x109   : > { %3826 = vmatprep.mubr.msk.bf16.mxu0 %vm4213_vm0, %v4212_v1  ;;  %v2656_v59 = vsel %vm4914_vm8, %v2622_v4, %v2164_v6 }
 0x10a   : > { %vm2690_vm15 = vcmp.ne.s32.totalorder %v2656_v59, 16 }
 0x10f   : > { %3659 = vmatmul.mubr.bf16.gmra.mrb[44].mxu1 %v4643_v62  ;;  %v4882_v62 = vmul.u32.u64.low 4042322161, %v2114_v61  ;;  %v4883_v40 = vmul.u32.u64.high 4042322161, %v2114_v61, %v4882_v62 }
 0x110   : > { %3827 = vmatmul.mubr.bf16.gmra.mrb[44].mxu0 %v1661_v13  ;;  %3662 = vmatprep.mubr.msk.bf16.mxu1 %vm4213_vm0, %v4212_v1  ;;  %v4984_v62 = vadd.s32 80, %v4865_v15 }
 0x111   : > { %3830 = vmatprep.mubr.msk.bf16.mxu0 %vm4213_vm0, %v4212_v1  ;;  %v2184_v7 = vshrl.u32 %v4883_v40, 4 }
 0x113   : > { %v2185_v18 = vmul.u32 17, %v2184_v7 }
 0x115   : > { %v2186_v23 = vsub.s32 %v2114_v61, %v2185_v18  ;;  %v2228_v61 = vshrl.u32 %v4921_v47, 4 }
 0x117   : > { %3663 = vmatmul.mubr.bf16.gmra.mrb[48].mxu1 %v4658_v9  ;;  %v2115_v9 = vadd.s32 32, %v4865_v15  ;;  %vm2522_vm13 = vcmp.ne.s32.totalorder %v2186_v23, 0  ;;  %vm2556_vm14 = vcmp.lt.s32.totalorder %v2186_v23, 0  ;;  %v2624_v48 = vadd.s32 17, %v2186_v23 }
 0x118   : > { %3831 = vmatmul.mubr.bf16.gmra.mrb[48].mxu0 %v1663_v45  ;;  %3666 = vmatprep.mubr.msk.bf16.mxu1 %vm4213_vm0, %v4212_v1  ;;  %v2229_v7 = vmul.u32 17, %v2228_v61 }
 0x119   : > { %3834 = vmatprep.mubr.msk.bf16.mxu0 %vm4213_vm0, %v4212_v1 }
 0x11f   : > { %3667 = vmatmul.mubr.bf16.gmra.mrb[52].mxu1 %v4673_v27  ;;  %v4887_v27 = vadd.s32 40, %v4865_v15 }
 0x120   : > { %3835 = vmatmul.mubr.bf16.gmra.mrb[52].mxu0 %v1665_v11  ;;  %3670 = vmatprep.mubr.msk.bf16.mxu1 %vm4213_vm0, %v4212_v1  ;;  %v4944_v11 = vadd.s32 72, %v4865_v15 }
 0x121   : > { %3838 = vmatprep.mubr.msk.bf16.mxu0 %vm4213_vm0, %v4212_v1 }
 0x127   : > { %3671 = vmatmul.mubr.bf16.gmra.mrb[56].mxu1 %v4695_v42  ;;  %v4890_v38 = vmul.u32.u64.low 4042322161, %v2115_v9  ;;  %v4891_v42 = vmul.u32.u64.high 4042322161, %v2115_v9, %v4890_v38 }
 0x128   : > { %3839 = vmatmul.mubr.bf16.gmra.mrb[56].mxu0 %v1667_v56  ;;  %3674 = vmatprep.mubr.msk.bf16.mxu1 %vm4213_vm0, %v4212_v1 }
 0x129   : > { %3842 = vmatprep.mubr.msk.bf16.mxu0 %vm4213_vm0, %v4212_v1  ;;  %v2195_v36 = vshrl.u32 %v4891_v42, 4  ;;  %v4994_v42 = vadd.s32 88, %v4865_v15 }
 0x12b   : > { %v2196_v28 = vmul.u32 17, %v2195_v36 }
 0x12d   : > { %v2197_v63 = vsub.s32 %v2115_v9, %v2196_v28 }
 0x12f   : > { %3675 = vmatmul.mubr.bf16.gmra.mrb[60].mxu1 %v4712_v2  ;;  %v4895_v2 = vmul.u32.u64.low 4042322161, %v4887_v27  ;;  %v4896_v5 = vmul.u32.u64.high 4042322161, %v4887_v27, %v4895_v2  ;;  %vm2523_vm1 = vcmp.ne.s32.totalorder %v2197_v63, 0  ;;  %vm2557_vm2 = vcmp.lt.s32.totalorder %v2197_v63, 0 }
 0x130   : > { %3843 = vmatmul.mubr.bf16.gmra.mrb[60].mxu0 %v1669_v14  ;;  %3678 = vmatprep.mubr.msk.bf16.mxu1 %vm4213_vm0, %v4212_v1  ;;  %v4947_v14 = vmul.u32.u64.low 4042322161, %v4926_v53  ;;  %v4948_v49 = vmul.u32.u64.high 4042322161, %v4926_v53, %v4947_v14  ;;  %v2625_v38 = vadd.s32 17, %v2197_v63 }
 0x131   : > { %3846 = vmatprep.mubr.msk.bf16.mxu0 %vm4213_vm0, %v4212_v1  ;;  %v2113_v1 = vadd.s32 16, %v4865_v15  ;;  %v2206_v41 = vshrl.u32 %v4896_v5, 4  ;;  %vm4966_vm0 = vmand %vm2556_vm14, %vm2522_vm13 }
 0x132   : > { %v2658_v9 = vsel %vm4966_vm0, %v2624_v48, %v2186_v23  ;;  %v2239_v18 = vshrl.u32 %v4948_v49, 4 }
 0x133   : > { %v4877_v44 = vmul.u32.u64.low 4042322161, %v2113_v1  ;;  %v4878_v51 = vmul.u32.u64.high 4042322161, %v2113_v1, %v4877_v44  ;;  %v2207_v12 = vmul.u32 17, %v2206_v41 }
 0x134   : > { %v2240_v59 = vmul.u32 17, %v2239_v18 }
 0x135   : > { %v2173_v37 = vshrl.u32 %v4878_v51, 4 }
 0x137   : > { %3679 = vmatmul.mubr.bf16.gmra.mrb[64].mxu1 %v4550_v35  ;;  %v2151_v35 = vshrl.u32 %v4870_v30, 4  ;;  %v2174_v20 = vmul.u32 17, %v2173_v37  ;;  %v2217_v30 = vshrl.u32 %v4912_v31, 4 }
 0x138   : > { %3847 = vmatmul.mubr.bf16.gmra.mrb[64].mxu0 %v1671_v52 }
 0x139   : > { %v2152_v17 = vmul.u32 17, %v2151_v35  ;;  %v2175_v34 = vsub.s32 %v2113_v1, %v2174_v20  ;;  %v4971_v1 = vsub.s32 %v4887_v27, %v2207_v12 }
 0x13a   : > { %v4980_v35 = vmul.u32.u64.low 4042322161, %v4944_v11  ;;  %v4981_v55 = vmul.u32.u64.high 4042322161, %v4944_v11, %v4980_v35 }
 0x13b   : > { %v2153_v50 = vsub.s32 %v4865_v15, %v2152_v17  ;;  %vm2521_vm9 = vcmp.ne.s32.totalorder %v2175_v34, 0  ;;  %vm2555_vm10 = vcmp.lt.s32.totalorder %v2175_v34, 0  ;;  %v2623_v3 = vadd.s32 17, %v2175_v34 }
 0x13c   : > { %vm4939_vm12 = vmand %vm2555_vm10, %vm2521_vm9  ;;  %v2218_v17 = vmul.u32 17, %v2217_v30  ;;  %vm2524_vm5 = vcmp.ne.s32.totalorder %v4971_v1, 0  ;;  %vm2558_vm6 = vcmp.lt.s32.totalorder %v4971_v1, 0  ;;  %v2626_v31 = vadd.s32 17, %v4971_v1 }
 0x13d   : > { %vm2519_vm3 = vcmp.ne.s32.totalorder %v2153_v50, 0  ;;  %vm2553_vm4 = vcmp.lt.s32.totalorder %v2153_v50, 0  ;;  %v2621_v58 = vadd.s32 17, %v2153_v50  ;;  %v2657_v32 = vsel %vm4939_vm12, %v2623_v3, %v2175_v34  ;;  %vm5024_vm8 = vmand %vm2558_vm6, %vm2524_vm5 }
 0x13e   : > { %vm4905_vm7 = vmand %vm2553_vm4, %vm2519_vm3  ;;  %vm4989_vm3 = vcmp.ne.s32.totalorder %v2657_v32, 16  ;;  %v5008_v22 = vmul.u32.u64.low 4042322161, %v4984_v62  ;;  %v5009_v34 = vmul.u32.u64.high 4042322161, %v4984_v62, %v5008_v22  ;;  %v2219_v39 = vsub.s32 %v4900_v10, %v2218_v17 }
 0x13f   : > { %v2655_v25 = vsel %vm4905_vm7, %v2621_v58, %v2153_v50  ;;  %vm5000_vm4 = vmand %vm2557_vm2, %vm2523_vm1  ;;  %vm2692_vm7 = vcmp.ne.s32.totalorder %v2658_v9, 16  ;;  %v2230_v10 = vsub.s32 %v4903_v16, %v2229_v7  ;;  %v2660_v60 = vsel %vm5024_vm8, %v2626_v31, %v4971_v1 }
 0x140   : > { %vm4930_vm11 = vcmp.ne.s32.totalorder %v2655_v25, 16  ;;  %v2659_v41 = vsel %vm5000_vm4, %v2625_v38, %v2197_v63  ;;  %v5029_v47 = vmul.u32.u64.low 4042322161, %v4994_v42  ;;  %v5030_v25 = vmul.u32.u64.high 4042322161, %v4994_v42, %v5029_v47 }
 0x141   : > { %vm2525_vm9 = vcmp.ne.s32.totalorder %v2219_v39, 0  ;;  %vm2559_vm10 = vcmp.lt.s32.totalorder %v2219_v39, 0  ;;  %vm2526_vm12 = vcmp.ne.s32.totalorder %v2230_v10, 0  ;;  %vm2560_vm13 = vcmp.lt.s32.totalorder %v2230_v10, 0 }
 0x142   : > { %vm2694_vm14 = vcmp.ne.s32.totalorder %v2660_v60, 16  ;;  %v2628_v48 = vadd.s32 17, %v2230_v10  ;;  %v2241_v30 = vsub.s32 %v4926_v53, %v2240_v59  ;;  %v2261_v32 = vshrl.u32 %v5009_v34, 4  ;;  %vm5074_vm0 = vmand %vm2560_vm13, %vm2526_vm12 }
 0x143   : > { %v2272_v53 = vshrl.u32 %v5030_v25, 4 }
 0x144   : > { %vm2527_vm1 = vcmp.ne.s32.totalorder %v2241_v30, 0  ;;  %vm2561_vm2 = vcmp.lt.s32.totalorder %v2241_v30, 0  ;;  %v2262_v38 = vmul.u32 17, %v2261_v32  ;;  %v2662_v6 = vsel %vm5074_vm0, %v2628_v48, %v2230_v10 }
 0x145   : > { %v2629_v18 = vadd.s32 17, %v2241_v30  ;;  %v2273_v22 = vmul.u32 17, %v2272_v53  ;;  %vm5105_vm4 = vmand %vm2561_vm2, %vm2527_vm1 }
 0x146   : > { %v2263_v47 = vsub.s32 %v4984_v62, %v2262_v38 }
 0x147   : > { %v5132_v12 = vsub.s32 %v4994_v42, %v2273_v22 }
 0x149   : > { %vm2530_vm13 = vcmp.ne.s32.totalorder %v5132_v12, 0 }
 0x18a   : > { %v932_v54 = vpop.f32.mrb[0].mxu1 }
 0x18b   : > { %v1771_v21 = vpop.f32.mrb[0].mxu0  ;;  %v3616_v8 = vpop.f32.mrb[1].mxu1 }
 0x18c   : > { %v4935_v13 = vadd.f32 %v1771_v21, %v932_v54  ;;  %v3784_v33 = vpop.f32.mrb[1].mxu0  ;;  %v935_v45 = vpop.f32.mrb[2].mxu1  ;;  %v2250_v54 = vshrl.u32 %v4981_v55, 4  ;;  %v5044_v8 = vadd.s32 96, %v4865_v15 }
 0x18d   : > { %v1774_v46 = vpop.f32.mrb[2].mxu0  ;;  %v3617_v56 = vpop.f32.mrb[3].mxu1  ;;  %v2627_v33 = vadd.s32 17, %v2219_v39 }
 0x18e   : > { %v4953_v52 = vsel %vm4930_vm11, %v4935_v13, 0.0  ;;  %v4955_v26 = vadd.f32 %v1774_v46, %v935_v45  ;;  %v3785_v29 = vpop.f32.mrb[3].mxu0  ;;  %vm5046_vm11 = vcmp.ne.s32.totalorder %v2659_v41, 16  ;;  %v5051_v45 = vadd.s32 104, %v4865_v15 }
 0x18f   : > { %v2251_v63 = vmul.u32 17, %v2250_v54 }
 0x190   : > { %v3316_v44 = vpack.c.bf16 %v4955_v26, %v4935_v13  ;;  %v4977_v51 = vsel %vm2690_vm15, %v4955_v26, 0.0  ;;  %vm5057_vm15 = vmand %vm2559_vm10, %vm2525_vm9  ;;  %vm2529_vm9 = vcmp.ne.s32.totalorder %v2263_v47, 0  ;;  %vm2563_vm10 = vcmp.lt.s32.totalorder %v2263_v47, 0 }
 0x191   : > { %v2661_v19 = vsel %vm5057_vm15, %v2627_v33, %v2219_v39  ;;  %v5110_v39 = vadd.s32 120, %v4865_v15  ;;  %vm5161_vm12 = vmand %vm2563_vm10, %vm2529_vm9 }
 0x192   : > { %3317 = vst [vmem:[%s4961_s9] sm:$0xff] %v3316_v44   ;;  %v940_v40 = vpop.f32.mrb[4].mxu1  ;;  %v5071_v44 = vmul.u32.u64.low 4042322161, %v5044_v8  ;;  %v5072_v35 = vmul.u32.u64.high 4042322161, %v5044_v8, %v5071_v44 }
 0x193   : > { %v1779_v27 = vpop.f32.mrb[4].mxu0  ;;  %v3620_v37 = vpop.f32.mrb[5].mxu1  ;;  %v5155_v44 = vadd.s32 136, %v4865_v15 }
 0x194   : > { %v4996_v50 = vadd.f32 %v1779_v27, %v940_v40  ;;  %v3788_v2 = vpop.f32.mrb[5].mxu0  ;;  %v943_v5 = vpop.f32.mrb[6].mxu1  ;;  %v5080_v40 = vmul.u32.u64.low 4042322161, %v5051_v45  ;;  %v5081_v9 = vmul.u32.u64.high 4042322161, %v5051_v45, %v5080_v40  ;;  %v2252_v37 = vsub.s32 %v4944_v11, %v2251_v63 }
 0x195   : > { %v1782_v20 = vpop.f32.mrb[6].mxu0  ;;  %v3621_v58 = vpop.f32.mrb[7].mxu1  ;;  %v5092_v2 = vadd.s32 112, %v4865_v15  ;;  %v2283_v60 = vshrl.u32 %v5072_v35, 4 }
 0x196   : > { %v5014_v36 = vsel %vm4989_vm3, %v4996_v50, 0.0  ;;  %v5016_v4 = vadd.f32 %v1782_v20, %v943_v5  ;;  %v3789_v0 = vpop.f32.mrb[7].mxu0  ;;  %vm5097_vm3 = vcmp.ne.s32.totalorder %v2661_v19, 16  ;;  %vm2528_vm5 = vcmp.ne.s32.totalorder %v2252_v37, 0 }
 0x197   : > { %vm2562_vm6 = vcmp.lt.s32.totalorder %v2252_v37, 0  ;;  %v2284_v29 = vmul.u32 17, %v2283_v60 }
 0x198   : > { %v3321_v23 = vpack.c.bf16 %v5016_v4, %v4996_v50  ;;  %v5035_v28 = vsel %vm2692_vm7, %v5016_v4, 0.0  ;;  %vm2696_vm7 = vcmp.ne.s32.totalorder %v2662_v6, 16  ;;  %vm5127_vm8 = vmand %vm2562_vm6, %vm2528_vm5 }
 0x19a   : > { %3398 = vst [vmem:[%s4961_s9 + $0x8] sm:$0xff] %v3321_v23   ;;  %v948_v21 = vpop.f32.mrb[8].mxu1  ;;  %v5114_v25 = vmul.u32.u64.low 4042322161, %v5092_v2  ;;  %v5115_v23 = vmul.u32.u64.high 4042322161, %v5092_v2, %v5114_v25 }
 0x19b   : > { %v1787_v3 = vpop.f32.mrb[8].mxu0  ;;  %v3624_v16 = vpop.f32.mrb[9].mxu1 }
 0x19c   : > { %v5053_v57 = vadd.f32 %v1787_v3, %v948_v21  ;;  %v3792_v46 = vpop.f32.mrb[9].mxu0  ;;  %v951_v56 = vpop.f32.mrb[10].mxu1  ;;  %v2630_v21 = vadd.s32 17, %v2252_v37  ;;  %v2663_v3 = vsel %vm5105_vm4, %v2629_v18, %v2241_v30  ;;  %v2294_v16 = vshrl.u32 %v5081_v9, 4 }
 0x19d   : > { %v1790_v14 = vpop.f32.mrb[10].mxu0  ;;  %v3625_v49 = vpop.f32.mrb[11].mxu1  ;;  %v2285_v18 = vsub.s32 %v5044_v8, %v2284_v29 }
 0x19e   : > { %v5066_v24 = vsel %vm5046_vm11, %v5053_v57, 0.0  ;;  %v5068_v1 = vadd.f32 %v1790_v14, %v951_v56  ;;  %v3793_v61 = vpop.f32.mrb[11].mxu0  ;;  %v5141_v56 = vmul.u32.u64.low 4042322161, %v5110_v39  ;;  %v5142_v63 = vmul.u32.u64.high 4042322161, %v5110_v39, %v5141_v56 }
 0x19f   : > { %v5145_v14 = vadd.s32 128, %v4865_v15  ;;  %v2664_v49 = vsel %vm5127_vm8, %v2630_v21, %v2252_v37  ;;  %vm5150_vm11 = vcmp.ne.s32.totalorder %v2663_v3, 16  ;;  %v2631_v61 = vadd.s32 17, %v2263_v47 }
 0x1a0   : > { %v3326_v17 = vpack.c.bf16 %v5068_v1, %v5053_v57  ;;  %v5086_v27 = vsel %vm2694_vm14, %v5068_v1, 0.0  ;;  %vm2564_vm14 = vcmp.lt.s32.totalorder %v5132_v12, 0  ;;  %v2295_v9 = vmul.u32 17, %v2294_v16 }
 0x1a1   : > { %vm2698_vm15 = vcmp.ne.s32.totalorder %v2664_v49, 16  ;;  %v2305_v37 = vshrl.u32 %v5115_v23, 4  ;;  %v2665_v22 = vsel %vm5161_vm12, %v2631_v61, %v2263_v47  ;;  %vm5185_vm0 = vmand %vm2564_vm14, %vm2530_vm13  ;;  %v2316_v47 = vshrl.u32 %v5142_v63, 4 }
 0x1a2   : > { %3399 = vst [vmem:[%s4961_s9 + $0x10] sm:$0xff] %v3326_v17   ;;  %v956_v5 = vpop.f32.mrb[12].mxu1  ;;  %v2296_v8 = vsub.s32 %v5051_v45, %v2295_v9  ;;  %vm2531_vm1 = vcmp.ne.s32.totalorder %v2285_v18, 0  ;;  %vm2565_vm2 = vcmp.lt.s32.totalorder %v2285_v18, 0  ;;  %v5205_v21 = vadd.s32 144, %v4865_v15 }
 0x1a3   : > { %v1795_v7 = vpop.f32.mrb[12].mxu0  ;;  %v3628_v58 = vpop.f32.mrb[13].mxu1  ;;  %v2306_v25 = vmul.u32 17, %v2305_v37  ;;  %v2633_v62 = vadd.s32 17, %v2285_v18  ;;  %v5212_v16 = vadd.s32 152, %v4865_v15 }
 0x1a4   : > { %v5101_v11 = vadd.f32 %v1795_v7, %v956_v5  ;;  %v3796_v34 = vpop.f32.mrb[13].mxu0  ;;  %v959_v0 = vpop.f32.mrb[14].mxu1  ;;  %v5169_v38 = vmul.u32.u64.low 4042322161, %v5145_v14  ;;  %v5170_v5 = vmul.u32.u64.high 4042322161, %v5145_v14, %v5169_v38  ;;  %v2632_v58 = vadd.s32 17, %v5132_v12 }
 0x1a5   : > { %v1798_v41 = vpop.f32.mrb[14].mxu0  ;;  %v3629_v43 = vpop.f32.mrb[15].mxu1  ;;  %vm2532_vm4 = vcmp.ne.s32.totalorder %v2296_v8, 0  ;;  %vm2566_vm5 = vcmp.lt.s32.totalorder %v2296_v8, 0  ;;  %v2307_v30 = vsub.s32 %v5092_v2, %v2306_v25  ;;  %v5253_v34 = vadd.s32 160, %v4865_v15 }
 0x1a6   : > { %v5120_v10 = vsel %vm5097_vm3, %v5101_v11, 0.0  ;;  %v5122_v54 = vadd.f32 %v1798_v41, %v959_v0  ;;  %v3797_v59 = vpop.f32.mrb[15].mxu0  ;;  %v5190_v0 = vmul.u32.u64.low 4042322161, %v5155_v44  ;;  %v5191_v31 = vmul.u32.u64.high 4042322161, %v5155_v44, %v5190_v0  ;;  %vm5235_vm8 = vmand %vm2566_vm5, %vm2532_vm4 }
 0x1a7   : > { %v2666_v59 = vsel %vm5185_vm0, %v2632_v58, %v5132_v12  ;;  %vm5207_vm3 = vcmp.ne.s32.totalorder %v2665_v22, 16  ;;  %v2317_v12 = vmul.u32 17, %v2316_v47  ;;  %vm2533_vm9 = vcmp.ne.s32.totalorder %v2307_v30, 0 }
 0x1a8   : > { %v3331_v33 = vpack.c.bf16 %v5122_v54, %v5101_v11  ;;  %v5138_v46 = vsel %vm2696_vm7, %v5122_v54, 0.0  ;;  %vm2700_vm6 = vcmp.ne.s32.totalorder %v2666_v59, 16  ;;  %vm5218_vm7 = vmand %vm2565_vm2, %vm2531_vm1  ;;  %v2338_v2 = vshrl.u32 %v5191_v31, 4 }
 0x1a9   : > { %v5232_v40 = vmul.u32.u64.low 4042322161, %v5205_v21  ;;  %v5233_v9 = vmul.u32.u64.high 4042322161, %v5205_v21, %v5232_v40  ;;  %v2318_v58 = vsub.s32 %v5110_v39, %v2317_v12  ;;  %vm2567_vm10 = vcmp.lt.s32.totalorder %v2307_v30, 0 }
 0x1aa   : > { %3400 = vst [vmem:[%s4961_s9 + $0x18] sm:$0xff] %v3331_v33   ;;  %v964_v42 = vpop.f32.mrb[16].mxu1  ;;  %vm5266_vm12 = vmand %vm2567_vm10, %vm2533_vm9 }
 0x1ab   : > { %v1803_v48 = vpop.f32.mrb[16].mxu0  ;;  %v3632_v32 = vpop.f32.mrb[17].mxu1  ;;  %vm2534_vm13 = vcmp.ne.s32.totalorder %v2318_v58, 0  ;;  %vm2568_vm14 = vcmp.lt.s32.totalorder %v2318_v58, 0 }
 0x1ac   : > { %v5157_v35 = vadd.f32 %v1803_v48, %v964_v42  ;;  %v3800_v55 = vpop.f32.mrb[17].mxu0  ;;  %v967_v53 = vpop.f32.mrb[18].mxu1  ;;  %v2634_v48 = vadd.s32 17, %v2296_v8  ;;  %v2327_v32 = vshrl.u32 %v5170_v5, 4  ;;  %vm5288_vm0 = vmand %vm2568_vm14, %vm2534_vm13 }
 0x1ad   : > { %v1806_v17 = vpop.f32.mrb[18].mxu0  ;;  %v3633_v19 = vpop.f32.mrb[19].mxu1 }
 0x1ae   : > { %v5175_v6 = vsel %vm5150_vm11, %v5157_v35, 0.0  ;;  %v5177_v7 = vadd.f32 %v1806_v17, %v967_v53  ;;  %v3801_v20 = vpop.f32.mrb[19].mxu0  ;;  %v5241_v19 = vmul.u32.u64.low 4042322161, %v5212_v16  ;;  %v5242_v37 = vmul.u32.u64.high 4042322161, %v5212_v16, %v5241_v19 }
 0x1af   : > { %v2667_v20 = vsel %vm5218_vm7, %v2633_v62, %v2285_v18  ;;  %v2328_v22 = vmul.u32 17, %v2327_v32  ;;  %v2668_v31 = vsel %vm5235_vm8, %v2634_v48, %v2296_v8  ;;  %v2635_v18 = vadd.s32 17, %v2307_v30 }
 0x1b0   : > { %v3336_v41 = vpack.c.bf16 %v5177_v7, %v5157_v35  ;;  %v5196_v43 = vsel %vm2698_vm15, %v5177_v7, 0.0  ;;  %vm5258_vm11 = vcmp.ne.s32.totalorder %v2667_v20, 16  ;;  %v5271_v8 = vadd.s32 168, %v4865_v15 }
 0x1b1   : > { %vm2702_vm15 = vcmp.ne.s32.totalorder %v2668_v31, 16  ;;  %v2636_v48 = vadd.s32 17, %v2318_v58  ;;  %v2349_v32 = vshrl.u32 %v5233_v9, 4  ;;  %v2360_v17 = vshrl.u32 %v5242_v37, 4 }
 0x1b2   : > { %3401 = vst [vmem:[%s4961_s9 + $0x20] sm:$0xff] %v3336_v41   ;;  %v972_v23 = vpop.f32.mrb[20].mxu1 }
 0x1b3   : > { %v1811_v60 = vpop.f32.mrb[20].mxu0  ;;  %v3636_v45 = vpop.f32.mrb[21].mxu1  ;;  %v2670_v20 = vsel %vm5288_vm0, %v2636_v48, %v2318_v58  ;;  %v2361_v3 = vmul.u32 17, %v2360_v17 }
 0x1b4   : > { %v5214_v33 = vadd.f32 %v1811_v60, %v972_v23  ;;  %v3804_v56 = vpop.f32.mrb[21].mxu0  ;;  %v975_v63 = vpop.f32.mrb[22].mxu1  ;;  %v2339_v23 = vmul.u32 17, %v2338_v2  ;;  %v5297_v2 = vadd.s32 176, %v4865_v15  ;;  %vm2704_vm7 = vcmp.ne.s32.totalorder %v2670_v20, 16 }
 0x1b5   : > { %v1814_v42 = vpop.f32.mrb[22].mxu0  ;;  %v3637_v49 = vpop.f32.mrb[23].mxu1  ;;  %v2329_v56 = vsub.s32 %v5145_v14, %v2328_v22  ;;  %v2350_v22 = vmul.u32 17, %v2349_v32 }
 0x1b6   : > { %v5227_v61 = vsel %vm5207_vm3, %v5214_v33, 0.0  ;;  %v5229_v55 = vadd.f32 %v1814_v42, %v975_v63  ;;  %v3805_v53 = vpop.f32.mrb[23].mxu0  ;;  %v5275_v63 = vmul.u32.u64.low 4042322161, %v5253_v34  ;;  %v5276_v12 = vmul.u32.u64.high 4042322161, %v5253_v34, %v5275_v63 }
 0x1b7   : > { %v2669_v53 = vsel %vm5266_vm12, %v2635_v18, %v2307_v30  ;;  %v5293_v40 = vsub.s32 %v5155_v44, %v2339_v23  ;;  %vm2535_vm1 = vcmp.ne.s32.totalorder %v2329_v56, 0  ;;  %vm2569_vm2 = vcmp.lt.s32.totalorder %v2329_v56, 0 }
 0x1b8   : > { %v3341_v38 = vpack.c.bf16 %v5229_v55, %v5214_v33  ;;  %v5247_v5 = vsel %vm2700_vm6, %v5229_v55, 0.0  ;;  %v5309_v44 = vadd.s32 184, %v4865_v15  ;;  %vm5314_vm3 = vcmp.ne.s32.totalorder %v2669_v53, 16  ;;  %vm5326_vm4 = vmand %vm2569_vm2, %vm2535_vm1 }
 0x1b9   : > { %v2637_v47 = vadd.s32 17, %v2329_v56  ;;  %vm2536_vm5 = vcmp.ne.s32.totalorder %v5293_v40, 0  ;;  %vm2570_vm6 = vcmp.lt.s32.totalorder %v5293_v40, 0  ;;  %v2371_v63 = vshrl.u32 %v5276_v12, 4 }
 0x1ba   : > { %3402 = vst [vmem:[%s4961_s9 + $0x28] sm:$0xff] %v3341_v38   ;;  %v980_v0 = vpop.f32.mrb[24].mxu1  ;;  %v5305_v30 = vmul.u32.u64.low 4042322161, %v5271_v8  ;;  %v5306_v38 = vmul.u32.u64.high 4042322161, %v5271_v8, %v5305_v30  ;;  %v2638_v17 = vadd.s32 17, %v5293_v40  ;;  %vm5350_vm8 = vmand %vm2570_vm6, %vm2536_vm5 }
 0x1bb   : > { %v1819_v41 = vpop.f32.mrb[24].mxu0  ;;  %v3640_v25 = vpop.f32.mrb[25].mxu1  ;;  %v2671_v30 = vsel %vm5326_vm4, %v2637_v47, %v2329_v56 }
 0x1bc   : > { %v5262_v39 = vadd.f32 %v1819_v41, %v980_v0  ;;  %v3808_v59 = vpop.f32.mrb[25].mxu0  ;;  %v983_v60 = vpop.f32.mrb[26].mxu1  ;;  %v5319_v25 = vmul.u32.u64.low 4042322161, %v5297_v2  ;;  %v5320_v18 = vmul.u32.u64.high 4042322161, %v5297_v2, %v5319_v25  ;;  %v2382_v31 = vshrl.u32 %v5306_v38, 4 }
 0x1bd   : > { %v1822_v45 = vpop.f32.mrb[26].mxu0  ;;  %v3641_v62 = vpop.f32.mrb[27].mxu1  ;;  %v2672_v56 = vsel %vm5350_vm8, %v2638_v17, %v5293_v40 }
 0x1be   : > { %v5281_v42 = vsel %vm5258_vm11, %v5262_v39, 0.0  ;;  %v5283_v49 = vadd.f32 %v1822_v45, %v983_v60  ;;  %v3809_v29 = vpop.f32.mrb[27].mxu0  ;;  %vm5368_vm11 = vcmp.ne.s32.totalorder %v2671_v30, 16  ;;  %v2393_v38 = vshrl.u32 %v5320_v18, 4 }
 0x1bf   : > { %v5334_v29 = vmul.u32.u64.low 4042322161, %v5309_v44  ;;  %v5335_v48 = vmul.u32.u64.high 4042322161, %v5309_v44, %v5334_v29  ;;  %vm2706_vm14 = vcmp.ne.s32.totalorder %v2672_v56, 16 }
 0x1c0   : > { %v3346_v19 = vpack.c.bf16 %v5283_v49, %v5262_v39  ;;  %v5302_v9 = vsel %vm2702_vm15, %v5283_v49, 0.0 }
 0x1c1   : > { %v2404_v17 = vshrl.u32 %v5335_v48, 4 }
 0x1c2   : > { %3403 = vst [vmem:[%s4961_s9 + $0x30] sm:$0xff] %v3346_v19   ;;  %v988_v37 = vpop.f32.mrb[28].mxu1  ;;  %v2351_v19 = vsub.s32 %v5205_v21, %v2350_v22  ;;  %v2372_v21 = vmul.u32 17, %v2371_v63 }
 0x1c3   : > { %v1827_v0 = vpop.f32.mrb[28].mxu0  ;;  %v3644_v41 = vpop.f32.mrb[29].mxu1 }
 0x1c4   : > { %v5322_v23 = vadd.f32 %v1827_v0, %v988_v37  ;;  %v3812_v59 = vpop.f32.mrb[29].mxu0  ;;  %v991_v60 = vpop.f32.mrb[30].mxu1  ;;  %v2362_v0 = vsub.s32 %v5212_v16, %v2361_v3  ;;  %vm2537_vm9 = vcmp.ne.s32.totalorder %v2351_v19, 0  ;;  %vm2571_vm10 = vcmp.lt.s32.totalorder %v2351_v19, 0 }
 0x1c5   : > { %v1830_v45 = vpop.f32.mrb[30].mxu0  ;;  %v3645_v62 = vpop.f32.mrb[31].mxu1  ;;  %v5366_v41 = vadd.s32 192, %v4865_v15  ;;  %v2639_v59 = vadd.s32 17, %v2351_v19  ;;  %vm5380_vm15 = vmand %vm2571_vm10, %vm2537_vm9 }
 0x1c6   : > { %v5340_v32 = vsel %vm5314_vm3, %v5322_v23, 0.0  ;;  %v5342_v53 = vadd.f32 %v1830_v45, %v991_v60  ;;  %v3813_v14 = vpop.f32.mrb[31].mxu0  ;;  %v5374_v60 = vadd.s32 200, %v4865_v15  ;;  %vm2538_vm12 = vcmp.ne.s32.totalorder %v2362_v0, 0 }
 0x1c7   : > { %vm2572_vm13 = vcmp.lt.s32.totalorder %v2362_v0, 0  ;;  %v2383_v45 = vmul.u32 17, %v2382_v31  ;;  %v2640_v18 = vadd.s32 17, %v2362_v0  ;;  %v2373_v14 = vsub.s32 %v5253_v34, %v2372_v21 }
 0x1c8   : > { %v3351_v37 = vpack.c.bf16 %v5342_v53, %v5322_v23  ;;  %v5357_v20 = vsel %vm2704_vm7, %v5342_v53, 0.0  ;;  %vm5397_vm0 = vmand %vm2572_vm13, %vm2538_vm12  ;;  %v2394_v34 = vmul.u32 17, %v2393_v38  ;;  %v5414_v38 = vadd.s32 208, %v4865_v15 }
 0x1c9   : > { %v5402_v48 = vmul.u32.u64.low 4042322161, %v5374_v60  ;;  %v5403_v21 = vmul.u32.u64.high 4042322161, %v5374_v60, %v5402_v48  ;;  %vm2539_vm1 = vcmp.ne.s32.totalorder %v2373_v14, 0  ;;  %vm2573_vm2 = vcmp.lt.s32.totalorder %v2373_v14, 0 }
 0x1ca   : > { %3404 = vst [vmem:[%s4961_s9 + $0x38] sm:$0xff] %v3351_v37   ;;  %v996_v22 = vpop.f32.mrb[32].mxu1  ;;  %vm5430_vm4 = vmand %vm2573_vm2, %vm2539_vm1 }
 0x1cb   : > { %v1835_v47 = vpop.f32.mrb[32].mxu0  ;;  %v3648_v16 = vpop.f32.mrb[33].mxu1 }
 0x1cc   : > { %v5376_v58 = vadd.f32 %v1835_v47, %v996_v22  ;;  %v3816_v40 = vpop.f32.mrb[33].mxu0  ;;  %v999_v3 = vpop.f32.mrb[34].mxu1  ;;  %v5394_v31 = vmul.u32.u64.low 4042322161, %v5366_v41  ;;  %v5395_v22 = vmul.u32.u64.high 4042322161, %v5366_v41, %v5394_v31  ;;  %v2673_v16 = vsel %vm5380_vm15, %v2639_v59, %v2351_v19 }
 0x1cd   : > { %v1838_v62 = vpop.f32.mrb[34].mxu0  ;;  %v3649_v63 = vpop.f32.mrb[35].mxu1  ;;  %v2384_v40 = vsub.s32 %v5271_v8, %v2383_v45  ;;  %vm5419_vm3 = vcmp.ne.s32.totalorder %v2673_v16, 16  ;;  %v2641_v19 = vadd.s32 17, %v2373_v14  ;;  %v5424_v8 = vsub.s32 %v5297_v2, %v2394_v34 }
 0x1ce   : > { %5922 = vst [vmem:[#allocation3_spill] sm:$0xff] %v5376_v58  ;;  %v5389_v30 = vsel %vm5368_vm11, %v5376_v58, 0.0  ;;  %v5391_v12 = vadd.f32 %v1838_v62, %v999_v3  ;;  %v3817_v37 = vpop.f32.mrb[35].mxu0  ;;  %v2405_v3 = vmul.u32 17, %v2404_v17  ;;  %v2674_v63 = vsel %vm5397_vm0, %v2640_v18, %v2362_v0 }
 0x1cf   : > { %vm2540_vm5 = vcmp.ne.s32.totalorder %v2384_v40, 0  ;;  %vm2574_vm6 = vcmp.lt.s32.totalorder %v2384_v40, 0  ;;  %v5435_v0 = vadd.s32 216, %v4865_v15  ;;  %vm2708_vm7 = vcmp.ne.s32.totalorder %v2674_v63, 16 }
 0x1d0   : > { %5925 = vst [vmem:[#allocation4_spill] sm:$0xff] %v5391_v12  ;;  %v3356_v47 = vpack.c.bf16 %v5391_v12, %v5376_v58  ;;  %v5408_v25 = vsel %vm2706_vm14, %v5391_v12, 0.0  ;;  %v2406_v2 = vsub.s32 %v5309_v44, %v2405_v3  ;;  %v2675_v63 = vsel %vm5430_vm4, %v2641_v19, %v2373_v14  ;;  %vm5452_vm8 = vmand %vm2574_vm6, %vm2540_vm5 }
 0x1d1   : > { %vm2541_vm9 = vcmp.ne.s32.totalorder %v5424_v8, 0  ;;  %vm2575_vm10 = vcmp.lt.s32.totalorder %v5424_v8, 0  ;;  %v2426_v3 = vshrl.u32 %v5403_v21, 4  ;;  %v5469_v14 = vadd.s32 224, %v4865_v15 }
 0x1d2   : > { %3405 = vst [vmem:[%s4961_s9 + $0x40] sm:$0xff] %v3356_v47   ;;  %v1004_v62 = vpop.f32.mrb[36].mxu1  ;;  %v5439_v34 = vmul.u32.u64.low 4042322161, %v5414_v38  ;;  %v5440_v47 = vmul.u32.u64.high 4042322161, %v5414_v38, %v5439_v34  ;;  %vm2542_vm11 = vcmp.ne.s32.totalorder %v2406_v2, 0  ;;  %vm2576_vm12 = vcmp.lt.s32.totalorder %v2406_v2, 0  ;;  %vm5482_vm14 = vmand %vm2575_vm10, %vm2541_vm9 }
 0x1d3   : > { %v1843_v37 = vpop.f32.mrb[36].mxu0  ;;  %v3652_v29 = vpop.f32.mrb[37].mxu1  ;;  %vm5474_vm13 = vcmp.ne.s32.totalorder %v2675_v63, 16  ;;  %vm5494_vm15 = vmand %vm2576_vm12, %vm2542_vm11 }
 0x1d4   : > { %v5426_v59 = vadd.f32 %v1843_v37, %v1004_v62  ;;  %v3820_v45 = vpop.f32.mrb[37].mxu0  ;;  %v1007_v17 = vpop.f32.mrb[38].mxu1  ;;  %v2642_v29 = vadd.s32 17, %v2384_v40 }
 0x1d5   : > { %v1846_v18 = vpop.f32.mrb[38].mxu0  ;;  %v3653_v56 = vpop.f32.mrb[39].mxu1  ;;  %v2415_v45 = vshrl.u32 %v5395_v22, 4  ;;  %v5465_v22 = vmul.u32.u64.low 4042322161, %v5435_v0  ;;  %v5466_v48 = vmul.u32.u64.high 4042322161, %v5435_v0, %v5465_v22 }
 0x1d6   : > { %5930 = vst [vmem:[#allocation5_spill] sm:$0xff] %v5426_v59  ;;  %v5445_v16 = vsel %vm5419_vm3, %v5426_v59, 0.0  ;;  %v5447_v62 = vadd.f32 %v1846_v18, %v1007_v17  ;;  %v3821_v37 = vpop.f32.mrb[39].mxu0  ;;  %v2676_v21 = vsel %vm5452_vm8, %v2642_v29, %v2384_v40  ;;  %v5488_v40 = vadd.s32 232, %v4865_v15 }
 0x1d7   : > { %5933 = vst [vmem:[#allocation6_spill] sm:$0xff] %v5445_v16  ;;  %v2416_v18 = vmul.u32 17, %v2415_v45  ;;  %vm2710_vm0 = vcmp.ne.s32.totalorder %v2676_v21, 16  ;;  %v5500_v58 = vmul.u32.u64.low 4042322161, %v5469_v14  ;;  %v5501_v16 = vmul.u32.u64.high 4042322161, %v5469_v14, %v5500_v58 }
 0x1d8   : > { %5934 = vst [vmem:[#allocation7_spill] sm:$0xff] %v5447_v62  ;;  %v3361_v31 = vpack.c.bf16 %v5447_v62, %v5426_v59  ;;  %v5462_v17 = vsel %vm2708_vm7, %v5447_v62, 0.0  ;;  %v2644_v62 = vadd.s32 17, %v2406_v2 }
 0x1d9   : > { %5937 = vst [vmem:[#allocation8_spill] sm:$0xff] %v5462_v17  ;;  %v2437_v17 = vshrl.u32 %v5440_v47, 4  ;;  %v5517_v21 = vmul.u32.u64.low 4042322161, %v5488_v40  ;;  %v5518_v58 = vmul.u32.u64.high 4042322161, %v5488_v40, %v5517_v21 }
 0x1da   : > { %3406 = vst [vmem:[%s4961_s9 + $0x48] sm:$0xff] %v3361_v31   ;;  %v1012_v19 = vpop.f32.mrb[40].mxu1  ;;  %v2643_v31 = vadd.s32 17, %v5424_v8  ;;  %v2678_v47 = vsel %vm5494_vm15, %v2644_v62, %v2406_v2 }
 0x1db   : > { %v1851_v56 = vpop.f32.mrb[40].mxu0  ;;  %v3656_v37 = vpop.f32.mrb[41].mxu1  ;;  %vm5535_vm4 = vcmp.ne.s32.totalorder %v2678_v47, 16 }
 0x1dc   : > { %v5490_v29 = vadd.f32 %v1851_v56, %v1012_v19  ;;  %v3824_v45 = vpop.f32.mrb[41].mxu0  ;;  %v1015_v63 = vpop.f32.mrb[42].mxu1  ;;  %v2427_v37 = vmul.u32 17, %v2426_v3  ;;  %v2417_v3 = vsub.s32 %v5366_v41, %v2416_v18  ;;  %v2448_v41 = vshrl.u32 %v5466_v48, 4 }
 0x1dd   : > { %v1854_v59 = vpop.f32.mrb[42].mxu0  ;;  %v3657_v12 = vpop.f32.mrb[43].mxu1  ;;  %v2438_v18 = vmul.u32 17, %v2437_v17  ;;  %v5540_v17 = vadd.s32 248, %v4865_v15 }
 0x1de   : > { %5942 = vst [vmem:[#allocation9_spill] sm:$0xff] %v5490_v29  ;;  %v5506_v19 = vsel %vm5474_vm13, %v5490_v29, 0.0  ;;  %v5508_v56 = vadd.f32 %v1854_v59, %v1015_v63  ;;  %v3825_v45 = vpop.f32.mrb[43].mxu0  ;;  %v2677_v12 = vsel %vm5482_vm14, %v2643_v31, %v5424_v8  ;;  %v2428_v63 = vsub.s32 %v5374_v60, %v2427_v37 }
 0x1df   : > { %v5528_v8 = vadd.s32 240, %v4865_v15  ;;  %vm2543_vm1 = vcmp.ne.s32.totalorder %v2417_v3, 0  ;;  %vm2577_vm2 = vcmp.lt.s32.totalorder %v2417_v3, 0  ;;  %vm5531_vm3 = vcmp.ne.s32.totalorder %v2677_v12, 16 }
 0x1e0   : > { %5945 = vst [vmem:[#allocation10_spill] sm:$0xff] %v5508_v56  ;;  %v3366_v34 = vpack.c.bf16 %v5508_v56, %v5490_v29  ;;  %v5523_v59 = vsel %vm2710_vm0, %v5508_v56, 0.0  ;;  %v2645_v60 = vadd.s32 17, %v2417_v3  ;;  %vm2544_vm5 = vcmp.ne.s32.totalorder %v2428_v63, 0  ;;  %vm5546_vm7 = vmand %vm2577_vm2, %vm2543_vm1 }
 0x1e1   : > { %5946 = vst [vmem:[#allocation11_spill] sm:$0xff] %v5523_v59  ;;  %vm2578_vm6 = vcmp.lt.s32.totalorder %v2428_v63, 0  ;;  %v2449_v21 = vmul.u32 17, %v2448_v41  ;;  %v2459_v56 = vshrl.u32 %v5501_v16, 4  ;;  %v2646_v29 = vadd.s32 17, %v2428_v63 }
 0x1e2   : > { %3407 = vst [vmem:[%s4961_s9 + $0x50] sm:$0xff] %v3366_v34   ;;  %v1020_v2 = vpop.f32.mrb[44].mxu1  ;;  %vm5563_vm8 = vmand %vm2578_vm6, %vm2544_vm5 }
 0x1e3   : > { %v1859_v62 = vpop.f32.mrb[44].mxu0  ;;  %v3660_v31 = vpop.f32.mrb[45].mxu1 }
 0x1e4   : > { %v5542_v48 = vadd.f32 %v1859_v62, %v1020_v2  ;;  %v3828_v37 = vpop.f32.mrb[45].mxu0  ;;  %v1023_v45 = vpop.f32.mrb[46].mxu1  ;;  %v2439_v31 = vsub.s32 %v5414_v38, %v2438_v18  ;;  %v5553_v2 = vmul.u32.u64.low 4042322161, %v5528_v8  ;;  %v5554_v62 = vmul.u32.u64.high 4042322161, %v5528_v8, %v5553_v2 }
 0x1e5   : > { %v1862_v12 = vpop.f32.mrb[46].mxu0  ;;  %v3661_v34 = vpop.f32.mrb[47].mxu1  ;;  %v2470_v38 = vshrl.u32 %v5518_v58, 4  ;;  %v5569_v16 = vmul.u32.u64.low 4042322161, %v5540_v17  ;;  %v5570_v18 = vmul.u32.u64.high 4042322161, %v5540_v17, %v5569_v16  ;;  %v2460_v58 = vmul.u32 17, %v2459_v56 }
 0x1e6   : > { %5951 = vst [vmem:[#allocation12_spill] sm:$0xff] %v5542_v48  ;;  %v5559_v41 = vsel %vm5531_vm3, %v5542_v48, 0.0  ;;  %v5561_v37 = vadd.f32 %v1862_v12, %v1023_v45  ;;  %v3829_v34 = vpop.f32.mrb[47].mxu0  ;;  %v2679_v45 = vsel %vm5546_vm7, %v2645_v60, %v2417_v3  ;;  %v2450_v12 = vsub.s32 %v5435_v0, %v2449_v21 }
 0x1e7   : > { %5954 = vst [vmem:[#allocation13_spill] sm:$0xff] %v5559_v41  ;;  %vm2545_vm9 = vcmp.ne.s32.totalorder %v2439_v31, 0  ;;  %vm2579_vm10 = vcmp.lt.s32.totalorder %v2439_v31, 0  ;;  %v2680_v16 = vsel %vm5563_vm8, %v2646_v29, %v2428_v63  ;;  %vm5588_vm11 = vcmp.ne.s32.totalorder %v2679_v45, 16 }
 0x1e8   : > { %5955 = vst [vmem:[#allocation14_spill] sm:$0xff] %v5561_v37  ;;  %v3371_v2 = vpack.c.bf16 %v5561_v37, %v5542_v48  ;;  %v5577_v22 = vsel %vm5535_vm4, %v5561_v37, 0.0  ;;  %v5586_v48 = vadd.s32 256, %v4865_v15  ;;  %v2647_v3 = vadd.s32 17, %v2439_v31  ;;  %vm5596_vm12 = vmand %vm2579_vm10, %vm2545_vm9 }
 0x1e9   : > { %v2471_v60 = vmul.u32 17, %v2470_v38  ;;  %vm2546_vm13 = vcmp.ne.s32.totalorder %v2450_v12, 0  ;;  %vm2580_vm14 = vcmp.lt.s32.totalorder %v2450_v12, 0  ;;  %v5601_v29 = vadd.s32 264, %v4865_v15 }
 0x1ea   : > { %3408 = vst [vmem:[%s4961_s9 + $0x58] sm:$0xff] %v3371_v2   ;;  %v1028_v34 = vpop.f32.mrb[48].mxu1  ;;  %vm2714_vm15 = vcmp.ne.s32.totalorder %v2680_v16, 16  ;;  %v2648_v45 = vadd.s32 17, %v2450_v12  ;;  %v2481_v38 = vshrl.u32 %v5554_v62, 4  ;;  %v2681_v16 = vsel %vm5596_vm12, %v2647_v3, %v2439_v31  ;;  %vm5618_vm0 = vmand %vm2580_vm14, %vm2546_vm13 }
 0x1eb   : > { %v1867_v41 = vpop.f32.mrb[48].mxu0  ;;  %v3664_v47 = vpop.f32.mrb[49].mxu1  ;;  %v5613_v15 = vmul.u32.u64.low 4042322161, %v5586_v48  ;;  %v5614_v37 = vmul.u32.u64.high 4042322161, %v5586_v48, %v5613_v15  ;;  %v2492_v62 = vshrl.u32 %v5570_v18, 4  ;;  %vm2715_vm3 = vcmp.ne.s32.totalorder %v2681_v16, 16 }
 0x1ec   : > { %v5592_v0 = vadd.f32 %v1867_v41, %v1028_v34  ;;  %v3832_v21 = vpop.f32.mrb[49].mxu0  ;;  %v1031_v56 = vpop.f32.mrb[50].mxu1  ;;  %v2461_v41 = vsub.s32 %v5469_v14, %v2460_v58  ;;  %v2472_v14 = vsub.s32 %v5488_v40, %v2471_v60  ;;  %v2682_v3 = vsel %vm5618_vm0, %v2648_v45, %v2450_v12 }
 0x1ed   : > { %v1870_v63 = vpop.f32.mrb[50].mxu0  ;;  %v3665_v2 = vpop.f32.mrb[51].mxu1  ;;  %v2482_v40 = vmul.u32 17, %v2481_v38  ;;  %vm2716_vm7 = vcmp.ne.s32.totalorder %v2682_v3, 16 }
 0x1ee   : > { %5960 = vst [vmem:[#allocation15_spill] sm:$0xff] %v5592_v0  ;;  %v5608_v34 = vsel %vm5588_vm11, %v5592_v0, 0.0  ;;  %v5610_v47 = vadd.f32 %v1870_v63, %v1031_v56  ;;  %v3833_v21 = vpop.f32.mrb[51].mxu0  ;;  %v5630_v56 = vmul.u32.u64.low 4042322161, %v5601_v29  ;;  %v5631_v63 = vmul.u32.u64.high 4042322161, %v5601_v29, %v5630_v56 }
 0x1ef   : > { %vm2547_vm1 = vcmp.ne.s32.totalorder %v2461_v41, 0  ;;  %vm2581_vm2 = vcmp.lt.s32.totalorder %v2461_v41, 0  ;;  %v2649_v59 = vadd.s32 17, %v2461_v41  ;;  %vm2548_vm5 = vcmp.ne.s32.totalorder %v2472_v14, 0 }
 0x1f0   : > { %5963 = vst [vmem:[#allocation16_spill] sm:$0xff] %v5610_v47  ;;  %v3376_v58 = vpack.c.bf16 %v5610_v47, %v5592_v0  ;;  %v5627_v44 = vsel %vm2714_vm15, %v5610_v47, 0.0  ;;  %vm5638_vm4 = vmand %vm2581_vm2, %vm2547_vm1  ;;  %vm2582_vm6 = vcmp.lt.s32.totalorder %v2472_v14, 0  ;;  %v2650_v45 = vadd.s32 17, %v2472_v14 }
 0x1f1   : > { %vm5651_vm8 = vmand %vm2582_vm6, %vm2548_vm5 }
 0x1f2   : > { %3409 = vst [vmem:[%s4961_s9 + $0x60] sm:$0xff] %v3376_v58   ;;  %v1036_v31 = vpop.f32.mrb[52].mxu1  ;;  %v2493_v58 = vmul.u32 17, %v2492_v62 }
 0x1f3   : > { %v1875_v60 = vpop.f32.mrb[52].mxu0  ;;  %v3668_v18 = vpop.f32.mrb[53].mxu1 }
 0x1f4   : > { %v5636_v21 = vadd.f32 %v1875_v60, %v1036_v31  ;;  %v3836_v15 = vpop.f32.mrb[53].mxu0  ;;  %v1039_v47 = vpop.f32.mrb[54].mxu1  ;;  %v2483_v31 = vsub.s32 %v5528_v8, %v2482_v40  ;;  %v2503_v60 = vshrl.u32 %v5614_v37, 4  ;;  %v2683_v18 = vsel %vm5638_vm4, %v2649_v59, %v2461_v41 }
 0x1f5   : > { %v1878_v56 = vpop.f32.mrb[54].mxu0  ;;  %v3669_v12 = vpop.f32.mrb[55].mxu1  ;;  %v2684_v37 = vsel %vm5651_vm8, %v2650_v45, %v2472_v14  ;;  %vm2717_vm11 = vcmp.ne.s32.totalorder %v2683_v18, 16 }
 0x1f6   : > { %v5643_v38 = vsel %vm2715_vm3, %v5636_v21, 0.0  ;;  %v5645_v16 = vadd.f32 %v1878_v56, %v1039_v47  ;;  %v3837_v2 = vpop.f32.mrb[55].mxu0  ;;  %v2494_v47 = vsub.s32 %v5540_v17, %v2493_v58  ;;  %v2514_v56 = vshrl.u32 %v5631_v63, 4 }
 0x1f7   : > { %vm2549_vm9 = vcmp.ne.s32.totalorder %v2483_v31, 0  ;;  %vm2583_vm10 = vcmp.lt.s32.totalorder %v2483_v31, 0  ;;  %v2504_v0 = vmul.u32 17, %v2503_v60  ;;  %v2651_v59 = vadd.s32 17, %v2483_v31 }
 0x1f8   : > { %5968 = vst [vmem:[#allocation17_spill] sm:$0xff] %v5645_v16  ;;  %v3381_v3 = vpack.c.bf16 %v5645_v16, %v5636_v21  ;;  %v5658_v15 = vsel %vm2716_vm7, %v5645_v16, 0.0  ;;  %vm2550_vm12 = vcmp.ne.s32.totalorder %v2494_v47, 0  ;;  %vm2584_vm13 = vcmp.lt.s32.totalorder %v2494_v47, 0  ;;  %vm5669_vm15 = vmand %vm2583_vm10, %vm2549_vm9 }
 0x1f9   : > { %v2515_v17 = vmul.u32 17, %v2514_v56  ;;  %vm2718_vm14 = vcmp.ne.s32.totalorder %v2684_v37, 16  ;;  %v2652_v62 = vadd.s32 17, %v2494_v47  ;;  %vm5679_vm0 = vmand %vm2584_vm13, %vm2550_vm12 }
 0x1fa   : > { %3410 = vst [vmem:[%s4961_s9 + $0x68] sm:$0xff] %v3381_v3   ;;  %v1044_v8 = vpop.f32.mrb[56].mxu1  ;;  %v2505_v3 = vsub.s32 %v5586_v48, %v2504_v0 }
 0x1fb   : > { %v1883_v41 = vpop.f32.mrb[56].mxu0  ;;  %v3672_v40 = vpop.f32.mrb[57].mxu1  ;;  %v2686_v48 = vsel %vm5679_vm0, %v2652_v62, %v2494_v47 }
 0x1fc   : > { %v5665_v12 = vadd.f32 %v1883_v41, %v1044_v8  ;;  %v3840_v2 = vpop.f32.mrb[57].mxu0  ;;  %v1047_v16 = vpop.f32.mrb[58].mxu1  ;;  %v2685_v41 = vsel %vm5669_vm15, %v2651_v59, %v2483_v31  ;;  %vm2551_vm1 = vcmp.ne.s32.totalorder %v2505_v3, 0  ;;  %vm2585_vm2 = vcmp.lt.s32.totalorder %v2505_v3, 0 }
 0x1fd   : > { %v1886_v63 = vpop.f32.mrb[58].mxu0  ;;  %v3673_v58 = vpop.f32.mrb[59].mxu1  ;;  %vm2719_vm3 = vcmp.ne.s32.totalorder %v2685_v41, 16  ;;  %vm2720_vm6 = vcmp.ne.s32.totalorder %v2686_v48, 16  ;;  %vm2619_vm7 = vmand %vm2585_vm2, %vm2551_vm1 }
 0x1fe   : > { %v5674_v45 = vsel %vm2717_vm11, %v5665_v12, 0.0  ;;  %v5676_v60 = vadd.f32 %v1886_v63, %v1047_v16  ;;  %v3841_v18 = vpop.f32.mrb[59].mxu0  ;;  %v2516_v16 = vsub.s32 %v5601_v29, %v2515_v17 }
 0x200   : > { %5973 = vst [vmem:[#allocation18_spill] sm:$0xff] %v5676_v60  ;;  %v3386_v8 = vpack.c.bf16 %v5676_v60, %v5665_v12  ;;  %v5686_v37 = vsel %vm2718_vm14, %v5676_v60, 0.0  ;;  %v2653_v60 = vadd.s32 17, %v2505_v3  ;;  %vm2552_vm4 = vcmp.ne.s32.totalorder %v2516_v16, 0 }
 0x201   : > { %vm2586_vm5 = vcmp.lt.s32.totalorder %v2516_v16, 0  ;;  %v2654_v14 = vadd.s32 17, %v2516_v16 }
 0x202   : > { %3411 = vst [vmem:[%s4961_s9 + $0x70] sm:$0xff] %v3386_v8   ;;  %v1052_v40 = vpop.f32.mrb[60].mxu1  ;;  %vm2620_vm8 = vmand %vm2586_vm5, %vm2552_vm4  ;;  %v2687_v8 = vsel %vm2619_vm7, %v2653_v60, %v2505_v3 }
 0x203   : > { %v1891_v0 = vpop.f32.mrb[60].mxu0  ;;  %v3676_v2 = vpop.f32.mrb[61].mxu1  ;;  %vm2721_vm9 = vcmp.ne.s32.totalorder %v2687_v8, 16 }
 0x204   : > { %v5694_v63 = vadd.f32 %v1891_v0, %v1052_v40  ;;  %v3844_v58 = vpop.f32.mrb[61].mxu0  ;;  %v1055_v18 = vpop.f32.mrb[62].mxu1  ;;  %v2688_v40 = vsel %vm2620_vm8, %v2654_v14, %v2516_v16  ;;  %v4214_v14 = vmov (!%p3274_p5), 0.0  }
 0x205   : > { %v1894_v31 = vpop.f32.mrb[62].mxu0  ;;  %v3677_v29 = vpop.f32.mrb[63].mxu1  ;;  %vm2722_vm10 = vcmp.ne.s32.totalorder %v2688_v40, 16  ;;  %2829 = vst [vmem:[#allocation2] sm:$0x3] (!%p3274_p5), %v4214_v14 }
 0x206   : > { %v5697_v59 = vsel %vm2719_vm3, %v5694_v63, 0.0  ;;  %v5699_v47 = vadd.f32 %v1894_v31, %v1055_v18  ;;  %v3845_v17 = vpop.f32.mrb[63].mxu0 }
 0x208   : > { %5976 = vst [vmem:[#allocation19_spill] sm:$0xff] %v5699_v47  ;;  %v3391_v62 = vpack.c.bf16 %v5699_v47, %v5694_v63  ;;  %v5704_v56 = vsel %vm2720_vm6, %v5699_v47, 0.0 }
 0x20a   : > { %3412 = vst [vmem:[%s4961_s9 + $0x78] sm:$0xff] %v3391_v62   ;;  %v1060_v41 = vpop.f32.mrb[64].mxu1 }
 0x20b   : > { %v1899_v48 = vpop.f32.mrb[64].mxu0  ;;  %v3680_v0 = vpop.f32.mrb[65].mxu1 }
 0x20c   : > { %v5707_v2 = vadd.f32 %v1899_v48, %v1060_v41  ;;  %v3848_v58 = vpop.f32.mrb[65].mxu0  ;;  %v1063_v18 = vpop.f32.mrb[66].mxu1  ;;  %2828 = sbr.rel (%p3274_p5) target bundleno = 531 (0x213), region = 40 }
 0x20d   : > { %v1902_v31 = vpop.f32.mrb[66].mxu0  ;;  %v3681_v29 = vpop.f32.mrb[67].mxu1 }
 0x20e   : > { %v5710_v17 = vsel %vm2721_vm9, %v5707_v2, 0.0  ;;  %v5712_v47 = vadd.f32 %v1902_v31, %v1063_v18  ;;  %v3849_v60 = vpop.f32.mrb[67].mxu0 }
 0x210   : > { %v3396_v3 = vpack.c.bf16 %v5712_v47, %v5707_v2  ;;  %v5717_v16 = vsel %vm2722_vm10, %v5712_v47, 0.0 }
 0x212   : > { %3413 = vst [vmem:[%s4961_s9 + $0x80] sm:$0xff] %v3396_v3  }
 0x213 PF: > { %v2831_v62 = vadd.f32 %v4977_v51, %v4953_v52  ;;  %v2873_v40 = vmul.f32 %v4935_v13, %v4953_v52  ;;  %v2874_v48 = vmul.f32 %v4955_v26, %v4977_v51  ;;  %v2875_v58 = vmul.f32 %v4996_v50, %v5014_v36  ;;  %p3275_p6 = scmp.ne.s32.totalorder %s4202_s18, 1 }
 0x214   : > { %v2876_v31 = vmul.f32 %v5016_v4, %v5035_v28  ;;  %v2877_v3 = vmul.f32 %v5053_v57, %v5066_v24  ;;  %v2878_v26 = vmul.f32 %v5068_v1, %v5086_v27 }
 0x215   : > { %v2832_v8 = vadd.f32 %v2831_v62, %v5014_v36  ;;  %v2907_v29 = vadd.f32 %v2874_v48, %v2873_v40  ;;  %v2879_v36 = vmul.f32 %v5101_v11, %v5120_v10 }
 0x217   : > { %v2833_v41 = vadd.f32 %v2832_v8, %v5035_v28  ;;  %v2908_v13 = vadd.f32 %v2907_v29, %v2875_v58  ;;  %v2880_v28 = vmul.f32 %v5122_v54, %v5138_v46  ;;  %v5978_v29 = vld [vmem:[#allocation3_spill] sm:$0xff] }
 0x219   : > { %v2834_v0 = vadd.f32 %v2833_v41, %v5066_v24  ;;  %v2909_v51 = vadd.f32 %v2908_v13, %v2876_v31  ;;  %v2881_v24 = vmul.f32 %v5157_v35, %v5175_v6  ;;  %v5980_v13 = vld [vmem:[#allocation4_spill] sm:$0xff] }
 0x21b   : > { %v2835_v18 = vadd.f32 %v2834_v0, %v5086_v27  ;;  %v2910_v14 = vadd.f32 %v2909_v51, %v2877_v3  ;;  %v2882_v27 = vmul.f32 %v5177_v7, %v5196_v43 }
 0x21d   : > { %v2836_v60 = vadd.f32 %v2835_v18, %v5120_v10  ;;  %v2911_v62 = vadd.f32 %v2910_v14, %v2878_v26  ;;  %v2883_v10 = vmul.f32 %v5214_v33, %v5227_v61 }
 0x21f   : > { %v2837_v52 = vadd.f32 %v2836_v60, %v5138_v46  ;;  %v2912_v8 = vadd.f32 %v2911_v62, %v2879_v36  ;;  %v2884_v46 = vmul.f32 %v5229_v55, %v5247_v5  ;;  %v2889_v60 = vmul.f32 %v5978_v29, %v5389_v30  ;;  %v5983_v36 = vld [vmem:[#allocation7_spill] sm:$0xff]  ;;  %v5985_v62 = vld [vmem:[#allocation9_spill] sm:$0xff] }
 0x220   : > { %v2901_v29 = vmul.f32 %v5665_v12, %v5674_v45 }
 0x221   : > { %v2838_v50 = vadd.f32 %v2837_v52, %v5175_v6  ;;  %v2913_v41 = vadd.f32 %v2912_v8, %v2880_v28  ;;  %v2885_v6 = vmul.f32 %v5262_v39, %v5281_v42  ;;  %v5977_v39 = vld [vmem:[#allocation6_spill] sm:$0xff]  ;;  %v2890_v52 = vmul.f32 %v5980_v13, %v5408_v25 }
 0x222   : > { %v5986_v8 = vld [vmem:[#allocation10_spill] sm:$0xff] }
 0x223   : > { %v2839_v4 = vadd.f32 %v2838_v50, %v5196_v43  ;;  %v2914_v40 = vadd.f32 %v2913_v41, %v2881_v24  ;;  %v2886_v43 = vmul.f32 %v5283_v49, %v5302_v9  ;;  %v5979_v49 = vld [vmem:[#allocation8_spill] sm:$0xff] }
 0x224   : > { %v2892_v14 = vmul.f32 %v5983_v36, %v5979_v49 }
 0x225   : > { %v2840_v57 = vadd.f32 %v2839_v4, %v5227_v61  ;;  %v2915_v48 = vadd.f32 %v2914_v40, %v2882_v27  ;;  %v2887_v61 = vmul.f32 %v5322_v23, %v5340_v32 }
 0x227   : > { %v2841_v1 = vadd.f32 %v2840_v57, %v5247_v5  ;;  %v2916_v0 = vadd.f32 %v2915_v48, %v2883_v10  ;;  %v2888_v5 = vmul.f32 %v5342_v53, %v5357_v20  ;;  %v5982_v53 = vld [vmem:[#allocation11_spill] sm:$0xff]  ;;  %v2893_v57 = vmul.f32 %v5985_v62, %v5506_v19 }
 0x229   : > { %v2842_v11 = vadd.f32 %v2841_v1, %v5281_v42  ;;  %v2917_v58 = vadd.f32 %v2916_v0, %v2884_v46  ;;  %v2894_v1 = vmul.f32 %v5986_v8, %v5982_v53  ;;  %v5988_v46 = vld [vmem:[#allocation14_spill] sm:$0xff] }
 0x22a   : > { %v2896_v48 = vmul.f32 %v5988_v46, %v5577_v22 }
 0x22b   : > { %v2843_v54 = vadd.f32 %v2842_v11, %v5302_v9  ;;  %v2918_v18 = vadd.f32 %v2917_v58, %v2885_v6  ;;  %v5987_v11 = vld [vmem:[#allocation12_spill] sm:$0xff]  ;;  %v5989_v6 = vld [vmem:[#allocation15_spill] sm:$0xff] }
 0x22c   : > { %v2897_v0 = vmul.f32 %v5989_v6, %v5608_v34  ;;  %v5990_v58 = vld [vmem:[#allocation16_spill] sm:$0xff] }
 0x22d   : > { %v2844_v35 = vadd.f32 %v2843_v54, %v5340_v32  ;;  %v2919_v31 = vadd.f32 %v2918_v18, %v2886_v43  ;;  %v5981_v32 = vld [vmem:[#allocation5_spill] sm:$0xff] }
 0x22e   : > { %v2891_v51 = vmul.f32 %v5981_v32, %v5977_v39 }
 0x22f   : > { %v2845_v7 = vadd.f32 %v2844_v35, %v5357_v20  ;;  %v2920_v3 = vadd.f32 %v2919_v31, %v2887_v61  ;;  %v5991_v31 = vld [vmem:[#allocation17_spill] sm:$0xff] }
 0x231   : > { %v2846_v33 = vadd.f32 %v2845_v7, %v5389_v30  ;;  %v2921_v26 = vadd.f32 %v2920_v3, %v2888_v5  ;;  %v5984_v30 = vld [vmem:[#allocation13_spill] sm:$0xff]  ;;  %v5992_v3 = vld [vmem:[#allocation18_spill] sm:$0xff] }
 0x232   : > { %v2895_v10 = vmul.f32 %v5987_v11, %v5984_v30 }
 0x233   : > { %v2847_v55 = vadd.f32 %v2846_v33, %v5408_v25  ;;  %v2922_v50 = vadd.f32 %v2921_v26, %v2889_v60  ;;  %v2898_v33 = vmul.f32 %v5990_v58, %v5627_v44 }
 0x235   : > { %v2848_v42 = vadd.f32 %v2847_v55, %v5977_v39  ;;  %v2923_v4 = vadd.f32 %v2922_v50, %v2890_v52  ;;  %v2899_v55 = vmul.f32 %v5636_v21, %v5643_v38  ;;  %v2900_v39 = vmul.f32 %v5991_v31, %v5658_v15  ;;  %v5993_v52 = vld [vmem:[#allocation19_spill] sm:$0xff] }
 0x236   : > { %v2904_v26 = vmul.f32 %v5993_v52, %v5704_v56 }
 0x237   : > { %v2849_v9 = vadd.f32 %v2848_v42, %v5979_v49  ;;  %v2924_v24 = vadd.f32 %v2923_v4, %v2891_v51  ;;  %v2902_v49 = vmul.f32 %v5992_v3, %v5686_v37 }
 0x239   : > { %v2850_v23 = vadd.f32 %v2849_v9, %v5506_v19  ;;  %v2925_v27 = vadd.f32 %v2924_v24, %v2892_v14  ;;  %v2830_v14 = vld [vmem:[#allocation2] sm:$0x1] }
 0x23b   : > { %v2851_v20 = vadd.f32 %v2850_v23, %v5982_v53  ;;  %v2926_v40 = vadd.f32 %v2925_v27, %v2893_v57 }
 0x23d   : > { %v2852_v28 = vadd.f32 %v2851_v20, %v5984_v30  ;;  %v2927_v35 = vadd.f32 %v2926_v40, %v2894_v1  ;;  %v2959_v40 = vld [vmem:[%s5847_s2] sm:$0x1] (!%p3275_p6) }
 0x23f   : > { %v2853_v25 = vadd.f32 %v2852_v28, %v5577_v22  ;;  %v2928_v7 = vadd.f32 %v2927_v35, %v2895_v10 }
 0x241   : > { %v2854_v41 = vadd.f32 %v2853_v25, %v5608_v34  ;;  %v2929_v61 = vadd.f32 %v2928_v7, %v2896_v48  ;;  %v2964_v48 = vld [vmem:[%s5848_s3] sm:$0x1] (!%p3275_p6) }
 0x243   : > { %v2855_v54 = vadd.f32 %v2854_v41, %v5627_v44  ;;  %v2930_v5 = vadd.f32 %v2929_v61, %v2897_v0 }
 0x245   : > { %v2856_v19 = vadd.f32 %v2855_v54, %v5643_v38  ;;  %v2931_v42 = vadd.f32 %v2930_v5, %v2898_v33  ;;  %v2903_v38 = vmul.f32 %v5694_v63, %v5697_v59 }
 0x247   : > { %v2857_v43 = vadd.f32 %v2856_v19, %v5658_v15  ;;  %v2932_v60 = vadd.f32 %v2931_v42, %v2899_v55 }
 0x249   : > { %v2858_v18 = vadd.f32 %v2857_v43, %v5674_v45  ;;  %v2933_v9 = vadd.f32 %v2932_v60, %v2900_v39  ;;  %v2905_v45 = vmul.f32 %v5707_v2, %v5710_v17 }
 0x24b   : > { %v2859_v22 = vadd.f32 %v2858_v18, %v5686_v37  ;;  %v2934_v13 = vadd.f32 %v2933_v9, %v2901_v29  ;;  %v2906_v37 = vmul.f32 %v5712_v47, %v5717_v16 }
 0x24d   : > { %v2860_v34 = vadd.f32 %v2859_v22, %v5697_v59  ;;  %v2935_v23 = vadd.f32 %v2934_v13, %v2902_v49 }
 0x24f   : > { %v2861_v44 = vadd.f32 %v2860_v34, %v5704_v56  ;;  %v2936_v32 = vadd.f32 %v2935_v23, %v2903_v38 }
 0x251   : > { %v2862_v21 = vadd.f32 %v2861_v44, %v5710_v17  ;;  %v2937_v50 = vadd.f32 %v2936_v32, %v2904_v26  ;;  %v2872_v17 = vld [vmem:[#allocation2 + $0x1] sm:$0x1] }
 0x253   : > { %v2863_v15 = vadd.f32 %v2862_v21, %v5717_v16  ;;  %v2938_v20 = vadd.f32 %v2937_v50, %v2905_v45 }
 0x255   : > { %v2864_v12 = vrot.slane %v2863_v15, 4  ;;  %v2939_v59 = vadd.f32 %v2938_v20, %v2906_v37 }
 0x257   : > { %v2865_v51 = vadd.f32 %v2864_v12, %v2863_v15  ;;  %v2940_v4 = vrot.slane %v2939_v59, 4 }
 0x259   : > { %v2866_v53 = vrot.slane %v2865_v51, 2  ;;  %v2941_v56 = vadd.f32 %v2940_v4, %v2939_v59 }
 0x25b   : > { %v2867_v63 = vadd.f32 %v2866_v53, %v2865_v51  ;;  %v2942_v62 = vrot.slane %v2941_v56, 2 }
 0x25d   : > { %v2868_v36 = vrot.slane %v2867_v63, 1  ;;  %v2943_v57 = vadd.f32 %v2942_v62, %v2941_v56 }
 0x25f   : > { %v2869_v30 = vadd.f32 %v2868_v36, %v2867_v63  ;;  %v2944_v2 = vrot.slane %v2943_v57, 1  ;;  %2951 = sbr.rel (%p3275_p6) target bundleno = 647 (0x287), region = 44 }
 0x261   : > { %v2870_v28 = vadd.f32 %v2869_v30, %v2830_v14  ;;  %v2945_v24 = vadd.f32 %v2944_v2, %v2943_v57 }
 0x263   : > { %2871 = vst [vmem:[#allocation2] sm:$0x1] %v2870_v28  ;;  %v2946_v25 = vadd.f32 %v2945_v24, %v2872_v17 }
 0x265   : > { %2947 = vst [vmem:[#allocation2 + $0x1] sm:$0x1] %v2946_v25 }
 0x26a   : > { %v2952_v47 = vld [vmem:[#allocation2] sm:$0x1] }
 0x26b   : > { %v2953_v8 = vmul.f32 0.001953125, %v2952_v47 }
 0x26c   : > { %v2954_v16 = vld [vmem:[#allocation2 + $0x1] sm:$0x1] }
 0x26d   : > { %v2955_v1 = vmul.f32 0.001953125, %v2954_v16  ;;  %v2956_v27 = vmul.f32 %v2953_v8, %v2953_v8 }
 0x26f   : > { %v2957_v41 = vsub.f32 %v2955_v1, %v2956_v27 }
 0x271   : > { %v2958_v11 = vmax.f32 %v2957_v41, 0.0 }
 0x273   : > { %v2960_v10 = vadd.f32 1e-05, %v2958_v11 }
 0x275   : > { %4186 = vrsqrt.f32 %v2960_v10 }
 0x27f   : > { %v4187_v54 = vpop.eup %4186 }
 0x280   : > { %v2962_v46 = vmul.f32 %v4187_v54, %v2959_v40 }
 0x282   : > { %2963 = vst [vmem:[%s5850_s5] sm:$0x1] %v2962_v46  ;;  %v2965_v35 = vmul.f32 %v2962_v46, %v2953_v8 }
 0x284   : > { %v2966_v19 = vsub.f32 %v2964_v48, %v2965_v35 }
 0x286   : > { %2967 = vst [vmem:[%s5850_s5 + $0x1] sm:$0x1] %v2966_v19 }
 0x287 PF: > { %s16_s20 = sadd.s32 1, %s4210_s20   ;;  %s5994_s18 = smov %s4206_s19 }
 0x288   : > { %p13_p7 = scmp.ge.s32.totalorder %s16_s20, 4   ;;  %s5995_s19 = smov %s5997_s21 }
 0x28a   :  { %15 = sbr.rel (!%p13_p7) target bundleno = 2 (0x2), region = 98 }

// kernel: dc_discriminator.8
= control target key start
LH: loop header
LB: loop body
LE: loop exit
PB: predicated region body
PF: predicated region fallthrough
CT: control target
= control target key end

     0   :  { %s1038_s9 = smov 0   ;;  %s1040_s10 = smov 0   ;;  %s1195_s0 = inlined_call_operand.vmem [shape: bf16[2,272,128], index: 0, kind: input, shape index: {}]   ;;  %s1196_s1 = inlined_call_operand.vmem [shape: f32[2,128], index: 1, kind: input, shape index: {}]   ;;  %s1197_s2 = inlined_call_operand.vmem [shape: bf16[2,272,128], index: 2, kind: output, shape index: {}]  }
   0x1   :  { %s1042_s11 = smov 0  }
   0x2 LB: > { %s21_s12 = sadd.s32 1, %s1017_s10  ;;  %p714_p0 = scmp.ge.s32.totalorder %s1021_s11, 1  ;;  %s1021_s11 = sphi %s1042_s11, %s12_s11   ;;  %s1017_s10 = sphi %s1040_s10, %s1199_s10   ;;  %s1013_s9 = sphi %s1038_s9, %s1198_s9  }
   0x3   : > { %p22_p1 = scmp.ge.s32.totalorder %s21_s12, 2  ;;  %p140_p2 = scmp.lt.s32.totalorder %s1021_s11, 3 }
   0x5   : > { %s1201_s12 = smov (%p22_p1, %s21_s12), 0  ;;  %p141_p3 = pnand %p714_p0, %p140_p2 }
   0x6   : > { %p172_p4 = scmp.lt.s32.totalorder (!%p141_p3), %s1013_s9, 1  ;;  %v1069_v0 = vld [vmem:[%s1196_s1] ss:$0 sm:$0xff] (!%p141_p3)  ;;  %v1078_v9 = vld [vmem:[%s1196_s1 + $0x1] ss:$0 sm:$0xff] (!%p141_p3) }
   0x7   : > { %144 = sbr.rel (%p141_p3) target bundleno = 79 (0x4f), region = 28 }
   0xe   : > { %s1203_s9 = smov (!%p172_p4, %s1013_s9), 1 }
   0xf   : > { %s974_s13 = smul.u32 136, %s1203_s9 }
  0x11   : > { %s1064_s16 = scalar_lea.vmem %s1195_s0, %s974_s13  ;;  %s1101_s23 = scalar_lea.vmem %s1197_s2, %s974_s13 }
  0x12   : > { %v790_v1 = vld [vmem:[%s1064_s16] sm:$0xff]   ;;  %v942_v2 = vld [vmem:[%s1064_s16 + $0x8] sm:$0xff]   ;;  %v943_v3 = vld [vmem:[%s1064_s16 + $0x10] sm:$0xff]  }
  0x13   : > { %v791_v4 = vunpack.c.l.bf16 %v790_v1  ;;  %v792_v5 = vunpack.c.h.bf16 %v790_v1  ;;  %v795_v6 = vunpack.c.l.bf16 %v942_v2  ;;  %v796_v7 = vunpack.c.h.bf16 %v942_v2  ;;  %v944_v8 = vld [vmem:[%s1064_s16 + $0x18] sm:$0xff]   ;;  %v945_v36 = vld [vmem:[%s1064_s16 + $0x20] sm:$0xff]   ;;  %v946_v41 = vld [vmem:[%s1064_s16 + $0x28] sm:$0xff]  }
  0x14   : > { %v799_v10 = vunpack.c.l.bf16 %v943_v3  ;;  %v800_v11 = vunpack.c.h.bf16 %v943_v3  ;;  %v803_v12 = vunpack.c.l.bf16 %v944_v8  ;;  %v804_v13 = vunpack.c.h.bf16 %v944_v8  ;;  %v947_v52 = vld [vmem:[%s1064_s16 + $0x30] sm:$0xff]   ;;  %v948_v53 = vld [vmem:[%s1064_s16 + $0x38] sm:$0xff]  }
  0x15   : > { %v265_v14 = vmul.f32 %v791_v4, %v1069_v0  ;;  %v266_v15 = vmul.f32 %v792_v5, %v1069_v0  ;;  %v267_v16 = vmul.f32 %v795_v6, %v1069_v0  ;;  %v268_v17 = vmul.f32 %v796_v7, %v1069_v0 }
  0x16   : > { %v269_v18 = vmul.f32 %v799_v10, %v1069_v0  ;;  %v270_v19 = vmul.f32 %v800_v11, %v1069_v0  ;;  %v271_v20 = vmul.f32 %v803_v12, %v1069_v0  ;;  %v272_v21 = vmul.f32 %v804_v13, %v1069_v0 }
  0x17   : > { %v304_v22 = vadd.f32 %v1078_v9, %v265_v14  ;;  %v305_v23 = vadd.f32 %v1078_v9, %v266_v15  ;;  %v306_v24 = vadd.f32 %v1078_v9, %v267_v16  ;;  %v307_v25 = vadd.f32 %v1078_v9, %v268_v17 }
  0x18   : > { %v308_v26 = vadd.f32 %v1078_v9, %v269_v18  ;;  %v309_v27 = vadd.f32 %v1078_v9, %v270_v19  ;;  %v310_v28 = vadd.f32 %v1078_v9, %v271_v20  ;;  %v311_v29 = vadd.f32 %v1078_v9, %v272_v21  ;;  %v949_v20 = vld [vmem:[%s1064_s16 + $0x40] sm:$0xff]  }
  0x19   : > { %vm338_vm0 = vcmp.ge.f32.partialorder %v304_v22, 0.0  ;;  %vm339_vm1 = vcmp.ge.f32.partialorder %v305_v23, 0.0  ;;  %v372_v30 = vmul.f32 0.2, %v304_v22  ;;  %v373_v31 = vmul.f32 0.2, %v305_v23 }
  0x1a   : > { %vm340_vm2 = vcmp.ge.f32.partialorder %v306_v24, 0.0  ;;  %vm341_vm3 = vcmp.ge.f32.partialorder %v307_v25, 0.0  ;;  %v374_v32 = vmul.f32 0.2, %v306_v24  ;;  %v375_v33 = vmul.f32 0.2, %v307_v25 }
  0x1b   : > { %v406_v34 = vsel %vm338_vm0, %v304_v22, %v372_v30  ;;  %v407_v35 = vsel %vm339_vm1, %v305_v23, %v373_v31  ;;  %vm342_vm4 = vcmp.ge.f32.partialorder %v308_v26, 0.0  ;;  %vm343_vm5 = vcmp.ge.f32.partialorder %v309_v27, 0.0 }
  0x1c   : > { %v860_v37 = vpack.c.bf16 %v407_v35, %v406_v34  ;;  %v408_v38 = vsel %vm340_vm2, %v306_v24, %v374_v32  ;;  %v409_v39 = vsel %vm341_vm3, %v307_v25, %v375_v33  ;;  %v376_v40 = vmul.f32 0.2, %v308_v26  ;;  %v950_v24 = vld [vmem:[%s1064_s16 + $0x48] sm:$0xff]  }
  0x1d   : > { %v865_v42 = vpack.c.bf16 %v409_v39, %v408_v38  ;;  %v377_v43 = vmul.f32 0.2, %v309_v27  ;;  %vm344_vm6 = vcmp.ge.f32.partialorder %v310_v28, 0.0  ;;  %vm345_vm7 = vcmp.ge.f32.partialorder %v311_v29, 0.0 }
  0x1e   : > { %861 = vst [vmem:[%s1101_s23] sm:$0xff] %v860_v37   ;;  %v410_v44 = vsel %vm342_vm4, %v308_v26, %v376_v40  ;;  %v378_v45 = vmul.f32 0.2, %v310_v28  ;;  %v379_v46 = vmul.f32 0.2, %v311_v29  ;;  %v807_v47 = vunpack.c.l.bf16 %v945_v36 }
  0x1f   : > { %958 = vst [vmem:[%s1101_s23 + $0x8] sm:$0xff] %v865_v42   ;;  %v411_v48 = vsel %vm343_vm5, %v309_v27, %v377_v43  ;;  %v808_v49 = vunpack.c.h.bf16 %v945_v36  ;;  %v811_v50 = vunpack.c.l.bf16 %v946_v41  ;;  %v812_v51 = vunpack.c.h.bf16 %v946_v41  ;;  %v951_v36 = vld [vmem:[%s1064_s16 + $0x50] sm:$0xff]  }
  0x20   : > { %v870_v54 = vpack.c.bf16 %v411_v48, %v410_v44  ;;  %v412_v55 = vsel %vm344_vm6, %v310_v28, %v378_v45  ;;  %v413_v56 = vsel %vm345_vm7, %v311_v29, %v379_v46  ;;  %v273_v57 = vmul.f32 %v807_v47, %v1069_v0 }
  0x21   : > { %v875_v58 = vpack.c.bf16 %v413_v56, %v412_v55  ;;  %v274_v59 = vmul.f32 %v808_v49, %v1069_v0  ;;  %v275_v60 = vmul.f32 %v811_v50, %v1069_v0  ;;  %v276_v61 = vmul.f32 %v812_v51, %v1069_v0  ;;  %v952_v55 = vld [vmem:[%s1064_s16 + $0x58] sm:$0xff]  }
  0x22   : > { %959 = vst [vmem:[%s1101_s23 + $0x10] sm:$0xff] %v870_v54   ;;  %v312_v62 = vadd.f32 %v1078_v9, %v273_v57  ;;  %v815_v63 = vunpack.c.l.bf16 %v947_v52  ;;  %v816_v1 = vunpack.c.h.bf16 %v947_v52  ;;  %v819_v2 = vunpack.c.l.bf16 %v948_v53 }
  0x23   : > { %960 = vst [vmem:[%s1101_s23 + $0x18] sm:$0xff] %v875_v58   ;;  %v313_v3 = vadd.f32 %v1078_v9, %v274_v59  ;;  %v314_v4 = vadd.f32 %v1078_v9, %v275_v60  ;;  %v315_v5 = vadd.f32 %v1078_v9, %v276_v61  ;;  %v820_v6 = vunpack.c.h.bf16 %v948_v53 }
  0x24   : > { %vm346_vm8 = vcmp.ge.f32.partialorder %v312_v62, 0.0  ;;  %v380_v7 = vmul.f32 0.2, %v312_v62  ;;  %v277_v8 = vmul.f32 %v815_v63, %v1069_v0  ;;  %v278_v10 = vmul.f32 %v816_v1, %v1069_v0  ;;  %v953_v1 = vld [vmem:[%s1064_s16 + $0x60] sm:$0xff]  }
  0x25   : > { %vm347_vm9 = vcmp.ge.f32.partialorder %v313_v3, 0.0  ;;  %v381_v11 = vmul.f32 0.2, %v313_v3  ;;  %vm348_vm10 = vcmp.ge.f32.partialorder %v314_v4, 0.0  ;;  %vm349_vm11 = vcmp.ge.f32.partialorder %v315_v5, 0.0 }
  0x26   : > { %v414_v12 = vsel %vm346_vm8, %v312_v62, %v380_v7  ;;  %v382_v13 = vmul.f32 0.2, %v314_v4  ;;  %v383_v14 = vmul.f32 0.2, %v315_v5  ;;  %v316_v15 = vadd.f32 %v1078_v9, %v277_v8 }
  0x27   : > { %v415_v16 = vsel %vm347_vm9, %v313_v3, %v381_v11  ;;  %v317_v17 = vadd.f32 %v1078_v9, %v278_v10  ;;  %v279_v18 = vmul.f32 %v819_v2, %v1069_v0  ;;  %v280_v19 = vmul.f32 %v820_v6, %v1069_v0  ;;  %v954_v6 = vld [vmem:[%s1064_s16 + $0x68] sm:$0xff]  }
  0x28   : > { %v880_v21 = vpack.c.bf16 %v415_v16, %v414_v12  ;;  %v416_v22 = vsel %vm348_vm10, %v314_v4, %v382_v13  ;;  %v417_v23 = vsel %vm349_vm11, %v315_v5, %v383_v14  ;;  %vm350_vm12 = vcmp.ge.f32.partialorder %v316_v15, 0.0 }
  0x29   : > { %v885_v25 = vpack.c.bf16 %v417_v23, %v416_v22  ;;  %vm351_vm13 = vcmp.ge.f32.partialorder %v317_v17, 0.0  ;;  %v384_v26 = vmul.f32 0.2, %v316_v15  ;;  %v385_v27 = vmul.f32 0.2, %v317_v17  ;;  %v955_v22 = vld [vmem:[%s1064_s16 + $0x70] sm:$0xff]  }
  0x2a   : > { %961 = vst [vmem:[%s1101_s23 + $0x20] sm:$0xff] %v880_v21   ;;  %v318_v28 = vadd.f32 %v1078_v9, %v279_v18  ;;  %v319_v29 = vadd.f32 %v1078_v9, %v280_v19  ;;  %v823_v30 = vunpack.c.l.bf16 %v949_v20  ;;  %v824_v31 = vunpack.c.h.bf16 %v949_v20 }
  0x2b   : > { %962 = vst [vmem:[%s1101_s23 + $0x28] sm:$0xff] %v885_v25   ;;  %v418_v32 = vsel %vm350_vm12, %v316_v15, %v384_v26  ;;  %v419_v33 = vsel %vm351_vm13, %v317_v17, %v385_v27  ;;  %v827_v34 = vunpack.c.l.bf16 %v950_v24  ;;  %v828_v35 = vunpack.c.h.bf16 %v950_v24 }
  0x2c   : > { %v890_v37 = vpack.c.bf16 %v419_v33, %v418_v32  ;;  %vm352_vm14 = vcmp.ge.f32.partialorder %v318_v28, 0.0  ;;  %vm353_vm15 = vcmp.ge.f32.partialorder %v319_v29, 0.0  ;;  %v386_v38 = vmul.f32 0.2, %v318_v28 }
  0x2d   : > { %v387_v39 = vmul.f32 0.2, %v319_v29  ;;  %v281_v40 = vmul.f32 %v823_v30, %v1069_v0  ;;  %v282_v41 = vmul.f32 %v824_v31, %v1069_v0  ;;  %v283_v42 = vmul.f32 %v827_v34, %v1069_v0 }
  0x2e   : > { %963 = vst [vmem:[%s1101_s23 + $0x30] sm:$0xff] %v890_v37   ;;  %v420_v43 = vsel %vm352_vm14, %v318_v28, %v386_v38  ;;  %v284_v44 = vmul.f32 %v828_v35, %v1069_v0  ;;  %v831_v45 = vunpack.c.l.bf16 %v951_v36  ;;  %v832_v46 = vunpack.c.h.bf16 %v951_v36 }
  0x2f   : > { %v421_v47 = vsel %vm353_vm15, %v319_v29, %v387_v39  ;;  %v320_v48 = vadd.f32 %v1078_v9, %v281_v40  ;;  %v321_v49 = vadd.f32 %v1078_v9, %v282_v41  ;;  %v322_v50 = vadd.f32 %v1078_v9, %v283_v42  ;;  %v956_v41 = vld [vmem:[%s1064_s16 + $0x78] sm:$0xff]  }
  0x30   : > { %v895_v51 = vpack.c.bf16 %v421_v47, %v420_v43  ;;  %v323_v52 = vadd.f32 %v1078_v9, %v284_v44  ;;  %v285_v53 = vmul.f32 %v831_v45, %v1069_v0  ;;  %v286_v54 = vmul.f32 %v832_v46, %v1069_v0  ;;  %v957_v46 = vld [vmem:[%s1064_s16 + $0x80] sm:$0xff]  }
  0x31   : > { %vm354_vm0 = vcmp.ge.f32.partialorder %v320_v48, 0.0  ;;  %vm355_vm1 = vcmp.ge.f32.partialorder %v321_v49, 0.0  ;;  %v388_v56 = vmul.f32 0.2, %v320_v48  ;;  %v389_v57 = vmul.f32 0.2, %v321_v49 }
  0x32   : > { %964 = vst [vmem:[%s1101_s23 + $0x38] sm:$0xff] %v895_v51   ;;  %vm356_vm2 = vcmp.ge.f32.partialorder %v322_v50, 0.0  ;;  %vm357_vm3 = vcmp.ge.f32.partialorder %v323_v52, 0.0  ;;  %v390_v58 = vmul.f32 0.2, %v322_v50  ;;  %v324_v62 = vadd.f32 %v1078_v9, %v285_v53 }
  0x33   : > { %v391_v59 = vmul.f32 0.2, %v323_v52  ;;  %v422_v60 = vsel %vm354_vm0, %v320_v48, %v388_v56  ;;  %v423_v61 = vsel %vm355_vm1, %v321_v49, %v389_v57  ;;  %v325_v63 = vadd.f32 %v1078_v9, %v286_v54 }
  0x34   : > { %v900_v2 = vpack.c.bf16 %v423_v61, %v422_v60  ;;  %v424_v3 = vsel %vm356_vm2, %v322_v50, %v390_v58  ;;  %v835_v5 = vunpack.c.l.bf16 %v952_v55  ;;  %vm358_vm4 = vcmp.ge.f32.partialorder %v324_v62, 0.0 }
  0x35   : > { %v425_v4 = vsel %vm357_vm3, %v323_v52, %v391_v59  ;;  %vm359_vm5 = vcmp.ge.f32.partialorder %v325_v63, 0.0  ;;  %v392_v8 = vmul.f32 0.2, %v324_v62  ;;  %v393_v10 = vmul.f32 0.2, %v325_v63 }
  0x36   : > { %v905_v7 = vpack.c.bf16 %v425_v4, %v424_v3  ;;  %965 = vst [vmem:[%s1101_s23 + $0x40] sm:$0xff] %v900_v2   ;;  %v836_v11 = vunpack.c.h.bf16 %v952_v55  ;;  %v287_v12 = vmul.f32 %v835_v5, %v1069_v0  ;;  %v839_v13 = vunpack.c.l.bf16 %v953_v1 }
  0x37   : > { %v426_v14 = vsel %vm358_vm4, %v324_v62, %v392_v8  ;;  %v840_v15 = vunpack.c.h.bf16 %v953_v1  ;;  %v843_v16 = vunpack.c.l.bf16 %v954_v6  ;;  %v844_v17 = vunpack.c.h.bf16 %v954_v6 }
  0x38   : > { %966 = vst [vmem:[%s1101_s23 + $0x48] sm:$0xff] %v905_v7   ;;  %v427_v18 = vsel %vm359_vm5, %v325_v63, %v393_v10  ;;  %v288_v19 = vmul.f32 %v836_v11, %v1069_v0  ;;  %v326_v20 = vadd.f32 %v1078_v9, %v287_v12  ;;  %v289_v21 = vmul.f32 %v839_v13, %v1069_v0 }
  0x39   : > { %v910_v23 = vpack.c.bf16 %v427_v18, %v426_v14  ;;  %v290_v24 = vmul.f32 %v840_v15, %v1069_v0  ;;  %v291_v25 = vmul.f32 %v843_v16, %v1069_v0  ;;  %v292_v26 = vmul.f32 %v844_v17, %v1069_v0 }
  0x3a   : > { %v327_v27 = vadd.f32 %v1078_v9, %v288_v19  ;;  %vm360_vm6 = vcmp.ge.f32.partialorder %v326_v20, 0.0  ;;  %v394_v28 = vmul.f32 0.2, %v326_v20  ;;  %v328_v29 = vadd.f32 %v1078_v9, %v289_v21 }
  0x3b   : > { %967 = vst [vmem:[%s1101_s23 + $0x50] sm:$0xff] %v910_v23   ;;  %v329_v30 = vadd.f32 %v1078_v9, %v290_v24  ;;  %v330_v31 = vadd.f32 %v1078_v9, %v291_v25  ;;  %v331_v32 = vadd.f32 %v1078_v9, %v292_v26  ;;  %v847_v33 = vunpack.c.l.bf16 %v955_v22 }
  0x3c   : > { %vm361_vm7 = vcmp.ge.f32.partialorder %v327_v27, 0.0  ;;  %v395_v34 = vmul.f32 0.2, %v327_v27  ;;  %v428_v35 = vsel %vm360_vm6, %v326_v20, %v394_v28  ;;  %vm362_vm8 = vcmp.ge.f32.partialorder %v328_v29, 0.0 }
  0x3d   : > { %vm363_vm9 = vcmp.ge.f32.partialorder %v329_v30, 0.0  ;;  %v396_v36 = vmul.f32 0.2, %v328_v29  ;;  %v397_v37 = vmul.f32 0.2, %v329_v30  ;;  %vm364_vm10 = vcmp.ge.f32.partialorder %v330_v31, 0.0 }
  0x3e   : > { %v429_v38 = vsel %vm361_vm7, %v327_v27, %v395_v34  ;;  %vm365_vm11 = vcmp.ge.f32.partialorder %v331_v32, 0.0  ;;  %v398_v39 = vmul.f32 0.2, %v330_v31  ;;  %v399_v40 = vmul.f32 0.2, %v331_v32 }
  0x3f   : > { %v915_v42 = vpack.c.bf16 %v429_v38, %v428_v35  ;;  %v430_v43 = vsel %vm362_vm8, %v328_v29, %v396_v36  ;;  %v431_v44 = vsel %vm363_vm9, %v329_v30, %v397_v37  ;;  %v848_v45 = vunpack.c.h.bf16 %v955_v22 }
  0x40   : > { %v920_v47 = vpack.c.bf16 %v431_v44, %v430_v43  ;;  %v432_v48 = vsel %vm364_vm10, %v330_v31, %v398_v39  ;;  %v433_v49 = vsel %vm365_vm11, %v331_v32, %v399_v40  ;;  %v293_v50 = vmul.f32 %v847_v33, %v1069_v0 }
  0x41   : > { %968 = vst [vmem:[%s1101_s23 + $0x58] sm:$0xff] %v915_v42   ;;  %v925_v51 = vpack.c.bf16 %v433_v49, %v432_v48  ;;  %v294_v52 = vmul.f32 %v848_v45, %v1069_v0  ;;  %v851_v53 = vunpack.c.l.bf16 %v956_v41  ;;  %v852_v54 = vunpack.c.h.bf16 %v956_v41 }
  0x42   : > { %969 = vst [vmem:[%s1101_s23 + $0x60] sm:$0xff] %v920_v47   ;;  %v332_v55 = vadd.f32 %v1078_v9, %v293_v50  ;;  %v855_v56 = vunpack.c.l.bf16 %v957_v46  ;;  %v856_v57 = vunpack.c.h.bf16 %v957_v46 }
  0x43   : > { %970 = vst [vmem:[%s1101_s23 + $0x68] sm:$0xff] %v925_v51   ;;  %v333_v58 = vadd.f32 %v1078_v9, %v294_v52  ;;  %v295_v59 = vmul.f32 %v851_v53, %v1069_v0  ;;  %v296_v60 = vmul.f32 %v852_v54, %v1069_v0 }
  0x44   : > { %vm366_vm12 = vcmp.ge.f32.partialorder %v332_v55, 0.0  ;;  %v400_v61 = vmul.f32 0.2, %v332_v55  ;;  %v297_v62 = vmul.f32 %v855_v56, %v1069_v0  ;;  %v298_v63 = vmul.f32 %v856_v57, %v1069_v0 }
  0x45   : > { %vm367_vm13 = vcmp.ge.f32.partialorder %v333_v58, 0.0  ;;  %v401_v1 = vmul.f32 0.2, %v333_v58  ;;  %v334_v2 = vadd.f32 %v1078_v9, %v295_v59  ;;  %v335_v3 = vadd.f32 %v1078_v9, %v296_v60 }
  0x46   : > { %v434_v4 = vsel %vm366_vm12, %v332_v55, %v400_v61  ;;  %v336_v5 = vadd.f32 %v1078_v9, %v297_v62  ;;  %v337_v6 = vadd.f32 %v1078_v9, %v298_v63 }
  0x47   : > { %v435_v7 = vsel %vm367_vm13, %v333_v58, %v401_v1  ;;  %vm368_vm14 = vcmp.ge.f32.partialorder %v334_v2, 0.0  ;;  %vm369_vm15 = vcmp.ge.f32.partialorder %v335_v3, 0.0  ;;  %v402_v8 = vmul.f32 0.2, %v334_v2 }
  0x48   : > { %v930_v10 = vpack.c.bf16 %v435_v7, %v434_v4  ;;  %v403_v0 = vmul.f32 0.2, %v335_v3  ;;  %vm370_vm0 = vcmp.ge.f32.partialorder %v336_v5, 0.0  ;;  %vm371_vm1 = vcmp.ge.f32.partialorder %v337_v6, 0.0 }
  0x49   : > { %v436_v11 = vsel %vm368_vm14, %v334_v2, %v402_v8  ;;  %v404_v12 = vmul.f32 0.2, %v336_v5  ;;  %v405_v13 = vmul.f32 0.2, %v337_v6 }
  0x4a   : > { %971 = vst [vmem:[%s1101_s23 + $0x70] sm:$0xff] %v930_v10   ;;  %v437_v14 = vsel %vm369_vm15, %v335_v3, %v403_v0 }
  0x4b   : > { %v935_v15 = vpack.c.bf16 %v437_v14, %v436_v11  ;;  %v438_v16 = vsel %vm370_vm0, %v336_v5, %v404_v12  ;;  %v439_v17 = vsel %vm371_vm1, %v337_v6, %v405_v13 }
  0x4c   : > { %v940_v18 = vpack.c.bf16 %v439_v17, %v438_v16 }
  0x4d   : > { %972 = vst [vmem:[%s1101_s23 + $0x78] sm:$0xff] %v935_v15  }
  0x4e   : > { %973 = vst [vmem:[%s1101_s23 + $0x80] sm:$0xff] %v940_v18  }
  0x4f PF: > { %s12_s11 = sadd.s32 1, %s1021_s11   ;;  %s1198_s9 = smov %s1017_s10 }
  0x50   : > { %p9_p5 = scmp.ge.s32.totalorder %s12_s11, 4   ;;  %s1199_s10 = smov %s1201_s12 }
  0x52   :  { %11 = sbr.rel (!%p9_p5) target bundleno = 2 (0x2), region = 61 }

// kernel: dc_discriminator.10
= control target key start
LH: loop header
LB: loop body
LE: loop exit
PB: predicated region body
PF: predicated region fallthrough
CT: control target
= control target key end

     0   :  { %s546_s9 = smov 0   ;;  %s548_s10 = smov 0   ;;  %s618_s0 = inlined_call_operand.vmem [shape: bf16[2,72,128], index: 0, kind: input, shape index: {}]   ;;  %s619_s1 = inlined_call_operand.vmem [shape: f32[2,128], index: 1, kind: input, shape index: {}]   ;;  %s620_s2 = inlined_call_operand.vmem [shape: bf16[2,72,128], index: 2, kind: output, shape index: {}]  }
   0x1   :  { %s550_s11 = smov 0  }
   0x2 LB: > { %s21_s12 = sadd.s32 1, %s525_s10  ;;  %p415_p0 = scmp.ge.s32.totalorder %s529_s11, 1  ;;  %s529_s11 = sphi %s550_s11, %s12_s11   ;;  %s525_s10 = sphi %s548_s10, %s622_s10   ;;  %s521_s9 = sphi %s546_s9, %s621_s9  }
   0x3   : > { %p22_p1 = scmp.ge.s32.totalorder %s21_s12, 2  ;;  %p140_p2 = scmp.lt.s32.totalorder %s529_s11, 3 }
   0x5   : > { %s624_s12 = smov (%p22_p1, %s21_s12), 0  ;;  %p141_p3 = pnand %p415_p0, %p140_p2 }
   0x6   : > { %p172_p4 = scmp.lt.s32.totalorder (!%p141_p3), %s521_s9, 1  ;;  %v577_v0 = vld [vmem:[%s619_s1] ss:$0 sm:$0xff] (!%p141_p3)  ;;  %v419_v9 = vld [vmem:[%s619_s1 + $0x1] ss:$0 sm:$0xff] (!%p141_p3) }
   0x7   : > { %144 = sbr.rel (%p141_p3) target bundleno = 42 (0x2a), region = 28 }
   0xe   : > { %s626_s9 = smov (!%p172_p4, %s521_s9), 1 }
   0xf   : > { %s482_s13 = smul.u32 36, %s626_s9 }
  0x11   : > { %s572_s16 = scalar_lea.vmem %s618_s0, %s482_s13  ;;  %s599_s23 = scalar_lea.vmem %s620_s2, %s482_s13 }
  0x12   : > { %v441_v1 = vld [vmem:[%s572_s16] sm:$0xff]   ;;  %v476_v2 = vld [vmem:[%s572_s16 + $0x8] sm:$0xff]   ;;  %v477_v3 = vld [vmem:[%s572_s16 + $0x10] sm:$0xff]  }
  0x13   : > { %v442_v4 = vunpack.c.l.bf16 %v441_v1  ;;  %v443_v5 = vunpack.c.h.bf16 %v441_v1  ;;  %v446_v6 = vunpack.c.l.bf16 %v476_v2  ;;  %v447_v7 = vunpack.c.h.bf16 %v476_v2  ;;  %v478_v8 = vld [vmem:[%s572_s16 + $0x18] sm:$0xff]   ;;  %v200_v36 = vld [vmem:[%s572_s16 + $0x20] sm:$0xf] }
  0x14   : > { %v450_v10 = vunpack.c.l.bf16 %v477_v3  ;;  %v451_v11 = vunpack.c.h.bf16 %v477_v3  ;;  %v454_v12 = vunpack.c.l.bf16 %v478_v8  ;;  %v455_v13 = vunpack.c.h.bf16 %v478_v8 }
  0x15   : > { %v215_v14 = vmul.f32 %v442_v4, %v577_v0  ;;  %v216_v15 = vmul.f32 %v443_v5, %v577_v0  ;;  %v217_v16 = vmul.f32 %v446_v6, %v577_v0  ;;  %v218_v17 = vmul.f32 %v447_v7, %v577_v0 }
  0x16   : > { %v219_v18 = vmul.f32 %v450_v10, %v577_v0  ;;  %v220_v19 = vmul.f32 %v451_v11, %v577_v0  ;;  %v221_v20 = vmul.f32 %v454_v12, %v577_v0  ;;  %v222_v21 = vmul.f32 %v455_v13, %v577_v0 }
  0x17   : > { %v229_v22 = vadd.f32 %v419_v9, %v215_v14  ;;  %v230_v23 = vadd.f32 %v419_v9, %v216_v15  ;;  %v231_v24 = vadd.f32 %v419_v9, %v217_v16  ;;  %v232_v25 = vadd.f32 %v419_v9, %v218_v17 }
  0x18   : > { %v233_v26 = vadd.f32 %v419_v9, %v219_v18  ;;  %v234_v27 = vadd.f32 %v419_v9, %v220_v19  ;;  %v235_v28 = vadd.f32 %v419_v9, %v221_v20  ;;  %v236_v29 = vadd.f32 %v419_v9, %v222_v21 }
  0x19   : > { %vm238_vm0 = vcmp.ge.f32.partialorder %v229_v22, 0.0  ;;  %vm239_vm1 = vcmp.ge.f32.partialorder %v230_v23, 0.0  ;;  %v247_v30 = vmul.f32 0.2, %v229_v22  ;;  %v248_v31 = vmul.f32 0.2, %v230_v23 }
  0x1a   : > { %vm240_vm2 = vcmp.ge.f32.partialorder %v231_v24, 0.0  ;;  %vm241_vm3 = vcmp.ge.f32.partialorder %v232_v25, 0.0  ;;  %v249_v32 = vmul.f32 0.2, %v231_v24  ;;  %v250_v33 = vmul.f32 0.2, %v232_v25 }
  0x1b   : > { %v256_v34 = vsel %vm238_vm0, %v229_v22, %v247_v30  ;;  %v257_v35 = vsel %vm239_vm1, %v230_v23, %v248_v31  ;;  %vm242_vm4 = vcmp.ge.f32.partialorder %v233_v26, 0.0  ;;  %vm243_vm5 = vcmp.ge.f32.partialorder %v234_v27, 0.0 }
  0x1c   : > { %v459_v37 = vpack.c.bf16 %v257_v35, %v256_v34  ;;  %v258_v38 = vsel %vm240_vm2, %v231_v24, %v249_v32  ;;  %v259_v39 = vsel %vm241_vm3, %v232_v25, %v250_v33  ;;  %v251_v40 = vmul.f32 0.2, %v233_v26 }
  0x1d   : > { %v464_v41 = vpack.c.bf16 %v259_v39, %v258_v38  ;;  %v252_v42 = vmul.f32 0.2, %v234_v27  ;;  %vm244_vm6 = vcmp.ge.f32.partialorder %v235_v28, 0.0  ;;  %vm245_vm7 = vcmp.ge.f32.partialorder %v236_v29, 0.0 }
  0x1e   : > { %460 = vst [vmem:[%s599_s23] sm:$0xff] %v459_v37   ;;  %v260_v43 = vsel %vm242_vm4, %v233_v26, %v251_v40  ;;  %v253_v44 = vmul.f32 0.2, %v235_v28  ;;  %v254_v45 = vmul.f32 0.2, %v236_v29  ;;  %v209_v46 = vunpack.c.l.bf16 %v200_v36 }
  0x1f   : > { %479 = vst [vmem:[%s599_s23 + $0x8] sm:$0xff] %v464_v41   ;;  %v261_v47 = vsel %vm243_vm5, %v234_v27, %v252_v42 }
  0x20   : > { %v469_v48 = vpack.c.bf16 %v261_v47, %v260_v43  ;;  %v262_v49 = vsel %vm244_vm6, %v235_v28, %v253_v44  ;;  %v263_v50 = vsel %vm245_vm7, %v236_v29, %v254_v45  ;;  %v223_v51 = vmul.f32 %v577_v0, %v209_v46 }
  0x21   : > { %v474_v52 = vpack.c.bf16 %v263_v50, %v262_v49 }
  0x22   : > { %480 = vst [vmem:[%s599_s23 + $0x10] sm:$0xff] %v469_v48   ;;  %v237_v53 = vadd.f32 %v419_v9, %v223_v51 }
  0x23   : > { %481 = vst [vmem:[%s599_s23 + $0x18] sm:$0xff] %v474_v52  }
  0x24   : > { %vm246_vm8 = vcmp.ge.f32.partialorder %v237_v53, 0.0  ;;  %v255_v54 = vmul.f32 0.2, %v237_v53 }
  0x26   : > { %v264_v55 = vsel %vm246_vm8, %v237_v53, %v255_v54 }
  0x27   : > { %v439_v56 = vpack.c.bf16 %v264_v55, %v264_v55 }
  0x29   : > { %310 = vst [vmem:[%s599_s23 + $0x20] sm:$0xf] %v439_v56 }
  0x2a PF: > { %s12_s11 = sadd.s32 1, %s529_s11   ;;  %s621_s9 = smov %s525_s10 }
  0x2b   : > { %p9_p5 = scmp.ge.s32.totalorder %s12_s11, 4   ;;  %s622_s10 = smov %s624_s12 }
  0x2d   :  { %11 = sbr.rel (!%p9_p5) target bundleno = 2 (0x2), region = 61 }

// kernel: dc_discriminator.9
= control target key start
LH: loop header
LB: loop body
LE: loop exit
PB: predicated region body
PF: predicated region fallthrough
CT: control target
= control target key end

     0   :  { %s4092_s18 = smov 0   ;;  %s4094_s19 = smov 0   ;;  %s5271_s0 = inlined_call_operand.vmem [shape: bf16[2,90,512], index: 0, kind: input, shape index: {}]   ;;  %s5272_s1 = inlined_call_operand.vmem [shape: bf16[4,512,128], index: 1, kind: input, shape index: {}]   ;;  %s5273_s2 = inlined_call_operand.vmem [shape: f32[1,128], index: 2, kind: input, shape index: {}]   ;;  %s5274_s3 = inlined_call_operand.vmem [shape: f32[1,128], index: 3, kind: input, shape index: {}]   ;;  %s5275_s4 = inlined_call_operand.vmem [shape: bf16[2,72,128], index: 4, kind: output, shape index: {0}]   ;;  %s5276_s5 = inlined_call_operand.vmem [shape: f32[2,128], index: 5, kind: output, shape index: {1}]  }
   0x1   :  { %s4096_s20 = smov 0  }
   0x2 LB: > { %s25_s21 = sadd.s32 1, %s4055_s19  ;;  %p3025_p0 = scmp.ge.s32.totalorder %s4059_s20, 1  ;;  %s4059_s20 = sphi %s4096_s20, %s16_s20   ;;  %s4055_s19 = sphi %s4094_s19, %s5300_s19   ;;  %s4051_s18 = sphi %s4092_s18, %s5299_s18  }
   0x3   : > { %p26_p1 = scmp.ge.s32.totalorder %s25_s21, 2  ;;  %p229_p2 = scmp.lt.s32.totalorder %s4059_s20, 3 }
   0x5   : > { %s5302_s21 = smov (%p26_p1, %s25_s21), 0  ;;  %p230_p3 = pnand %p3025_p0, %p229_p2 }
   0x6   : > { %v3855_v0 = vld [vmem:[%s5272_s1 + $0x140] sm:$0xff] (!%p230_p3)   ;;  %v3859_v4 = vld [vmem:[%s5272_s1 + $0x148] sm:$0xff] (!%p230_p3)   ;;  %v3863_v8 = vld [vmem:[%s5272_s1 + $0x150] sm:$0xff] (!%p230_p3)   ;;  %p274_p4 = scmp.lt.s32.totalorder (!%p230_p3), %s4051_s18, 1  ;;  %vm531_vm0 = vsmask.f32 (!%p230_p3), 7424 }
   0x7   : > { %233 = sbr.rel (%p230_p3) target bundleno = 481 (0x1e1), region = 36  ;;  %v3856_v1 = vld [vmem:[%s5272_s1 + $0x1c0] sm:$0xff] (!%p230_p3)   ;;  %3442 = vmatprep.subr.bf16.mxu0 (!%p230_p3), %v3855_v0  ;;  %v3860_v5 = vld [vmem:[%s5272_s1 + $0x1c8] sm:$0xff] (!%p230_p3)   ;;  %v3864_v9 = vld [vmem:[%s5272_s1 + $0x1d0] sm:$0xff] (!%p230_p3)   ;;  %vm2167_vm1 = vcmask (!%p230_p3), 1046528   ;;  %p3405_p5 = scmp.ne.s32.totalorder (!%p230_p3), %s4051_s18, 0 }
   0x8   : > { %v3857_v2 = vld [vmem:[%s5272_s1 + $0x100] sm:$0xff] (!%p230_p3)   ;;  %3488 = vmatprep.subr.bf16.mxu1 (!%p230_p3), %v3856_v1  ;;  %v3861_v6 = vld [vmem:[%s5272_s1 + $0x108] sm:$0xff] (!%p230_p3)   ;;  %v3865_v10 = vld [vmem:[%s5272_s1 + $0x110] sm:$0xff] (!%p230_p3)  }
   0x9   : > { %v3858_v3 = vld [vmem:[%s5272_s1 + $0x180] sm:$0xff] (!%p230_p3)   ;;  %3443 = vmatpush3.bf16.msra.mxu0 (!%p230_p3), %v3857_v2  ;;  %v3862_v7 = vld [vmem:[%s5272_s1 + $0x188] sm:$0xff] (!%p230_p3)   ;;  %v3866_v11 = vld [vmem:[%s5272_s1 + $0x190] sm:$0xff] (!%p230_p3)  }
   0xa   : > { %3489 = vmatpush3.bf16.msra.mxu1 (!%p230_p3), %v3858_v3  ;;  %3444 = vmatprep.subr.bf16.mxu0 (!%p230_p3), %v3859_v4  ;;  %v3867_v12 = vld [vmem:[%s5272_s1 + $0x158] sm:$0xff] (!%p230_p3)   ;;  %v3871_v16 = vld [vmem:[%s5272_s1 + $0x160] sm:$0xff] (!%p230_p3)   ;;  %v3875_v20 = vld [vmem:[%s5272_s1 + $0x168] sm:$0xff] (!%p230_p3)  }
   0xb   : > { %3490 = vmatprep.subr.bf16.mxu1 (!%p230_p3), %v3860_v5  ;;  %v3868_v13 = vld [vmem:[%s5272_s1 + $0x1d8] sm:$0xff] (!%p230_p3)   ;;  %v3872_v17 = vld [vmem:[%s5272_s1 + $0x1e0] sm:$0xff] (!%p230_p3)   ;;  %v3876_v21 = vld [vmem:[%s5272_s1 + $0x1e8] sm:$0xff] (!%p230_p3)  }
   0xc   : > { %v3869_v14 = vld [vmem:[%s5272_s1 + $0x118] sm:$0xff] (!%p230_p3)   ;;  %v3873_v18 = vld [vmem:[%s5272_s1 + $0x120] sm:$0xff] (!%p230_p3)   ;;  %v3877_v22 = vld [vmem:[%s5272_s1 + $0x128] sm:$0xff] (!%p230_p3)  }
   0xd   : > { %3445 = vmatpush3.bf16.msra.mxu0 (!%p230_p3), %v3861_v6  ;;  %v3870_v15 = vld [vmem:[%s5272_s1 + $0x198] sm:$0xff] (!%p230_p3)   ;;  %v3874_v19 = vld [vmem:[%s5272_s1 + $0x1a0] sm:$0xff] (!%p230_p3)   ;;  %v3878_v23 = vld [vmem:[%s5272_s1 + $0x1a8] sm:$0xff] (!%p230_p3)  }
   0xe   : > { %3491 = vmatpush3.bf16.msra.mxu1 %v3862_v7  ;;  %3446 = vmatprep.subr.bf16.mxu0 %v3863_v8  ;;  %s4180_s24 = scalar_select %p274_p4, %s4051_s18, 1  ;;  %v3879_v24 = vld [vmem:[%s5272_s1 + $0x170] sm:$0xff]   ;;  %v3883_v28 = vld [vmem:[%s5272_s1 + $0x178] sm:$0xff]   ;;  %v3895_v50 = vld [vmem:[%s5272_s1 + $0x40] sm:$0xff]  }
   0xf   : > { %3492 = vmatprep.subr.bf16.mxu1 %v3864_v9  ;;  %v3880_v25 = vld [vmem:[%s5272_s1 + $0x1f0] sm:$0xff]   ;;  %v3884_v29 = vld [vmem:[%s5272_s1 + $0x1f8] sm:$0xff]   ;;  %v3896_v59 = vld [vmem:[%s5272_s1 + $0xc0] sm:$0xff]  }
  0x10   : > { %s3810_s8 = smul.u32 192, %s4180_s24  ;;  %v3881_v26 = vld [vmem:[%s5272_s1 + $0x130] sm:$0xff]   ;;  %v3885_v30 = vld [vmem:[%s5272_s1 + $0x138] sm:$0xff]   ;;  %v3897_v7 = vld [vmem:[%s5272_s1] sm:$0xff]  }
  0x11   : > { %3447 = vmatpush3.bf16.msra.mxu0 %v3865_v10  ;;  %v3882_v27 = vld [vmem:[%s5272_s1 + $0x1b0] sm:$0xff]   ;;  %v3886_v31 = vld [vmem:[%s5272_s1 + $0x1b8] sm:$0xff]   ;;  %v3899_v10 = vld [vmem:[%s5272_s1 + $0x48] sm:$0xff]   ;;  %s3811_s30 = smul.u32 36, %s4180_s24 }
  0x12   : > { %3493 = vmatpush3.bf16.msra.mxu1 %v3866_v11  ;;  %3448 = vmatprep.subr.bf16.mxu0 %v3867_v12  ;;  %s4210_s23 = scalar_lea.vmem %s5271_s0, %s3810_s8 }
  0x13   : > { %3494 = vmatprep.subr.bf16.mxu1 %v3868_v13  ;;  %v302_v32 = vld [vmem:[%s4210_s23] sm:$0xff]  ;;  %v4220_v33 = vld [vmem:[%s4210_s23 + $0x10] sm:$0xff]  ;;  %v303_v37 = vld [vmem:[%s4210_s23 + $0x8] sm:$0xff]  ;;  %s5136_s7 = scalar_lea.vmem %s5275_s4, %s3811_s30 }
  0x14   : > { %v4223_v34 = vld [vmem:[%s4210_s23 + $0x20] sm:$0xff]  ;;  %v4226_v35 = vld [vmem:[%s4210_s23 + $0x30] sm:$0xff]  ;;  %v4229_v36 = vcombine.high %v302_v32, %v4220_v33  ;;  %v4233_v38 = vld [vmem:[%s4210_s23 + $0x18] sm:$0xff]  ;;  %v4236_v39 = vcombine.low %v302_v32, %v4220_v33 }
  0x15   : > { %3449 = vmatpush3.bf16.msra.mxu0 %v3869_v14  ;;  %v4240_v40 = vcombine.high %v4223_v34, %v4226_v35  ;;  %v4243_v41 = vld [vmem:[%s4210_s23 + $0x28] sm:$0xff]  ;;  %v4246_v42 = vld [vmem:[%s4210_s23 + $0x38] sm:$0xff]  ;;  %v4249_v43 = vcombine.high %v303_v37, %v4233_v38  ;;  %v4253_v44 = vcombine.low %v4223_v34, %v4226_v35  ;;  %v4256_v45 = vcombine.low %v303_v37, %v4233_v38  ;;  %v3898_v14 = vld [vmem:[%s5272_s1 + $0x80] sm:$0xff]  }
  0x16   : > { %3495 = vmatpush3.bf16.msra.mxu1 %v3870_v15  ;;  %3450 = vmatprep.subr.bf16.mxu0 %v3871_v16  ;;  %v545_v46 = vshrl.u32 %v4229_v36, 16  ;;  %v547_v47 = vshll.u32 %v4229_v36, 16  ;;  %v4262_v48 = vcombine.high %v4243_v41, %v4246_v42  ;;  %v533_v49 = vshrl.u32 %v4236_v39, 16  ;;  %v3900_v16 = vld [vmem:[%s5272_s1 + $0xc8] sm:$0xff]  }
  0x17   : > { %3496 = vmatprep.subr.bf16.mxu1 %v3872_v17  ;;  %v552_v51 = vshll.u32 %v4240_v40, 16  ;;  %v569_v52 = vshrl.u32 %v4249_v43, 16  ;;  %v571_v53 = vshll.u32 %v4249_v43, 16  ;;  %v535_v54 = vshll.u32 %v4236_v39, 16 }
  0x18   : > { %v549_v55 = vrot.slane %v547_v47, 1  ;;  %v576_v56 = vshll.u32 %v4262_v48, 16  ;;  %v540_v57 = vshll.u32 %v4253_v44, 16  ;;  %v4276_v58 = vcombine.low %v4243_v41, %v4246_v42 }
  0x19   : > { %3451 = vmatpush3.bf16.msra.mxu0 %v3873_v18  ;;  %v554_v60 = vrot.slane %v552_v51, 1  ;;  %v573_v61 = vrot.slane %v571_v53, 1  ;;  %v537_v62 = vrot.slane %v535_v54, 1  ;;  %v557_v63 = vshrl.u32 %v4256_v45, 16  ;;  %v3901_v18 = vld [vmem:[%s5272_s1 + $0x8] sm:$0xff]   ;;  %v3909_v53 = vld [vmem:[%s5272_s1 + $0x10] sm:$0xff]  }
  0x1a   : > { %3497 = vmatpush3.bf16.msra.mxu1 %v3874_v19  ;;  %3452 = vmatprep.subr.bf16.mxu0 %v3875_v20  ;;  %v550_v0 = vor.u32 %v549_v55, %v545_v46  ;;  %v578_v1 = vrot.slane %v576_v56, 1  ;;  %v542_v2 = vrot.slane %v540_v57, 1  ;;  %v559_v3 = vshll.u32 %v4256_v45, 16 }
  0x1b   : > { %3498 = vmatprep.subr.bf16.mxu1 %v3876_v21  ;;  %v574_v4 = vor.u32 %v573_v61, %v569_v52  ;;  %v538_v5 = vor.u32 %v537_v62, %v533_v49  ;;  %v564_v6 = vshll.u32 %v4276_v58, 16  ;;  %v588_v17 = vshrl.u32 %v4240_v40, 16  ;;  %v3902_v21 = vld [vmem:[%s5272_s1 + $0x88] sm:$0xff]   ;;  %v3907_v49 = vld [vmem:[%s5272_s1 + $0x50] sm:$0xff]  }
  0x1c   : > { %v555_v8 = vsel %vm531_vm0, %v550_v0, %v554_v60  ;;  %v561_v9 = vrot.slane %v559_v3, 1  ;;  %v604_v19 = vshrl.u32 %v4262_v48, 16  ;;  %v3908_v52 = vld [vmem:[%s5272_s1 + $0xd0] sm:$0xff]  }
  0x1d   : > { %3453 = vmatpush3.bf16.msra.mxu0 %v3877_v22  ;;  %932 = vmatprep.mubr.bf16.mxu0 %v555_v8  ;;  %v579_v11 = vsel %vm531_vm0, %v574_v4, %v578_v1  ;;  %v543_v12 = vsel %vm531_vm0, %v538_v5, %v542_v2  ;;  %v566_v13 = vrot.slane %v564_v6, 1  ;;  %v310_v22 = vld [vmem:[%s4210_s23 + $0x40] sm:$0xff]  ;;  %v315_v4 = vld [vmem:[%s4210_s23 + $0x68] sm:$0xff]  ;;  %v4365_v5 = vld [vmem:[%s4210_s23 + $0x78] sm:$0xff] }
  0x1e   : > { %3499 = vmatpush3.bf16.msra.mxu1 %v3878_v23  ;;  %3454 = vmatprep.subr.bf16.mxu0 %v3879_v24  ;;  %v562_v15 = vor.u32 %v561_v9, %v557_v63  ;;  %v4310_v23 = vld [vmem:[%s4210_s23 + $0x50] sm:$0xff]  ;;  %v311_v24 = vld [vmem:[%s4210_s23 + $0x48] sm:$0xff]  ;;  %v606_v37 = vor.u32 %v604_v19, %v578_v1  ;;  %v4345_v54 = vcombine.high %v4226_v35, %v310_v22  ;;  %v314_v63 = vld [vmem:[%s4210_s23 + $0x60] sm:$0xff] }
  0x1f   : > { %3500 = vmatprep.subr.bf16.mxu1 %v3880_v25  ;;  %1004 = vmatprep.mubr.bf16.mxu1 %v579_v11  ;;  %v580_v25 = vshrl.u32 %v4253_v44, 16  ;;  %v4348_v55 = vcombine.low %v4246_v42, %v311_v24 }
  0x20   : > { %v567_v20 = vsel %vm531_vm0, %v562_v15, %v566_v13  ;;  %v3914_v15 = vld [vmem:[%s5272_s1 + $0xd8] sm:$0xff]  }
  0x21   : > { %3455 = vmatpush3.bf16.msra.mxu0 %v3881_v26  ;;  %v596_v26 = vshrl.u32 %v4276_v58, 16  ;;  %v582_v46 = vor.u32 %v580_v25, %v542_v2  ;;  %v4360_v2 = vld [vmem:[%s4210_s23 + $0x70] sm:$0xff]  ;;  %v3918_v25 = vld [vmem:[%s5272_s1 + $0x98] sm:$0xff]  }
  0x22   : > { %3501 = vmatpush3.bf16.msra.mxu1 %v3882_v27  ;;  %3456 = vmatprep.subr.bf16.mxu0 %v3883_v28  ;;  %v4316_v27 = vcombine.high %v310_v22, %v4310_v23  ;;  %v590_v28 = vor.u32 %v588_v17, %v554_v60  ;;  %v4353_v60 = vcombine.high %v4246_v42, %v311_v24 }
  0x23   : > { %3502 = vmatprep.subr.bf16.mxu1 %v3884_v29  ;;  %v4319_v29 = vld [vmem:[%s4210_s23 + $0x58] sm:$0xff]  ;;  %v598_v57 = vor.u32 %v596_v26, %v566_v13  ;;  %v4368_v42 = vcombine.high %v4310_v23, %v314_v63  ;;  %v4373_v8 = vcombine.high %v314_v63, %v4360_v2 }
  0x24   : > { %v4328_v32 = vcombine.high %v311_v24, %v4319_v29  ;;  %v4331_v47 = vcombine.low %v311_v24, %v4319_v29  ;;  %v620_v3 = vshrl.u32 %v4316_v27, 16  ;;  %v3917_v24 = vld [vmem:[%s5272_s1 + $0x18] sm:$0xff]   ;;  %v4404_v26 = vcombine.high %v4319_v29, %v315_v4 }
  0x25   : > { %3457 = vmatpush3.bf16.msra.mxu0 %v3885_v30  ;;  %v4322_v30 = vcombine.low %v310_v22, %v4310_v23 }
  0x26   : > { %3503 = vmatpush3.bf16.msra.mxu1 %v3886_v31  ;;  %3534 = vmatprep.subr.bf16.mxu0 %v3895_v50  ;;  %v4325_v31 = vcombine.low %v4226_v35, %v310_v22  ;;  %v592_v50 = vshll.u32 %v4316_v27, 16  ;;  %v608_v56 = vshll.u32 %v4328_v32, 16  ;;  %v3910_v35 = vld [vmem:[%s5272_s1 + $0x90] sm:$0xff]   ;;  %v636_v9 = vshrl.u32 %v4328_v32, 16 }
  0x27   : > { %3580 = vmatprep.subr.bf16.mxu1 %v3896_v59  ;;  %v584_v51 = vshll.u32 %v4322_v30, 16  ;;  %v600_v59 = vshll.u32 %v4331_v47, 16  ;;  %v612_v19 = vshrl.u32 %v4322_v30, 16  ;;  %v628_v22 = vshrl.u32 %v4331_v47, 16 }
  0x28   : > { %933 = vmatmul.mubr.bf16.vlgmr.msra.gmra.mrb[0].mxu0 %v543_v12  ;;  %v594_v61 = vrot.slane %v592_v50, 1  ;;  %v610_v0 = vrot.slane %v608_v56, 1  ;;  %v3920_v56 = vld [vmem:[%s5272_s1 + $0xe0] sm:$0xff]  }
  0x29   : > { %3535 = vmatpush3.bf16.msra.mxu0 %v3897_v7  ;;  %1005 = vmatmul.mubr.bf16.vlgmr.msra.gmra.mrb[0].mxu1 %v567_v20  ;;  %v586_v62 = vrot.slane %v584_v51, 1  ;;  %v602_v1 = vrot.slane %v600_v59, 1 }
  0x2a   : > { %3536 = vmatprep.subr.bf16.mxu0 %v3899_v10  ;;  %3581 = vmatpush3.bf16.msra.mxu1 %v3898_v14  ;;  %v595_v6 = vsel %vm531_vm0, %v590_v28, %v594_v61  ;;  %v3913_v10 = vld [vmem:[%s5272_s1 + $0x58] sm:$0xff]   ;;  %v611_v11 = vsel %vm531_vm0, %v606_v37, %v610_v0  ;;  %v622_v13 = vor.u32 %v620_v3, %v594_v61  ;;  %v3921_v61 = vld [vmem:[%s5272_s1 + $0x20] sm:$0xff]  }
  0x2b   : > { %3582 = vmatprep.subr.bf16.mxu1 %v3900_v16  ;;  %v587_v7 = vsel %vm531_vm0, %v582_v46, %v586_v62  ;;  %940 = vmatprep.mubr.bf16.mxu0 %v595_v6  ;;  %v603_v12 = vsel %vm531_vm0, %v598_v57, %v602_v1  ;;  %v4382_v14 = vcombine.high %v315_v4, %v4365_v5  ;;  %v624_v16 = vshll.u32 %v4373_v8, 16  ;;  %v4436_v6 = vld [vmem:[%s4210_s23 + $0x88] sm:$0xff] }
  0x2c   : > { %1012 = vmatprep.mubr.bf16.mxu1 %v611_v11  ;;  %v638_v17 = vor.u32 %v636_v9, %v610_v0  ;;  %v614_v37 = vor.u32 %v612_v19, %v586_v62  ;;  %v630_v51 = vor.u32 %v628_v22, %v602_v1  ;;  %v4418_v57 = vcombine.low %v4319_v29, %v315_v4  ;;  %v3922_v29 = vld [vmem:[%s5272_s1 + $0xa0] sm:$0xff]  }
  0x2d   : > { %3537 = vmatpush3.bf16.msra.mxu0 %v3901_v18  ;;  %v4389_v18 = vcombine.low %v314_v63, %v4360_v2  ;;  %v640_v20 = vshll.u32 %v4382_v14, 16  ;;  %v626_v28 = vrot.slane %v624_v16, 1  ;;  %v4430_v0 = vld [vmem:[%s4210_s23 + $0x80] sm:$0xff]  ;;  %v652_v1 = vshrl.u32 %v4373_v8, 16 }
  0x2e   : > { %3538 = vmatprep.subr.bf16.mxu0 %v3907_v49  ;;  %3583 = vmatpush3.bf16.msra.mxu1 %v3902_v21  ;;  %v4394_v21 = vcombine.low %v315_v4, %v4365_v5  ;;  %v4408_v49 = vcombine.low %v4310_v23, %v314_v63  ;;  %v384_v4 = vld [vmem:[%s4210_s23 + $0x90] sm:$0x11]  ;;  %v668_v9 = vshrl.u32 %v4382_v14, 16 }
  0x2f   : > { %3584 = vmatprep.subr.bf16.mxu1 %v3908_v52  ;;  %v616_v46 = vshll.u32 %v4389_v18, 16  ;;  %v642_v50 = vrot.slane %v640_v20, 1  ;;  %v627_v23 = vsel %vm531_vm0, %v622_v13, %v626_v28  ;;  %v3927_v13 = vld [vmem:[%s5272_s1 + $0x68] sm:$0xff]   ;;  %v644_v16 = vshrl.u32 %v4389_v18, 16 }
  0x30   : > { %941 = vmatmul.mubr.bf16.gmra.mrb[4].mxu0 %v587_v7  ;;  %v632_v52 = vshll.u32 %v4394_v21, 16  ;;  %v385_v7 = vld [vmem:[%s4210_s23 + $0x98] sm:$0x11]  ;;  %v660_v19 = vshrl.u32 %v4394_v21, 16 }
  0x31   : > { %3539 = vmatpush3.bf16.msra.mxu0 %v3909_v53  ;;  %1013 = vmatmul.mubr.bf16.gmra.mrb[4].mxu1 %v603_v12  ;;  %v3919_v53 = vld [vmem:[%s5272_s1 + $0x60] sm:$0xff]   ;;  %v618_v59 = vrot.slane %v616_v46, 1  ;;  %v643_v62 = vsel %vm531_vm0, %v638_v17, %v642_v50  ;;  %v3111_v11 = vcombine.high %v4436_v6, %v385_v7  ;;  %v3108_v12 = vcombine.low %v4430_v0, %v384_v4 }
  0x32   : > { %3540 = vmatprep.subr.bf16.mxu0 %v3913_v10  ;;  %3585 = vmatpush3.bf16.msra.mxu1 %v3910_v35  ;;  %v634_v35 = vrot.slane %v632_v52, 1  ;;  %v3109_v10 = vcombine.high %v4430_v0, %v384_v4  ;;  %v3110_v17 = vcombine.low %v4436_v6, %v385_v7  ;;  %v670_v22 = vor.u32 %v668_v9, %v642_v50  ;;  %v3930_v50 = vld [vmem:[%s5272_s1 + $0xa8] sm:$0xff]   ;;  %v3932_v7 = vld [vmem:[%s5272_s1 + $0xf0] sm:$0xff]  }
  0x33   : > { %3586 = vmatprep.subr.bf16.mxu1 %v3914_v15  ;;  %948 = vmatprep.mubr.bf16.mxu0 %v627_v23  ;;  %v619_v63 = vsel %vm531_vm0, %v614_v37, %v618_v59  ;;  %v654_v15 = vor.u32 %v652_v1, %v626_v28  ;;  %v3928_v37 = vld [vmem:[%s5272_s1 + $0xe8] sm:$0xff]   ;;  %v646_v46 = vor.u32 %v644_v16, %v618_v59  ;;  %v3931_v59 = vld [vmem:[%s5272_s1 + $0x70] sm:$0xff]  }
  0x34   : > { %1020 = vmatprep.mubr.bf16.mxu1 %v643_v62  ;;  %v635_v3 = vsel %vm531_vm0, %v630_v51, %v634_v35  ;;  %v656_v20 = vshll.u32 %v3109_v10, 16  ;;  %v662_v51 = vor.u32 %v660_v19, %v634_v35  ;;  %v664_v52 = vshll.u32 %v3110_v17, 16  ;;  %v3929_v28 = vld [vmem:[%s5272_s1 + $0x28] sm:$0xff]   ;;  %v3934_v19 = vld [vmem:[%s5272_s1 + $0xb0] sm:$0xff]  }
  0x35   : > { %3541 = vmatpush3.bf16.msra.mxu0 %v3917_v24  ;;  %v672_v24 = vshll.u32 %v3111_v11, 16  ;;  %v4467_v35 = vcombine.high %v4365_v5, %v4436_v6  ;;  %v679_v9 = vshrl.u32 %v3109_v10, 16  ;;  %v676_v10 = vshrl.u32 %v3108_v12, 16 }
  0x36   : > { %3542 = vmatprep.subr.bf16.mxu0 %v3919_v53  ;;  %3587 = vmatpush3.bf16.msra.mxu1 %v3918_v25  ;;  %v648_v25 = vshll.u32 %v3108_v12, 16  ;;  %v658_v53 = vrot.slane %v656_v20, 1  ;;  %v666_v62 = vrot.slane %v664_v52, 1  ;;  %v3937_v12 = vld [vmem:[%s5272_s1 + $0x38] sm:$0xff]   ;;  %v3247_v52 = vcombine.high %v4233_v38, %v4243_v41 }
  0x37   : > { %3588 = vmatprep.subr.bf16.mxu1 %v3920_v56  ;;  %v674_v56 = vrot.slane %v672_v24, 1  ;;  %v3936_v24 = vld [vmem:[%s5272_s1 + $0xf8] sm:$0xff]  }
  0x38   : > { %949 = vmatmul.mubr.bf16.gmra.mrb[8].mxu0 %v619_v63  ;;  %v650_v23 = vrot.slane %v648_v25, 1  ;;  %v4475_v63 = vcombine.low %v4365_v5, %v4436_v6  ;;  %v659_v1 = vsel %vm531_vm0, %v654_v15, %v658_v53  ;;  %v3933_v5 = vld [vmem:[%s5272_s1 + $0x30] sm:$0xff]   ;;  %v3245_v15 = vcombine.high %v4220_v33, %v4223_v34 }
  0x39   : > { %3543 = vmatpush3.bf16.msra.mxu0 %v3921_v61  ;;  %1021 = vmatmul.mubr.bf16.gmra.mrb[8].mxu1 %v635_v3  ;;  %v4460_v61 = vcombine.high %v4360_v2, %v4430_v0  ;;  %v675_v3 = vsel %vm531_vm0, %v670_v22, %v674_v56  ;;  %v681_v16 = vor.u32 %v679_v9, %v658_v53  ;;  %v682_v22 = vshrl.u32 %v3110_v17, 16  ;;  %v3938_v17 = vld [vmem:[%s5272_s1 + $0xb8] sm:$0xff]   ;;  %v3939_v53 = vld [vmem:[%s5272_s1 + $0x240] sm:$0xff]  }
  0x3a   : > { %3589 = vmatpush3.bf16.msra.mxu1 %v3922_v29  ;;  %3544 = vmatprep.subr.bf16.mxu0 %v3927_v13  ;;  %v4471_v29 = vcombine.low %v4360_v2, %v4430_v0  ;;  %v651_v4 = vsel %vm531_vm0, %v646_v46, %v650_v23  ;;  %v667_v2 = vsel %vm531_vm0, %v662_v51, %v666_v62  ;;  %v685_v13 = vshrl.u32 %v3111_v11, 16  ;;  %v3935_v11 = vld [vmem:[%s5272_s1 + $0x78] sm:$0xff]  }
  0x3b   : > { %3590 = vmatprep.subr.bf16.mxu1 %v3928_v37  ;;  %956 = vmatprep.mubr.bf16.mxu0 %v659_v1  ;;  %v1582_v25 = vshrl.u32 %v3245_v15, 16  ;;  %v1584_v37 = vshll.u32 %v3245_v15, 16  ;;  %v678_v46 = vor.u32 %v676_v10, %v650_v23  ;;  %v1589_v51 = vshll.u32 %v4345_v54, 16  ;;  %v3940_v23 = vld [vmem:[%s5272_s1 + $0x2c0] sm:$0xff]  }
  0x3c   : > { %1028 = vmatprep.mubr.bf16.mxu1 %v675_v3  ;;  %v687_v20 = vor.u32 %v685_v13, %v674_v56  ;;  %v1606_v1 = vshrl.u32 %v3247_v52, 16  ;;  %v1608_v3 = vshll.u32 %v3247_v52, 16  ;;  %v1577_v10 = vshll.u32 %v4325_v31, 16  ;;  %v3951_v52 = vld [vmem:[%s5272_s1 + $0x258] sm:$0xff]  }
  0x3d   : > { %3545 = vmatpush3.bf16.msra.mxu0 %v3929_v28  ;;  %v684_v28 = vor.u32 %v682_v22, %v666_v62  ;;  %v1586_v56 = vrot.slane %v1584_v37, 1  ;;  %v3244_v62 = vcombine.low %v4220_v33, %v4223_v34  ;;  %v3943_v33 = vld [vmem:[%s5272_s1 + $0x248] sm:$0xff]  }
  0x3e   : > { %3591 = vmatpush3.bf16.msra.mxu1 %v3930_v50  ;;  %3546 = vmatprep.subr.bf16.mxu0 %v3931_v59  ;;  %v1591_v50 = vrot.slane %v1589_v51, 1  ;;  %v1610_v9 = vrot.slane %v1608_v3, 1  ;;  %v1641_v3 = vshrl.u32 %v4353_v60, 16 }
  0x3f   : > { %3592 = vmatprep.subr.bf16.mxu1 %v3932_v7  ;;  %v1587_v59 = vor.u32 %v1586_v56, %v1582_v25  ;;  %v1613_v7 = vshll.u32 %v4353_v60, 16  ;;  %v1572_v15 = vshll.u32 %v3244_v62, 16  ;;  %v1629_v56 = vshll.u32 %v4368_v42, 16 }
  0x40   : > { %957 = vmatmul.mubr.bf16.gmra.mrb[12].mxu0 %v651_v4  ;;  %v1611_v34 = vor.u32 %v1610_v9, %v1606_v1 }
  0x41   : > { %1029 = vmatmul.mubr.bf16.gmra.mrb[12].mxu1 %v667_v2  ;;  %964 = vmatprep.mubr.bf16.mxu0 %v681_v16  ;;  %v4517_v4 = vsel %vm531_vm0, %v1587_v59, %v1591_v50  ;;  %v3941_v2 = vld [vmem:[%s5272_s1 + $0x200] sm:$0xff]   ;;  %v1615_v13 = vrot.slane %v1613_v7, 1  ;;  %v3246_v16 = vcombine.low %v4233_v38, %v4243_v41  ;;  %v1574_v22 = vrot.slane %v1572_v15, 1  ;;  %v3947_v38 = vld [vmem:[%s5272_s1 + $0x250] sm:$0xff]  }
  0x42   : > { %3547 = vmatpush3.bf16.msra.mxu0 %v3933_v5  ;;  %1036 = vmatprep.mubr.bf16.mxu1 %v687_v20  ;;  %v1570_v5 = vshrl.u32 %v3244_v62, 16  ;;  %v3945_v20 = vld [vmem:[%s5272_s1 + $0x208] sm:$0xff]   ;;  %v3954_v62 = vld [vmem:[%s5272_s1 + $0x298] sm:$0xff]   ;;  %v1631_v7 = vrot.slane %v1629_v56, 1  ;;  %v1649_v56 = vshrl.u32 %v4408_v49, 16 }
  0x43   : > { %3593 = vmatpush3.bf16.msra.mxu1 %v3934_v19  ;;  %3548 = vmatprep.subr.bf16.mxu0 %v3935_v11  ;;  %v4536_v19 = vsel %vm531_vm0, %v1611_v34, %v1615_v13  ;;  %v3946_v11 = vld [vmem:[%s5272_s1 + $0x288] sm:$0xff]   ;;  %v1594_v25 = vshrl.u32 %v3246_v16, 16  ;;  %v1643_v9 = vor.u32 %v1641_v3, %v1615_v13  ;;  %v1621_v34 = vshll.u32 %v4408_v49, 16  ;;  %v3973_v3 = vld [vmem:[%s5272_s1 + $0x238] sm:$0xff]  }
  0x44   : > { %3594 = vmatprep.subr.bf16.mxu1 %v3936_v24  ;;  %v1579_v24 = vrot.slane %v1577_v10, 1  ;;  %v1575_v41 = vor.u32 %v1574_v22, %v1570_v5  ;;  %v3959_v5 = vld [vmem:[%s5272_s1 + $0x268] sm:$0xff]  }
  0x45   : > { %v1623_v10 = vrot.slane %v1621_v34, 1 }
  0x46   : > { %3549 = vmatpush3.bf16.msra.mxu0 %v3937_v12  ;;  %v1596_v12 = vshll.u32 %v3246_v16, 16  ;;  %v4555_v37 = vsel %vm531_vm0, %v1575_v41, %v1579_v24  ;;  %v3960_v16 = vld [vmem:[%s5272_s1 + $0x2e8] sm:$0xff]   ;;  %v1657_v41 = vshrl.u32 %v4368_v42, 16 }
  0x47   : > { %3595 = vmatpush3.bf16.msra.mxu1 %v3938_v17  ;;  %3626 = vmatprep.subr.bf16.mxu0 %v3939_v53  ;;  %v3952_v53 = vld [vmem:[%s5272_s1 + $0x2d8] sm:$0xff]  }
  0x48   : > { %965 = vmatmul.mubr.bf16.gmra.mrb[16].mxu0 %v678_v46  ;;  %3672 = vmatprep.subr.bf16.mxu1 %v3940_v23  ;;  %v3949_v46 = vld [vmem:[%s5272_s1 + $0x210] sm:$0xff]   ;;  %v1598_v17 = vrot.slane %v1596_v12, 1  ;;  %v3953_v23 = vld [vmem:[%s5272_s1 + $0x218] sm:$0xff]   ;;  %v1659_v12 = vor.u32 %v1657_v41, %v1631_v7  ;;  %v2180_v41 = vrot.slane %v4408_v49, 1 }
  0x49   : > { %1037 = vmatmul.mubr.bf16.gmra.mrb[16].mxu1 %v684_v28  ;;  %1292 = vmatprep.mubr.bf16.mxu0 %v4229_v36  ;;  %v3942_v36 = vld [vmem:[%s5272_s1 + $0x280] sm:$0xff]  }
  0x4a   : > { %1364 = vmatprep.mubr.bf16.mxu1 %v4249_v43  ;;  %v3944_v43 = vld [vmem:[%s5272_s1 + $0x2c8] sm:$0xff]   ;;  %v1599_v28 = vor.u32 %v1598_v17, %v1594_v25 }
  0x50   : > { %1293 = vmatmul.mubr.bf16.vlgmr.msra.gmra.mrb[20].mxu0 %v4236_v39  ;;  %v3948_v39 = vld [vmem:[%s5272_s1 + $0x2d0] sm:$0xff]  }
  0x51   : > { %1365 = vmatmul.mubr.bf16.vlgmr.msra.gmra.mrb[20].mxu1 %v4256_v45  ;;  %3627 = vmatpush3.bf16.msra.mxu0 %v3941_v2  ;;  %v1601_v45 = vshll.u32 %v4348_v55, 16 }
  0x52   : > { %3673 = vmatpush3.bf16.msra.mxu1 %v3942_v36  ;;  %3628 = vmatprep.subr.bf16.mxu0 %v3943_v33  ;;  %v1617_v36 = vshrl.u32 %v4325_v31, 16 }
  0x53   : > { %3674 = vmatprep.subr.bf16.mxu1 %v3944_v43  ;;  %1300 = vmatprep.mubr.bf16.mxu0 %v4240_v40  ;;  %v3950_v40 = vld [vmem:[%s5272_s1 + $0x290] sm:$0xff]   ;;  %v1603_v51 = vrot.slane %v1601_v45, 1  ;;  %v1633_v43 = vshrl.u32 %v4348_v55, 16 }
  0x54   : > { %1372 = vmatprep.mubr.bf16.mxu1 %v4262_v48  ;;  %v1625_v48 = vshrl.u32 %v4345_v54, 16  ;;  %v1619_v33 = vor.u32 %v1617_v36, %v1579_v24  ;;  %v3962_v24 = vld [vmem:[%s5272_s1 + $0x2a8] sm:$0xff]   ;;  %v3984_v36 = vld [vmem:[%s5272_s1 + $0x3c0] sm:$0xff]  }
  0x55   : > { %3629 = vmatpush3.bf16.msra.mxu0 %v3945_v20  ;;  %v4578_v59 = vsel %vm531_vm0, %v1599_v28, %v1603_v51  ;;  %v3961_v20 = vld [vmem:[%s5272_s1 + $0x228] sm:$0xff]   ;;  %v1635_v22 = vor.u32 %v1633_v43, %v1603_v51  ;;  %v3968_v51 = vld [vmem:[%s5272_s1 + $0x2b0] sm:$0xff]   ;;  %v1677_v28 = vshll.u32 %v4467_v35, 16 }
  0x56   : > { %3675 = vmatpush3.bf16.msra.mxu1 %v3946_v11  ;;  %3630 = vmatprep.subr.bf16.mxu0 %v3947_v38  ;;  %v1627_v1 = vor.u32 %v1625_v48, %v1591_v50  ;;  %v1645_v50 = vshll.u32 %v4404_v26, 16  ;;  %v1637_v11 = vshll.u32 %v4418_v57, 16  ;;  %v4625_v38 = vsel %vm531_vm0, %v1619_v33, %v1623_v10  ;;  %v3971_v48 = vld [vmem:[%s5272_s1 + $0x278] sm:$0xff]   ;;  %v3987_v43 = vld [vmem:[%s5272_s1 + $0x348] sm:$0xff]  }
  0x57   : > { %3676 = vmatprep.subr.bf16.mxu1 %v3948_v39  ;;  %v1661_v39 = vshll.u32 %v4460_v61, 16 }
  0x58   : > { %1301 = vmatmul.mubr.bf16.gmra.mrb[24].mxu0 %v4253_v44  ;;  %v3955_v44 = vld [vmem:[%s5272_s1 + $0x260] sm:$0xff]   ;;  %v4595_v2 = vsel %vm531_vm0, %v1627_v1, %v1631_v7  ;;  %v1647_v13 = vrot.slane %v1645_v50, 1  ;;  %v1639_v25 = vrot.slane %v1637_v11, 1  ;;  %v4666_v1 = vrot.slane %v1677_v28, 1 }
  0x59   : > { %1373 = vmatmul.mubr.bf16.gmra.mrb[24].mxu1 %v4276_v58  ;;  %3631 = vmatpush3.bf16.msra.mxu0 %v3949_v46  ;;  %v3956_v58 = vld [vmem:[%s5272_s1 + $0x2e0] sm:$0xff]   ;;  %v3145_v46 = vcombine.high %v4430_v0, %v4430_v0  ;;  %v4646_v17 = vrot.slane %v1661_v39, 1  ;;  %v1653_v7 = vshll.u32 %v4471_v29, 16  ;;  %v2169_v11 = vrot.slane %v4325_v31, 1  ;;  %v3997_v39 = vld [vmem:[%s5272_s1 + $0x310] sm:$0xff]  }
  0x5a   : > { %3677 = vmatpush3.bf16.msra.mxu1 %v3950_v40  ;;  %1308 = vmatprep.mubr.bf16.mxu0 %v4316_v27  ;;  %v3957_v27 = vld [vmem:[%s5272_s1 + $0x220] sm:$0xff]   ;;  %v4609_v15 = vsel %vm531_vm0, %v1643_v9, %v1647_v13  ;;  %v4638_v45 = vsel %vm531_vm0, %v1635_v22, %v1639_v25  ;;  %v3147_v40 = vcombine.high %v4436_v6, %v4436_v6  ;;  %v2186_v22 = vrot.slane %v4404_v26, 1 }
  0x5b   : > { %1380 = vmatprep.mubr.bf16.mxu1 %v4328_v32  ;;  %3632 = vmatprep.subr.bf16.mxu0 %v3951_v52  ;;  %v3958_v32 = vld [vmem:[%s5272_s1 + $0x2a0] sm:$0xff]   ;;  %v4684_v50 = vrot.slane %v1653_v7, 1  ;;  %v1697_v7 = vshrl.u32 %v4475_v63, 16 }
  0x5c   : > { %3678 = vmatprep.subr.bf16.mxu1 %v3952_v53  ;;  %v4659_v53 = vsel %vm531_vm0, %v1659_v12, %v4646_v17  ;;  %v3983_v9 = vld [vmem:[%s5272_s1 + $0x340] sm:$0xff]  }
  0x5d   : > { %3633 = vmatpush3.bf16.msra.mxu0 %v3953_v23  ;;  %v3972_v23 = vld [vmem:[%s5272_s1 + $0x2f8] sm:$0xff]   ;;  %v4761_v12 = vld [vmem:[%s4210_s23 + $0x94] ss:$16 sps:$4 sm:$0x1f]  }
  0x5e   : > { %3679 = vmatpush3.bf16.msra.mxu1 %v3954_v62  ;;  %3634 = vmatprep.subr.bf16.mxu0 %v3955_v44  ;;  %v1651_v62 = vor.u32 %v1649_v56, %v1623_v10  ;;  %v3989_v10 = vld [vmem:[%s5272_s1 + $0x308] sm:$0xff]   ;;  %v1693_v28 = vshll.u32 %v4761_v12, 16  ;;  %v4006_v56 = vld [vmem:[%s5272_s1 + $0x398] sm:$0xff]   ;;  %v2198_v31 = vrot.slane %v4761_v12, 1 }
  0x5f   : > { %3680 = vmatprep.subr.bf16.mxu1 %v3956_v58  ;;  %v3144_v58 = vcombine.low %v4430_v0, %v4430_v0 }
  0x60   : > { %1309 = vmatmul.mubr.bf16.gmra.mrb[28].mxu0 %v4322_v30  ;;  %v3963_v30 = vld [vmem:[%s5272_s1 + $0x270] sm:$0xff]   ;;  %v4696_v33 = vsel %vm531_vm0, %v1651_v62, %v4684_v50  ;;  %v4007_v62 = vld [vmem:[%s5272_s1 + $0x360] sm:$0xff]  }
  0x61   : > { %1381 = vmatmul.mubr.bf16.gmra.mrb[28].mxu1 %v4331_v47  ;;  %3635 = vmatpush3.bf16.msra.mxu0 %v3957_v27  ;;  %v3964_v47 = vld [vmem:[%s5272_s1 + $0x2f0] sm:$0xff]  }
  0x62   : > { %3681 = vmatpush3.bf16.msra.mxu1 %v3958_v32  ;;  %1316 = vmatprep.mubr.bf16.mxu0 %v4373_v8  ;;  %v1673_v8 = vshrl.u32 %v4404_v26, 16  ;;  %v3146_v32 = vcombine.low %v4436_v6, %v4436_v6  ;;  %v3985_v6 = vld [vmem:[%s5272_s1 + $0x300] sm:$0xff]  }
  0x63   : > { %1388 = vmatprep.mubr.bf16.mxu1 %v4382_v14  ;;  %3636 = vmatprep.subr.bf16.mxu0 %v3959_v5  ;;  %v3967_v14 = vld [vmem:[%s5272_s1 + $0x230] sm:$0xff]   ;;  %v3986_v5 = vld [vmem:[%s5272_s1 + $0x380] sm:$0xff]  }
  0x64   : > { %3682 = vmatprep.subr.bf16.mxu1 %v3960_v16  ;;  %v1675_v52 = vor.u32 %v1673_v8, %v1647_v13  ;;  %v1669_v13 = vshll.u32 %v4475_v63, 16  ;;  %v3988_v16 = vld [vmem:[%s5272_s1 + $0x3c8] sm:$0xff]  }
  0x65   : > { %3637 = vmatpush3.bf16.msra.mxu0 %v3961_v20  ;;  %v2178_v20 = vrot.slane %v4353_v60, 1  ;;  %v4768_v8 = vld [vmem:[%s4210_s23 + $0x9c] ss:$16 sps:$4 sm:$0x1f]  }
  0x66   : > { %3683 = vmatpush3.bf16.msra.mxu1 %v3962_v24  ;;  %3638 = vmatprep.subr.bf16.mxu0 %v3963_v30  ;;  %v4678_v44 = vsel %vm531_vm0, %v1675_v52, %v4666_v1  ;;  %v4698_v34 = vrot.slane %v1669_v13, 1  ;;  %v3990_v30 = vld [vmem:[%s5272_s1 + $0x388] sm:$0xff]   ;;  %v4005_v52 = vld [vmem:[%s5272_s1 + $0x318] sm:$0xff]   ;;  %v1722_v26 = vshrl.u32 %v4768_v8, 16 }
  0x67   : > { %3684 = vmatprep.subr.bf16.mxu1 %v3964_v47  ;;  %v3996_v47 = vld [vmem:[%s5272_s1 + $0x3d0] sm:$0xff]  }
  0x68   : > { %1317 = vmatmul.mubr.bf16.gmra.mrb[32].mxu0 %v4389_v18  ;;  %v3974_v18 = vld [vmem:[%s5272_s1 + $0x2b8] sm:$0xff]  }
  0x69   : > { %1389 = vmatmul.mubr.bf16.gmra.mrb[32].mxu1 %v4394_v21  ;;  %1324 = vmatprep.mubr.bf16.mxu0 %v3145_v46  ;;  %v1665_v21 = vshrl.u32 %v4418_v57, 16  ;;  %v4001_v46 = vld [vmem:[%s5272_s1 + $0x358] sm:$0xff]  }
  0x6a   : > { %1396 = vmatprep.mubr.bf16.mxu1 %v3147_v40  ;;  %3639 = vmatpush3.bf16.msra.mxu0 %v3967_v14  ;;  %v1689_v14 = vshrl.u32 %v4460_v61, 16  ;;  %v4002_v40 = vld [vmem:[%s5272_s1 + $0x3d8] sm:$0xff]  }
  0x6b   : > { %3685 = vmatpush3.bf16.msra.mxu1 %v3968_v51  ;;  %3640 = vmatprep.subr.bf16.mxu0 %v3971_v48  ;;  %v1667_v27 = vor.u32 %v1665_v21, %v1639_v25  ;;  %v3995_v25 = vld [vmem:[%s5272_s1 + $0x350] sm:$0xff]   ;;  %v1681_v51 = vshrl.u32 %v4471_v29, 16 }
  0x6c   : > { %3686 = vmatprep.subr.bf16.mxu1 %v3972_v23  ;;  %v4787_v48 = vld [vmem:[%s4210_s23 + $0x90] ss:$16 sps:$4 sm:$0x1f]   ;;  %v1709_v23 = vshll.u32 %v4768_v8, 16  ;;  %v1691_v21 = vor.u32 %v1689_v14, %v4646_v17  ;;  %v2190_v17 = vrot.slane %v4460_v61, 1 }
  0x6d   : > { %v4702_v0 = vsel %vm531_vm0, %v1667_v27, %v4698_v34  ;;  %v1685_v27 = vshll.u32 %v4787_v48, 16 }
  0x6e   : > { %3641 = vmatpush3.bf16.msra.mxu0 %v3973_v3  ;;  %v4795_v3 = vld [vmem:[%s4210_s23 + $0x98] ss:$16 sps:$4 sm:$0x1f]   ;;  %v2199_v60 = vsel %vm2167_vm1, %v2190_v17, %v2198_v31 }
  0x6f   : > { %3687 = vmatpush3.bf16.msra.mxu1 %v3974_v18  ;;  %3718 = vmatprep.subr.bf16.mxu0 %v3983_v9  ;;  %v2175_v18 = vrot.slane %v4348_v55, 1  ;;  %v1695_v9 = vrot.slane %v1693_v28, 1  ;;  %v1701_v13 = vshll.u32 %v4795_v3, 16  ;;  %v4033_v28 = vld [vmem:[%s4210_s23 + $0x20] sm:$0xff]  ;;  %v2202_v55 = vrot.slane %v4768_v8, 1 }
  0x70   : > { %1325 = vmatmul.mubr.bf16.gmra.mrb[36].mxu0 %v3144_v58  ;;  %3764 = vmatprep.subr.bf16.mxu1 %v3984_v36  ;;  %v1711_v36 = vrot.slane %v1709_v23, 1  ;;  %v4024_v23 = vld [vmem:[%s5272_s1 + $0x3b0] sm:$0xff]  }
  0x71   : > { %1397 = vmatmul.mubr.bf16.gmra.mrb[36].mxu1 %v3146_v32  ;;  %1969 = vmatprep.mubr.bf16.mxu0 %v4517_v4  ;;  %v2172_v4 = vrot.slane %v4345_v54, 1  ;;  %v1696_v32 = vsel %vm531_vm0, %v1691_v21, %v1695_v9  ;;  %v4026_v21 = vld [vmem:[%s5272_s1 + $0x3f8] sm:$0xff]  }
  0x72   : > { %2041 = vmatprep.mubr.bf16.mxu1 %v4536_v19  ;;  %v2182_v19 = vrot.slane %v4368_v42, 1 }
  0x74   : > { %v4732_v24 = vsel %vm2167_vm1, %v2172_v4, %v2182_v19 }
  0x78   : > { %1970 = vmatmul.mubr.bf16.vlgmr.msra.gmra.mrb[40].mxu0 %v4555_v37  ;;  %v4744_v37 = vsel %vm2167_vm1, %v2178_v20, %v2186_v22 }
  0x79   : > { %2042 = vmatmul.mubr.bf16.vlgmr.msra.gmra.mrb[40].mxu1 %v4578_v59  ;;  %3719 = vmatpush3.bf16.msra.mxu0 %v3985_v6  ;;  %v4754_v59 = vsel %vm2167_vm1, %v2169_v11, %v2180_v41  ;;  %v4017_v6 = vld [vmem:[%s5272_s1 + $0x368] sm:$0xff]  }
  0x7a   : > { %3765 = vmatpush3.bf16.msra.mxu1 %v3986_v5  ;;  %3720 = vmatprep.subr.bf16.mxu0 %v3987_v43  ;;  %v1683_v43 = vor.u32 %v1681_v51, %v4684_v50  ;;  %v4019_v50 = vld [vmem:[%s5272_s1 + $0x328] sm:$0xff]   ;;  %v1724_v51 = vor.u32 %v1722_v26, %v1711_v36 }
  0x7b   : > { %3766 = vmatprep.subr.bf16.mxu1 %v3988_v16  ;;  %1977 = vmatprep.mubr.bf16.mxu0 %v4595_v2  ;;  %v3998_v2 = vld [vmem:[%s5272_s1 + $0x390] sm:$0xff]   ;;  %v4018_v16 = vld [vmem:[%s5272_s1 + $0x3e8] sm:$0xff]  }
  0x7c   : > { %2049 = vmatprep.mubr.bf16.mxu1 %v4609_v15  ;;  %v1705_v15 = vshrl.u32 %v4467_v35, 16 }
  0x7d   : > { %3721 = vmatpush3.bf16.msra.mxu0 %v3989_v10  ;;  %v4841_v10 = vsel %vm2167_vm1, %v2182_v19, %v2190_v17  ;;  %v2192_v19 = vrot.slane %v4475_v63, 1 }
  0x7e   : > { %3767 = vmatpush3.bf16.msra.mxu1 %v3990_v30  ;;  %3722 = vmatprep.subr.bf16.mxu0 %v3995_v25  ;;  %v1707_v58 = vor.u32 %v1705_v15, %v4666_v1  ;;  %v2188_v30 = vrot.slane %v4471_v29, 1  ;;  %v1716_v25 = vshrl.u32 %v4761_v12, 16  ;;  %v2091_v15 = vld [vmem:[%s4210_s23 + $0x18] sm:$0xee] }
  0x7f   : > { %3768 = vmatprep.subr.bf16.mxu1 %v3996_v47  ;;  %v1703_v47 = vrot.slane %v1701_v13, 1 }
  0x80   : > { %1978 = vmatmul.mubr.bf16.gmra.mrb[44].mxu0 %v4625_v38  ;;  %v4008_v38 = vld [vmem:[%s5272_s1 + $0x3e0] sm:$0xff]   ;;  %v1712_v5 = vsel %vm531_vm0, %v1707_v58, %v1711_v36  ;;  %v4028_v36 = vld [vmem:[%s5272_s1 + $0x3b8] sm:$0xff]  }
  0x81   : > { %2050 = vmatmul.mubr.bf16.gmra.mrb[44].mxu1 %v4638_v45  ;;  %3723 = vmatpush3.bf16.msra.mxu0 %v3997_v39  ;;  %v4009_v45 = vld [vmem:[%s5272_s1 + $0x320] sm:$0xff]   ;;  %v4020_v39 = vld [vmem:[%s5272_s1 + $0x3a8] sm:$0xff]  }
  0x82   : > { %3769 = vmatpush3.bf16.msra.mxu1 %v3998_v2  ;;  %1985 = vmatprep.mubr.bf16.mxu0 %v4659_v53  ;;  %v4010_v53 = vld [vmem:[%s5272_s1 + $0x3a0] sm:$0xff]   ;;  %v4021_v2 = vld [vmem:[%s5272_s1 + $0x370] sm:$0xff]  }
  0x83   : > { %2057 = vmatprep.mubr.bf16.mxu1 %v4678_v44  ;;  %3724 = vmatprep.subr.bf16.mxu0 %v4001_v46  ;;  %v2184_v44 = vrot.slane %v4418_v57, 1  ;;  %v2194_v57 = vrot.slane %v4467_v35, 1  ;;  %v2090_v46 = vld [vmem:[%s4210_s23 + $0x10] sm:$0xee] }
  0x84   : > { %3770 = vmatprep.subr.bf16.mxu1 %v4002_v40 }
  0x85   : > { %3725 = vmatpush3.bf16.msra.mxu0 %v4005_v52  ;;  %v4827_v1 = vsel %vm2167_vm1, %v2175_v18, %v2184_v44  ;;  %v4854_v42 = vsel %vm2167_vm1, %v2186_v22, %v2194_v57  ;;  %v4870_v22 = vsel %vm2167_vm1, %v2180_v41, %v2188_v30  ;;  %v2193_v14 = vsel %vm2167_vm1, %v2184_v44, %v2192_v19  ;;  %v4023_v52 = vld [vmem:[%s5272_s1 + $0x330] sm:$0xff]  }
  0x86   : > { %3771 = vmatpush3.bf16.msra.mxu1 %v4006_v56  ;;  %3726 = vmatprep.subr.bf16.mxu0 %v4007_v62  ;;  %v1718_v41 = vor.u32 %v1716_v25, %v1695_v9  ;;  %v3361_v56 = vcombine.high %v2090_v46, %v4033_v28  ;;  %v4025_v62 = vld [vmem:[%s5272_s1 + $0x378] sm:$0xff]   ;;  %v1719_v9 = vshrl.u32 %v4795_v3, 16 }
  0x87   : > { %3772 = vmatprep.subr.bf16.mxu1 %v4008_v38 }
  0x88   : > { %1986 = vmatmul.mubr.bf16.gmra.mrb[48].mxu0 %v4696_v33  ;;  %v1687_v33 = vrot.slane %v1685_v27, 1  ;;  %v2171_v58 = vrot.slane %v3361_v56, 1  ;;  %v1721_v13 = vor.u32 %v1719_v9, %v1703_v47 }
  0x89   : > { %2058 = vmatmul.mubr.bf16.gmra.mrb[48].mxu1 %v4702_v0  ;;  %3727 = vmatpush3.bf16.msra.mxu0 %v4009_v45  ;;  %v1699_v0 = vor.u32 %v1697_v7, %v4698_v34  ;;  %v4022_v34 = vld [vmem:[%s5272_s1 + $0x3f0] sm:$0xff]   ;;  %v4034_v7 = vld [vmem:[%s4210_s23 + $0x28] sm:$0xff]  ;;  %v1713_v45 = vshrl.u32 %v4787_v48, 16 }
  0x8a   : > { %3773 = vmatpush3.bf16.msra.mxu1 %v4010_v53  ;;  %1993 = vmatprep.mubr.bf16.mxu0 %v1696_v32  ;;  %v1688_v49 = vsel %vm531_vm0, %v1683_v43, %v1687_v33  ;;  %v3363_v38 = vcombine.high %v2091_v15, %v4034_v7  ;;  %v4027_v53 = vld [vmem:[%s5272_s1 + $0x338] sm:$0xff]   ;;  %v3360_v32 = vcombine.low %v2090_v46, %v4033_v28 }
  0x8b   : > { %2065 = vmatprep.mubr.bf16.mxu1 %v1712_v5  ;;  %3728 = vmatprep.subr.bf16.mxu0 %v4017_v6  ;;  %v1704_v40 = vsel %vm531_vm0, %v1699_v0, %v1703_v47  ;;  %v1715_v44 = vor.u32 %v1713_v45, %v1687_v33  ;;  %v2173_v6 = vsel %vm2167_vm1, %v2171_v58, %v2172_v4 }
  0x8c   : > { %3774 = vmatprep.subr.bf16.mxu1 %v4018_v16  ;;  %v2177_v27 = vrot.slane %v3363_v38, 1  ;;  %v3362_v5 = vcombine.low %v2091_v15, %v4034_v7  ;;  %v2168_v16 = vrot.slane %v3360_v32, 1  ;;  %v2203_v4 = vsel %vm2167_vm1, %v2194_v57, %v2202_v55 }
  0x8d   : > { %3729 = vmatpush3.bf16.msra.mxu0 %v4019_v50 }
  0x8e   : > { %3775 = vmatpush3.bf16.msra.mxu1 %v4020_v39  ;;  %3730 = vmatprep.subr.bf16.mxu0 %v4021_v2  ;;  %v2179_v43 = vsel %vm2167_vm1, %v2177_v27, %v2178_v20  ;;  %v2174_v50 = vrot.slane %v3362_v5, 1  ;;  %v2170_v33 = vsel %vm2167_vm1, %v2168_v16, %v2169_v11  ;;  %v2196_v20 = vrot.slane %v4787_v48, 1 }
  0x8f   : > { %3776 = vmatprep.subr.bf16.mxu1 %v4022_v34  ;;  %v2200_v11 = vrot.slane %v4795_v3, 1 }
  0x90   : > { %1994 = vmatmul.mubr.bf16.gmra.mrb[52].mxu0 %v1688_v49  ;;  %v2176_v54 = vsel %vm2167_vm1, %v2174_v50, %v2175_v18 }
  0x91   : > { %2066 = vmatmul.mubr.bf16.gmra.mrb[52].mxu1 %v1704_v40  ;;  %2001 = vmatprep.mubr.bf16.mxu0 %v1718_v41  ;;  %v2201_v61 = vsel %vm2167_vm1, %v2192_v19, %v2200_v11 }
  0x92   : > { %2073 = vmatprep.mubr.bf16.mxu1 %v1724_v51  ;;  %3731 = vmatpush3.bf16.msra.mxu0 %v4023_v52 }
  0x93   : > { %3777 = vmatpush3.bf16.msra.mxu1 %v4024_v23  ;;  %3732 = vmatprep.subr.bf16.mxu0 %v4025_v62 }
  0x94   : > { %3778 = vmatprep.subr.bf16.mxu1 %v4026_v21 }
  0x96   : > { %3733 = vmatpush3.bf16.msra.mxu0 %v4027_v53 }
  0x97   : > { %3779 = vmatpush3.bf16.msra.mxu1 %v4028_v36 }
  0x98   : > { %2002 = vmatmul.mubr.bf16.gmra.mrb[56].mxu0 %v1715_v44 }
  0x99   : > { %2074 = vmatmul.mubr.bf16.gmra.mrb[56].mxu1 %v1721_v13  ;;  %2448 = vmatprep.mubr.bf16.mxu0 %v2173_v6 }
  0x9a   : > { %2520 = vmatprep.mubr.bf16.mxu1 %v2179_v43 }
  0xa0   : > { %2449 = vmatmul.mubr.bf16.vlgmr.msra.gmra.mrb[60].mxu0 %v2170_v33 }
  0xa1   : > { %2521 = vmatmul.mubr.bf16.vlgmr.msra.gmra.mrb[60].mxu1 %v2176_v54  ;;  %2456 = vmatprep.mubr.bf16.mxu0 %v4732_v24  ;;  %v2197_v24 = vsel %vm2167_vm1, %v2188_v30, %v2196_v20 }
  0xa2   : > { %2528 = vmatprep.mubr.bf16.mxu1 %v4744_v37 }
  0xa8   : > { %2457 = vmatmul.mubr.bf16.gmra.mrb[64].mxu0 %v4754_v59 }
  0xa9   : > { %2529 = vmatmul.mubr.bf16.gmra.mrb[64].mxu1 %v4827_v1  ;;  %2464 = vmatprep.mubr.bf16.mxu0 %v4841_v10 }
  0xaa   : > { %2536 = vmatprep.mubr.bf16.mxu1 %v4854_v42 }
  0xb0   : > { %2465 = vmatmul.mubr.bf16.gmra.mrb[68].mxu0 %v4870_v22 }
  0xb1   : > { %2537 = vmatmul.mubr.bf16.gmra.mrb[68].mxu1 %v2193_v14  ;;  %2472 = vmatprep.mubr.bf16.mxu0 %v2199_v60 }
  0xb2   : > { %2544 = vmatprep.mubr.bf16.mxu1 %v2203_v4 }
  0xb8   : > { %2473 = vmatmul.mubr.bf16.gmra.mrb[72].mxu0 %v2197_v24 }
  0xb9   : > { %2545 = vmatmul.mubr.bf16.gmra.mrb[72].mxu1 %v2201_v61  ;;  %2480 = vmatprep.mubr.bf16.mxu0 %v2198_v31 }
  0xba   : > { %2552 = vmatprep.mubr.bf16.mxu1 %v2202_v55 }
  0xc0   : > { %2481 = vmatmul.mubr.bf16.gmra.mrb[76].mxu0 %v2196_v20 }
  0xc1   : > { %2553 = vmatmul.mubr.bf16.gmra.mrb[76].mxu1 %v2200_v11 }
  0xfb   : > { %v3458_v35 = vpop.f32.mrb[0].mxu0 }
  0xfc   : > { %v3459_v37 = vpop.f32.mrb[1].mxu0  ;;  %v3504_v8 = vpop.f32.mrb[0].mxu1 }
  0xfd   : > { %v3460_v59 = vadd.f32 %v3459_v37, %v3458_v35  ;;  %v3461_v12 = vpop.f32.mrb[2].mxu0  ;;  %v3505_v3 = vpop.f32.mrb[1].mxu1 }
  0xfe   : > { %v3462_v48 = vpop.f32.mrb[3].mxu0  ;;  %v3506_v18 = vadd.f32 %v3505_v3, %v3504_v8  ;;  %v3507_v17 = vpop.f32.mrb[2].mxu1 }
  0xff   : > { %v3463_v29 = vadd.f32 %v3462_v48, %v3461_v12  ;;  %v3508_v1 = vpop.f32.mrb[3].mxu1 }
 0x100   : > { %v4939_v63 = vadd.f32 %v3506_v18, %v3460_v59  ;;  %v3509_v57 = vadd.f32 %v3508_v1, %v3507_v17 }
 0x102   : > { %v4941_v10 = vadd.f32 %v3509_v57, %v3463_v29 }
 0x103   : > { %v3464_v30 = vpop.f32.mrb[4].mxu0 }
 0x104   : > { %v3510_v25 = vpop.f32.mrb[4].mxu1  ;;  %v3465_v42 = vpop.f32.mrb[5].mxu0 }
 0x105   : > { %v3466_v19 = vadd.f32 %v3465_v42, %v3464_v30  ;;  %v3511_v0 = vpop.f32.mrb[5].mxu1  ;;  %v3467_v47 = vpop.f32.mrb[6].mxu0 }
 0x106   : > { %v3512_v39 = vadd.f32 %v3511_v0, %v3510_v25  ;;  %v3513_v2 = vpop.f32.mrb[6].mxu1  ;;  %v3468_v26 = vpop.f32.mrb[7].mxu0 }
 0x107   : > { %v3469_v22 = vadd.f32 %v3468_v26, %v3467_v47  ;;  %v3514_v34 = vpop.f32.mrb[7].mxu1 }
 0x108   : > { %v4943_v46 = vadd.f32 %v3512_v39, %v3466_v19  ;;  %v3515_v14 = vadd.f32 %v3514_v34, %v3513_v2 }
 0x10a   : > { %v4945_v15 = vadd.f32 %v3515_v14, %v3469_v22 }
 0x10b   : > { %v3470_v49 = vpop.f32.mrb[8].mxu0 }
 0x10c   : > { %v3516_v41 = vpop.f32.mrb[8].mxu1  ;;  %v3471_v40 = vpop.f32.mrb[9].mxu0 }
 0x10d   : > { %v3472_v51 = vadd.f32 %v3471_v40, %v3470_v49  ;;  %v3517_v52 = vpop.f32.mrb[9].mxu1  ;;  %v3473_v28 = vpop.f32.mrb[10].mxu0 }
 0x10e   : > { %v3518_v56 = vadd.f32 %v3517_v52, %v3516_v41  ;;  %v3519_v23 = vpop.f32.mrb[10].mxu1  ;;  %v3474_v62 = vpop.f32.mrb[11].mxu0 }
 0x10f   : > { %v3475_v7 = vadd.f32 %v3474_v62, %v3473_v28  ;;  %v3520_v38 = vpop.f32.mrb[11].mxu1 }
 0x110   : > { %v4947_v45 = vadd.f32 %v3518_v56, %v3472_v51  ;;  %v3521_v21 = vadd.f32 %v3520_v38, %v3519_v23 }
 0x112   : > { %v4949_v9 = vadd.f32 %v3521_v21, %v3475_v7 }
 0x113   : > { %v3476_v53 = vpop.f32.mrb[12].mxu0 }
 0x114   : > { %v3522_v58 = vpop.f32.mrb[12].mxu1  ;;  %v3477_v36 = vpop.f32.mrb[13].mxu0 }
 0x115   : > { %v3478_v27 = vadd.f32 %v3477_v36, %v3476_v53  ;;  %v3523_v44 = vpop.f32.mrb[13].mxu1  ;;  %v3479_v13 = vpop.f32.mrb[14].mxu0 }
 0x116   : > { %v3524_v32 = vadd.f32 %v3523_v44, %v3522_v58  ;;  %v3525_v6 = vpop.f32.mrb[14].mxu1  ;;  %v3480_v5 = vpop.f32.mrb[15].mxu0 }
 0x117   : > { %v3481_v43 = vadd.f32 %v3480_v5, %v3479_v13  ;;  %v3526_v16 = vpop.f32.mrb[15].mxu1 }
 0x118   : > { %v4951_v50 = vadd.f32 %v3524_v32, %v3478_v27  ;;  %v3527_v33 = vadd.f32 %v3526_v16, %v3525_v6 }
 0x11a   : > { %v4953_v54 = vadd.f32 %v3527_v33, %v3481_v43 }
 0x11b   : > { %v3482_v31 = vpop.f32.mrb[16].mxu0 }
 0x11c   : > { %v3528_v55 = vpop.f32.mrb[16].mxu1  ;;  %v3483_v60 = vpop.f32.mrb[17].mxu0 }
 0x11d   : > { %v3484_v4 = vadd.f32 %v3483_v60, %v3482_v31  ;;  %v3529_v20 = vpop.f32.mrb[17].mxu1  ;;  %v3485_v11 = vpop.f32.mrb[18].mxu0 }
 0x11e   : > { %v3530_v24 = vadd.f32 %v3529_v20, %v3528_v55  ;;  %v3531_v61 = vpop.f32.mrb[18].mxu1  ;;  %v3486_v35 = vpop.f32.mrb[19].mxu0 }
 0x11f   : > { %v3532_v37 = vpop.f32.mrb[19].mxu1 }
 0x120   : > { %v4955_v59 = vadd.f32 %v3530_v24, %v3484_v4 }
 0x123   : > { %v3550_v12 = vpop.f32.mrb[20].mxu0 }
 0x124   : > { %v3596_v8 = vpop.f32.mrb[20].mxu1  ;;  %v3551_v48 = vpop.f32.mrb[21].mxu0 }
 0x125   : > { %v3552_v3 = vadd.f32 %v3551_v48, %v3550_v12  ;;  %v3597_v29 = vpop.f32.mrb[21].mxu1  ;;  %v3553_v18 = vpop.f32.mrb[22].mxu0 }
 0x126   : > { %v3598_v17 = vadd.f32 %v3597_v29, %v3596_v8  ;;  %v3599_v1 = vpop.f32.mrb[22].mxu1  ;;  %v3554_v57 = vpop.f32.mrb[23].mxu0 }
 0x127   : > { %v1295_v30 = vadd.f32 %v3552_v3, %v4939_v63  ;;  %v3555_v25 = vadd.f32 %v3554_v57, %v3553_v18  ;;  %v3600_v42 = vpop.f32.mrb[23].mxu1 }
 0x128   : > { %v3601_v19 = vadd.f32 %v3600_v42, %v3599_v1 }
 0x129   : > { %v4958_v0 = vadd.f32 %v3598_v17, %v1295_v30  ;;  %v1298_v47 = vadd.f32 %v3555_v25, %v4941_v10 }
 0x12b   : > { %v4961_v39 = vadd.f32 %v3601_v19, %v1298_v47  ;;  %v3556_v2 = vpop.f32.mrb[24].mxu0 }
 0x12c   : > { %v3602_v26 = vpop.f32.mrb[24].mxu1  ;;  %v3557_v22 = vpop.f32.mrb[25].mxu0 }
 0x12d   : > { %v3558_v34 = vadd.f32 %v3557_v22, %v3556_v2  ;;  %v3603_v14 = vpop.f32.mrb[25].mxu1  ;;  %v3559_v49 = vpop.f32.mrb[26].mxu0 }
 0x12e   : > { %v3604_v41 = vadd.f32 %v3603_v14, %v3602_v26  ;;  %v3605_v40 = vpop.f32.mrb[26].mxu1  ;;  %v3560_v51 = vpop.f32.mrb[27].mxu0 }
 0x12f   : > { %v1303_v63 = vadd.f32 %v3558_v34, %v4943_v46  ;;  %v3561_v52 = vadd.f32 %v3560_v51, %v3559_v49  ;;  %v3606_v28 = vpop.f32.mrb[27].mxu1 }
 0x130   : > { %v3607_v56 = vadd.f32 %v3606_v28, %v3605_v40 }
 0x131   : > { %v4964_v23 = vadd.f32 %v3604_v41, %v1303_v63  ;;  %v1306_v10 = vadd.f32 %v3561_v52, %v4945_v15 }
 0x133   : > { %v4967_v62 = vadd.f32 %v3607_v56, %v1306_v10  ;;  %v3562_v7 = vpop.f32.mrb[28].mxu0  ;;  %v2615_v56 = vlaneseq }
 0x134   : > { %v3608_v38 = vpop.f32.mrb[28].mxu1  ;;  %v3563_v21 = vpop.f32.mrb[29].mxu0 }
 0x135   : > { %v3564_v53 = vadd.f32 %v3563_v21, %v3562_v7  ;;  %v3609_v58 = vpop.f32.mrb[29].mxu1  ;;  %v3565_v36 = vpop.f32.mrb[30].mxu0 }
 0x136   : > { %v3610_v27 = vadd.f32 %v3609_v58, %v3608_v38  ;;  %v3611_v44 = vpop.f32.mrb[30].mxu1  ;;  %v3566_v13 = vpop.f32.mrb[31].mxu0 }
 0x137   : > { %v1311_v46 = vadd.f32 %v3564_v53, %v4947_v45  ;;  %v3567_v32 = vadd.f32 %v3566_v13, %v3565_v36  ;;  %v3612_v6 = vpop.f32.mrb[31].mxu1 }
 0x138   : > { %v3613_v5 = vadd.f32 %v3612_v6, %v3611_v44  ;;  %v4990_v44 = vshrl.u32 %v2615_v56, 7 }
 0x139   : > { %v4970_v43 = vadd.f32 %v3610_v27, %v1311_v46  ;;  %v1314_v15 = vadd.f32 %v3567_v32, %v4949_v9 }
 0x13b   : > { %v4973_v16 = vadd.f32 %v3613_v5, %v1314_v15  ;;  %v3568_v33 = vpop.f32.mrb[32].mxu0 }
 0x13c   : > { %v3614_v31 = vpop.f32.mrb[32].mxu1  ;;  %v3569_v55 = vpop.f32.mrb[33].mxu0 }
 0x13d   : > { %v3570_v60 = vadd.f32 %v3569_v55, %v3568_v33  ;;  %v3615_v4 = vpop.f32.mrb[33].mxu1  ;;  %v3571_v20 = vpop.f32.mrb[34].mxu0  ;;  %v2617_v33 = vadd.s32 8, %v4990_v44 }
 0x13e   : > { %v3616_v11 = vadd.f32 %v3615_v4, %v3614_v31  ;;  %v3617_v24 = vpop.f32.mrb[34].mxu1  ;;  %v3572_v61 = vpop.f32.mrb[35].mxu0 }
 0x13f   : > { %v1319_v45 = vadd.f32 %v3570_v60, %v4951_v50  ;;  %v3573_v35 = vadd.f32 %v3572_v61, %v3571_v20  ;;  %v3618_v37 = vpop.f32.mrb[35].mxu1 }
 0x140   : > { %v3619_v12 = vadd.f32 %v3618_v37, %v3617_v24 }
 0x141   : > { %v4976_v8 = vadd.f32 %v3616_v11, %v1319_v45  ;;  %v1322_v9 = vadd.f32 %v3573_v35, %v4953_v54  ;;  %v5000_v11 = vmul.u32.u64.low 3817748708, %v4990_v44  ;;  %v5001_v24 = vmul.u32.u64.high 3817748708, %v4990_v44, %v5000_v11 }
 0x143   : > { %v4979_v48 = vadd.f32 %v3619_v12, %v1322_v9  ;;  %v3574_v3 = vpop.f32.mrb[36].mxu0  ;;  %v5003_v37 = vmul.u32.u64.low 3817748708, %v2617_v33  ;;  %v5004_v12 = vmul.u32.u64.high 3817748708, %v2617_v33, %v5003_v37 }
 0x144   : > { %v3620_v29 = vpop.f32.mrb[36].mxu1  ;;  %v3575_v18 = vpop.f32.mrb[37].mxu0 }
 0x145   : > { %v3576_v17 = vadd.f32 %v3575_v18, %v3574_v3  ;;  %v3621_v1 = vpop.f32.mrb[37].mxu1  ;;  %v3577_v57 = vpop.f32.mrb[38].mxu0 }
 0x146   : > { %v3622_v30 = vadd.f32 %v3621_v1, %v3620_v29  ;;  %v3623_v25 = vpop.f32.mrb[38].mxu1  ;;  %v3578_v42 = vpop.f32.mrb[39].mxu0  ;;  %v5010_v57 = vadd.s32 24, %v4990_v44 }
 0x147   : > { %v1327_v50 = vadd.f32 %v3576_v17, %v4955_v59  ;;  %v3624_v19 = vpop.f32.mrb[39].mxu1 }
 0x149   : > { %v4982_v47 = vadd.f32 %v3622_v30, %v1327_v50 }
 0x14b   : > { %v3642_v2 = vpop.f32.mrb[40].mxu0 }
 0x14c   : > { %v3688_v26 = vpop.f32.mrb[40].mxu1  ;;  %v3643_v22 = vpop.f32.mrb[41].mxu0 }
 0x14d   : > { %v3644_v54 = vadd.f32 %v3643_v22, %v3642_v2  ;;  %v3689_v34 = vpop.f32.mrb[41].mxu1  ;;  %v3645_v14 = vpop.f32.mrb[42].mxu0 }
 0x14e   : > { %v3690_v49 = vadd.f32 %v3689_v34, %v3688_v26  ;;  %v3691_v41 = vpop.f32.mrb[42].mxu1  ;;  %v3646_v40 = vpop.f32.mrb[43].mxu0 }
 0x14f   : > { %v3647_v51 = vadd.f32 %v3646_v40, %v3645_v14  ;;  %v3692_v63 = vpop.f32.mrb[43].mxu1  ;;  %v5024_v34 = vmul.u32.u64.low 3817748708, %v5010_v57  ;;  %v5025_v14 = vmul.u32.u64.high 3817748708, %v5010_v57, %v5024_v34  ;;  %v2642_v40 = vshrl.u32 %v5004_v12, 3 }
 0x150   : > { %v2044_v52 = vadd.f32 %v3690_v49, %v3644_v54  ;;  %v3693_v28 = vadd.f32 %v3692_v63, %v3691_v41  ;;  %v2631_v54 = vshrl.u32 %v5001_v24, 3 }
 0x152   : > { %v4985_v10 = vadd.f32 %v2044_v52, %v4958_v0  ;;  %v2047_v59 = vadd.f32 %v3693_v28, %v3647_v51 }
 0x153   : > { %v3648_v7 = vpop.f32.mrb[44].mxu0 }
 0x154   : > { %v4988_v38 = vadd.f32 %v2047_v59, %v4961_v39  ;;  %v3694_v21 = vpop.f32.mrb[44].mxu1  ;;  %v3649_v53 = vpop.f32.mrb[45].mxu0 }
 0x155   : > { %v3650_v58 = vadd.f32 %v3649_v53, %v3648_v7  ;;  %v3695_v36 = vpop.f32.mrb[45].mxu1  ;;  %v3651_v27 = vpop.f32.mrb[46].mxu0  ;;  %v2643_v53 = vmul.u32 9, %v2642_v40 }
 0x156   : > { %v3696_v13 = vadd.f32 %v3695_v36, %v3694_v21  ;;  %v3697_v46 = vpop.f32.mrb[46].mxu1  ;;  %v3652_v32 = vpop.f32.mrb[47].mxu0  ;;  %v2632_v21 = vmul.u32 9, %v2631_v54 }
 0x157   : > { %v3653_v6 = vadd.f32 %v3652_v32, %v3651_v27  ;;  %v3698_v5 = vpop.f32.mrb[47].mxu1  ;;  %v2644_v11 = vsub.s32 %v2617_v33, %v2643_v53  ;;  %v5055_v33 = vadd.s32 56, %v4990_v44 }
 0x158   : > { %v2052_v15 = vadd.f32 %v3696_v13, %v3650_v58  ;;  %v3699_v0 = vadd.f32 %v3698_v5, %v3697_v46  ;;  %v5032_v58 = vadd.s32 40, %v4990_v44 }
 0x159   : > { %vm2725_vm4 = vcmp.ne.s32.totalorder %v2644_v11, 0  ;;  %vm2734_vm5 = vcmp.lt.s32.totalorder %v2644_v11, 0 }
 0x15a   : > { %v4994_v31 = vadd.f32 %v2052_v15, %v4964_v23  ;;  %v2055_v39 = vadd.f32 %v3699_v0, %v3653_v6  ;;  %vm5072_vm7 = vmand %vm2734_vm5, %vm2725_vm4 }
 0x15b   : > { %v3654_v55 = vpop.f32.mrb[48].mxu0 }
 0x15c   : > { %v4997_v60 = vadd.f32 %v2055_v39, %v4967_v62  ;;  %v3700_v4 = vpop.f32.mrb[48].mxu1  ;;  %v3655_v20 = vpop.f32.mrb[49].mxu0  ;;  %v5007_v62 = vadd.s32 16, %v4990_v44  ;;  %v2633_v39 = vsub.s32 %v4990_v44, %v2632_v21 }
 0x15d   : > { %v3656_v61 = vadd.f32 %v3655_v20, %v3654_v55  ;;  %v3701_v45 = vpop.f32.mrb[49].mxu1  ;;  %v3657_v35 = vpop.f32.mrb[50].mxu0  ;;  %v2664_v55 = vshrl.u32 %v5025_v14, 3 }
 0x15e   : > { %v3702_v9 = vadd.f32 %v3701_v45, %v3700_v4  ;;  %v3703_v23 = vpop.f32.mrb[50].mxu1  ;;  %v3658_v3 = vpop.f32.mrb[51].mxu0  ;;  %v5016_v50 = vmul.u32.u64.low 3817748708, %v5007_v62  ;;  %v5017_v19 = vmul.u32.u64.high 3817748708, %v5007_v62, %v5016_v50  ;;  %vm2724_vm2 = vcmp.ne.s32.totalorder %v2633_v39, 0 }
 0x15f   : > { %v3659_v29 = vadd.f32 %v3658_v3, %v3657_v35  ;;  %v3704_v18 = vpop.f32.mrb[51].mxu1  ;;  %vm2733_vm3 = vcmp.lt.s32.totalorder %v2633_v39, 0  ;;  %v2665_v3 = vmul.u32 9, %v2664_v55 }
 0x160   : > { %v2060_v17 = vadd.f32 %v3702_v9, %v3656_v61  ;;  %v3705_v1 = vadd.f32 %v3704_v18, %v3703_v23  ;;  %v2653_v46 = vshrl.u32 %v5017_v19, 3  ;;  %v5052_v9 = vadd.s32 48, %v4990_v44  ;;  %vm5060_vm6 = vmand %vm2733_vm3, %vm2724_vm2 }
 0x161   : > { %v5048_v24 = vmul.u32.u64.low 3817748708, %v5032_v58  ;;  %v5049_v61 = vmul.u32.u64.high 3817748708, %v5032_v58, %v5048_v24  ;;  %v2751_v18 = vadd.s32 9, %v2633_v39  ;;  %v5077_v34 = vsub.s32 %v5010_v57, %v2665_v3 }
 0x162   : > { %v5013_v30 = vadd.f32 %v2060_v17, %v4970_v43  ;;  %v2063_v25 = vadd.f32 %v3705_v1, %v3659_v29  ;;  %v2752_v17 = vadd.s32 9, %v2644_v11 }
 0x163   : > { %v3660_v42 = vpop.f32.mrb[52].mxu0  ;;  %vm2727_vm11 = vcmp.ne.s32.totalorder %v5077_v34, 0  ;;  %vm2736_vm12 = vcmp.lt.s32.totalorder %v5077_v34, 0 }
 0x164   : > { %v5020_v2 = vadd.f32 %v2063_v25, %v4973_v16  ;;  %v3706_v26 = vpop.f32.mrb[52].mxu1  ;;  %v3661_v22 = vpop.f32.mrb[53].mxu0  ;;  %v5029_v16 = vadd.s32 32, %v4990_v44  ;;  %v2761_v57 = vsel %vm5072_vm7, %v2752_v17, %v2644_v11  ;;  %vm5125_vm15 = vmand %vm2736_vm12, %vm2727_vm11 }
 0x165   : > { %v3662_v49 = vadd.f32 %v3661_v22, %v3660_v42  ;;  %v3707_v43 = vpop.f32.mrb[53].mxu1  ;;  %v3663_v41 = vpop.f32.mrb[54].mxu0  ;;  %vm5100_vm13 = vcmp.ne.s32.totalorder %v2761_v57, 8 }
 0x166   : > { %v3708_v51 = vadd.f32 %v3707_v43, %v3706_v26  ;;  %v3709_v63 = vpop.f32.mrb[54].mxu1  ;;  %v3664_v52 = vpop.f32.mrb[55].mxu0  ;;  %v5039_v32 = vmul.u32.u64.low 3817748708, %v5029_v16  ;;  %v5040_v6 = vmul.u32.u64.high 3817748708, %v5029_v16, %v5039_v32 }
 0x167   : > { %v3665_v28 = vadd.f32 %v3664_v52, %v3663_v41  ;;  %v3710_v56 = vpop.f32.mrb[55].mxu1  ;;  %v5069_v19 = vmul.u32.u64.low 3817748708, %v5052_v9  ;;  %v5070_v26 = vmul.u32.u64.high 3817748708, %v5052_v9, %v5069_v19 }
 0x168   : > { %v2068_v59 = vadd.f32 %v3708_v51, %v3662_v49  ;;  %v3711_v7 = vadd.f32 %v3710_v56, %v3709_v63  ;;  %v2675_v50 = vshrl.u32 %v5040_v6, 3  ;;  %v2760_v63 = vsel %vm5060_vm6, %v2751_v18, %v2633_v39 }
 0x169   : > { %v5081_v41 = vmul.u32.u64.low 3817748708, %v5055_v33  ;;  %v5082_v40 = vmul.u32.u64.high 3817748708, %v5055_v33, %v5081_v41  ;;  %vm2769_vm10 = vcmp.ne.s32.totalorder %v2760_v63, 8  ;;  %v2754_v39 = vadd.s32 9, %v5077_v34 }
 0x16a   : > { %v5035_v36 = vadd.f32 %v2068_v59, %v4976_v8  ;;  %v2071_v27 = vadd.f32 %v3711_v7, %v3665_v28  ;;  %v2676_v7 = vmul.u32 9, %v2675_v50 }
 0x16b   : > { %v3666_v13 = vpop.f32.mrb[56].mxu0 }
 0x16c   : > { %v5043_v5 = vadd.f32 %v2071_v27, %v4979_v48  ;;  %v3712_v15 = vpop.f32.mrb[56].mxu1  ;;  %v3667_v0 = vpop.f32.mrb[57].mxu0  ;;  %v2654_v48 = vmul.u32 9, %v2653_v46  ;;  %v5091_v27 = vadd.s32 64, %v4990_v44  ;;  %v5112_v55 = vsub.s32 %v5029_v16, %v2676_v7 }
 0x16d   : > { %v3668_v4 = vadd.f32 %v3667_v0, %v3666_v13  ;;  %v3713_v8 = vpop.f32.mrb[57].mxu1  ;;  %v3669_v20 = vpop.f32.mrb[58].mxu0 }
 0x16e   : > { %v3714_v45 = vadd.f32 %v3713_v8, %v3712_v15  ;;  %v3715_v35 = vpop.f32.mrb[58].mxu1  ;;  %v3670_v37 = vpop.f32.mrb[59].mxu0  ;;  %v5065_v42 = vsub.s32 %v5007_v62, %v2654_v48  ;;  %v2686_v62 = vshrl.u32 %v5049_v61, 3  ;;  %vm2728_vm0 = vcmp.ne.s32.totalorder %v5112_v55, 0 }
 0x16f   : > { %v3716_v12 = vpop.f32.mrb[59].mxu1  ;;  %v5130_v16 = vmul.u32.u64.low 3817748708, %v5091_v27  ;;  %v5131_v61 = vmul.u32.u64.high 3817748708, %v5091_v27, %v5130_v16  ;;  %vm2737_vm1 = vcmp.lt.s32.totalorder %v5112_v55, 0 }
 0x170   : > { %v2076_v23 = vadd.f32 %v3714_v45, %v3668_v4  ;;  %vm2726_vm8 = vcmp.ne.s32.totalorder %v5065_v42, 0  ;;  %vm2735_vm9 = vcmp.lt.s32.totalorder %v5065_v42, 0  ;;  %v2687_v13 = vmul.u32 9, %v2686_v62  ;;  %vm5164_vm6 = vmand %vm2737_vm1, %vm2728_vm0 }
 0x171   : > { %v2753_v6 = vadd.s32 9, %v5065_v42  ;;  %vm5106_vm14 = vmand %vm2735_vm9, %vm2726_vm8  ;;  %v2708_v12 = vshrl.u32 %v5082_v40, 3 }
 0x172   : > { %v5058_v29 = vadd.f32 %v2076_v23, %v4982_v47  ;;  %v2688_v37 = vsub.s32 %v5032_v58, %v2687_v13  ;;  %v2763_v58 = vsel %vm5125_vm15, %v2754_v39, %v5077_v34 }
 0x173   : > { %v3734_v1 = vpop.f32.mrb[60].mxu0  ;;  %v2762_v18 = vsel %vm5106_vm14, %v2753_v6, %v5065_v42  ;;  %v2709_v42 = vmul.u32 9, %v2708_v12  ;;  %vm5160_vm5 = vcmp.ne.s32.totalorder %v2763_v58, 8 }
 0x174   : > { %v3780_v22 = vpop.f32.mrb[60].mxu1  ;;  %v3735_v54 = vpop.f32.mrb[61].mxu0  ;;  %vm2771_vm2 = vcmp.ne.s32.totalorder %v2762_v18, 8  ;;  %vm2729_vm3 = vcmp.ne.s32.totalorder %v2688_v37, 0  ;;  %vm2738_vm4 = vcmp.lt.s32.totalorder %v2688_v37, 0  ;;  %v2756_v62 = vadd.s32 9, %v2688_v37 }
 0x175   : > { %v3736_v14 = vadd.f32 %v3735_v54, %v3734_v1  ;;  %v3781_v49 = vpop.f32.mrb[61].mxu1  ;;  %v3737_v43 = vpop.f32.mrb[62].mxu0  ;;  %vm5176_vm7 = vmand %vm2738_vm4, %vm2729_vm3 }
 0x176   : > { %v3782_v51 = vadd.f32 %v3781_v49, %v3780_v22  ;;  %v3783_v52 = vpop.f32.mrb[62].mxu1  ;;  %v3738_v28 = vpop.f32.mrb[63].mxu0 }
 0x177   : > { %v3739_v56 = vadd.f32 %v3738_v28, %v3737_v43  ;;  %v3784_v59 = vpop.f32.mrb[63].mxu1  ;;  %v2719_v28 = vshrl.u32 %v5131_v61, 3 }
 0x178   : > { %v2523_v21 = vadd.f32 %v3782_v51, %v3736_v14  ;;  %v3785_v53 = vadd.f32 %v3784_v59, %v3783_v52  ;;  %v2755_v14 = vadd.s32 9, %v5112_v55 }
 0x179   : > { %v2720_v39 = vmul.u32 9, %v2719_v28 }
 0x17a   : > { %v5097_v46 = vadd.f32 %v2523_v21, %v4985_v10  ;;  %v2526_v32 = vadd.f32 %v3785_v53, %v3739_v56  ;;  %v2697_v10 = vshrl.u32 %v5070_v26, 3  ;;  %v2764_v53 = vsel %vm5164_vm6, %v2755_v14, %v5112_v55 }
 0x17b   : > { %v3740_v0 = vpop.f32.mrb[64].mxu0 }
 0x17c   : > { %v5116_v4 = vsel %vm2769_vm10, %v5097_v46, 0.0  ;;  %v5119_v8 = vadd.f32 %v2526_v32, %v4988_v38  ;;  %v3786_v20 = vpop.f32.mrb[64].mxu1  ;;  %v3741_v11 = vpop.f32.mrb[65].mxu0  ;;  %v2698_v19 = vmul.u32 9, %v2697_v10  ;;  %vm2773_vm10 = vcmp.ne.s32.totalorder %v2764_v53, 8 }
 0x17d   : > { %v3742_v38 = vadd.f32 %v3741_v11, %v3740_v0  ;;  %v3787_v45 = vpop.f32.mrb[65].mxu1  ;;  %v3743_v35 = vpop.f32.mrb[66].mxu0 }
 0x17e   : > { %v3422_v48 = vpack.c.bf16 %v5119_v8, %v5097_v46  ;;  %v5145_v23 = vsel %vm5100_vm13, %v5119_v8, 0.0  ;;  %v3788_v3 = vadd.f32 %v3787_v45, %v3786_v20  ;;  %v3789_v17 = vpop.f32.mrb[66].mxu1  ;;  %v3744_v1 = vpop.f32.mrb[67].mxu0  ;;  %v2699_v41 = vsub.s32 %v5052_v9, %v2698_v19 }
 0x17f   : > { %v3745_v25 = vadd.f32 %v3744_v1, %v3743_v35  ;;  %v3790_v50 = vpop.f32.mrb[67].mxu1  ;;  %v2710_v9 = vsub.s32 %v5055_v33, %v2709_v42  ;;  %v2765_v33 = vsel %vm5176_vm7, %v2756_v62, %v2688_v37  ;;  %v2721_v37 = vsub.s32 %v5091_v27, %v2720_v39 }
 0x180   : > { %3423 = vst [vmem:[%s5136_s7] sm:$0xff] %v3422_v48   ;;  %v2531_v26 = vadd.f32 %v3788_v3, %v3742_v38  ;;  %v3791_v22 = vadd.f32 %v3790_v50, %v3789_v17  ;;  %vm2730_vm8 = vcmp.ne.s32.totalorder %v2699_v41, 0  ;;  %vm2739_vm9 = vcmp.lt.s32.totalorder %v2699_v41, 0 }
 0x181   : > { %vm2731_vm11 = vcmp.ne.s32.totalorder %v2710_v9, 0  ;;  %vm2740_vm12 = vcmp.lt.s32.totalorder %v2710_v9, 0  ;;  %v2757_v20 = vadd.s32 9, %v2699_v41  ;;  %vm2774_vm13 = vcmp.ne.s32.totalorder %v2765_v33, 8  ;;  %vm5198_vm14 = vmand %vm2739_vm9, %vm2730_vm8 }
 0x182   : > { %v5157_v54 = vadd.f32 %v2531_v26, %v4994_v31  ;;  %v2534_v47 = vadd.f32 %v3791_v22, %v3745_v25  ;;  %v2758_v16 = vadd.s32 9, %v2710_v9  ;;  %vm5208_vm15 = vmand %vm2740_vm12, %vm2731_vm11  ;;  %vm2732_vm0 = vcmp.ne.s32.totalorder %v2721_v37, 0 }
 0x183   : > { %v3746_v49 = vpop.f32.mrb[68].mxu0  ;;  %vm2741_vm1 = vcmp.lt.s32.totalorder %v2721_v37, 0  ;;  %v2759_v14 = vadd.s32 9, %v2721_v37 }
 0x184   : > { %v5170_v40 = vsel %vm2771_vm2, %v5157_v54, 0.0  ;;  %v5173_v31 = vadd.f32 %v2534_v47, %v4997_v60  ;;  %v3792_v51 = vpop.f32.mrb[68].mxu1  ;;  %v3747_v63 = vpop.f32.mrb[69].mxu0  ;;  %v2767_v26 = vsel %vm5208_vm15, %v2758_v16, %v2710_v9  ;;  %vm5222_vm4 = vmand %vm2741_vm1, %vm2732_vm0 }
 0x185   : > { %v3748_v56 = vadd.f32 %v3747_v63, %v3746_v49  ;;  %v3793_v59 = vpop.f32.mrb[69].mxu1  ;;  %v3749_v57 = vpop.f32.mrb[70].mxu0  ;;  %vm2776_vm3 = vcmp.ne.s32.totalorder %v2767_v26, 8 }
 0x186   : > { %v3427_v7 = vpack.c.bf16 %v5173_v31, %v5157_v54  ;;  %v5187_v60 = vsel %vm5160_vm5, %v5173_v31, 0.0  ;;  %v3794_v21 = vadd.f32 %v3793_v59, %v3792_v51  ;;  %v3795_v13 = vpop.f32.mrb[70].mxu1  ;;  %v3750_v32 = vpop.f32.mrb[71].mxu0 }
 0x187   : > { %v3751_v6 = vadd.f32 %v3750_v32, %v3749_v57  ;;  %v3796_v15 = vpop.f32.mrb[71].mxu1  ;;  %v2768_v57 = vsel %vm5222_vm4, %v2759_v14, %v2721_v37 }
 0x188   : > { %3439 = vst [vmem:[%s5136_s7 + $0x8] sm:$0xff] %v3427_v7   ;;  %v2539_v0 = vadd.f32 %v3794_v21, %v3748_v56  ;;  %v3797_v44 = vadd.f32 %v3796_v15, %v3795_v13  ;;  %vm2777_vm5 = vcmp.ne.s32.totalorder %v2768_v57, 8 }
 0x18a   : > { %v5196_v10 = vadd.f32 %v2539_v0, %v5013_v30  ;;  %v2542_v55 = vadd.f32 %v3797_v44, %v3751_v6  ;;  %v4061_v6 = vmov (!%p3405_p5), 0.0  }
 0x18b   : > { %v3752_v11 = vpop.f32.mrb[72].mxu0  ;;  %2809 = vst [vmem:[#allocation2] sm:$0x3] (!%p3405_p5), %v4061_v6 }
 0x18c   : > { %v5203_v61 = vsel %vm2773_vm10, %v5196_v10, 0.0  ;;  %v5206_v38 = vadd.f32 %v2542_v55, %v5020_v2  ;;  %v3798_v45 = vpop.f32.mrb[72].mxu1  ;;  %v3753_v35 = vpop.f32.mrb[73].mxu0  ;;  %v2766_v2 = vsel %vm5198_vm14, %v2757_v20, %v2699_v41 }
 0x18d   : > { %v3754_v12 = vadd.f32 %v3753_v35, %v3752_v11  ;;  %v3799_v48 = vpop.f32.mrb[73].mxu1  ;;  %v3755_v3 = vpop.f32.mrb[74].mxu0  ;;  %vm2775_vm2 = vcmp.ne.s32.totalorder %v2766_v2, 8 }
 0x18e   : > { %v3432_v18 = vpack.c.bf16 %v5206_v38, %v5196_v10  ;;  %v2801_v17 = vsel %vm2774_vm13, %v5206_v38, 0.0  ;;  %v3800_v1 = vadd.f32 %v3799_v48, %v3798_v45  ;;  %v3801_v25 = vpop.f32.mrb[74].mxu1  ;;  %v3756_v50 = vpop.f32.mrb[75].mxu0 }
 0x18f   : > { %v3757_v58 = vadd.f32 %v3756_v50, %v3755_v3  ;;  %v3802_v19 = vpop.f32.mrb[75].mxu1 }
 0x190   : > { %3440 = vst [vmem:[%s5136_s7 + $0x10] sm:$0xff] %v3432_v18   ;;  %v2547_v27 = vadd.f32 %v3800_v1, %v3754_v12  ;;  %v3803_v22 = vadd.f32 %v3802_v19, %v3801_v25 }
 0x192   : > { %v2566_v42 = vadd.f32 %v2547_v27, %v5035_v36  ;;  %v2550_v47 = vadd.f32 %v3803_v22, %v3757_v58 }
 0x193   : > { %v3758_v34 = vpop.f32.mrb[76].mxu0 }
 0x194   : > { %v2802_v43 = vsel %vm2775_vm2, %v2566_v42, 0.0  ;;  %v2567_v62 = vadd.f32 %v2550_v47, %v5043_v5  ;;  %v3804_v41 = vpop.f32.mrb[76].mxu1  ;;  %v3759_v51 = vpop.f32.mrb[77].mxu0 }
 0x195   : > { %v3760_v63 = vadd.f32 %v3759_v51, %v3758_v34  ;;  %v3805_v52 = vpop.f32.mrb[77].mxu1  ;;  %v3761_v28 = vpop.f32.mrb[78].mxu0 }
 0x196   : > { %v3437_v56 = vpack.c.bf16 %v2567_v62, %v2566_v42  ;;  %v2803_v36 = vsel %vm2776_vm3, %v2567_v62, 0.0  ;;  %v3806_v59 = vadd.f32 %v3805_v52, %v3804_v41  ;;  %v3807_v9 = vpop.f32.mrb[78].mxu1  ;;  %v3762_v7 = vpop.f32.mrb[79].mxu0 }
 0x197   : > { %v3808_v21 = vpop.f32.mrb[79].mxu1 }
 0x198   : > { %3441 = vst [vmem:[%s5136_s7 + $0x18] sm:$0xff] %v3437_v56   ;;  %v2555_v53 = vadd.f32 %v3806_v59, %v3760_v63  ;;  %2808 = sbr.rel (%p3405_p5) target bundleno = 415 (0x19f), region = 40 }
 0x19a   : > { %v2568_v5 = vadd.f32 %v2555_v53, %v5058_v29 }
 0x19c   : > { %v3418_v13 = vpack.c.bf16 %v2568_v5, %v2568_v5  ;;  %v2804_v32 = vsel %vm2777_vm5, %v2568_v5, 0.0 }
 0x19e   : > { %2614 = vst [vmem:[%s5136_s7 + $0x20] sm:$0xf] %v3418_v13 }
 0x19f PF: > { %v2811_v15 = vadd.f32 %v5145_v23, %v5116_v4  ;;  %v2828_v33 = vmul.f32 %v5116_v4, %v5097_v46  ;;  %v2829_v0 = vmul.f32 %v5145_v23, %v5119_v8  ;;  %v2830_v29 = vmul.f32 %v5170_v40, %v5157_v54  ;;  %v2810_v50 = vld [vmem:[#allocation2] sm:$0x1]  ;;  %v2827_v26 = vld [vmem:[#allocation2 + $0x1] sm:$0x1]  ;;  %p3406_p6 = scmp.ne.s32.totalorder %s4051_s18, 1 }
 0x1a0   : > { %v2831_v39 = vmul.f32 %v5187_v60, %v5173_v31  ;;  %v2832_v11 = vmul.f32 %v5203_v61, %v5196_v10  ;;  %v2833_v4 = vmul.f32 %v2801_v17, %v5206_v38  ;;  %v2834_v16 = vmul.f32 %v2802_v43, %v2566_v42  ;;  %v2864_v63 = vld [vmem:[%s5273_s2] sm:$0x1] (!%p3406_p6) }
 0x1a1   : > { %v2812_v44 = vadd.f32 %v2811_v15, %v5170_v40  ;;  %v2837_v55 = vadd.f32 %v2829_v0, %v2828_v33  ;;  %v2835_v40 = vmul.f32 %v2803_v36, %v2567_v62  ;;  %v2836_v31 = vmul.f32 %v2804_v32, %v2568_v5  ;;  %v2869_v56 = vld [vmem:[%s5274_s3] sm:$0x1] (!%p3406_p6) }
 0x1a3   : > { %v2813_v20 = vadd.f32 %v2812_v44, %v5187_v60  ;;  %v2838_v24 = vadd.f32 %v2837_v55, %v2830_v29 }
 0x1a5   : > { %v2814_v46 = vadd.f32 %v2813_v20, %v5203_v61  ;;  %v2839_v8 = vadd.f32 %v2838_v24, %v2831_v39 }
 0x1a7   : > { %v2815_v23 = vadd.f32 %v2814_v46, %v2801_v17  ;;  %v2840_v54 = vadd.f32 %v2839_v8, %v2832_v11 }
 0x1a9   : > { %v2816_v45 = vadd.f32 %v2815_v23, %v2802_v43  ;;  %v2841_v35 = vadd.f32 %v2840_v54, %v2833_v4 }
 0x1ab   : > { %v2817_v30 = vadd.f32 %v2816_v45, %v2803_v36  ;;  %v2842_v37 = vadd.f32 %v2841_v35, %v2834_v16 }
 0x1ad   : > { %v2818_v12 = vadd.f32 %v2817_v30, %v2804_v32  ;;  %v2843_v60 = vadd.f32 %v2842_v37, %v2835_v40 }
 0x1af   : > { %v2819_v48 = vrot.slane %v2818_v12, 4  ;;  %v2844_v3 = vadd.f32 %v2843_v60, %v2836_v31 }
 0x1b1   : > { %v2820_v10 = vadd.f32 %v2819_v48, %v2818_v12  ;;  %v2845_v18 = vrot.slane %v2844_v3, 4 }
 0x1b3   : > { %v2821_v1 = vrot.slane %v2820_v10, 2  ;;  %v2846_v61 = vadd.f32 %v2845_v18, %v2844_v3 }
 0x1b5   : > { %v2822_v2 = vadd.f32 %v2821_v1, %v2820_v10  ;;  %v2847_v38 = vrot.slane %v2846_v61, 2 }
 0x1b7   : > { %v2823_v25 = vrot.slane %v2822_v2, 1  ;;  %v2848_v17 = vadd.f32 %v2847_v38, %v2846_v61 }
 0x1b9   : > { %v2824_v58 = vadd.f32 %v2823_v25, %v2822_v2  ;;  %v2849_v19 = vrot.slane %v2848_v17, 1  ;;  %2856 = sbr.rel (%p3406_p6) target bundleno = 481 (0x1e1), region = 44 }
 0x1bb   : > { %v2825_v27 = vadd.f32 %v2824_v58, %v2810_v50  ;;  %v2850_v22 = vadd.f32 %v2849_v19, %v2848_v17 }
 0x1bd   : > { %2826 = vst [vmem:[#allocation2] sm:$0x1] %v2825_v27  ;;  %v2851_v42 = vadd.f32 %v2850_v22, %v2827_v26 }
 0x1bf   : > { %2852 = vst [vmem:[#allocation2 + $0x1] sm:$0x1] %v2851_v42 }
 0x1c4   : > { %v2857_v47 = vld [vmem:[#allocation2] sm:$0x1] }
 0x1c5   : > { %v2858_v34 = vmul.f32 0.0078125, %v2857_v47 }
 0x1c6   : > { %v2859_v14 = vld [vmem:[#allocation2 + $0x1] sm:$0x1] }
 0x1c7   : > { %v2860_v49 = vmul.f32 0.0078125, %v2859_v14  ;;  %v2861_v43 = vmul.f32 %v2858_v34, %v2858_v34 }
 0x1c9   : > { %v2862_v62 = vsub.f32 %v2860_v49, %v2861_v43 }
 0x1cb   : > { %v2863_v41 = vmax.f32 %v2862_v62, 0.0 }
 0x1cd   : > { %v2865_v51 = vadd.f32 1e-05, %v2863_v41 }
 0x1cf   : > { %4035 = vrsqrt.f32 %v2865_v51 }
 0x1d9   : > { %v4036_v52 = vpop.eup %4035 }
 0x1da   : > { %v2867_v28 = vmul.f32 %v4036_v52, %v2864_v63 }
 0x1dc   : > { %2868 = vst [vmem:[%s5276_s5] sm:$0x1] %v2867_v28  ;;  %v2870_v36 = vmul.f32 %v2867_v28, %v2858_v34 }
 0x1de   : > { %v2871_v59 = vsub.f32 %v2869_v56, %v2870_v36 }
 0x1e0   : > { %2872 = vst [vmem:[%s5276_s5 + $0x1] sm:$0x1] %v2871_v59 }
 0x1e1 PF: > { %s16_s20 = sadd.s32 1, %s4059_s20   ;;  %s5299_s18 = smov %s4055_s19 }
 0x1e2   : > { %p13_p7 = scmp.ge.s32.totalorder %s16_s20, 4   ;;  %s5300_s19 = smov %s5302_s21 }
 0x1e4   :  { %15 = sbr.rel (!%p13_p7) target bundleno = 2 (0x2), region = 98 }

// kernel: dc_discriminator.12
= control target key start
LH: loop header
LB: loop body
LE: loop exit
PB: predicated region body
PF: predicated region fallthrough
CT: control target
= control target key end

     0   :  { %s475_s9 = smov 0   ;;  %s477_s10 = smov 0   ;;  %s521_s0 = inlined_call_operand.vmem [shape: bf16[2,20,256], index: 0, kind: input, shape index: {}]   ;;  %s522_s1 = inlined_call_operand.vmem [shape: f32[2,256], index: 1, kind: input, shape index: {}]   ;;  %s523_s2 = inlined_call_operand.vmem [shape: bf16[2,20,256], index: 2, kind: output, shape index: {}]  }
   0x1   :  { %s479_s11 = smov 0  }
   0x2 LB: > { %s21_s12 = sadd.s32 1, %s454_s10  ;;  %p399_p0 = scmp.ge.s32.totalorder %s458_s11, 1  ;;  %s458_s11 = sphi %s479_s11, %s12_s11   ;;  %s454_s10 = sphi %s477_s10, %s525_s10   ;;  %s450_s9 = sphi %s475_s9, %s524_s9  }
   0x3   : > { %p22_p1 = scmp.ge.s32.totalorder %s21_s12, 2  ;;  %p144_p2 = scmp.lt.s32.totalorder %s458_s11, 3 }
   0x5   : > { %s527_s12 = smov (%p22_p1, %s21_s12), 0  ;;  %p145_p3 = pnand %p399_p0, %p144_p2 }
   0x6   : > { %p180_p4 = scmp.lt.s32.totalorder (!%p145_p3), %s450_s9, 1  ;;  %v216_v0 = vlaneseq (!%p145_p3)  ;;  %v214_v2 = vld [vmem:[%s522_s1] ss:$2 sm:$0x3] (!%p145_p3) }
   0x7   : > { %148 = sbr.rel (%p145_p3) target bundleno = 35 (0x23), region = 28  ;;  %v402_v5 = vld [vmem:[%s522_s1 + $0x1] ss:$2 sm:$0x3] (!%p145_p3) }
   0x8   : > { %v217_v1 = vshrl.u32 (!%p145_p3), %v216_v0, 7 }
   0xa   : > { %v218_v3 = vsub.s32 (!%p145_p3), 0, %v217_v1  ;;  %v222_v4 = vsub.s32 (!%p145_p3), 1, %v217_v1 }
   0xc   : > { %v219_v6 = vrot.slane (!%p145_p3), %v214_v2, %v218_v3  ;;  %v223_v7 = vrot.slane (!%p145_p3), %v214_v2, %v222_v4  ;;  %v238_v11 = vrot.slane (!%p145_p3), %v402_v5, %v218_v3  ;;  %v242_v12 = vrot.slane (!%p145_p3), %v402_v5, %v222_v4 }
   0xe   : > { %s529_s9 = smov (!%p180_p4, %s450_s9), 1 }
   0xf   : > { %s411_s15 = smul.u32 24, %s529_s9 }
  0x11   : > { %s187_s20 = scalar_lea.vmem %s521_s0, %s411_s15  ;;  %s203_s23 = scalar_lea.vmem %s523_s2, %s411_s15 }
  0x12   : > { %v205_v8 = vld [vmem:[%s187_s20] sm:$0xff]  ;;  %v206_v9 = vld [vmem:[%s187_s20 + $0x8] sm:$0xff]  ;;  %v207_v10 = vld [vmem:[%s187_s20 + $0x10] sm:$0x33] }
  0x13   : > { %v208_v13 = vunpack.c.l.bf16 %v205_v8  ;;  %v209_v14 = vunpack.c.h.bf16 %v205_v8  ;;  %v210_v15 = vunpack.c.l.bf16 %v206_v9  ;;  %v211_v16 = vunpack.c.h.bf16 %v206_v9 }
  0x14   : > { %v212_v17 = vunpack.c.l.bf16 %v207_v10  ;;  %v213_v18 = vunpack.c.h.bf16 %v207_v10 }
  0x15   : > { %v226_v19 = vmul.f32 %v219_v6, %v208_v13  ;;  %v227_v20 = vmul.f32 %v223_v7, %v209_v14  ;;  %v228_v21 = vmul.f32 %v219_v6, %v210_v15  ;;  %v229_v22 = vmul.f32 %v223_v7, %v211_v16 }
  0x16   : > { %v230_v23 = vmul.f32 %v219_v6, %v212_v17  ;;  %v231_v24 = vmul.f32 %v223_v7, %v213_v18 }
  0x17   : > { %v245_v25 = vadd.f32 %v238_v11, %v226_v19  ;;  %v246_v26 = vadd.f32 %v242_v12, %v227_v20  ;;  %v247_v27 = vadd.f32 %v238_v11, %v228_v21  ;;  %v248_v28 = vadd.f32 %v242_v12, %v229_v22 }
  0x18   : > { %v249_v29 = vadd.f32 %v238_v11, %v230_v23  ;;  %v250_v30 = vadd.f32 %v242_v12, %v231_v24 }
  0x19   : > { %vm251_vm0 = vcmp.ge.f32.partialorder %v245_v25, 0.0  ;;  %vm252_vm1 = vcmp.ge.f32.partialorder %v246_v26, 0.0  ;;  %v257_v31 = vmul.f32 0.2, %v245_v25  ;;  %v258_v32 = vmul.f32 0.2, %v246_v26 }
  0x1a   : > { %vm253_vm2 = vcmp.ge.f32.partialorder %v247_v27, 0.0  ;;  %vm254_vm3 = vcmp.ge.f32.partialorder %v248_v28, 0.0  ;;  %v259_v33 = vmul.f32 0.2, %v247_v27  ;;  %v260_v34 = vmul.f32 0.2, %v248_v28 }
  0x1b   : > { %v263_v35 = vsel %vm251_vm0, %v245_v25, %v257_v31  ;;  %v264_v36 = vsel %vm252_vm1, %v246_v26, %v258_v32  ;;  %vm255_vm4 = vcmp.ge.f32.partialorder %v249_v29, 0.0  ;;  %vm256_vm5 = vcmp.ge.f32.partialorder %v250_v30, 0.0 }
  0x1c   : > { %v408_v37 = vpack.c.bf16 %v264_v36, %v263_v35  ;;  %v265_v38 = vsel %vm253_vm2, %v247_v27, %v259_v33  ;;  %v266_v39 = vsel %vm254_vm3, %v248_v28, %v260_v34  ;;  %v261_v40 = vmul.f32 0.2, %v249_v29 }
  0x1d   : > { %v409_v41 = vpack.c.bf16 %v266_v39, %v265_v38  ;;  %v262_v42 = vmul.f32 0.2, %v250_v30 }
  0x1e   : > { %289 = vst [vmem:[%s203_s23] sm:$0xff] %v408_v37  ;;  %v267_v43 = vsel %vm255_vm4, %v249_v29, %v261_v40 }
  0x1f   : > { %290 = vst [vmem:[%s203_s23 + $0x8] sm:$0xff] %v409_v41  ;;  %v268_v44 = vsel %vm256_vm5, %v250_v30, %v262_v42 }
  0x20   : > { %v410_v45 = vpack.c.bf16 %v268_v44, %v267_v43 }
  0x22   : > { %291 = vst [vmem:[%s203_s23 + $0x10] sm:$0x33] %v410_v45 }
  0x23 PF: > { %s12_s11 = sadd.s32 1, %s458_s11   ;;  %s524_s9 = smov %s454_s10 }
  0x24   : > { %p9_p5 = scmp.ge.s32.totalorder %s12_s11, 4   ;;  %s525_s10 = smov %s527_s12 }
  0x26   :  { %11 = sbr.rel (!%p9_p5) target bundleno = 2 (0x2), region = 62 }

// kernel: dc_discriminator.11
= control target key start
LH: loop header
LB: loop body
LE: loop exit
PB: predicated region body
PF: predicated region fallthrough
CT: control target
= control target key end

     0   :  { %s3963_s18 = smov 0   ;;  %s3965_s19 = smov 0   ;;  %s4982_s0 = inlined_call_operand.vmem [shape: bf16[2,30,512], index: 0, kind: input, shape index: {}]   ;;  %s4983_s1 = inlined_call_operand.vmem [shape: bf16[4,512,256], index: 1, kind: input, shape index: {}]   ;;  %s4984_s2 = inlined_call_operand.vmem [shape: f32[1,256], index: 2, kind: input, shape index: {}]   ;;  %s4985_s3 = inlined_call_operand.vmem [shape: f32[1,256], index: 3, kind: input, shape index: {}]   ;;  %s4986_s4 = inlined_call_operand.vmem [shape: bf16[2,20,256], index: 4, kind: output, shape index: {0}]   ;;  %s4987_s5 = inlined_call_operand.vmem [shape: f32[2,256], index: 5, kind: output, shape index: {1}]  }
   0x1   :  { %s3967_s20 = smov 0  }
   0x2 LB: > { %s25_s21 = sadd.s32 1, %s3925_s19  ;;  %p2916_p0 = scmp.ge.s32.totalorder %s3929_s20, 1  ;;  %s3929_s20 = sphi %s3967_s20, %s16_s20   ;;  %s3925_s19 = sphi %s3965_s19, %s4997_s19   ;;  %s3921_s18 = sphi %s3963_s18, %s4996_s18  }
   0x3   : > { %p26_p1 = scmp.ge.s32.totalorder %s25_s21, 2  ;;  %p235_p2 = scmp.lt.s32.totalorder %s3929_s20, 3 }
   0x5   : > { %s4999_s21 = smov (%p26_p1, %s25_s21), 0  ;;  %p236_p3 = pnand %p2916_p0, %p235_p2 }
   0x6   : > { %v3493_v0 = vld [vmem:[%s4983_s1 + $0x204] ss:$8 sps:$4 sm:$0xff] (!%p236_p3)   ;;  %v3497_v2 = vld [vmem:[%s4983_s1 + $0x200] ss:$8 sps:$4 sm:$0xff] (!%p236_p3)   ;;  %v3499_v4 = vld [vmem:[%s4983_s1 + $0x214] ss:$8 sps:$4 sm:$0xff] (!%p236_p3)  }
   0x7   : > { %239 = sbr.rel (%p236_p3) target bundleno = 552 (0x228), region = 36  ;;  %v3495_v1 = vld [vmem:[%s4983_s1 + $0x404] ss:$8 sps:$4 sm:$0xff] (!%p236_p3)   ;;  %874 = vmatprep.subr.bf16.mxu1 (!%p236_p3), %v3493_v0  ;;  %v3498_v3 = vld [vmem:[%s4983_s1 + $0x400] ss:$8 sps:$4 sm:$0xff] (!%p236_p3)   ;;  %p285_p4 = scmp.lt.s32.totalorder (!%p236_p3), %s3921_s18, 1 }
   0x8   : > { %1918 = vmatprep.subr.bf16.mxu0 (!%p236_p3), %v3495_v1  ;;  %875 = vmatpush1.bf16.msra.mxu1 (!%p236_p3), %v3497_v2  ;;  %v3501_v5 = vld [vmem:[%s4983_s1 + $0x414] ss:$8 sps:$4 sm:$0xff] (!%p236_p3)   ;;  %v3503_v6 = vld [vmem:[%s4983_s1 + $0x210] ss:$8 sps:$4 sm:$0xff] (!%p236_p3)   ;;  %v3505_v8 = vld [vmem:[%s4983_s1 + $0x224] ss:$8 sps:$4 sm:$0xff] (!%p236_p3)  }
   0x9   : > { %1919 = vmatpush1.bf16.msra.mxu0 (!%p236_p3), %v3498_v3  ;;  %876 = vmatprep.subr.bf16.mxu1 (!%p236_p3), %v3499_v4  ;;  %v3504_v7 = vld [vmem:[%s4983_s1 + $0x410] ss:$8 sps:$4 sm:$0xff] (!%p236_p3)   ;;  %v3507_v9 = vld [vmem:[%s4983_s1 + $0x424] ss:$8 sps:$4 sm:$0xff] (!%p236_p3)   ;;  %v3509_v10 = vld [vmem:[%s4983_s1 + $0x220] ss:$8 sps:$4 sm:$0xff] (!%p236_p3)  }
   0xa   : > { %1920 = vmatprep.subr.bf16.mxu0 (!%p236_p3), %v3501_v5  ;;  %v3510_v11 = vld [vmem:[%s4983_s1 + $0x420] ss:$8 sps:$4 sm:$0xff] (!%p236_p3)   ;;  %v3511_v12 = vld [vmem:[%s4983_s1 + $0x234] ss:$8 sps:$4 sm:$0xff] (!%p236_p3)   ;;  %v3515_v14 = vld [vmem:[%s4983_s1 + $0x230] ss:$8 sps:$4 sm:$0xff] (!%p236_p3)  }
   0xb   : > { %v3513_v13 = vld [vmem:[%s4983_s1 + $0x434] ss:$8 sps:$4 sm:$0xff] (!%p236_p3)   ;;  %v3516_v15 = vld [vmem:[%s4983_s1 + $0x430] ss:$8 sps:$4 sm:$0xff] (!%p236_p3)   ;;  %v3517_v16 = vld [vmem:[%s4983_s1 + $0x244] ss:$8 sps:$4 sm:$0xff] (!%p236_p3)  }
   0xc   : > { %877 = vmatpush1.bf16.msra.mxu1 (!%p236_p3), %v3503_v6  ;;  %v3519_v17 = vld [vmem:[%s4983_s1 + $0x444] ss:$8 sps:$4 sm:$0xff] (!%p236_p3)   ;;  %v3521_v18 = vld [vmem:[%s4983_s1 + $0x240] ss:$8 sps:$4 sm:$0xff] (!%p236_p3)   ;;  %v3523_v20 = vld [vmem:[%s4983_s1 + $0x254] ss:$8 sps:$4 sm:$0xff] (!%p236_p3)  }
   0xd   : > { %1921 = vmatpush1.bf16.msra.mxu0 (!%p236_p3), %v3504_v7  ;;  %878 = vmatprep.subr.bf16.mxu1 (!%p236_p3), %v3505_v8  ;;  %v3522_v19 = vld [vmem:[%s4983_s1 + $0x440] ss:$8 sps:$4 sm:$0xff] (!%p236_p3)   ;;  %v3525_v21 = vld [vmem:[%s4983_s1 + $0x454] ss:$8 sps:$4 sm:$0xff] (!%p236_p3)   ;;  %v3527_v22 = vld [vmem:[%s4983_s1 + $0x250] ss:$8 sps:$4 sm:$0xff] (!%p236_p3)  }
   0xe   : > { %1922 = vmatprep.subr.bf16.mxu0 %v3507_v9  ;;  %v3528_v23 = vld [vmem:[%s4983_s1 + $0x450] ss:$8 sps:$4 sm:$0xff]   ;;  %v3529_v24 = vld [vmem:[%s4983_s1 + $0x264] ss:$8 sps:$4 sm:$0xff]   ;;  %v3533_v26 = vld [vmem:[%s4983_s1 + $0x260] ss:$8 sps:$4 sm:$0xff]  }
   0xf   : > { %v3531_v25 = vld [vmem:[%s4983_s1 + $0x464] ss:$8 sps:$4 sm:$0xff]   ;;  %v3534_v27 = vld [vmem:[%s4983_s1 + $0x460] ss:$8 sps:$4 sm:$0xff]   ;;  %v3535_v28 = vld [vmem:[%s4983_s1 + $0x274] ss:$8 sps:$4 sm:$0xff]  }
  0x10   : > { %879 = vmatpush1.bf16.msra.mxu1 %v3509_v10  ;;  %v3537_v29 = vld [vmem:[%s4983_s1 + $0x474] ss:$8 sps:$4 sm:$0xff]   ;;  %v3539_v30 = vld [vmem:[%s4983_s1 + $0x270] ss:$8 sps:$4 sm:$0xff]   ;;  %v3541_v32 = vld [vmem:[%s4983_s1 + $0x284] ss:$8 sps:$4 sm:$0xff]  }
  0x11   : > { %1923 = vmatpush1.bf16.msra.mxu0 %v3510_v11  ;;  %880 = vmatprep.subr.bf16.mxu1 %v3511_v12  ;;  %v3540_v31 = vld [vmem:[%s4983_s1 + $0x470] ss:$8 sps:$4 sm:$0xff]   ;;  %v3543_v33 = vld [vmem:[%s4983_s1 + $0x484] ss:$8 sps:$4 sm:$0xff]   ;;  %v3545_v34 = vld [vmem:[%s4983_s1 + $0x280] ss:$8 sps:$4 sm:$0xff]  }
  0x12   : > { %1924 = vmatprep.subr.bf16.mxu0 %v3513_v13  ;;  %v3546_v35 = vld [vmem:[%s4983_s1 + $0x480] ss:$8 sps:$4 sm:$0xff]   ;;  %v3547_v36 = vld [vmem:[%s4983_s1 + $0x294] ss:$8 sps:$4 sm:$0xff]   ;;  %s4096_s8 = scalar_select %p285_p4, %s3921_s18, 1  ;;  %vm2103_vm2 = vcmask 1044480  }
  0x13   : > { %v3549_v37 = vld [vmem:[%s4983_s1 + $0x494] ss:$8 sps:$4 sm:$0xff]   ;;  %v3551_v38 = vld [vmem:[%s4983_s1 + $0x290] ss:$8 sps:$4 sm:$0xff]   ;;  %v3553_v40 = vld [vmem:[%s4983_s1 + $0x2a4] ss:$8 sps:$4 sm:$0xff]  }
  0x14   : > { %881 = vmatpush1.bf16.msra.mxu1 %v3515_v14  ;;  %v3552_v39 = vld [vmem:[%s4983_s1 + $0x490] ss:$8 sps:$4 sm:$0xff]   ;;  %s3402_s17 = sshll.u32 %s4096_s8, 6  ;;  %v3555_v41 = vld [vmem:[%s4983_s1 + $0x4a4] ss:$8 sps:$4 sm:$0xff]   ;;  %p3395_p5 = scmp.ne.s32.totalorder %s3921_s18, 0 }
  0x15   : > { %1925 = vmatpush1.bf16.msra.mxu0 %v3516_v15  ;;  %882 = vmatprep.subr.bf16.mxu1 %v3517_v16  ;;  %v3557_v42 = vld [vmem:[%s4983_s1 + $0x2a0] ss:$8 sps:$4 sm:$0xff]   ;;  %s4123_s30 = scalar_lea.vmem %s4982_s0, %s3402_s17  ;;  %v3559_v44 = vld [vmem:[%s4983_s1 + $0x2b4] ss:$8 sps:$4 sm:$0xff]   ;;  %v3563_v46 = vld [vmem:[%s4983_s1 + $0x2b0] ss:$8 sps:$4 sm:$0xff]  }
  0x16   : > { %1926 = vmatprep.subr.bf16.mxu0 %v3519_v17  ;;  %v3558_v43 = vld [vmem:[%s4983_s1 + $0x4a0] ss:$8 sps:$4 sm:$0xff]   ;;  %v3561_v45 = vld [vmem:[%s4983_s1 + $0x4b4] ss:$8 sps:$4 sm:$0xff]   ;;  %v3564_v47 = vld [vmem:[%s4983_s1 + $0x4b0] ss:$8 sps:$4 sm:$0xff]  }
  0x17   : > { %v322_v48 = vld [vmem:[%s4123_s30] sm:$0xff]  ;;  %v4139_v49 = vld [vmem:[%s4123_s30 + $0x10] sm:$0xff]  ;;  %vm485_vm0 = vsmask.f32 7424  ;;  %vm1521_vm1 = vsmask.f32 5376 }
  0x18   : > { %883 = vmatpush1.bf16.msra.mxu1 %v3521_v18  ;;  %v392_v50 = vld [vmem:[%s4123_s30 + $0x20] sm:$0x77]  ;;  %v4149_v53 = vcombine.high %v322_v48, %v4139_v49  ;;  %v4168_v63 = vcombine.low %v322_v48, %v4139_v49  ;;  %v3571_v1 = vld [vmem:[%s4983_s1 + $0x2d4] ss:$8 sps:$4 sm:$0xff]   ;;  %v3575_v13 = vld [vmem:[%s4983_s1 + $0x2d0] ss:$8 sps:$4 sm:$0xff]  }
  0x19   : > { %1927 = vmatpush1.bf16.msra.mxu0 %v3522_v19  ;;  %884 = vmatprep.subr.bf16.mxu1 %v3523_v20  ;;  %v3565_v51 = vld [vmem:[%s4983_s1 + $0x2c4] ss:$8 sps:$4 sm:$0xff]   ;;  %v4151_v54 = vcombine.high %v392_v50, %v392_v50  ;;  %v3569_v56 = vld [vmem:[%s4983_s1 + $0x2c0] ss:$8 sps:$4 sm:$0xff]   ;;  %v3573_v6 = vld [vmem:[%s4983_s1 + $0x4d4] ss:$8 sps:$4 sm:$0xff]   ;;  %v4185_v16 = vcombine.low %v392_v50, %v392_v50 }
  0x1a   : > { %1928 = vmatprep.subr.bf16.mxu0 %v3525_v21  ;;  %v3567_v52 = vld [vmem:[%s4983_s1 + $0x4c4] ss:$8 sps:$4 sm:$0xff]   ;;  %v499_v57 = vshrl.u32 %v4149_v53, 16  ;;  %v501_v58 = vshll.u32 %v4149_v53, 16  ;;  %v3570_v62 = vld [vmem:[%s4983_s1 + $0x4c0] ss:$8 sps:$4 sm:$0xff]  }
  0x1b   : > { %v1416_v55 = vld [vmem:[%s4123_s30] sm:$0xcc]  ;;  %v506_v59 = vshll.u32 %v4151_v54, 16  ;;  %v489_v17 = vshll.u32 %v4168_v63, 16  ;;  %v3576_v18 = vld [vmem:[%s4983_s1 + $0x4d0] ss:$8 sps:$4 sm:$0xff]  }
  0x1c   : > { %885 = vmatpush1.bf16.msra.mxu1 %v3527_v22  ;;  %v3189_v60 = vcombine.high %v1416_v55, %v4139_v49  ;;  %v4162_v61 = vld [vmem:[%s4123_s30 + $0x24] ss:$16 sps:$4 sm:$0x1f]   ;;  %v3188_v0 = vcombine.low %v1416_v55, %v4139_v49  ;;  %v503_v2 = vrot.slane %v501_v58, 1  ;;  %v537_v48 = vshrl.u32 %v4151_v54, 16 }
  0x1d   : > { %1929 = vmatpush1.bf16.msra.mxu0 %v3528_v23  ;;  %886 = vmatprep.subr.bf16.mxu1 %v3529_v24  ;;  %v4174_v3 = vrot.slane %v506_v59, 1  ;;  %v1548_v7 = vshrl.u32 %v4162_v61, 16  ;;  %v1551_v8 = vshll.u32 %v4162_v61, 16  ;;  %v3603_v12 = vld [vmem:[%s4123_s30 + $0x20] ss:$16 sps:$4 sm:$0x1f]  }
  0x1e   : > { %1930 = vmatprep.subr.bf16.mxu0 %v3531_v25  ;;  %v1540_v4 = vshrl.u32 %v3189_v60, 16  ;;  %v1543_v5 = vshll.u32 %v3189_v60, 16  ;;  %v504_v9 = vor.u32 %v503_v2, %v499_v57  ;;  %v1523_v21 = vshrl.u32 %v3188_v0, 16  ;;  %v3577_v23 = vld [vmem:[%s4983_s1 + $0x2e4] ss:$8 sps:$4 sm:$0xff]  }
  0x1f   : > { %v1550_v14 = vrot.slane %v1548_v7, 2  ;;  %v1553_v15 = vrot.slane %v1551_v8, 3  ;;  %v1526_v22 = vshll.u32 %v3188_v0, 16  ;;  %v3579_v24 = vld [vmem:[%s4983_s1 + $0x4e4] ss:$8 sps:$4 sm:$0xff]   ;;  %v539_v57 = vor.u32 %v537_v48, %v4174_v3 }
  0x20   : > { %887 = vmatpush1.bf16.msra.mxu1 %v3533_v26  ;;  %v1542_v10 = vrot.slane %v1540_v4, 2  ;;  %v1545_v11 = vrot.slane %v1543_v5, 3  ;;  %v509_v19 = vsel %vm485_vm0, %v504_v9, %v4174_v3  ;;  %v1531_v26 = vshrl.u32 %v3603_v12, 16  ;;  %v3591_v50 = vld [vmem:[%s4983_s1 + $0x300] ss:$8 sps:$4 sm:$0xff]  }
  0x21   : > { %1931 = vmatpush1.bf16.msra.mxu0 %v3534_v27  ;;  %888 = vmatprep.subr.bf16.mxu1 %v3535_v28  ;;  %v1554_v25 = vor.u32 %v1553_v15, %v1550_v14  ;;  %v1534_v27 = vshll.u32 %v3603_v12, 16  ;;  %v3581_v28 = vld [vmem:[%s4983_s1 + $0x2e0] ss:$8 sps:$4 sm:$0xff]   ;;  %v3606_v54 = vld [vmem:[%s4983_s1 + $0x314] ss:$8 sps:$4 sm:$0xff]   ;;  %v534_v59 = vshrl.u32 %v4185_v16, 16 }
  0x22   : > { %1932 = vmatprep.subr.bf16.mxu0 %v3537_v29  ;;  %v1546_v20 = vor.u32 %v1545_v11, %v1542_v10  ;;  %v3582_v29 = vld [vmem:[%s4983_s1 + $0x4e0] ss:$8 sps:$4 sm:$0xff]   ;;  %906 = vmatprep.mubr.bf16.mxu1 %v509_v19  ;;  %v3604_v58 = vld [vmem:[%s4983_s1 + $0x310] ss:$8 sps:$4 sm:$0xff]   ;;  %v3615_v0 = vld [vmem:[%s4983_s1 + $0x524] ss:$8 sps:$4 sm:$0xff]  }
  0x23   : > { %v3607_v60 = vld [vmem:[%s4983_s1 + $0x510] ss:$8 sps:$4 sm:$0xff]   ;;  %v3613_v3 = vld [vmem:[%s4983_s1 + $0x520] ss:$8 sps:$4 sm:$0xff]   ;;  %v3618_v4 = vld [vmem:[%s4983_s1 + $0x334] ss:$8 sps:$4 sm:$0xff]  }
  0x24   : > { %889 = vmatpush1.bf16.msra.mxu1 %v3539_v30  ;;  %v1555_v30 = vsel %vm1521_vm1, %v1546_v20, %v1554_v25  ;;  %v3621_v5 = vld [vmem:[%s4983_s1 + $0x534] ss:$8 sps:$4 sm:$0xff]   ;;  %v3619_v7 = vld [vmem:[%s4983_s1 + $0x530] ss:$8 sps:$4 sm:$0xff]   ;;  %v3624_v8 = vld [vmem:[%s4983_s1 + $0x344] ss:$8 sps:$4 sm:$0xff]  }
  0x25   : > { %1933 = vmatpush1.bf16.msra.mxu0 %v3540_v31  ;;  %890 = vmatprep.subr.bf16.mxu1 %v3541_v32  ;;  %v487_v31 = vshrl.u32 %v4168_v63, 16  ;;  %v491_v32 = vrot.slane %v489_v17, 1  ;;  %v3627_v9 = vld [vmem:[%s4983_s1 + $0x544] ss:$8 sps:$4 sm:$0xff]   ;;  %v3622_v10 = vld [vmem:[%s4983_s1 + $0x340] ss:$8 sps:$4 sm:$0xff]  }
  0x26   : > { %1934 = vmatprep.subr.bf16.mxu0 %v3543_v33  ;;  %v494_v33 = vshll.u32 %v4185_v16, 16  ;;  %1950 = vmatprep.mubr.bf16.mxu0 %v1555_v30  ;;  %v3625_v11 = vld [vmem:[%s4983_s1 + $0x540] ss:$8 sps:$4 sm:$0xff]   ;;  %v3630_v12 = vld [vmem:[%s4983_s1 + $0x354] ss:$8 sps:$4 sm:$0xff]  }
  0x27   : > { %v3628_v14 = vld [vmem:[%s4983_s1 + $0x350] ss:$8 sps:$4 sm:$0xff]   ;;  %v3636_v16 = vld [vmem:[%s4983_s1 + $0x364] ss:$8 sps:$4 sm:$0xff]   ;;  %v3637_v19 = vld [vmem:[%s4983_s1 + $0x560] ss:$8 sps:$4 sm:$0xff]  }
  0x28   : > { %891 = vmatpush1.bf16.msra.mxu1 %v3545_v34  ;;  %v1525_v34 = vrot.slane %v1523_v21, 2  ;;  %v3631_v15 = vld [vmem:[%s4983_s1 + $0x550] ss:$8 sps:$4 sm:$0xff]   ;;  %v3639_v17 = vld [vmem:[%s4983_s1 + $0x564] ss:$8 sps:$4 sm:$0xff]  }
  0x29   : > { %1935 = vmatpush1.bf16.msra.mxu0 %v3546_v35  ;;  %892 = vmatprep.subr.bf16.mxu1 %v3547_v36  ;;  %v1528_v35 = vrot.slane %v1526_v22, 3  ;;  %v1533_v36 = vrot.slane %v1531_v26, 2  ;;  %v3642_v20 = vld [vmem:[%s4983_s1 + $0x374] ss:$8 sps:$4 sm:$0xff]   ;;  %v3640_v22 = vld [vmem:[%s4983_s1 + $0x370] ss:$8 sps:$4 sm:$0xff]  }
  0x2a   : > { %1936 = vmatprep.subr.bf16.mxu0 %v3549_v37  ;;  %v1536_v37 = vrot.slane %v1534_v27, 3  ;;  %v3645_v21 = vld [vmem:[%s4983_s1 + $0x574] ss:$8 sps:$4 sm:$0xff]   ;;  %v4328_v26 = vld [vmem:[%s4123_s30 + $0x28] sm:$0x77] }
  0x2b   : > { %v3648_v27 = vld [vmem:[%s4983_s1 + $0x384] ss:$8 sps:$4 sm:$0xff]   ;;  %v4342_v30 = vcombine.high %v4328_v26, %v4328_v26 }
  0x2c   : > { %893 = vmatpush1.bf16.msra.mxu1 %v3551_v38  ;;  %v3583_v38 = vld [vmem:[%s4983_s1 + $0x2f4] ss:$8 sps:$4 sm:$0xff]  }
  0x2d   : > { %1937 = vmatpush1.bf16.msra.mxu0 %v3552_v39  ;;  %894 = vmatprep.subr.bf16.mxu1 %v3553_v40  ;;  %v3585_v39 = vld [vmem:[%s4983_s1 + $0x4f4] ss:$8 sps:$4 sm:$0xff]   ;;  %v3587_v40 = vld [vmem:[%s4983_s1 + $0x2f0] ss:$8 sps:$4 sm:$0xff]  }
  0x2e   : > { %1938 = vmatprep.subr.bf16.mxu0 %v3555_v41  ;;  %v3588_v41 = vld [vmem:[%s4983_s1 + $0x4f0] ss:$8 sps:$4 sm:$0xff]  }
  0x30   : > { %895 = vmatpush1.bf16.msra.mxu1 %v3557_v42  ;;  %v492_v42 = vor.u32 %v491_v32, %v487_v31  ;;  %v1417_v31 = vld [vmem:[%s4123_s30 + $0x8] sm:$0xcc] }
  0x31   : > { %1939 = vmatpush1.bf16.msra.mxu0 %v3558_v43  ;;  %896 = vmatprep.subr.bf16.mxu1 %v3559_v44  ;;  %v496_v43 = vrot.slane %v494_v33, 1  ;;  %v1529_v44 = vor.u32 %v1528_v35, %v1525_v34  ;;  %v3646_v35 = vld [vmem:[%s4983_s1 + $0x380] ss:$8 sps:$4 sm:$0xff]  }
  0x32   : > { %1940 = vmatprep.subr.bf16.mxu0 %v3561_v45  ;;  %v1537_v45 = vor.u32 %v1536_v37, %v1533_v36  ;;  %v3649_v36 = vld [vmem:[%s4983_s1 + $0x580] ss:$8 sps:$4 sm:$0xff]   ;;  %v530_v37 = vshll.u32 %v4342_v30, 16 }
  0x33   : > { %v536_v2 = vor.u32 %v534_v59, %v496_v43 }
  0x34   : > { %897 = vmatpush1.bf16.msra.mxu1 %v3563_v46  ;;  %v3593_v46 = vld [vmem:[%s4983_s1 + $0x304] ss:$8 sps:$4 sm:$0xff]   ;;  %v1538_v55 = vsel %vm1521_vm1, %v1529_v44, %v1537_v45  ;;  %v4364_v44 = vrot.slane %v530_v37, 1  ;;  %v3690_v37 = vld [vmem:[%s4983_s1 + $0x3f4] ss:$8 sps:$4 sm:$0xff]  }
  0x35   : > { %1941 = vmatpush1.bf16.msra.mxu0 %v3564_v47  ;;  %898 = vmatprep.subr.bf16.mxu1 %v3565_v51  ;;  %v3599_v47 = vld [vmem:[%s4983_s1 + $0x504] ss:$8 sps:$4 sm:$0xff]   ;;  %v3597_v51 = vld [vmem:[%s4983_s1 + $0x500] ss:$8 sps:$4 sm:$0xff]  }
  0x36   : > { %1942 = vmatprep.subr.bf16.mxu0 %v3567_v52  ;;  %v497_v52 = vsel %vm485_vm0, %v492_v42, %v496_v43  ;;  %v3654_v42 = vld [vmem:[%s4983_s1 + $0x394] ss:$8 sps:$4 sm:$0xff]  }
  0x37   : > { %v3657_v43 = vld [vmem:[%s4983_s1 + $0x594] ss:$8 sps:$4 sm:$0xff]  }
  0x38   : > { %899 = vmatpush1.bf16.msra.mxu1 %v3569_v56  ;;  %v3609_v56 = vld [vmem:[%s4983_s1 + $0x514] ss:$8 sps:$4 sm:$0xff]  }
  0x39   : > { %1943 = vmatpush1.bf16.msra.mxu0 %v3570_v62  ;;  %900 = vmatprep.subr.bf16.mxu1 %v3571_v1  ;;  %v3612_v62 = vld [vmem:[%s4983_s1 + $0x324] ss:$8 sps:$4 sm:$0xff]   ;;  %v3610_v1 = vld [vmem:[%s4983_s1 + $0x320] ss:$8 sps:$4 sm:$0xff]  }
  0x3a   : > { %1944 = vmatprep.subr.bf16.mxu0 %v3573_v6  ;;  %v3616_v6 = vld [vmem:[%s4983_s1 + $0x330] ss:$8 sps:$4 sm:$0xff]  }
  0x3c   : > { %901 = vmatpush1.bf16.msra.mxu1 %v3575_v13  ;;  %v3633_v13 = vld [vmem:[%s4983_s1 + $0x554] ss:$8 sps:$4 sm:$0xff]  }
  0x3d   : > { %1945 = vmatpush1.bf16.msra.mxu0 %v3576_v18  ;;  %902 = vmatprep.subr.bf16.mxu1 %v3577_v23  ;;  %v3634_v18 = vld [vmem:[%s4983_s1 + $0x360] ss:$8 sps:$4 sm:$0xff]   ;;  %v3643_v23 = vld [vmem:[%s4983_s1 + $0x570] ss:$8 sps:$4 sm:$0xff]  }
  0x3e   : > { %1946 = vmatprep.subr.bf16.mxu0 %v3579_v24  ;;  %v4322_v24 = vld [vmem:[%s4123_s30 + $0x8] sm:$0xff] }
  0x40   : > { %903 = vmatpush1.bf16.msra.mxu1 %v3581_v28 }
  0x41   : > { %1947 = vmatpush1.bf16.msra.mxu0 %v3582_v29  ;;  %904 = vmatprep.subr.bf16.mxu1 %v3583_v38  ;;  %v3651_v29 = vld [vmem:[%s4983_s1 + $0x584] ss:$8 sps:$4 sm:$0xff]  }
  0x42   : > { %1948 = vmatprep.subr.bf16.mxu0 %v3585_v39  ;;  %v4356_v39 = vld [vmem:[%s4123_s30 + $0x2c] ss:$16 sps:$4 sm:$0x1f]  }
  0x43   : > { %v1582_v48 = vshrl.u32 %v4356_v39, 16 }
  0x44   : > { %905 = vmatpush1.bf16.msra.mxu1 %v3587_v40 }
  0x45   : > { %1949 = vmatpush1.bf16.msra.mxu0 %v3588_v41  ;;  %925 = vmatprep.subr.bf16.mxu1 %v3593_v46 }
  0x46   : > { %1969 = vmatprep.subr.bf16.mxu0 %v3599_v47 }
  0x47   : > { %907 = vmatmul.mubr.bf16.vlgmr.msra.gmra.mrb[0].mxu1 %v497_v52  ;;  %v3655_v52 = vld [vmem:[%s4983_s1 + $0x590] ss:$8 sps:$4 sm:$0xff]  }
  0x48   : > { %1951 = vmatmul.mubr.bf16.vlgmr.msra.gmra.mrb[0].mxu0 %v1538_v55  ;;  %926 = vmatpush1.bf16.msra.mxu1 %v3591_v50  ;;  %v3652_v50 = vld [vmem:[%s4983_s1 + $0x390] ss:$8 sps:$4 sm:$0xff]  }
  0x49   : > { %1970 = vmatpush1.bf16.msra.mxu0 %v3597_v51  ;;  %927 = vmatprep.subr.bf16.mxu1 %v3606_v54  ;;  %v1585_v51 = vshll.u32 %v4356_v39, 16  ;;  %v1584_v54 = vrot.slane %v1582_v48, 2  ;;  %v3708_v48 = vld [vmem:[%s4983_s1 + $0x604] ss:$8 sps:$4 sm:$0xff]  }
  0x4a   : > { %1971 = vmatprep.subr.bf16.mxu0 %v3609_v56  ;;  %916 = vmatprep.mubr.bf16.mxu1 %v539_v57  ;;  %v3660_v56 = vld [vmem:[%s4983_s1 + $0x3a4] ss:$8 sps:$4 sm:$0xff]  }
  0x4b   : > { %1960 = vmatprep.mubr.bf16.mxu0 %v1554_v25  ;;  %v4325_v25 = vld [vmem:[%s4123_s30 + $0x18] sm:$0xff]  ;;  %v3663_v57 = vld [vmem:[%s4983_s1 + $0x5a4] ss:$8 sps:$4 sm:$0xff]   ;;  %v1587_v59 = vrot.slane %v1585_v51, 3  ;;  %v3698_v51 = vld [vmem:[%s4983_s1] ss:$8 sps:$4 sm:$0xff]  }
  0x4c   : > { %928 = vmatpush1.bf16.msra.mxu1 %v3604_v58  ;;  %v4335_v28 = vcombine.high %v4322_v24, %v4325_v25  ;;  %v3191_v34 = vcombine.high %v1417_v31, %v4325_v25 }
  0x4d   : > { %1972 = vmatpush1.bf16.msra.mxu0 %v3607_v60  ;;  %929 = vmatprep.subr.bf16.mxu1 %v3612_v62  ;;  %v4382_v60 = vor.u32 %v1587_v59, %v1584_v54  ;;  %v3658_v62 = vld [vmem:[%s4983_s1 + $0x3a0] ss:$8 sps:$4 sm:$0xff]   ;;  %v3709_v59 = vld [vmem:[%s4983_s1 + $0x10] ss:$8 sps:$4 sm:$0xff]  }
  0x4e   : > { %1973 = vmatprep.subr.bf16.mxu0 %v3615_v0  ;;  %v523_v32 = vshrl.u32 %v4335_v28, 16  ;;  %v525_v33 = vshll.u32 %v4335_v28, 16  ;;  %v1574_v40 = vshrl.u32 %v3191_v34, 16  ;;  %v1577_v41 = vshll.u32 %v3191_v34, 16  ;;  %v3661_v0 = vld [vmem:[%s4983_s1 + $0x5a0] ss:$8 sps:$4 sm:$0xff]  }
  0x4f   : > { %917 = vmatmul.mubr.bf16.gmra.mrb[4].mxu1 %v536_v2  ;;  %v3669_v2 = vld [vmem:[%s4983_s1 + $0x5b4] ss:$8 sps:$4 sm:$0xff]  }
  0x50   : > { %1961 = vmatmul.mubr.bf16.gmra.mrb[4].mxu0 %v1537_v45  ;;  %930 = vmatpush1.bf16.msra.mxu1 %v3610_v1  ;;  %v527_v38 = vrot.slane %v525_v33, 1  ;;  %v1576_v46 = vrot.slane %v1574_v40, 2  ;;  %v1579_v47 = vrot.slane %v1577_v41, 3  ;;  %v3666_v1 = vld [vmem:[%s4983_s1 + $0x3b4] ss:$8 sps:$4 sm:$0xff]  }
  0x51   : > { %1974 = vmatpush1.bf16.msra.mxu0 %v3613_v3  ;;  %931 = vmatprep.subr.bf16.mxu1 %v3618_v4  ;;  %v3664_v4 = vld [vmem:[%s4983_s1 + $0x3b0] ss:$8 sps:$4 sm:$0xff]  }
  0x52   : > { %1975 = vmatprep.subr.bf16.mxu0 %v3621_v5  ;;  %v528_v45 = vor.u32 %v527_v38, %v523_v32  ;;  %v1580_v58 = vor.u32 %v1579_v47, %v1576_v46  ;;  %v3667_v5 = vld [vmem:[%s4983_s1 + $0x5b0] ss:$8 sps:$4 sm:$0xff]   ;;  %v3693_v38 = vld [vmem:[%s4983_s1 + $0x5f4] ss:$8 sps:$4 sm:$0xff]   ;;  %v3700_v47 = vld [vmem:[%s4983_s1 + $0x4] ss:$8 sps:$4 sm:$0xff]  }
  0x53   : > { %v3688_v40 = vld [vmem:[%s4983_s1 + $0x3f0] ss:$8 sps:$4 sm:$0xff]  }
  0x54   : > { %932 = vmatpush1.bf16.msra.mxu1 %v3616_v6  ;;  %v533_v55 = vsel %vm485_vm0, %v528_v45, %v4364_v44  ;;  %v1589_v3 = vsel %vm1521_vm1, %v1580_v58, %v4382_v60  ;;  %v3672_v6 = vld [vmem:[%s4983_s1 + $0x3c4] ss:$8 sps:$4 sm:$0xff]   ;;  %v3691_v41 = vld [vmem:[%s4983_s1 + $0x5f0] ss:$8 sps:$4 sm:$0xff]  }
  0x55   : > { %1976 = vmatpush1.bf16.msra.mxu0 %v3619_v7  ;;  %933 = vmatprep.subr.bf16.mxu1 %v3624_v8  ;;  %v3675_v7 = vld [vmem:[%s4983_s1 + $0x5c4] ss:$8 sps:$4 sm:$0xff]   ;;  %v3670_v8 = vld [vmem:[%s4983_s1 + $0x3c0] ss:$8 sps:$4 sm:$0xff]  }
  0x56   : > { %1977 = vmatprep.subr.bf16.mxu0 %v3627_v9  ;;  %957 = vmatprep.mubr.bf16.mxu1 %v533_v55  ;;  %v4415_v9 = vcombine.low %v4322_v24, %v4325_v25  ;;  %v3687_v24 = vld [vmem:[%s4983_s1 + $0x5e4] ss:$8 sps:$4 sm:$0xff]  }
  0x57   : > { %2001 = vmatprep.mubr.bf16.mxu0 %v1589_v3  ;;  %v3718_v3 = vld [vmem:[%s4983_s1 + $0x620] ss:$8 sps:$4 sm:$0xff]  }
  0x58   : > { %934 = vmatpush1.bf16.msra.mxu1 %v3622_v10  ;;  %v3673_v10 = vld [vmem:[%s4983_s1 + $0x5c0] ss:$8 sps:$4 sm:$0xff]  }
  0x59   : > { %1978 = vmatpush1.bf16.msra.mxu0 %v3625_v11  ;;  %935 = vmatprep.subr.bf16.mxu1 %v3630_v12  ;;  %v3190_v11 = vcombine.low %v1417_v31, %v4325_v25  ;;  %v4422_v12 = vld [vmem:[%s4123_s30 + $0x28] ss:$16 sps:$4 sm:$0x1f]  }
  0x5a   : > { %1979 = vmatprep.subr.bf16.mxu0 %v3633_v13  ;;  %v3678_v13 = vld [vmem:[%s4983_s1 + $0x3d4] ss:$8 sps:$4 sm:$0xff]  }
  0x5c   : > { %936 = vmatpush1.bf16.msra.mxu1 %v3628_v14  ;;  %v3681_v14 = vld [vmem:[%s4983_s1 + $0x5d4] ss:$8 sps:$4 sm:$0xff]  }
  0x5d   : > { %1980 = vmatpush1.bf16.msra.mxu0 %v3631_v15  ;;  %937 = vmatprep.subr.bf16.mxu1 %v3636_v16  ;;  %v3676_v15 = vld [vmem:[%s4983_s1 + $0x3d0] ss:$8 sps:$4 sm:$0xff]  }
  0x5e   : > { %1981 = vmatprep.subr.bf16.mxu0 %v3639_v17  ;;  %v3679_v16 = vld [vmem:[%s4983_s1 + $0x5d0] ss:$8 sps:$4 sm:$0xff]   ;;  %v4438_v17 = vcombine.low %v4328_v26, %v4328_v26  ;;  %v3682_v26 = vld [vmem:[%s4983_s1 + $0x3e0] ss:$8 sps:$4 sm:$0xff]  }
  0x60   : > { %938 = vmatpush1.bf16.msra.mxu1 %v3634_v18  ;;  %v513_v18 = vshll.u32 %v4415_v9, 16  ;;  %v518_v32 = vshll.u32 %v4438_v17, 16  ;;  %v540_v58 = vshrl.u32 %v4438_v17, 16 }
  0x61   : > { %1982 = vmatpush1.bf16.msra.mxu0 %v3637_v19  ;;  %939 = vmatprep.subr.bf16.mxu1 %v3642_v20  ;;  %v1557_v19 = vshrl.u32 %v3190_v11, 16  ;;  %v1560_v20 = vshll.u32 %v3190_v11, 16 }
  0x62   : > { %1983 = vmatprep.subr.bf16.mxu0 %v3645_v21  ;;  %v1565_v21 = vshrl.u32 %v4422_v12, 16  ;;  %v515_v31 = vrot.slane %v513_v18, 1  ;;  %v3733_v18 = vld [vmem:[%s4983_s1 + $0x50] ss:$8 sps:$4 sm:$0xff]  }
  0x63   : > { %v1559_v33 = vrot.slane %v1557_v19, 2  ;;  %v1562_v34 = vrot.slane %v1560_v20, 3  ;;  %v3736_v19 = vld [vmem:[%s4983_s1 + $0x650] ss:$8 sps:$4 sm:$0xff]   ;;  %v3741_v20 = vld [vmem:[%s4983_s1 + $0x64] ss:$8 sps:$4 sm:$0xff]  }
  0x64   : > { %940 = vmatpush1.bf16.msra.mxu1 %v3640_v22  ;;  %v1568_v22 = vshll.u32 %v4422_v12, 16 }
  0x65   : > { %1984 = vmatpush1.bf16.msra.mxu0 %v3643_v23  ;;  %941 = vmatprep.subr.bf16.mxu1 %v3648_v27  ;;  %v3684_v23 = vld [vmem:[%s4983_s1 + $0x3e4] ss:$8 sps:$4 sm:$0xff]   ;;  %v3685_v27 = vld [vmem:[%s4983_s1 + $0x5e0] ss:$8 sps:$4 sm:$0xff]   ;;  %v1563_v45 = vor.u32 %v1562_v34, %v1559_v33 }
  0x66   : > { %1985 = vmatprep.subr.bf16.mxu0 %v3651_v29  ;;  %v511_v29 = vshrl.u32 %v4415_v9, 16  ;;  %v3751_v33 = vld [vmem:[%s4983_s1 + $0x80] ss:$8 sps:$4 sm:$0xff]  }
  0x67   : > { %v3754_v34 = vld [vmem:[%s4983_s1 + $0x680] ss:$8 sps:$4 sm:$0xff]  }
  0x68   : > { %942 = vmatpush1.bf16.msra.mxu1 %v3646_v35  ;;  %v1567_v35 = vrot.slane %v1565_v21, 2  ;;  %v3744_v21 = vld [vmem:[%s4983_s1 + $0x664] ss:$8 sps:$4 sm:$0xff]  }
  0x69   : > { %1986 = vmatpush1.bf16.msra.mxu0 %v3649_v36  ;;  %943 = vmatprep.subr.bf16.mxu1 %v3654_v42  ;;  %v1570_v36 = vrot.slane %v1568_v22, 3  ;;  %v516_v42 = vor.u32 %v515_v31, %v511_v29  ;;  %v3739_v22 = vld [vmem:[%s4983_s1 + $0x60] ss:$8 sps:$4 sm:$0xff]   ;;  %v3748_v29 = vld [vmem:[%s4983_s1 + $0x670] ss:$8 sps:$4 sm:$0xff]  }
  0x6a   : > { %1987 = vmatprep.subr.bf16.mxu0 %v3657_v43  ;;  %v520_v43 = vrot.slane %v518_v32, 1  ;;  %v3753_v31 = vld [vmem:[%s4983_s1 + $0x84] ss:$8 sps:$4 sm:$0xff]  }
  0x6b   : > { %v1571_v46 = vor.u32 %v1570_v36, %v1567_v35  ;;  %v3756_v32 = vld [vmem:[%s4983_s1 + $0x684] ss:$8 sps:$4 sm:$0xff]   ;;  %v3759_v35 = vld [vmem:[%s4983_s1 + $0x94] ss:$8 sps:$4 sm:$0xff]  }
  0x6c   : > { %944 = vmatpush1.bf16.msra.mxu1 %v3652_v50  ;;  %v543_v50 = vshrl.u32 %v4342_v30, 16  ;;  %v521_v55 = vsel %vm485_vm0, %v516_v42, %v520_v43  ;;  %v3711_v30 = vld [vmem:[%s4983_s1 + $0x14] ss:$8 sps:$4 sm:$0xff]   ;;  %v3763_v42 = vld [vmem:[%s4983_s1 + $0xa0] ss:$8 sps:$4 sm:$0xff]  }
  0x6d   : > { %1988 = vmatpush1.bf16.msra.mxu0 %v3655_v52  ;;  %945 = vmatprep.subr.bf16.mxu1 %v3660_v56  ;;  %v3706_v52 = vld [vmem:[%s4983_s1 + $0x600] ss:$8 sps:$4 sm:$0xff]   ;;  %v1572_v54 = vsel %vm1521_vm1, %v1563_v45, %v1571_v46  ;;  %v3714_v56 = vld [vmem:[%s4983_s1 + $0x614] ss:$8 sps:$4 sm:$0xff]  }
  0x6e   : > { %1989 = vmatprep.subr.bf16.mxu0 %v3663_v57  ;;  %v545_v57 = vor.u32 %v543_v50, %v4364_v44  ;;  %v3717_v44 = vld [vmem:[%s4983_s1 + $0x24] ss:$8 sps:$4 sm:$0xff]   ;;  %v3762_v36 = vld [vmem:[%s4983_s1 + $0x694] ss:$8 sps:$4 sm:$0xff]  }
  0x6f   : > { %v3771_v45 = vld [vmem:[%s4983_s1 + $0xb4] ss:$8 sps:$4 sm:$0xff]   ;;  %v3777_v50 = vld [vmem:[%s4983_s1 + $0xc4] ss:$8 sps:$4 sm:$0xff]  }
  0x70   : > { %946 = vmatpush1.bf16.msra.mxu1 %v3658_v62  ;;  %v3712_v62 = vld [vmem:[%s4983_s1 + $0x610] ss:$8 sps:$4 sm:$0xff]  }
  0x71   : > { %1990 = vmatpush1.bf16.msra.mxu0 %v3661_v0  ;;  %947 = vmatprep.subr.bf16.mxu1 %v3666_v1  ;;  %v3720_v0 = vld [vmem:[%s4983_s1 + $0x624] ss:$8 sps:$4 sm:$0xff]   ;;  %v542_v1 = vor.u32 %v540_v58, %v520_v43  ;;  %v3766_v43 = vld [vmem:[%s4983_s1 + $0x6a0] ss:$8 sps:$4 sm:$0xff]  }
  0x72   : > { %1991 = vmatprep.subr.bf16.mxu0 %v3669_v2  ;;  %v3715_v2 = vld [vmem:[%s4983_s1 + $0x20] ss:$8 sps:$4 sm:$0xff]   ;;  %v3789_v58 = vld [vmem:[%s4983_s1 + $0xe4] ss:$8 sps:$4 sm:$0xff]  }
  0x74   : > { %948 = vmatpush1.bf16.msra.mxu1 %v3664_v4  ;;  %v3723_v4 = vld [vmem:[%s4983_s1 + $0x34] ss:$8 sps:$4 sm:$0xff]  }
  0x75   : > { %1992 = vmatpush1.bf16.msra.mxu0 %v3667_v5  ;;  %949 = vmatprep.subr.bf16.mxu1 %v3672_v6  ;;  %v3721_v5 = vld [vmem:[%s4983_s1 + $0x30] ss:$8 sps:$4 sm:$0xff]  }
  0x76   : > { %1993 = vmatprep.subr.bf16.mxu0 %v3675_v7  ;;  %v3724_v6 = vld [vmem:[%s4983_s1 + $0x630] ss:$8 sps:$4 sm:$0xff]   ;;  %v3729_v7 = vld [vmem:[%s4983_s1 + $0x44] ss:$8 sps:$4 sm:$0xff]  }
  0x78   : > { %950 = vmatpush1.bf16.msra.mxu1 %v3670_v8  ;;  %v4527_v8 = vld [vmem:[%s4123_s30] sm:$0x88] }
  0x79   : > { %1994 = vmatpush1.bf16.msra.mxu0 %v3673_v10  ;;  %951 = vmatprep.subr.bf16.mxu1 %v3678_v13  ;;  %v3732_v10 = vld [vmem:[%s4983_s1 + $0x644] ss:$8 sps:$4 sm:$0xff]   ;;  %v3325_v11 = vcombine.high %v4527_v8, %v4139_v49  ;;  %v2108_v13 = vrot.slane %v4162_v61, 3  ;;  %v3735_v49 = vld [vmem:[%s4983_s1 + $0x54] ss:$8 sps:$4 sm:$0xff]  }
  0x7a   : > { %1995 = vmatprep.subr.bf16.mxu0 %v3681_v14  ;;  %v3727_v14 = vld [vmem:[%s4983_s1 + $0x40] ss:$8 sps:$4 sm:$0xff]   ;;  %v3821_v61 = vld [vmem:[%s4983_s1 + $0x134] ss:$8 sps:$4 sm:$0xff]  }
  0x7c   : > { %952 = vmatpush1.bf16.msra.mxu1 %v3676_v15  ;;  %v3730_v15 = vld [vmem:[%s4983_s1 + $0x640] ss:$8 sps:$4 sm:$0xff]  }
  0x7d   : > { %1996 = vmatpush1.bf16.msra.mxu0 %v3679_v16  ;;  %953 = vmatprep.subr.bf16.mxu1 %v3684_v23  ;;  %v2107_v16 = vrot.slane %v3325_v11, 3  ;;  %v3742_v23 = vld [vmem:[%s4983_s1 + $0x660] ss:$8 sps:$4 sm:$0xff]  }
  0x7e   : > { %1997 = vmatprep.subr.bf16.mxu0 %v3687_v24  ;;  %v3747_v24 = vld [vmem:[%s4983_s1 + $0x74] ss:$8 sps:$4 sm:$0xff]   ;;  %v3904_v11 = vld [vmem:[%s4123_s30 + $0x20] ss:$16 sps:$4 sm:$0x1f]  }
  0x7f   : > { %v2109_v17 = vsel %vm2103_vm2, %v2107_v16, %v2108_v13  ;;  %v3801_v16 = vld [vmem:[%s4983_s1 + $0x104] ss:$8 sps:$4 sm:$0xff]  }
  0x80   : > { %954 = vmatpush1.bf16.msra.mxu1 %v3682_v26  ;;  %v3750_v26 = vld [vmem:[%s4983_s1 + $0x674] ss:$8 sps:$4 sm:$0xff]  }
  0x81   : > { %1998 = vmatpush1.bf16.msra.mxu0 %v3685_v27  ;;  %955 = vmatprep.subr.bf16.mxu1 %v3690_v37  ;;  %v3745_v27 = vld [vmem:[%s4983_s1 + $0x70] ss:$8 sps:$4 sm:$0xff]  }
  0x82   : > { %1999 = vmatprep.subr.bf16.mxu0 %v3693_v38  ;;  %v3757_v37 = vld [vmem:[%s4983_s1 + $0x90] ss:$8 sps:$4 sm:$0xff]  }
  0x83   : > { %v3760_v38 = vld [vmem:[%s4983_s1 + $0x690] ss:$8 sps:$4 sm:$0xff]  }
  0x84   : > { %956 = vmatpush1.bf16.msra.mxu1 %v3688_v40  ;;  %v3765_v40 = vld [vmem:[%s4983_s1 + $0xa4] ss:$8 sps:$4 sm:$0xff]  }
  0x85   : > { %2000 = vmatpush1.bf16.msra.mxu0 %v3691_v41  ;;  %1314 = vmatprep.subr.bf16.mxu1 %v3700_v47  ;;  %v3768_v41 = vld [vmem:[%s4983_s1 + $0x6a4] ss:$8 sps:$4 sm:$0xff]   ;;  %v3769_v47 = vld [vmem:[%s4983_s1 + $0xb0] ss:$8 sps:$4 sm:$0xff]  }
  0x86   : > { %2444 = vmatprep.subr.bf16.mxu0 %v3708_v48  ;;  %v3772_v48 = vld [vmem:[%s4983_s1 + $0x6b0] ss:$8 sps:$4 sm:$0xff]  }
  0x87   : > { %958 = vmatmul.mubr.bf16.vlgmr.msra.gmra.mrb[0].mxu1 %v521_v55  ;;  %v3778_v55 = vld [vmem:[%s4983_s1 + $0x6c0] ss:$8 sps:$4 sm:$0xff]  }
  0x88   : > { %2002 = vmatmul.mubr.bf16.vlgmr.msra.gmra.mrb[0].mxu0 %v1572_v54  ;;  %1315 = vmatpush1.bf16.msra.mxu1 %v3698_v51  ;;  %v3780_v51 = vld [vmem:[%s4983_s1 + $0x6c4] ss:$8 sps:$4 sm:$0xff]   ;;  %v3783_v54 = vld [vmem:[%s4983_s1 + $0xd4] ss:$8 sps:$4 sm:$0xff]  }
  0x89   : > { %2445 = vmatpush1.bf16.msra.mxu0 %v3706_v52  ;;  %1316 = vmatprep.subr.bf16.mxu1 %v3711_v30  ;;  %v3775_v52 = vld [vmem:[%s4983_s1 + $0xc0] ss:$8 sps:$4 sm:$0xff]   ;;  %v3786_v30 = vld [vmem:[%s4983_s1 + $0x6d4] ss:$8 sps:$4 sm:$0xff]  }
  0x8a   : > { %2446 = vmatprep.subr.bf16.mxu0 %v3714_v56  ;;  %967 = vmatprep.mubr.bf16.mxu1 %v545_v57  ;;  %v3781_v56 = vld [vmem:[%s4983_s1 + $0xd0] ss:$8 sps:$4 sm:$0xff]  }
  0x8b   : > { %2011 = vmatprep.mubr.bf16.mxu0 %v4382_v60  ;;  %v3726_v60 = vld [vmem:[%s4983_s1 + $0x634] ss:$8 sps:$4 sm:$0xff]   ;;  %v3784_v57 = vld [vmem:[%s4983_s1 + $0x6d0] ss:$8 sps:$4 sm:$0xff]  }
  0x8c   : > { %1317 = vmatpush1.bf16.msra.mxu1 %v3709_v59  ;;  %v3792_v59 = vld [vmem:[%s4983_s1 + $0x6e4] ss:$8 sps:$4 sm:$0xff]  }
  0x8d   : > { %2447 = vmatpush1.bf16.msra.mxu0 %v3712_v62  ;;  %1318 = vmatprep.subr.bf16.mxu1 %v3717_v44  ;;  %v2027_v62 = vld [vmem:[%s4123_s30 + $0x8] sm:$0x88] }
  0x8e   : > { %2448 = vmatprep.subr.bf16.mxu0 %v3720_v0  ;;  %v3787_v44 = vld [vmem:[%s4983_s1 + $0xe0] ss:$8 sps:$4 sm:$0xff]  }
  0x8f   : > { %968 = vmatmul.mubr.bf16.gmra.mrb[4].mxu1 %v542_v1  ;;  %v3790_v0 = vld [vmem:[%s4983_s1 + $0x6e0] ss:$8 sps:$4 sm:$0xff]   ;;  %v3903_v1 = vld [vmem:[%s4123_s30 + $0x10] sm:$0xff] }
  0x90   : > { %2012 = vmatmul.mubr.bf16.gmra.mrb[4].mxu0 %v1571_v46  ;;  %1319 = vmatpush1.bf16.msra.mxu1 %v3715_v2  ;;  %v3774_v46 = vld [vmem:[%s4983_s1 + $0x6b4] ss:$8 sps:$4 sm:$0xff]   ;;  %v3324_v2 = vcombine.low %v4527_v8, %v3903_v1  ;;  %v3796_v8 = vld [vmem:[%s4983_s1 + $0x6f0] ss:$8 sps:$4 sm:$0xff]   ;;  %v3863_v1 = vld [vmem:[%s4983_s1 + $0x1a4] ss:$8 sps:$4 sm:$0xff]  }
  0x91   : > { %2449 = vmatpush1.bf16.msra.mxu0 %v3718_v3  ;;  %1320 = vmatprep.subr.bf16.mxu1 %v3723_v4  ;;  %v3326_v3 = vcombine.low %v2027_v62, %v4325_v25  ;;  %v2111_v4 = vrot.slane %v4422_v12, 3 }
  0x92   : > { %2450 = vmatprep.subr.bf16.mxu0 %v3726_v60  ;;  %1346 = vmatprep.mubr.bf16.mxu1 %v4149_v53  ;;  %v3738_v53 = vld [vmem:[%s4983_s1 + $0x654] ss:$8 sps:$4 sm:$0xff]  }
  0x93   : > { %2476 = vmatprep.mubr.bf16.mxu0 %v2109_v17  ;;  %v3795_v60 = vld [vmem:[%s4983_s1 + $0xf4] ss:$8 sps:$4 sm:$0xff]   ;;  %v3799_v17 = vld [vmem:[%s4983_s1 + $0x100] ss:$8 sps:$4 sm:$0xff]  }
  0x94   : > { %1321 = vmatpush1.bf16.msra.mxu1 %v3721_v5  ;;  %v3798_v5 = vld [vmem:[%s4983_s1 + $0x6f4] ss:$8 sps:$4 sm:$0xff]  }
  0x95   : > { %2451 = vmatpush1.bf16.msra.mxu0 %v3724_v6  ;;  %1322 = vmatprep.subr.bf16.mxu1 %v3729_v7  ;;  %v2110_v6 = vrot.slane %v3326_v3, 3  ;;  %v3793_v7 = vld [vmem:[%s4983_s1 + $0xf0] ss:$8 sps:$4 sm:$0xff]   ;;  %v3861_v3 = vld [vmem:[%s4983_s1 + $0x1a0] ss:$8 sps:$4 sm:$0xff]  }
  0x96   : > { %2452 = vmatprep.subr.bf16.mxu0 %v3732_v10  ;;  %v2104_v10 = vrot.slane %v3324_v2, 3  ;;  %v3866_v2 = vld [vmem:[%s4983_s1 + $0x7a4] ss:$8 sps:$4 sm:$0xff]  }
  0x98   : > { %1323 = vmatpush1.bf16.msra.mxu1 %v3727_v14  ;;  %v2105_v14 = vrot.slane %v3904_v11, 3  ;;  %v3878_v11 = vld [vmem:[%s4983_s1 + $0x7c4] ss:$8 sps:$4 sm:$0xff]  }
  0x99   : > { %2453 = vmatpush1.bf16.msra.mxu0 %v3730_v15  ;;  %1324 = vmatprep.subr.bf16.mxu1 %v3735_v49  ;;  %v4686_v15 = vsel %vm2103_vm2, %v2110_v6, %v2111_v4  ;;  %v3806_v49 = vld [vmem:[%s4983_s1 + $0x704] ss:$8 sps:$4 sm:$0xff]   ;;  %v3872_v6 = vld [vmem:[%s4983_s1 + $0x7b4] ss:$8 sps:$4 sm:$0xff]  }
  0x9a   : > { %2454 = vmatprep.subr.bf16.mxu0 %v3738_v53  ;;  %v326_v53 = vld [vmem:[%s4123_s30 + $0x20] sm:$0x33] }
  0x9c   : > { %1325 = vmatpush1.bf16.msra.mxu1 %v3733_v18  ;;  %v3804_v18 = vld [vmem:[%s4983_s1 + $0x700] ss:$8 sps:$4 sm:$0xff]  }
  0x9d   : > { %2455 = vmatpush1.bf16.msra.mxu0 %v3736_v19  ;;  %1326 = vmatprep.subr.bf16.mxu1 %v3741_v20  ;;  %v2106_v19 = vsel %vm2103_vm2, %v2104_v10, %v2105_v14  ;;  %v3809_v20 = vld [vmem:[%s4983_s1 + $0x114] ss:$8 sps:$4 sm:$0xff]   ;;  %v3875_v10 = vld [vmem:[%s4983_s1 + $0x1c4] ss:$8 sps:$4 sm:$0xff]  }
  0x9e   : > { %2456 = vmatprep.subr.bf16.mxu0 %v3744_v21  ;;  %v3812_v21 = vld [vmem:[%s4983_s1 + $0x714] ss:$8 sps:$4 sm:$0xff]  }
  0xa0   : > { %1327 = vmatpush1.bf16.msra.mxu1 %v3739_v22  ;;  %v3057_v22 = vcombine.high %v326_v53, %v326_v53 }
  0xa1   : > { %2457 = vmatpush1.bf16.msra.mxu0 %v3742_v23  ;;  %1328 = vmatprep.subr.bf16.mxu1 %v3747_v24  ;;  %v3327_v23 = vcombine.high %v2027_v62, %v4325_v25  ;;  %v3807_v24 = vld [vmem:[%s4983_s1 + $0x110] ss:$8 sps:$4 sm:$0xff]   ;;  %v3056_v25 = vcombine.low %v326_v53, %v326_v53  ;;  %v3860_v62 = vld [vmem:[%s4983_s1 + $0x794] ss:$8 sps:$4 sm:$0xff]  }
  0xa2   : > { %2458 = vmatprep.subr.bf16.mxu0 %v3750_v26  ;;  %v3810_v26 = vld [vmem:[%s4983_s1 + $0x710] ss:$8 sps:$4 sm:$0xff]   ;;  %v3884_v53 = vld [vmem:[%s4983_s1 + $0x7d4] ss:$8 sps:$4 sm:$0xff]  }
  0xa4   : > { %1329 = vmatpush1.bf16.msra.mxu1 %v3745_v27  ;;  %v3815_v27 = vld [vmem:[%s4983_s1 + $0x124] ss:$8 sps:$4 sm:$0xff]  }
  0xa5   : > { %2459 = vmatpush1.bf16.msra.mxu0 %v3748_v29  ;;  %1330 = vmatprep.subr.bf16.mxu1 %v3753_v31  ;;  %v2113_v29 = vrot.slane %v3327_v23, 3  ;;  %v2114_v31 = vrot.slane %v4356_v39, 3  ;;  %v3895_v23 = vld [vmem:[%s4983_s1 + $0x1f4] ss:$8 sps:$4 sm:$0xff]  }
  0xa6   : > { %2460 = vmatprep.subr.bf16.mxu0 %v3756_v32  ;;  %v3813_v32 = vld [vmem:[%s4983_s1 + $0x120] ss:$8 sps:$4 sm:$0xff]  }
  0xa8   : > { %1331 = vmatpush1.bf16.msra.mxu1 %v3751_v33  ;;  %v3816_v33 = vld [vmem:[%s4983_s1 + $0x720] ss:$8 sps:$4 sm:$0xff]  }
  0xa9   : > { %2461 = vmatpush1.bf16.msra.mxu0 %v3754_v34  ;;  %1332 = vmatprep.subr.bf16.mxu1 %v3759_v35  ;;  %v2115_v34 = vsel %vm2103_vm2, %v2113_v29, %v2114_v31  ;;  %v3819_v35 = vld [vmem:[%s4983_s1 + $0x130] ss:$8 sps:$4 sm:$0xff]  }
  0xaa   : > { %2462 = vmatprep.subr.bf16.mxu0 %v3762_v36  ;;  %v3822_v36 = vld [vmem:[%s4983_s1 + $0x730] ss:$8 sps:$4 sm:$0xff]  }
  0xac   : > { %1333 = vmatpush1.bf16.msra.mxu1 %v3757_v37  ;;  %v3827_v37 = vld [vmem:[%s4983_s1 + $0x144] ss:$8 sps:$4 sm:$0xff]  }
  0xad   : > { %2463 = vmatpush1.bf16.msra.mxu0 %v3760_v38  ;;  %1334 = vmatprep.subr.bf16.mxu1 %v3765_v40  ;;  %v3830_v38 = vld [vmem:[%s4983_s1 + $0x744] ss:$8 sps:$4 sm:$0xff]   ;;  %v3825_v40 = vld [vmem:[%s4983_s1 + $0x140] ss:$8 sps:$4 sm:$0xff]  }
  0xae   : > { %2464 = vmatprep.subr.bf16.mxu0 %v3768_v41  ;;  %v3828_v41 = vld [vmem:[%s4983_s1 + $0x740] ss:$8 sps:$4 sm:$0xff]  }
  0xb0   : > { %1335 = vmatpush1.bf16.msra.mxu1 %v3763_v42  ;;  %v3833_v42 = vld [vmem:[%s4983_s1 + $0x154] ss:$8 sps:$4 sm:$0xff]  }
  0xb1   : > { %2465 = vmatpush1.bf16.msra.mxu0 %v3766_v43  ;;  %1336 = vmatprep.subr.bf16.mxu1 %v3771_v45  ;;  %v3831_v43 = vld [vmem:[%s4983_s1 + $0x150] ss:$8 sps:$4 sm:$0xff]  }
  0xb2   : > { %2466 = vmatprep.subr.bf16.mxu0 %v3774_v46  ;;  %v3834_v45 = vld [vmem:[%s4983_s1 + $0x750] ss:$8 sps:$4 sm:$0xff]   ;;  %v3839_v46 = vld [vmem:[%s4983_s1 + $0x164] ss:$8 sps:$4 sm:$0xff]  }
  0xb4   : > { %1337 = vmatpush1.bf16.msra.mxu1 %v3769_v47  ;;  %v3842_v47 = vld [vmem:[%s4983_s1 + $0x764] ss:$8 sps:$4 sm:$0xff]  }
  0xb5   : > { %2467 = vmatpush1.bf16.msra.mxu0 %v3772_v48  ;;  %1338 = vmatprep.subr.bf16.mxu1 %v3777_v50  ;;  %v3837_v48 = vld [vmem:[%s4983_s1 + $0x160] ss:$8 sps:$4 sm:$0xff]  }
  0xb6   : > { %2468 = vmatprep.subr.bf16.mxu0 %v3780_v51  ;;  %v3840_v50 = vld [vmem:[%s4983_s1 + $0x760] ss:$8 sps:$4 sm:$0xff]   ;;  %v3845_v51 = vld [vmem:[%s4983_s1 + $0x174] ss:$8 sps:$4 sm:$0xff]  }
  0xb8   : > { %1339 = vmatpush1.bf16.msra.mxu1 %v3775_v52  ;;  %v3848_v52 = vld [vmem:[%s4983_s1 + $0x774] ss:$8 sps:$4 sm:$0xff]  }
  0xb9   : > { %2469 = vmatpush1.bf16.msra.mxu0 %v3778_v55  ;;  %1340 = vmatprep.subr.bf16.mxu1 %v3783_v54  ;;  %v3843_v55 = vld [vmem:[%s4983_s1 + $0x170] ss:$8 sps:$4 sm:$0xff]  }
  0xba   : > { %2470 = vmatprep.subr.bf16.mxu0 %v3786_v30  ;;  %v3846_v54 = vld [vmem:[%s4983_s1 + $0x770] ss:$8 sps:$4 sm:$0xff]   ;;  %v3851_v30 = vld [vmem:[%s4983_s1 + $0x184] ss:$8 sps:$4 sm:$0xff]  }
  0xbc   : > { %1341 = vmatpush1.bf16.msra.mxu1 %v3781_v56  ;;  %v3854_v56 = vld [vmem:[%s4983_s1 + $0x784] ss:$8 sps:$4 sm:$0xff]  }
  0xbd   : > { %2471 = vmatpush1.bf16.msra.mxu0 %v3784_v57  ;;  %1342 = vmatprep.subr.bf16.mxu1 %v3789_v58  ;;  %v3849_v57 = vld [vmem:[%s4983_s1 + $0x180] ss:$8 sps:$4 sm:$0xff]  }
  0xbe   : > { %2472 = vmatprep.subr.bf16.mxu0 %v3792_v59  ;;  %v3852_v58 = vld [vmem:[%s4983_s1 + $0x780] ss:$8 sps:$4 sm:$0xff]   ;;  %v3857_v59 = vld [vmem:[%s4983_s1 + $0x194] ss:$8 sps:$4 sm:$0xff]  }
  0xc0   : > { %1343 = vmatpush1.bf16.msra.mxu1 %v3787_v44  ;;  %v3855_v44 = vld [vmem:[%s4983_s1 + $0x190] ss:$8 sps:$4 sm:$0xff]  }
  0xc1   : > { %2473 = vmatpush1.bf16.msra.mxu0 %v3790_v0  ;;  %1344 = vmatprep.subr.bf16.mxu1 %v3795_v60  ;;  %v3858_v0 = vld [vmem:[%s4983_s1 + $0x790] ss:$8 sps:$4 sm:$0xff]   ;;  %v3864_v60 = vld [vmem:[%s4983_s1 + $0x7a0] ss:$8 sps:$4 sm:$0xff]  }
  0xc2   : > { %2474 = vmatprep.subr.bf16.mxu0 %v3798_v5  ;;  %v3869_v5 = vld [vmem:[%s4983_s1 + $0x1b4] ss:$8 sps:$4 sm:$0xff]  }
  0xc4   : > { %1345 = vmatpush1.bf16.msra.mxu1 %v3793_v7  ;;  %v3867_v7 = vld [vmem:[%s4983_s1 + $0x1b0] ss:$8 sps:$4 sm:$0xff]  }
  0xc5   : > { %2475 = vmatpush1.bf16.msra.mxu0 %v3796_v8  ;;  %1365 = vmatprep.subr.bf16.mxu1 %v3801_v16  ;;  %v3870_v8 = vld [vmem:[%s4983_s1 + $0x7b0] ss:$8 sps:$4 sm:$0xff]   ;;  %v3876_v16 = vld [vmem:[%s4983_s1 + $0x7c0] ss:$8 sps:$4 sm:$0xff]  }
  0xc6   : > { %2495 = vmatprep.subr.bf16.mxu0 %v3806_v49  ;;  %v3881_v49 = vld [vmem:[%s4983_s1 + $0x1d4] ss:$8 sps:$4 sm:$0xff]  }
  0xc7   : > { %1347 = vmatmul.mubr.bf16.vlgmr.msra.gmra.mrb[0].mxu1 %v4168_v63  ;;  %v3818_v63 = vld [vmem:[%s4983_s1 + $0x724] ss:$8 sps:$4 sm:$0xff]  }
  0xc8   : > { %2477 = vmatmul.mubr.bf16.vlgmr.msra.gmra.mrb[0].mxu0 %v2106_v19  ;;  %1366 = vmatpush1.bf16.msra.mxu1 %v3799_v17  ;;  %v3879_v17 = vld [vmem:[%s4983_s1 + $0x1d0] ss:$8 sps:$4 sm:$0xff]   ;;  %v3889_v19 = vld [vmem:[%s4983_s1 + $0x1e4] ss:$8 sps:$4 sm:$0xff]  }
  0xc9   : > { %2496 = vmatpush1.bf16.msra.mxu0 %v3804_v18  ;;  %1367 = vmatprep.subr.bf16.mxu1 %v3809_v20  ;;  %v3882_v18 = vld [vmem:[%s4983_s1 + $0x7d0] ss:$8 sps:$4 sm:$0xff]   ;;  %v3892_v20 = vld [vmem:[%s4983_s1 + $0x7e4] ss:$8 sps:$4 sm:$0xff]  }
  0xca   : > { %2497 = vmatprep.subr.bf16.mxu0 %v3812_v21  ;;  %1356 = vmatprep.mubr.bf16.mxu1 %v3057_v22  ;;  %v3887_v21 = vld [vmem:[%s4983_s1 + $0x1e0] ss:$8 sps:$4 sm:$0xff]  }
  0xcb   : > { %2486 = vmatprep.mubr.bf16.mxu0 %v2108_v13  ;;  %v3824_v13 = vld [vmem:[%s4983_s1 + $0x734] ss:$8 sps:$4 sm:$0xff]   ;;  %v3890_v22 = vld [vmem:[%s4983_s1 + $0x7e0] ss:$8 sps:$4 sm:$0xff]  }
  0xcc   : > { %1368 = vmatpush1.bf16.msra.mxu1 %v3807_v24  ;;  %v3898_v24 = vld [vmem:[%s4983_s1 + $0x7f4] ss:$8 sps:$4 sm:$0xff]  }
  0xcd   : > { %2498 = vmatpush1.bf16.msra.mxu0 %v3810_v26  ;;  %1369 = vmatprep.subr.bf16.mxu1 %v3815_v27  ;;  %v3893_v26 = vld [vmem:[%s4983_s1 + $0x1f0] ss:$8 sps:$4 sm:$0xff]  }
  0xce   : > { %2499 = vmatprep.subr.bf16.mxu0 %v3818_v63  ;;  %v3896_v27 = vld [vmem:[%s4983_s1 + $0x7f0] ss:$8 sps:$4 sm:$0xff]   ;;  %v327_v63 = vld [vmem:[%s4123_s30 + $0x28] sm:$0x33]  ;;  %s3460_s30 = smul.u32 24, %s4096_s8 }
  0xcf   : > { %1357 = vmatmul.mubr.bf16.gmra.mrb[4].mxu1 %v3056_v25  ;;  %v3059_v25 = vcombine.high %v327_v63, %v327_v63  ;;  %v3058_v29 = vcombine.low %v327_v63, %v327_v63 }
  0xd0   : > { %2487 = vmatmul.mubr.bf16.gmra.mrb[4].mxu0 %v2105_v14  ;;  %1370 = vmatpush1.bf16.msra.mxu1 %v3813_v32  ;;  %v3873_v14 = vld [vmem:[%s4983_s1 + $0x1c0] ss:$8 sps:$4 sm:$0xff]   ;;  %v2575_v32 = vlaneseq  ;;  %s314_s14 = scalar_lea.vmem %s4986_s4, %s3460_s30 }
  0xd1   : > { %2500 = vmatpush1.bf16.msra.mxu0 %v3816_v33  ;;  %1371 = vmatprep.subr.bf16.mxu1 %v3821_v61 }
  0xd2   : > { %2501 = vmatprep.subr.bf16.mxu0 %v3824_v13  ;;  %1397 = vmatprep.mubr.bf16.mxu1 %v4335_v28  ;;  %v3836_v28 = vld [vmem:[%s4983_s1 + $0x754] ss:$8 sps:$4 sm:$0xff]   ;;  %v4899_v33 = vshrl.u32 %v2575_v32, 7 }
  0xd3   : > { %2527 = vmatprep.mubr.bf16.mxu0 %v2115_v34 }
  0xd4   : > { %1372 = vmatpush1.bf16.msra.mxu1 %v3819_v35  ;;  %v2577_v61 = vadd.s32 8, %v4899_v33  ;;  %v2578_v39 = vadd.s32 16, %v4899_v33 }
  0xd5   : > { %2502 = vmatpush1.bf16.msra.mxu0 %v3822_v36  ;;  %1373 = vmatprep.subr.bf16.mxu1 %v3827_v37 }
  0xd6   : > { %2503 = vmatprep.subr.bf16.mxu0 %v3830_v38  ;;  %v4911_v35 = vmul.u32.u64.low 3435973837, %v2578_v39  ;;  %v4912_v12 = vmul.u32.u64.high 3435973837, %v2578_v39, %v4911_v35 }
  0xd8   : > { %1374 = vmatpush1.bf16.msra.mxu1 %v3825_v40  ;;  %v2607_v40 = vshrl.u32 %v4912_v12, 2 }
  0xd9   : > { %2504 = vmatpush1.bf16.msra.mxu0 %v3828_v41  ;;  %1375 = vmatprep.subr.bf16.mxu1 %v3833_v42 }
  0xda   : > { %2505 = vmatprep.subr.bf16.mxu0 %v3836_v28  ;;  %v2608_v42 = vmul.u32 5, %v2607_v40 }
  0xdc   : > { %1376 = vmatpush1.bf16.msra.mxu1 %v3831_v43 }
  0xdd   : > { %2506 = vmatpush1.bf16.msra.mxu0 %v3834_v45  ;;  %1377 = vmatprep.subr.bf16.mxu1 %v3839_v46  ;;  %v2609_v45 = vsub.s32 %v2578_v39, %v2608_v42 }
  0xde   : > { %2507 = vmatprep.subr.bf16.mxu0 %v3842_v47 }
  0xdf   : > { %vm2614_vm9 = vcmp.ne.s32.totalorder %v2609_v45, 0  ;;  %vm2617_vm10 = vcmp.lt.s32.totalorder %v2609_v45, 0 }
  0xe0   : > { %1378 = vmatpush1.bf16.msra.mxu1 %v3837_v48  ;;  %vm4928_vm13 = vmand %vm2617_vm10, %vm2614_vm9 }
  0xe1   : > { %2508 = vmatpush1.bf16.msra.mxu0 %v3840_v50  ;;  %1379 = vmatprep.subr.bf16.mxu1 %v3845_v51 }
  0xe2   : > { %2509 = vmatprep.subr.bf16.mxu0 %v3848_v52 }
  0xe4   : > { %1380 = vmatpush1.bf16.msra.mxu1 %v3843_v55 }
  0xe5   : > { %2510 = vmatpush1.bf16.msra.mxu0 %v3846_v54  ;;  %1381 = vmatprep.subr.bf16.mxu1 %v3851_v30 }
  0xe6   : > { %2511 = vmatprep.subr.bf16.mxu0 %v3854_v56  ;;  %v2623_v56 = vadd.s32 5, %v2609_v45 }
  0xe8   : > { %1382 = vmatpush1.bf16.msra.mxu1 %v3849_v57 }
  0xe9   : > { %2512 = vmatpush1.bf16.msra.mxu0 %v3852_v58  ;;  %1383 = vmatprep.subr.bf16.mxu1 %v3857_v59 }
  0xea   : > { %2513 = vmatprep.subr.bf16.mxu0 %v3860_v62 }
  0xec   : > { %1384 = vmatpush1.bf16.msra.mxu1 %v3855_v44 }
  0xed   : > { %2514 = vmatpush1.bf16.msra.mxu0 %v3858_v0  ;;  %1385 = vmatprep.subr.bf16.mxu1 %v3863_v1 }
  0xee   : > { %2515 = vmatprep.subr.bf16.mxu0 %v3866_v2 }
  0xf0   : > { %1386 = vmatpush1.bf16.msra.mxu1 %v3861_v3 }
  0xf1   : > { %2516 = vmatpush1.bf16.msra.mxu0 %v3864_v60  ;;  %1387 = vmatprep.subr.bf16.mxu1 %v3869_v5 }
  0xf2   : > { %2517 = vmatprep.subr.bf16.mxu0 %v3872_v6 }
  0xf4   : > { %1388 = vmatpush1.bf16.msra.mxu1 %v3867_v7  ;;  %v2626_v7 = vsel %vm4928_vm13, %v2623_v56, %v2609_v45 }
  0xf5   : > { %2518 = vmatpush1.bf16.msra.mxu0 %v3870_v8  ;;  %1389 = vmatprep.subr.bf16.mxu1 %v3875_v10  ;;  %vm2629_vm14 = vcmp.ne.s32.totalorder %v2626_v7, 4 }
  0xf6   : > { %2519 = vmatprep.subr.bf16.mxu0 %v3878_v11 }
  0xf8   : > { %1390 = vmatpush1.bf16.msra.mxu1 %v3873_v14 }
  0xf9   : > { %2520 = vmatpush1.bf16.msra.mxu0 %v3876_v16  ;;  %1391 = vmatprep.subr.bf16.mxu1 %v3881_v49 }
  0xfa   : > { %2521 = vmatprep.subr.bf16.mxu0 %v3884_v53 }
  0xfc   : > { %1392 = vmatpush1.bf16.msra.mxu1 %v3879_v17 }
  0xfd   : > { %2522 = vmatpush1.bf16.msra.mxu0 %v3882_v18  ;;  %1393 = vmatprep.subr.bf16.mxu1 %v3889_v19 }
  0xfe   : > { %2523 = vmatprep.subr.bf16.mxu0 %v3892_v20 }
 0x100   : > { %1394 = vmatpush1.bf16.msra.mxu1 %v3887_v21 }
 0x101   : > { %2524 = vmatpush1.bf16.msra.mxu0 %v3890_v22  ;;  %1395 = vmatprep.subr.bf16.mxu1 %v3895_v23 }
 0x102   : > { %2525 = vmatprep.subr.bf16.mxu0 %v3898_v24 }
 0x104   : > { %1396 = vmatpush1.bf16.msra.mxu1 %v3893_v26  ;;  %v3931_v26 = vmov (!%p3395_p5), 0.0  }
 0x105   : > { %2526 = vmatpush1.bf16.msra.mxu0 %v3896_v27  ;;  %2646 = vst [vmem:[#allocation2] sm:$0xf] (!%p3395_p5), %v3931_v26 }
 0x107   : > { %1398 = vmatmul.mubr.bf16.vlgmr.msra.gmra.mrb[0].mxu1 %v4415_v9  ;;  %v4903_v13 = vmul.u32.u64.low 3435973837, %v4899_v33  ;;  %v4904_v9 = vmul.u32.u64.high 3435973837, %v4899_v33, %v4903_v13 }
 0x108   : > { %2528 = vmatmul.mubr.bf16.vlgmr.msra.gmra.mrb[0].mxu0 %v4686_v15  ;;  %1407 = vmatprep.mubr.bf16.mxu1 %v3059_v25  ;;  %v4906_v15 = vmul.u32.u64.low 3435973837, %v2577_v61  ;;  %v4907_v34 = vmul.u32.u64.high 3435973837, %v2577_v61, %v4906_v15 }
 0x109   : > { %2537 = vmatprep.mubr.bf16.mxu0 %v2114_v31  ;;  %v2585_v31 = vshrl.u32 %v4904_v9, 2 }
 0x10b   : > { %v2586_v36 = vmul.u32 5, %v2585_v31 }
 0x10d   : > { %v2587_v38 = vsub.s32 %v4899_v33, %v2586_v36 }
 0x10f   : > { %1408 = vmatmul.mubr.bf16.gmra.mrb[4].mxu1 %v3058_v29  ;;  %vm2612_vm3 = vcmp.ne.s32.totalorder %v2587_v38, 0  ;;  %vm2615_vm4 = vcmp.lt.s32.totalorder %v2587_v38, 0  ;;  %v2621_v28 = vadd.s32 5, %v2587_v38 }
 0x110   : > { %2538 = vmatmul.mubr.bf16.gmra.mrb[4].mxu0 %v2111_v4  ;;  %v2596_v4 = vshrl.u32 %v4907_v34, 2  ;;  %vm2618_vm7 = vmand %vm2615_vm4, %vm2612_vm3 }
 0x111   : > { %v2624_v47 = vsel %vm2618_vm7, %v2621_v28, %v2587_v38 }
 0x112   : > { %v2597_v37 = vmul.u32 5, %v2596_v4  ;;  %vm4924_vm11 = vcmp.ne.s32.totalorder %v2624_v47, 4 }
 0x114   : > { %v2598_v41 = vsub.s32 %v2577_v61, %v2597_v37 }
 0x116   : > { %vm2613_vm5 = vcmp.ne.s32.totalorder %v2598_v41, 0  ;;  %vm2616_vm6 = vcmp.lt.s32.totalorder %v2598_v41, 0  ;;  %v2622_v43 = vadd.s32 5, %v2598_v41 }
 0x117   : > { %vm4917_vm8 = vmand %vm2616_vm6, %vm2613_vm5 }
 0x118   : > { %v2625_v48 = vsel %vm4917_vm8, %v2622_v43, %v2598_v41 }
 0x119   : > { %vm2628_vm12 = vcmp.ne.s32.totalorder %v2625_v48, 4 }
 0x1da   : > { %v1399_v50 = vpop.f32.mrb[0].mxu1 }
 0x1db   : > { %v2529_v51 = vpop.f32.mrb[0].mxu0  ;;  %v1401_v54 = vpop.f32.mrb[1].mxu1 }
 0x1dc   : > { %v3406_v55 = vadd.f32 %v2529_v51, %v1399_v50  ;;  %v2531_v30 = vpop.f32.mrb[1].mxu0  ;;  %v1403_v58 = vpop.f32.mrb[2].mxu1 }
 0x1dd   : > { %v3407_v57 = vadd.f32 %v2531_v30, %v1401_v54  ;;  %v2533_v59 = vpop.f32.mrb[2].mxu0  ;;  %v1405_v1 = vpop.f32.mrb[3].mxu1 }
 0x1de   : > { %v2636_v44 = vsel %vm4924_vm11, %v3406_v55, 0.0  ;;  %v3408_v0 = vadd.f32 %v2533_v59, %v1403_v58  ;;  %v2535_v2 = vpop.f32.mrb[3].mxu0 }
 0x1df   : > { %v3403_v3 = vpack.c.bf16 %v3407_v57, %v3406_v55  ;;  %v2637_v60 = vsel %vm4924_vm11, %v3407_v57, 0.0  ;;  %v3409_v5 = vadd.f32 %v2535_v2, %v1405_v1 }
 0x1e0   : > { %v2638_v6 = vsel %vm2628_vm12, %v3408_v0, 0.0 }
 0x1e1   : > { %2572 = vst [vmem:[%s314_s14] sm:$0xff] %v3403_v3  ;;  %v3404_v8 = vpack.c.bf16 %v3409_v5, %v3408_v0  ;;  %v2639_v10 = vsel %vm2628_vm12, %v3409_v5, 0.0 }
 0x1e2   : > { %v1409_v11 = vpop.f32.mrb[4].mxu1 }
 0x1e3   : > { %2573 = vst [vmem:[%s314_s14 + $0x8] sm:$0xff] %v3404_v8  ;;  %v2539_v14 = vpop.f32.mrb[4].mxu0  ;;  %v1411_v49 = vpop.f32.mrb[5].mxu1  ;;  %2645 = sbr.rel (%p3395_p5) target bundleno = 490 (0x1ea), region = 40 }
 0x1e4   : > { %v3410_v16 = vadd.f32 %v2539_v14, %v1409_v11  ;;  %v2541_v53 = vpop.f32.mrb[5].mxu0  ;;  %v1413_v18 = vpop.f32.mrb[6].mxu1 }
 0x1e5   : > { %v3411_v17 = vadd.f32 %v2541_v53, %v1411_v49  ;;  %v2543_v19 = vpop.f32.mrb[6].mxu0  ;;  %v1414_v21 = vpop.f32.mrb[7].mxu1 }
 0x1e6   : > { %v2640_v20 = vsel %vm2629_vm14, %v3410_v16, 0.0  ;;  %v2544_v22 = vpop.f32.mrb[7].mxu0 }
 0x1e7   : > { %v3405_v23 = vpack.c.bf16 %v3411_v17, %v3410_v16  ;;  %v2641_v24 = vsel %vm2629_vm14, %v3411_v17, 0.0 }
 0x1e9   : > { %2574 = vst [vmem:[%s314_s14 + $0x10] sm:$0x33] %v3405_v23 }
 0x1ea PF: > { %v2648_v27 = vadd.f32 %v2638_v6, %v2636_v44  ;;  %vm2649_vm15 = vcmask 1043456   ;;  %v2658_v63 = vadd.f32 %v2639_v10, %v2637_v60  ;;  %v2693_v9 = vmul.f32 %v3406_v55, %v2636_v44  ;;  %v2647_v8 = vld [vmem:[#allocation2] ss:$2 sm:$0x3]  ;;  %p3396_p6 = scmp.ne.s32.totalorder %s3921_s18, 1 }
 0x1eb   : > { %v2650_v25 = vsel %vm2649_vm15, %v2640_v20, 0.0  ;;  %v2659_v29 = vsel %vm2649_vm15, %v2641_v24, 0.0  ;;  %v2694_v15 = vmul.f32 %v3407_v57, %v2637_v60  ;;  %v2695_v34 = vmul.f32 %v3408_v0, %v2638_v6 }
 0x1ec   : > { %v2651_v61 = vadd.f32 %v2650_v25, %v2648_v27  ;;  %v2660_v13 = vadd.f32 %v2659_v29, %v2658_v63  ;;  %v2696_v39 = vmul.f32 %v3409_v5, %v2639_v10  ;;  %v2697_v31 = vmul.f32 %v3410_v16, %v2640_v20  ;;  %v2748_v63 = vld [vmem:[%s4984_s2] sm:$0x3] (!%p3396_p6) }
 0x1ed   : > { %v2698_v4 = vmul.f32 %v3411_v17, %v2641_v24  ;;  %v2699_v36 = vadd.f32 %v2695_v34, %v2693_v9  ;;  %v3932_v42 = vmov 1966171168   ;;  %vm4948_vm0 = vcmp.lt.s32.totalorder %v2575_v32, 256 }
 0x1ee   : > { %v2652_v35 = vrot.slane %v2651_v61, 4  ;;  %v2661_v12 = vrot.slane %v2660_v13, 4  ;;  %v2700_v37 = vsel %vm2649_vm15, %v2697_v31, 0.0  ;;  %v2708_v38 = vadd.f32 %v2696_v39, %v2694_v15 }
 0x1ef   : > { %v2671_v28 = vunpack.c.l.s4 %v3932_v42  ;;  %v2709_v43 = vsel %vm2649_vm15, %v2698_v4, 0.0  ;;  %v2701_v45 = vadd.f32 %v2700_v37, %v2699_v36 }
 0x1f0   : > { %v2653_v40 = vadd.f32 %v2652_v35, %v2651_v61  ;;  %v2662_v41 = vadd.f32 %v2661_v12, %v2660_v13  ;;  %v2710_v46 = vadd.f32 %v2709_v43, %v2708_v38  ;;  %v2753_v61 = vld [vmem:[%s4985_s3] sm:$0x3] (!%p3396_p6) }
 0x1f1   : > { %v2702_v50 = vrot.slane %v2701_v45, 4  ;;  %v2672_v54 = vunpack.c.0.s8 %v2671_v28 }
 0x1f2   : > { %v2654_v47 = vrot.slane %v2653_v40, 2  ;;  %v2663_v48 = vrot.slane %v2662_v41, 2  ;;  %v2711_v51 = vrot.slane %v2710_v46, 4 }
 0x1f3   : > { %v2703_v30 = vadd.f32 %v2702_v50, %v2701_v45  ;;  %v2675_v1 = vsub.s32 %v2672_v54, %v4899_v33  ;;  %v2692_v33 = vld [vmem:[#allocation2 + $0x1] ss:$2 sm:$0x3] }
 0x1f4   : > { %v2655_v52 = vadd.f32 %v2654_v47, %v2653_v40  ;;  %v2664_v55 = vadd.f32 %v2663_v48, %v2662_v41  ;;  %v2712_v56 = vadd.f32 %v2711_v51, %v2710_v46 }
 0x1f5   : > { %v2704_v59 = vrot.slane %v2703_v30, 2 }
 0x1f6   : > { %v2656_v57 = vrot.slane %v2655_v52, 1  ;;  %v2665_v58 = vrot.slane %v2664_v55, 1  ;;  %v2713_v62 = vrot.slane %v2712_v56, 2 }
 0x1f7   : > { %v2705_v2 = vadd.f32 %v2704_v59, %v2703_v30 }
 0x1f8   : > { %v2657_v44 = vadd.f32 %v2656_v57, %v2655_v52  ;;  %v2666_v0 = vadd.f32 %v2665_v58, %v2664_v55  ;;  %v2714_v3 = vadd.f32 %v2713_v62, %v2712_v56 }
 0x1f9   : > { %v2706_v5 = vrot.slane %v2705_v2, 1 }
 0x1fa   : > { %v2669_v60 = vcombine.low %v2657_v44, %v2666_v0  ;;  %v2715_v6 = vrot.slane %v2714_v3, 1 }
 0x1fb   : > { %v2707_v10 = vadd.f32 %v2706_v5, %v2705_v2 }
 0x1fc   : > { %v2676_v7 = vrot.slane %v2669_v60, %v2675_v1  ;;  %v2716_v11 = vadd.f32 %v2715_v6, %v2714_v3 }
 0x1fe   : > { %v2683_v14 = vrot.slane %v2676_v7, %v2675_v1  ;;  %v2719_v49 = vcombine.low %v2707_v10, %v2716_v11 }
 0x200   : > { %v2685_v53 = vadd.f32 %v2683_v14, %v2647_v8  ;;  %v2726_v17 = vrot.slane %v2719_v49, %v2675_v1  ;;  %2740 = sbr.rel (%p3396_p6) target bundleno = 552 (0x228), region = 44 }
 0x202   : > { %2690 = vst.msk [vmem:[#allocation2] ss:$2 sm:$0x3] %vm4948_vm0, %v2685_v53  ;;  %v2733_v18 = vrot.slane %v2726_v17, %v2675_v1 }
 0x204   : > { %v2735_v19 = vadd.f32 %v2733_v18, %v2692_v33 }
 0x206   : > { %2736 = vst.msk [vmem:[#allocation2 + $0x1] ss:$2 sm:$0x3] %vm4948_vm0, %v2735_v19 }
 0x209   : > { %v2741_v20 = vld [vmem:[#allocation2] ss:$2 sm:$0x3] }
 0x20a   : > { %v2742_v21 = vmul.f32 0.03125, %v2741_v20 }
 0x20c   : > { %v2745_v23 = vmul.f32 %v2742_v21, %v2742_v21 }
 0x20d   : > { %v2743_v32 = vld [vmem:[#allocation2 + $0x1] ss:$2 sm:$0x3] }
 0x20e   : > { %v2744_v22 = vmul.f32 0.03125, %v2743_v32 }
 0x210   : > { %v2746_v24 = vsub.f32 %v2744_v22, %v2745_v23 }
 0x212   : > { %v2747_v26 = vmax.f32 %v2746_v24, 0.0 }
 0x214   : > { %v2749_v27 = vadd.f32 1e-05, %v2747_v26 }
 0x216   : > { %3905 = vrsqrt.f32 %v2749_v27 }
 0x220   : > { %v3906_v25 = vpop.eup %3905 }
 0x221   : > { %v2751_v29 = vmul.f32 %v3906_v25, %v2748_v63 }
 0x223   : > { %2752 = vst.msk [vmem:[%s4987_s5] ss:$2 sm:$0x3] %vm4948_vm0, %v2751_v29  ;;  %v2754_v13 = vmul.f32 %v2751_v29, %v2742_v21 }
 0x225   : > { %v2755_v9 = vsub.f32 %v2753_v61, %v2754_v13 }
 0x227   : > { %3397 = vst.msk [vmem:[%s4987_s5 + $0x1] ss:$2 sm:$0x3] %vm4948_vm0, %v2755_v9 }
 0x228 PF: > { %s16_s20 = sadd.s32 1, %s3929_s20   ;;  %s4996_s18 = smov %s3925_s19 }
 0x229   : > { %p13_p7 = scmp.ge.s32.totalorder %s16_s20, 4   ;;  %s4997_s19 = smov %s4999_s21 }
 0x22b   :  { %15 = sbr.rel (!%p13_p7) target bundleno = 2 (0x2), region = 100 }

// kernel: dc_discriminator.13
= control target key start
LH: loop header
LB: loop body
LE: loop exit
PB: predicated region body
PF: predicated region fallthrough
CT: control target
= control target key end

     0   :  { %v3834_v22 = vmov 1966171168   ;;  %v548_v24 = vlaneseq  ;;  %vm2954_vm0 = vcmask 1024   ;;  %s4687_s1 = inlined_call_operand.vmem [shape: bf16[4096,1], index: 1, kind: input, shape index: {}]   ;;  %s4688_s0 = inlined_call_operand.vmem [shape: bf16[2,4096], index: 0, kind: input, shape index: {}]   ;;  %s4689_s2 = inlined_call_operand.<no memory space> [shape: f32[1,1], index: 2, kind: input, shape index: {}]   ;;  %s4690_s3 = inlined_call_operand.vmem [shape: f32[2,1], index: 3, kind: output, shape index: {}]  }
   0x1   :  { %v3570_v0 = vld [vmem:[%s4687_s1 + $0x40] sm:$0xff]   ;;  %v3574_v4 = vld [vmem:[%s4687_s1 + $0x48] sm:$0xff]   ;;  %v3578_v8 = vld [vmem:[%s4687_s1 + $0x50] sm:$0xff]   ;;  %v546_v23 = vunpack.c.l.s4 %v3834_v22 }
   0x2   :  { %v3571_v1 = vld [vmem:[%s4687_s1 + $0xc0] sm:$0xff]   ;;  %3217 = vmatprep.subr.bf16.mxu0 %v3570_v0  ;;  %v3575_v5 = vld [vmem:[%s4687_s1 + $0xc8] sm:$0xff]   ;;  %v3579_v9 = vld [vmem:[%s4687_s1 + $0xd0] sm:$0xff]   ;;  %v549_v30 = vshrl.u32 %v548_v24, 7 }
   0x3   :  { %v3572_v2 = vld [vmem:[%s4687_s1] sm:$0xff]   ;;  %3239 = vmatprep.subr.bf16.mxu1 %v3571_v1  ;;  %v3576_v6 = vld [vmem:[%s4687_s1 + $0x8] sm:$0xff]   ;;  %v3580_v10 = vld [vmem:[%s4687_s1 + $0x10] sm:$0xff]   ;;  %v547_v29 = vunpack.c.0.s8 %v546_v23 }
   0x4   :  { %v3573_v3 = vld [vmem:[%s4687_s1 + $0x80] sm:$0xff]   ;;  %3218 = vmatpush3.bf16.msra.mxu0 %v3572_v2  ;;  %v3577_v7 = vld [vmem:[%s4687_s1 + $0x88] sm:$0xff]   ;;  %v3581_v11 = vld [vmem:[%s4687_s1 + $0x90] sm:$0xff]  }
   0x5   :  { %3240 = vmatpush3.bf16.msra.mxu1 %v3573_v3  ;;  %3219 = vmatprep.subr.bf16.mxu0 %v3574_v4  ;;  %v3582_v12 = vld [vmem:[%s4687_s1 + $0x58] sm:$0xff]   ;;  %v3586_v16 = vld [vmem:[%s4687_s1 + $0x60] sm:$0xff]   ;;  %v3590_v20 = vld [vmem:[%s4687_s1 + $0x68] sm:$0xff]   ;;  %v3945_v35 = vsub.s32 %v547_v29, %v549_v30 }
   0x6   :  { %3241 = vmatprep.subr.bf16.mxu1 %v3575_v5  ;;  %v3583_v13 = vld [vmem:[%s4687_s1 + $0xd8] sm:$0xff]   ;;  %v3587_v17 = vld [vmem:[%s4687_s1 + $0xe0] sm:$0xff]   ;;  %v3591_v21 = vld [vmem:[%s4687_s1 + $0xe8] sm:$0xff]  }
   0x7   :  { %v3584_v14 = vld [vmem:[%s4687_s1 + $0x18] sm:$0xff]   ;;  %v3588_v18 = vld [vmem:[%s4687_s1 + $0x20] sm:$0xff]   ;;  %v3592_v25 = vld [vmem:[%s4687_s1 + $0x28] sm:$0xff]  }
   0x8   :  { %3220 = vmatpush3.bf16.msra.mxu0 %v3576_v6  ;;  %v3585_v15 = vld [vmem:[%s4687_s1 + $0x98] sm:$0xff]   ;;  %v3589_v19 = vld [vmem:[%s4687_s1 + $0xa0] sm:$0xff]   ;;  %v3593_v26 = vld [vmem:[%s4687_s1 + $0xa8] sm:$0xff]  }
   0x9   :  { %3242 = vmatpush3.bf16.msra.mxu1 %v3577_v7  ;;  %3221 = vmatprep.subr.bf16.mxu0 %v3578_v8  ;;  %v3594_v27 = vld [vmem:[%s4687_s1 + $0x70] sm:$0xff]   ;;  %v3598_v33 = vld [vmem:[%s4687_s1 + $0x78] sm:$0xff]   ;;  %v17_v38 = vld [vmem:[%s4688_s0] sm:$0xff] }
   0xa   :  { %3243 = vmatprep.subr.bf16.mxu1 %v3579_v9  ;;  %v3595_v28 = vld [vmem:[%s4687_s1 + $0xf0] sm:$0xff]   ;;  %v3599_v34 = vld [vmem:[%s4687_s1 + $0xf8] sm:$0xff]   ;;  %v544_v39 = vcombine.high %v17_v38, %v17_v38  ;;  %v551_v40 = vrot.slane %v17_v38, %v3945_v35  ;;  %v3603_v41 = vld [vmem:[%s4687_s1 + $0x140] sm:$0xff]  }
   0xb   :  { %v3596_v31 = vld [vmem:[%s4687_s1 + $0x30] sm:$0xff]   ;;  %v3600_v36 = vld [vmem:[%s4687_s1 + $0x38] sm:$0xff]   ;;  %v3604_v42 = vld [vmem:[%s4687_s1 + $0x1c0] sm:$0xff]  }
   0xc   :  { %3222 = vmatpush3.bf16.msra.mxu0 %v3580_v10  ;;  %v3597_v32 = vld [vmem:[%s4687_s1 + $0xb0] sm:$0xff]   ;;  %v3601_v37 = vld [vmem:[%s4687_s1 + $0xb8] sm:$0xff]   ;;  %v559_v43 = vcombine.high %v551_v40, %v551_v40  ;;  %v567_v44 = vrot.slane %v551_v40, %v3945_v35  ;;  %v3965_v45 = vrot.slane %v544_v39, %v3945_v35  ;;  %v3605_v46 = vld [vmem:[%s4687_s1 + $0x100] sm:$0xff]  }
   0xd   :  { %3244 = vmatpush3.bf16.msra.mxu1 %v3581_v11  ;;  %3223 = vmatprep.subr.bf16.mxu0 %v3582_v12  ;;  %v3606_v48 = vld [vmem:[%s4687_s1 + $0x180] sm:$0xff]   ;;  %v3607_v51 = vld [vmem:[%s4687_s1 + $0x148] sm:$0xff]   ;;  %v3611_v58 = vld [vmem:[%s4687_s1 + $0x150] sm:$0xff]  }
   0xe   :  { %3245 = vmatprep.subr.bf16.mxu1 %v3583_v13  ;;  %v581_v47 = vrot.slane %v559_v43, %v3945_v35  ;;  %v560_v49 = vcombine.high %v3965_v45, %v3965_v45  ;;  %v589_v50 = vcombine.high %v567_v44, %v567_v44  ;;  %v3608_v53 = vld [vmem:[%s4687_s1 + $0x1c8] sm:$0xff]   ;;  %v3612_v59 = vld [vmem:[%s4687_s1 + $0x1d0] sm:$0xff]   ;;  %v3615_v62 = vld [vmem:[%s4687_s1 + $0x158] sm:$0xff]  }
   0xf   :  { %v3609_v55 = vld [vmem:[%s4687_s1 + $0x108] sm:$0xff]   ;;  %v3613_v60 = vld [vmem:[%s4687_s1 + $0x110] sm:$0xff]   ;;  %v3616_v63 = vld [vmem:[%s4687_s1 + $0x1d8] sm:$0xff]  }
  0x10   :  { %3224 = vmatpush3.bf16.msra.mxu0 %v3584_v14  ;;  %2340 = vmatprep.mubr.bf16.mxu0 %v581_v47  ;;  %v591_v52 = vcombine.high %v581_v47, %v581_v47  ;;  %v588_v54 = vrot.slane %v560_v49, %v3945_v35  ;;  %v3610_v56 = vld [vmem:[%s4687_s1 + $0x188] sm:$0xff]   ;;  %v3614_v61 = vld [vmem:[%s4687_s1 + $0x190] sm:$0xff]   ;;  %v3617_v0 = vld [vmem:[%s4687_s1 + $0x118] sm:$0xff]  }
  0x11   :  { %3246 = vmatpush3.bf16.msra.mxu1 %v3585_v15  ;;  %3225 = vmatprep.subr.bf16.mxu0 %v3586_v16  ;;  %v3618_v1 = vld [vmem:[%s4687_s1 + $0x198] sm:$0xff]   ;;  %v3619_v2 = vld [vmem:[%s4687_s1 + $0x160] sm:$0xff]   ;;  %v3623_v6 = vld [vmem:[%s4687_s1 + $0x168] sm:$0xff]  }
  0x12   :  { %3247 = vmatprep.subr.bf16.mxu1 %v3587_v17  ;;  %2380 = vmatprep.mubr.bf16.mxu1 %v591_v52  ;;  %v592_v57 = vcombine.high %v588_v54, %v588_v54  ;;  %v3620_v3 = vld [vmem:[%s4687_s1 + $0x1e0] sm:$0xff]   ;;  %v3624_v7 = vld [vmem:[%s4687_s1 + $0x1e8] sm:$0xff]   ;;  %v3627_v10 = vld [vmem:[%s4687_s1 + $0x170] sm:$0xff]  }
  0x13   :  { %v3621_v4 = vld [vmem:[%s4687_s1 + $0x120] sm:$0xff]   ;;  %v3625_v8 = vld [vmem:[%s4687_s1 + $0x128] sm:$0xff]   ;;  %v3628_v11 = vld [vmem:[%s4687_s1 + $0x1f0] sm:$0xff]  }
  0x14   :  { %3226 = vmatpush3.bf16.msra.mxu0 %v3588_v18  ;;  %v3622_v5 = vld [vmem:[%s4687_s1 + $0x1a0] sm:$0xff]   ;;  %v3626_v9 = vld [vmem:[%s4687_s1 + $0x1a8] sm:$0xff]   ;;  %v3629_v12 = vld [vmem:[%s4687_s1 + $0x130] sm:$0xff]   ;;  %v574_v18 = vrot.slane %v3965_v45, %v3945_v35 }
  0x15   :  { %3248 = vmatpush3.bf16.msra.mxu1 %v3589_v19  ;;  %3227 = vmatprep.subr.bf16.mxu0 %v3590_v20  ;;  %v3630_v13 = vld [vmem:[%s4687_s1 + $0x1b0] sm:$0xff]   ;;  %v3631_v14 = vld [vmem:[%s4687_s1 + $0x178] sm:$0xff]   ;;  %v3635_v19 = vld [vmem:[%s4687_s1 + $0x240] sm:$0xff]  }
  0x16   :  { %3249 = vmatprep.subr.bf16.mxu1 %v3591_v21  ;;  %v3632_v15 = vld [vmem:[%s4687_s1 + $0x1f8] sm:$0xff]   ;;  %v3636_v20 = vld [vmem:[%s4687_s1 + $0x2c0] sm:$0xff]   ;;  %v590_v23 = vcombine.high %v574_v18, %v574_v18  ;;  %v3639_v24 = vld [vmem:[%s4687_s1 + $0x248] sm:$0xff]  }
  0x17   :  { %v3633_v16 = vld [vmem:[%s4687_s1 + $0x138] sm:$0xff]   ;;  %v3637_v21 = vld [vmem:[%s4687_s1 + $0x200] sm:$0xff]   ;;  %v3644_v29 = vld [vmem:[%s4687_s1 + $0x2d0] sm:$0xff]  }
  0x18   :  { %3228 = vmatpush3.bf16.msra.mxu0 %v3592_v25  ;;  %v3634_v17 = vld [vmem:[%s4687_s1 + $0x1b8] sm:$0xff]   ;;  %v3638_v22 = vld [vmem:[%s4687_s1 + $0x280] sm:$0xff]   ;;  %v3640_v25 = vld [vmem:[%s4687_s1 + $0x2c8] sm:$0xff]  }
  0x19   :  { %3250 = vmatpush3.bf16.msra.mxu1 %v3593_v26  ;;  %3229 = vmatprep.subr.bf16.mxu0 %v3594_v27  ;;  %v3641_v26 = vld [vmem:[%s4687_s1 + $0x208] sm:$0xff]   ;;  %v3645_v30 = vld [vmem:[%s4687_s1 + $0x210] sm:$0xff]   ;;  %v3652_v38 = vld [vmem:[%s4687_s1 + $0x2e0] sm:$0xff]  }
  0x1a   :  { %3251 = vmatprep.subr.bf16.mxu1 %v3595_v28  ;;  %v3642_v27 = vld [vmem:[%s4687_s1 + $0x288] sm:$0xff]   ;;  %v3643_v28 = vld [vmem:[%s4687_s1 + $0x250] sm:$0xff]   ;;  %v3653_v39 = vld [vmem:[%s4687_s1 + $0x220] sm:$0xff]  }
  0x1b   :  { %v3654_v40 = vld [vmem:[%s4687_s1 + $0x2a0] sm:$0xff]   ;;  %v3657_v43 = vld [vmem:[%s4687_s1 + $0x228] sm:$0xff]   ;;  %v3659_v45 = vld [vmem:[%s4687_s1 + $0x270] sm:$0xff]  }
  0x1c   :  { %3230 = vmatpush3.bf16.msra.mxu0 %v3596_v31  ;;  %v3646_v31 = vld [vmem:[%s4687_s1 + $0x290] sm:$0xff]   ;;  %v3663_v49 = vld [vmem:[%s4687_s1 + $0x278] sm:$0xff]   ;;  %v18_v52 = vld [vmem:[%s4688_s0 + $0x8] sm:$0xff] }
  0x1d   :  { %3252 = vmatpush3.bf16.msra.mxu1 %v3597_v32  ;;  %3231 = vmatprep.subr.bf16.mxu0 %v3598_v33  ;;  %v3647_v32 = vld [vmem:[%s4687_s1 + $0x258] sm:$0xff]   ;;  %v3661_v47 = vld [vmem:[%s4687_s1 + $0x230] sm:$0xff]  }
  0x1e   :  { %3253 = vmatprep.subr.bf16.mxu1 %v3599_v34  ;;  %v3648_v33 = vld [vmem:[%s4687_s1 + $0x2d8] sm:$0xff]  }
  0x1f   :  { %v3649_v34 = vld [vmem:[%s4687_s1 + $0x218] sm:$0xff]  }
  0x20   :  { %3232 = vmatpush3.bf16.msra.mxu0 %v3600_v36  ;;  %v3650_v36 = vld [vmem:[%s4687_s1 + $0x298] sm:$0xff]  }
  0x21   :  { %3254 = vmatpush3.bf16.msra.mxu1 %v3601_v37  ;;  %3261 = vmatprep.subr.bf16.mxu0 %v3603_v41  ;;  %v3651_v37 = vld [vmem:[%s4687_s1 + $0x260] sm:$0xff]   ;;  %v3655_v41 = vld [vmem:[%s4687_s1 + $0x268] sm:$0xff]  }
  0x22   :  { %3283 = vmatprep.subr.bf16.mxu1 %v3604_v42  ;;  %v3656_v42 = vld [vmem:[%s4687_s1 + $0x2e8] sm:$0xff]  }
  0x23   :  { %2341 = vmatmul.mubr.bf16.vlgmr.msra.gmra.mrb[0].mxu0 %v567_v44  ;;  %v3658_v44 = vld [vmem:[%s4687_s1 + $0x2a8] sm:$0xff]  }
  0x24   :  { %3262 = vmatpush3.bf16.msra.mxu0 %v3605_v46  ;;  %2381 = vmatmul.mubr.bf16.vlgmr.msra.gmra.mrb[0].mxu1 %v589_v50  ;;  %v3660_v46 = vld [vmem:[%s4687_s1 + $0x2f0] sm:$0xff]   ;;  %v3664_v50 = vld [vmem:[%s4687_s1 + $0x2f8] sm:$0xff]  }
  0x25   :  { %3263 = vmatprep.subr.bf16.mxu0 %v3607_v51  ;;  %3284 = vmatpush3.bf16.msra.mxu1 %v3606_v48  ;;  %v3662_v48 = vld [vmem:[%s4687_s1 + $0x2b0] sm:$0xff]   ;;  %v3665_v51 = vld [vmem:[%s4687_s1 + $0x238] sm:$0xff]  }
  0x26   :  { %2420 = vmatprep.mubr.bf16.mxu0 %v588_v54  ;;  %3285 = vmatprep.subr.bf16.mxu1 %v3608_v53  ;;  %v3666_v53 = vld [vmem:[%s4687_s1 + $0x2b8] sm:$0xff]   ;;  %v600_v54 = vrot.slane %v18_v52, %v3945_v35 }
  0x27   :  { %2460 = vmatprep.mubr.bf16.mxu1 %v592_v57 }
  0x28   :  { %3264 = vmatpush3.bf16.msra.mxu0 %v3609_v55  ;;  %v593_v55 = vcombine.high %v18_v52, %v18_v52  ;;  %v608_v57 = vcombine.high %v600_v54, %v600_v54  ;;  %v3715_v52 = vld [vmem:[%s4687_s1 + $0x498] sm:$0xff]  }
  0x29   :  { %3265 = vmatprep.subr.bf16.mxu0 %v3611_v58  ;;  %3286 = vmatpush3.bf16.msra.mxu1 %v3610_v56  ;;  %v3667_v56 = vld [vmem:[%s4687_s1 + $0x340] sm:$0xff]   ;;  %v616_v58 = vrot.slane %v600_v54, %v3945_v35 }
  0x2a   :  { %3287 = vmatprep.subr.bf16.mxu1 %v3612_v59  ;;  %v3668_v59 = vld [vmem:[%s4687_s1 + $0x3c0] sm:$0xff]  }
  0x2b   :  { %v3717_v54 = vld [vmem:[%s4687_s1 + $0x4e0] sm:$0xff]  }
  0x2c   :  { %3266 = vmatpush3.bf16.msra.mxu0 %v3613_v60  ;;  %v4171_v60 = vrot.slane %v593_v55, %v3945_v35  ;;  %v3718_v55 = vld [vmem:[%s4687_s1 + $0x420] sm:$0xff]  }
  0x2d   :  { %3267 = vmatprep.subr.bf16.mxu0 %v3615_v62  ;;  %3288 = vmatpush3.bf16.msra.mxu1 %v3614_v61  ;;  %v3669_v61 = vld [vmem:[%s4687_s1 + $0x300] sm:$0xff]   ;;  %v630_v62 = vrot.slane %v608_v57, %v3945_v35  ;;  %v3720_v57 = vld [vmem:[%s4687_s1 + $0x468] sm:$0xff]  }
  0x2e   :  { %3289 = vmatprep.subr.bf16.mxu1 %v3616_v63  ;;  %v3670_v63 = vld [vmem:[%s4687_s1 + $0x380] sm:$0xff]  }
  0x30   :  { %3268 = vmatpush3.bf16.msra.mxu0 %v3617_v0  ;;  %v609_v0 = vcombine.high %v4171_v60, %v4171_v60 }
  0x31   :  { %3269 = vmatprep.subr.bf16.mxu0 %v3619_v2  ;;  %3290 = vmatpush3.bf16.msra.mxu1 %v3618_v1  ;;  %v638_v1 = vcombine.high %v616_v58, %v616_v58  ;;  %v3671_v2 = vld [vmem:[%s4687_s1 + $0x348] sm:$0xff]  }
  0x32   :  { %3291 = vmatprep.subr.bf16.mxu1 %v3620_v3  ;;  %v640_v3 = vcombine.high %v630_v62, %v630_v62 }
  0x34   :  { %3270 = vmatpush3.bf16.msra.mxu0 %v3621_v4  ;;  %v3672_v4 = vld [vmem:[%s4687_s1 + $0x3c8] sm:$0xff]  }
  0x35   :  { %3271 = vmatprep.subr.bf16.mxu0 %v3623_v6  ;;  %3292 = vmatpush3.bf16.msra.mxu1 %v3622_v5  ;;  %v637_v5 = vrot.slane %v609_v0, %v3945_v35  ;;  %v3673_v6 = vld [vmem:[%s4687_s1 + $0x308] sm:$0xff]   ;;  %v3727_v0 = vld [vmem:[%s4687_s1 + $0x4b0] sm:$0xff]  }
  0x36   :  { %3293 = vmatprep.subr.bf16.mxu1 %v3624_v7  ;;  %v3674_v7 = vld [vmem:[%s4687_s1 + $0x388] sm:$0xff]  }
  0x38   :  { %3272 = vmatpush3.bf16.msra.mxu0 %v3625_v8  ;;  %v641_v8 = vcombine.high %v637_v5, %v637_v5 }
  0x39   :  { %3273 = vmatprep.subr.bf16.mxu0 %v3627_v10  ;;  %3294 = vmatpush3.bf16.msra.mxu1 %v3626_v9  ;;  %v3675_v9 = vld [vmem:[%s4687_s1 + $0x350] sm:$0xff]  }
  0x3a   :  { %3295 = vmatprep.subr.bf16.mxu1 %v3628_v11  ;;  %v3676_v10 = vld [vmem:[%s4687_s1 + $0x3d0] sm:$0xff]  }
  0x3b   :  { %v3677_v11 = vld [vmem:[%s4687_s1 + $0x310] sm:$0xff]  }
  0x3c   :  { %3274 = vmatpush3.bf16.msra.mxu0 %v3629_v12  ;;  %v3678_v12 = vld [vmem:[%s4687_s1 + $0x390] sm:$0xff]  }
  0x3d   :  { %3275 = vmatprep.subr.bf16.mxu0 %v3631_v14  ;;  %3296 = vmatpush3.bf16.msra.mxu1 %v3630_v13  ;;  %v3679_v13 = vld [vmem:[%s4687_s1 + $0x358] sm:$0xff]  }
  0x3e   :  { %3297 = vmatprep.subr.bf16.mxu1 %v3632_v15  ;;  %v3680_v14 = vld [vmem:[%s4687_s1 + $0x3d8] sm:$0xff]  }
  0x3f   :  { %v3681_v15 = vld [vmem:[%s4687_s1 + $0x318] sm:$0xff]  }
  0x40   :  { %3276 = vmatpush3.bf16.msra.mxu0 %v3633_v16  ;;  %v3682_v16 = vld [vmem:[%s4687_s1 + $0x398] sm:$0xff]  }
  0x41   :  { %3305 = vmatprep.subr.bf16.mxu0 %v3635_v19  ;;  %3298 = vmatpush3.bf16.msra.mxu1 %v3634_v17  ;;  %v3683_v17 = vld [vmem:[%s4687_s1 + $0x360] sm:$0xff]  }
  0x42   :  { %3327 = vmatprep.subr.bf16.mxu1 %v3636_v20  ;;  %v3685_v19 = vld [vmem:[%s4687_s1 + $0x320] sm:$0xff]  }
  0x43   :  { %2421 = vmatmul.mubr.bf16.vlgmr.msra.gmra.mrb[4].mxu0 %v574_v18  ;;  %v3684_v18 = vld [vmem:[%s4687_s1 + $0x3e0] sm:$0xff]  }
  0x44   :  { %3306 = vmatpush3.bf16.msra.mxu0 %v3637_v21  ;;  %2461 = vmatmul.mubr.bf16.vlgmr.msra.gmra.mrb[4].mxu1 %v590_v23  ;;  %v3686_v20 = vld [vmem:[%s4687_s1 + $0x3a0] sm:$0xff]   ;;  %v3687_v21 = vld [vmem:[%s4687_s1 + $0x368] sm:$0xff]  }
  0x45   :  { %3307 = vmatprep.subr.bf16.mxu0 %v3639_v24  ;;  %3328 = vmatpush3.bf16.msra.mxu1 %v3638_v22  ;;  %v3688_v22 = vld [vmem:[%s4687_s1 + $0x3e8] sm:$0xff]  }
  0x46   :  { %3329 = vmatprep.subr.bf16.mxu1 %v3640_v25  ;;  %2500 = vmatprep.mubr.bf16.mxu0 %v630_v62  ;;  %v3689_v23 = vld [vmem:[%s4687_s1 + $0x328] sm:$0xff]   ;;  %v8_v25 = vstv %s4689_s2  ;;  %v3725_v62 = vld [vmem:[%s4687_s1 + $0x4f0] sm:$0xff]  }
  0x47   :  { %2540 = vmatprep.mubr.bf16.mxu1 %v640_v3  ;;  %v3690_v24 = vld [vmem:[%s4687_s1 + $0x3a8] sm:$0xff]   ;;  %9 = vst [vmem:[#allocation2] sm:$0x1] %v8_v25  ;;  %v3730_v3 = vld [vmem:[%s4687_s1 + $0x438] sm:$0xff]   ;;  %v3740_v25 = vld [vmem:[%s4687_s1 + $0x550] sm:$0xff]  }
  0x48   :  { %3308 = vmatpush3.bf16.msra.mxu0 %v3641_v26  ;;  %v3691_v26 = vld [vmem:[%s4687_s1 + $0x370] sm:$0xff]  }
  0x49   :  { %3309 = vmatprep.subr.bf16.mxu0 %v3643_v28  ;;  %3330 = vmatpush3.bf16.msra.mxu1 %v3642_v27  ;;  %v3692_v27 = vld [vmem:[%s4687_s1 + $0x3f0] sm:$0xff]  }
  0x4a   :  { %3331 = vmatprep.subr.bf16.mxu1 %v3644_v29  ;;  %v3693_v28 = vld [vmem:[%s4687_s1 + $0x330] sm:$0xff]  }
  0x4b   :  { %v3694_v29 = vld [vmem:[%s4687_s1 + $0x3b0] sm:$0xff]  }
  0x4c   :  { %3310 = vmatpush3.bf16.msra.mxu0 %v3645_v30  ;;  %v3695_v30 = vld [vmem:[%s4687_s1 + $0x378] sm:$0xff]  }
  0x4d   :  { %3311 = vmatprep.subr.bf16.mxu0 %v3647_v32  ;;  %3332 = vmatpush3.bf16.msra.mxu1 %v3646_v31  ;;  %v3696_v31 = vld [vmem:[%s4687_s1 + $0x3f8] sm:$0xff]  }
  0x4e   :  { %3333 = vmatprep.subr.bf16.mxu1 %v3648_v33  ;;  %v3697_v32 = vld [vmem:[%s4687_s1 + $0x338] sm:$0xff]  }
  0x4f   :  { %v3698_v33 = vld [vmem:[%s4687_s1 + $0x3b8] sm:$0xff]  }
  0x50   :  { %3312 = vmatpush3.bf16.msra.mxu0 %v3649_v34  ;;  %v623_v34 = vrot.slane %v4171_v60, %v3945_v35  ;;  %v3723_v60 = vld [vmem:[%s4687_s1 + $0x4a8] sm:$0xff]  }
  0x51   :  { %3313 = vmatprep.subr.bf16.mxu0 %v3651_v37  ;;  %3334 = vmatpush3.bf16.msra.mxu1 %v3650_v36  ;;  %v3700_v36 = vld [vmem:[%s4687_s1 + $0x440] sm:$0xff]  }
  0x52   :  { %3335 = vmatprep.subr.bf16.mxu1 %v3652_v38  ;;  %v3701_v37 = vld [vmem:[%s4687_s1 + $0x4c0] sm:$0xff]  }
  0x53   :  { %v3702_v38 = vld [vmem:[%s4687_s1 + $0x400] sm:$0xff]  }
  0x54   :  { %3314 = vmatpush3.bf16.msra.mxu0 %v3653_v39  ;;  %v3703_v39 = vld [vmem:[%s4687_s1 + $0x480] sm:$0xff]  }
  0x55   :  { %3315 = vmatprep.subr.bf16.mxu0 %v3655_v41  ;;  %3336 = vmatpush3.bf16.msra.mxu1 %v3654_v40  ;;  %v639_v40 = vcombine.high %v623_v34, %v623_v34  ;;  %v3704_v41 = vld [vmem:[%s4687_s1 + $0x448] sm:$0xff]  }
  0x56   :  { %3337 = vmatprep.subr.bf16.mxu1 %v3656_v42  ;;  %v3705_v42 = vld [vmem:[%s4687_s1 + $0x4c8] sm:$0xff]  }
  0x58   :  { %3316 = vmatpush3.bf16.msra.mxu0 %v3657_v43  ;;  %v3706_v43 = vld [vmem:[%s4687_s1 + $0x408] sm:$0xff]  }
  0x59   :  { %3317 = vmatprep.subr.bf16.mxu0 %v3659_v45  ;;  %3338 = vmatpush3.bf16.msra.mxu1 %v3658_v44  ;;  %v3707_v44 = vld [vmem:[%s4687_s1 + $0x488] sm:$0xff]   ;;  %v3708_v45 = vld [vmem:[%s4687_s1 + $0x450] sm:$0xff]  }
  0x5a   :  { %3339 = vmatprep.subr.bf16.mxu1 %v3660_v46  ;;  %v3709_v46 = vld [vmem:[%s4687_s1 + $0x4d0] sm:$0xff]  }
  0x5c   :  { %3318 = vmatpush3.bf16.msra.mxu0 %v3661_v47  ;;  %v3710_v47 = vld [vmem:[%s4687_s1 + $0x410] sm:$0xff]  }
  0x5d   :  { %3319 = vmatprep.subr.bf16.mxu0 %v3663_v49  ;;  %3340 = vmatpush3.bf16.msra.mxu1 %v3662_v48  ;;  %v3711_v48 = vld [vmem:[%s4687_s1 + $0x490] sm:$0xff]   ;;  %v3712_v49 = vld [vmem:[%s4687_s1 + $0x458] sm:$0xff]  }
  0x5e   :  { %3341 = vmatprep.subr.bf16.mxu1 %v3664_v50  ;;  %v3713_v50 = vld [vmem:[%s4687_s1 + $0x4d8] sm:$0xff]  }
  0x60   :  { %3320 = vmatpush3.bf16.msra.mxu0 %v3665_v51  ;;  %v3714_v51 = vld [vmem:[%s4687_s1 + $0x418] sm:$0xff]  }
  0x61   :  { %3349 = vmatprep.subr.bf16.mxu0 %v3667_v56  ;;  %3342 = vmatpush3.bf16.msra.mxu1 %v3666_v53  ;;  %v3716_v53 = vld [vmem:[%s4687_s1 + $0x460] sm:$0xff]  }
  0x62   :  { %3371 = vmatprep.subr.bf16.mxu1 %v3668_v59  ;;  %v3719_v56 = vld [vmem:[%s4687_s1 + $0x4a0] sm:$0xff]   ;;  %v3722_v59 = vld [vmem:[%s4687_s1 + $0x428] sm:$0xff]  }
  0x63   :  { %2501 = vmatmul.mubr.bf16.vlgmr.msra.gmra.mrb[8].mxu0 %v616_v58  ;;  %v3721_v58 = vld [vmem:[%s4687_s1 + $0x4e8] sm:$0xff]  }
  0x64   :  { %3350 = vmatpush3.bf16.msra.mxu0 %v3669_v61  ;;  %2541 = vmatmul.mubr.bf16.vlgmr.msra.gmra.mrb[8].mxu1 %v638_v1  ;;  %v3724_v61 = vld [vmem:[%s4687_s1 + $0x470] sm:$0xff]   ;;  %v3728_v1 = vld [vmem:[%s4687_s1 + $0x478] sm:$0xff]  }
  0x65   :  { %3351 = vmatprep.subr.bf16.mxu0 %v3671_v2  ;;  %3372 = vmatpush3.bf16.msra.mxu1 %v3670_v63  ;;  %v3726_v63 = vld [vmem:[%s4687_s1 + $0x430] sm:$0xff]   ;;  %v3729_v2 = vld [vmem:[%s4687_s1 + $0x4f8] sm:$0xff]  }
  0x66   :  { %2580 = vmatprep.mubr.bf16.mxu0 %v637_v5  ;;  %3373 = vmatprep.subr.bf16.mxu1 %v3672_v4  ;;  %v19_v4 = vld [vmem:[%s4688_s0 + $0x10] sm:$0xff]  ;;  %v3731_v5 = vld [vmem:[%s4687_s1 + $0x4b8] sm:$0xff]  }
  0x67   :  { %2620 = vmatprep.mubr.bf16.mxu1 %v641_v8  ;;  %v3732_v8 = vld [vmem:[%s4687_s1 + $0x540] sm:$0xff]  }
  0x68   :  { %3352 = vmatpush3.bf16.msra.mxu0 %v3673_v6  ;;  %v649_v6 = vrot.slane %v19_v4, %v3945_v35 }
  0x69   :  { %3353 = vmatprep.subr.bf16.mxu0 %v3675_v9  ;;  %3374 = vmatpush3.bf16.msra.mxu1 %v3674_v7  ;;  %v642_v7 = vcombine.high %v19_v4, %v19_v4  ;;  %v3781_v4 = vld [vmem:[%s4687_s1 + $0x660] sm:$0xff]  }
  0x6a   :  { %3375 = vmatprep.subr.bf16.mxu1 %v3676_v10  ;;  %v657_v9 = vcombine.high %v649_v6, %v649_v6  ;;  %v665_v10 = vrot.slane %v649_v6, %v3945_v35  ;;  %v3783_v6 = vld [vmem:[%s4687_s1 + $0x620] sm:$0xff]  }
  0x6c   :  { %3354 = vmatpush3.bf16.msra.mxu0 %v3677_v11  ;;  %v3733_v11 = vld [vmem:[%s4687_s1 + $0x5c0] sm:$0xff]  }
  0x6d   :  { %3355 = vmatprep.subr.bf16.mxu0 %v3679_v13  ;;  %3376 = vmatpush3.bf16.msra.mxu1 %v3678_v12  ;;  %v4380_v12 = vrot.slane %v642_v7, %v3945_v35  ;;  %v3734_v13 = vld [vmem:[%s4687_s1 + $0x500] sm:$0xff]  }
  0x6e   :  { %3377 = vmatprep.subr.bf16.mxu1 %v3680_v14  ;;  %v679_v14 = vrot.slane %v657_v9, %v3945_v35  ;;  %v3784_v7 = vld [vmem:[%s4687_s1 + $0x6a0] sm:$0xff]   ;;  %v3786_v9 = vld [vmem:[%s4687_s1 + $0x6e8] sm:$0xff]  }
  0x70   :  { %3356 = vmatpush3.bf16.msra.mxu0 %v3681_v15  ;;  %v3735_v15 = vld [vmem:[%s4687_s1 + $0x580] sm:$0xff]  }
  0x71   :  { %3357 = vmatprep.subr.bf16.mxu0 %v3683_v17  ;;  %3378 = vmatpush3.bf16.msra.mxu1 %v3682_v16  ;;  %v658_v16 = vcombine.high %v4380_v12, %v4380_v12  ;;  %v687_v17 = vcombine.high %v665_v10, %v665_v10 }
  0x72   :  { %3379 = vmatprep.subr.bf16.mxu1 %v3684_v18  ;;  %v3736_v18 = vld [vmem:[%s4687_s1 + $0x548] sm:$0xff]  }
  0x74   :  { %3358 = vmatpush3.bf16.msra.mxu0 %v3685_v19  ;;  %v689_v19 = vcombine.high %v679_v14, %v679_v14 }
  0x75   :  { %3359 = vmatprep.subr.bf16.mxu0 %v3687_v21  ;;  %3380 = vmatpush3.bf16.msra.mxu1 %v3686_v20  ;;  %v3737_v20 = vld [vmem:[%s4687_s1 + $0x5c8] sm:$0xff]   ;;  %v686_v21 = vrot.slane %v658_v16, %v3945_v35  ;;  %v3793_v16 = vld [vmem:[%s4687_s1 + $0x678] sm:$0xff]  }
  0x76   :  { %3381 = vmatprep.subr.bf16.mxu1 %v3688_v22  ;;  %v3738_v22 = vld [vmem:[%s4687_s1 + $0x508] sm:$0xff]  }
  0x78   :  { %3360 = vmatpush3.bf16.msra.mxu0 %v3689_v23  ;;  %v3739_v23 = vld [vmem:[%s4687_s1 + $0x588] sm:$0xff]  }
  0x79   :  { %3361 = vmatprep.subr.bf16.mxu0 %v3691_v26  ;;  %3382 = vmatpush3.bf16.msra.mxu1 %v3690_v24  ;;  %v690_v24 = vcombine.high %v686_v21, %v686_v21  ;;  %v3741_v26 = vld [vmem:[%s4687_s1 + $0x5d0] sm:$0xff]  }
  0x7a   :  { %3383 = vmatprep.subr.bf16.mxu1 %v3692_v27  ;;  %v3742_v27 = vld [vmem:[%s4687_s1 + $0x510] sm:$0xff]  }
  0x7c   :  { %3362 = vmatpush3.bf16.msra.mxu0 %v3693_v28  ;;  %v3743_v28 = vld [vmem:[%s4687_s1 + $0x590] sm:$0xff]  }
  0x7d   :  { %3363 = vmatprep.subr.bf16.mxu0 %v3695_v30  ;;  %3384 = vmatpush3.bf16.msra.mxu1 %v3694_v29  ;;  %v3744_v29 = vld [vmem:[%s4687_s1 + $0x558] sm:$0xff]  }
  0x7e   :  { %3385 = vmatprep.subr.bf16.mxu1 %v3696_v31  ;;  %v3745_v30 = vld [vmem:[%s4687_s1 + $0x5d8] sm:$0xff]  }
  0x7f   :  { %v3746_v31 = vld [vmem:[%s4687_s1 + $0x518] sm:$0xff]  }
  0x80   :  { %3364 = vmatpush3.bf16.msra.mxu0 %v3697_v32  ;;  %v3747_v32 = vld [vmem:[%s4687_s1 + $0x598] sm:$0xff]  }
  0x81   :  { %3393 = vmatprep.subr.bf16.mxu0 %v3700_v36  ;;  %3386 = vmatpush3.bf16.msra.mxu1 %v3698_v33  ;;  %v3748_v33 = vld [vmem:[%s4687_s1 + $0x560] sm:$0xff]  }
  0x82   :  { %3415 = vmatprep.subr.bf16.mxu1 %v3701_v37  ;;  %v3750_v36 = vld [vmem:[%s4687_s1 + $0x520] sm:$0xff]  }
  0x83   :  { %2581 = vmatmul.mubr.bf16.vlgmr.msra.gmra.mrb[12].mxu0 %v623_v34  ;;  %v3749_v34 = vld [vmem:[%s4687_s1 + $0x5e0] sm:$0xff]  }
  0x84   :  { %3394 = vmatpush3.bf16.msra.mxu0 %v3702_v38  ;;  %2621 = vmatmul.mubr.bf16.vlgmr.msra.gmra.mrb[12].mxu1 %v639_v40  ;;  %v3751_v37 = vld [vmem:[%s4687_s1 + $0x5a0] sm:$0xff]   ;;  %v3752_v38 = vld [vmem:[%s4687_s1 + $0x568] sm:$0xff]  }
  0x85   :  { %3395 = vmatprep.subr.bf16.mxu0 %v3704_v41  ;;  %3416 = vmatpush3.bf16.msra.mxu1 %v3703_v39  ;;  %v3753_v39 = vld [vmem:[%s4687_s1 + $0x5e8] sm:$0xff]  }
  0x86   :  { %3417 = vmatprep.subr.bf16.mxu1 %v3705_v42  ;;  %2660 = vmatprep.mubr.bf16.mxu0 %v679_v14  ;;  %v3754_v40 = vld [vmem:[%s4687_s1 + $0x528] sm:$0xff]   ;;  %v3756_v42 = vld [vmem:[%s4687_s1 + $0x570] sm:$0xff]  }
  0x87   :  { %2700 = vmatprep.mubr.bf16.mxu1 %v689_v19  ;;  %v3755_v41 = vld [vmem:[%s4687_s1 + $0x5a8] sm:$0xff]   ;;  %v3791_v14 = vld [vmem:[%s4687_s1 + $0x630] sm:$0xff]   ;;  %v20_v19 = vld [vmem:[%s4688_s0 + $0x18] sm:$0xff] }
  0x88   :  { %3396 = vmatpush3.bf16.msra.mxu0 %v3706_v43  ;;  %v3757_v43 = vld [vmem:[%s4687_s1 + $0x5f0] sm:$0xff]  }
  0x89   :  { %3397 = vmatprep.subr.bf16.mxu0 %v3708_v45  ;;  %3418 = vmatpush3.bf16.msra.mxu1 %v3707_v44  ;;  %v3758_v44 = vld [vmem:[%s4687_s1 + $0x530] sm:$0xff]  }
  0x8a   :  { %3419 = vmatprep.subr.bf16.mxu1 %v3709_v46  ;;  %v3759_v45 = vld [vmem:[%s4687_s1 + $0x5b0] sm:$0xff]   ;;  %v3760_v46 = vld [vmem:[%s4687_s1 + $0x578] sm:$0xff]  }
  0x8c   :  { %3398 = vmatpush3.bf16.msra.mxu0 %v3710_v47  ;;  %v3761_v47 = vld [vmem:[%s4687_s1 + $0x5f8] sm:$0xff]  }
  0x8d   :  { %3399 = vmatprep.subr.bf16.mxu0 %v3712_v49  ;;  %3420 = vmatpush3.bf16.msra.mxu1 %v3711_v48  ;;  %v3762_v48 = vld [vmem:[%s4687_s1 + $0x538] sm:$0xff]  }
  0x8e   :  { %3421 = vmatprep.subr.bf16.mxu1 %v3713_v50  ;;  %v3763_v49 = vld [vmem:[%s4687_s1 + $0x5b8] sm:$0xff]   ;;  %v672_v50 = vrot.slane %v4380_v12, %v3945_v35  ;;  %v3789_v12 = vld [vmem:[%s4687_s1 + $0x670] sm:$0xff]  }
  0x90   :  { %3400 = vmatpush3.bf16.msra.mxu0 %v3714_v51  ;;  %v3765_v51 = vld [vmem:[%s4687_s1 + $0x640] sm:$0xff]  }
  0x91   :  { %3401 = vmatprep.subr.bf16.mxu0 %v3716_v53  ;;  %3422 = vmatpush3.bf16.msra.mxu1 %v3715_v52  ;;  %v3766_v52 = vld [vmem:[%s4687_s1 + $0x6c0] sm:$0xff]  }
  0x92   :  { %3423 = vmatprep.subr.bf16.mxu1 %v3717_v54  ;;  %v3767_v53 = vld [vmem:[%s4687_s1 + $0x600] sm:$0xff]  }
  0x93   :  { %v3768_v54 = vld [vmem:[%s4687_s1 + $0x680] sm:$0xff]  }
  0x94   :  { %3402 = vmatpush3.bf16.msra.mxu0 %v3718_v55  ;;  %v688_v55 = vcombine.high %v672_v50, %v672_v50 }
  0x95   :  { %3403 = vmatprep.subr.bf16.mxu0 %v3720_v57  ;;  %3424 = vmatpush3.bf16.msra.mxu1 %v3719_v56  ;;  %v3769_v56 = vld [vmem:[%s4687_s1 + $0x648] sm:$0xff]  }
  0x96   :  { %3425 = vmatprep.subr.bf16.mxu1 %v3721_v58  ;;  %v3770_v57 = vld [vmem:[%s4687_s1 + $0x6c8] sm:$0xff]  }
  0x97   :  { %v3771_v58 = vld [vmem:[%s4687_s1 + $0x608] sm:$0xff]  }
  0x98   :  { %3404 = vmatpush3.bf16.msra.mxu0 %v3722_v59  ;;  %v3772_v59 = vld [vmem:[%s4687_s1 + $0x688] sm:$0xff]  }
  0x99   :  { %3405 = vmatprep.subr.bf16.mxu0 %v3724_v61  ;;  %3426 = vmatpush3.bf16.msra.mxu1 %v3723_v60  ;;  %v3773_v60 = vld [vmem:[%s4687_s1 + $0x650] sm:$0xff]  }
  0x9a   :  { %3427 = vmatprep.subr.bf16.mxu1 %v3725_v62  ;;  %v3774_v61 = vld [vmem:[%s4687_s1 + $0x6d0] sm:$0xff]  }
  0x9b   :  { %v3775_v62 = vld [vmem:[%s4687_s1 + $0x610] sm:$0xff]  }
  0x9c   :  { %3406 = vmatpush3.bf16.msra.mxu0 %v3726_v63  ;;  %v3776_v63 = vld [vmem:[%s4687_s1 + $0x690] sm:$0xff]  }
  0x9d   :  { %3407 = vmatprep.subr.bf16.mxu0 %v3728_v1  ;;  %3428 = vmatpush3.bf16.msra.mxu1 %v3727_v0  ;;  %v3777_v0 = vld [vmem:[%s4687_s1 + $0x658] sm:$0xff]  }
  0x9e   :  { %3429 = vmatprep.subr.bf16.mxu1 %v3729_v2  ;;  %v3778_v1 = vld [vmem:[%s4687_s1 + $0x6d8] sm:$0xff]  }
  0x9f   :  { %v3779_v2 = vld [vmem:[%s4687_s1 + $0x618] sm:$0xff]  }
  0xa0   :  { %3408 = vmatpush3.bf16.msra.mxu0 %v3730_v3  ;;  %v3780_v3 = vld [vmem:[%s4687_s1 + $0x698] sm:$0xff]  }
  0xa1   :  { %3437 = vmatprep.subr.bf16.mxu0 %v3732_v8  ;;  %3430 = vmatpush3.bf16.msra.mxu1 %v3731_v5  ;;  %v3782_v5 = vld [vmem:[%s4687_s1 + $0x6e0] sm:$0xff]   ;;  %v3785_v8 = vld [vmem:[%s4687_s1 + $0x668] sm:$0xff]  }
  0xa2   :  { %3459 = vmatprep.subr.bf16.mxu1 %v3733_v11  ;;  %v3788_v11 = vld [vmem:[%s4687_s1 + $0x6a8] sm:$0xff]  }
  0xa3   :  { %2661 = vmatmul.mubr.bf16.vlgmr.msra.gmra.mrb[16].mxu0 %v665_v10  ;;  %v3787_v10 = vld [vmem:[%s4687_s1 + $0x628] sm:$0xff]  }
  0xa4   :  { %3438 = vmatpush3.bf16.msra.mxu0 %v3734_v13  ;;  %2701 = vmatmul.mubr.bf16.vlgmr.msra.gmra.mrb[16].mxu1 %v687_v17  ;;  %v3790_v13 = vld [vmem:[%s4687_s1 + $0x6f0] sm:$0xff]   ;;  %v3794_v17 = vld [vmem:[%s4687_s1 + $0x6f8] sm:$0xff]  }
  0xa5   :  { %3439 = vmatprep.subr.bf16.mxu0 %v3736_v18  ;;  %3460 = vmatpush3.bf16.msra.mxu1 %v3735_v15  ;;  %v3792_v15 = vld [vmem:[%s4687_s1 + $0x6b0] sm:$0xff]   ;;  %v3795_v18 = vld [vmem:[%s4687_s1 + $0x638] sm:$0xff]  }
  0xa6   :  { %2740 = vmatprep.mubr.bf16.mxu0 %v686_v21  ;;  %3461 = vmatprep.subr.bf16.mxu1 %v3737_v20  ;;  %v698_v20 = vrot.slane %v20_v19, %v3945_v35  ;;  %v3797_v21 = vld [vmem:[%s4687_s1 + $0x740] sm:$0xff]  }
  0xa7   :  { %2780 = vmatprep.mubr.bf16.mxu1 %v690_v24 }
  0xa8   :  { %3440 = vmatpush3.bf16.msra.mxu0 %v3738_v22  ;;  %v691_v22 = vcombine.high %v20_v19, %v20_v19  ;;  %v706_v24 = vcombine.high %v698_v20, %v698_v20 }
  0xa9   :  { %3441 = vmatprep.subr.bf16.mxu0 %v3740_v25  ;;  %3462 = vmatpush3.bf16.msra.mxu1 %v3739_v23  ;;  %v3796_v23 = vld [vmem:[%s4687_s1 + $0x6b8] sm:$0xff]   ;;  %v714_v25 = vrot.slane %v698_v20, %v3945_v35 }
  0xaa   :  { %3463 = vmatprep.subr.bf16.mxu1 %v3741_v26  ;;  %v3798_v26 = vld [vmem:[%s4687_s1 + $0x7c0] sm:$0xff]  }
  0xac   :  { %3442 = vmatpush3.bf16.msra.mxu0 %v3742_v27  ;;  %v4586_v27 = vrot.slane %v691_v22, %v3945_v35 }
  0xad   :  { %3443 = vmatprep.subr.bf16.mxu0 %v3744_v29  ;;  %3464 = vmatpush3.bf16.msra.mxu1 %v3743_v28  ;;  %v728_v28 = vrot.slane %v706_v24, %v3945_v35  ;;  %v3799_v29 = vld [vmem:[%s4687_s1 + $0x700] sm:$0xff]  }
  0xae   :  { %3465 = vmatprep.subr.bf16.mxu1 %v3745_v30  ;;  %v707_v30 = vcombine.high %v4586_v27, %v4586_v27 }
  0xb0   :  { %3444 = vmatpush3.bf16.msra.mxu0 %v3746_v31  ;;  %v736_v31 = vcombine.high %v714_v25, %v714_v25 }
  0xb1   :  { %3445 = vmatprep.subr.bf16.mxu0 %v3748_v33  ;;  %3466 = vmatpush3.bf16.msra.mxu1 %v3747_v32  ;;  %v3801_v32 = vld [vmem:[%s4687_s1 + $0x748] sm:$0xff]   ;;  %v738_v33 = vcombine.high %v728_v28, %v728_v28 }
  0xb2   :  { %3467 = vmatprep.subr.bf16.mxu1 %v3749_v34  ;;  %v3800_v34 = vld [vmem:[%s4687_s1 + $0x780] sm:$0xff]  }
  0xb4   :  { %3446 = vmatpush3.bf16.msra.mxu0 %v3750_v36  ;;  %v735_v36 = vrot.slane %v707_v30, %v3945_v35 }
  0xb5   :  { %3447 = vmatprep.subr.bf16.mxu0 %v3752_v38  ;;  %3468 = vmatpush3.bf16.msra.mxu1 %v3751_v37  ;;  %v3802_v37 = vld [vmem:[%s4687_s1 + $0x7c8] sm:$0xff]  }
  0xb6   :  { %3469 = vmatprep.subr.bf16.mxu1 %v3753_v39  ;;  %v3803_v38 = vld [vmem:[%s4687_s1 + $0x708] sm:$0xff]   ;;  %v739_v39 = vcombine.high %v735_v36, %v735_v36 }
  0xb8   :  { %3448 = vmatpush3.bf16.msra.mxu0 %v3754_v40  ;;  %v3805_v40 = vld [vmem:[%s4687_s1 + $0x750] sm:$0xff]  }
  0xb9   :  { %3449 = vmatprep.subr.bf16.mxu0 %v3756_v42  ;;  %3470 = vmatpush3.bf16.msra.mxu1 %v3755_v41  ;;  %v3804_v41 = vld [vmem:[%s4687_s1 + $0x788] sm:$0xff]   ;;  %v3806_v42 = vld [vmem:[%s4687_s1 + $0x7d0] sm:$0xff]  }
  0xba   :  { %3471 = vmatprep.subr.bf16.mxu1 %v3757_v43  ;;  %v3807_v43 = vld [vmem:[%s4687_s1 + $0x710] sm:$0xff]  }
  0xbc   :  { %3450 = vmatpush3.bf16.msra.mxu0 %v3758_v44  ;;  %v3809_v44 = vld [vmem:[%s4687_s1 + $0x758] sm:$0xff]  }
  0xbd   :  { %3451 = vmatprep.subr.bf16.mxu0 %v3760_v46  ;;  %3472 = vmatpush3.bf16.msra.mxu1 %v3759_v45  ;;  %v3808_v45 = vld [vmem:[%s4687_s1 + $0x790] sm:$0xff]   ;;  %v3810_v46 = vld [vmem:[%s4687_s1 + $0x7d8] sm:$0xff]  }
  0xbe   :  { %3473 = vmatprep.subr.bf16.mxu1 %v3761_v47  ;;  %v3811_v47 = vld [vmem:[%s4687_s1 + $0x718] sm:$0xff]  }
  0xc0   :  { %3452 = vmatpush3.bf16.msra.mxu0 %v3762_v48  ;;  %v3813_v48 = vld [vmem:[%s4687_s1 + $0x760] sm:$0xff]  }
  0xc1   :  { %3481 = vmatprep.subr.bf16.mxu0 %v3765_v51  ;;  %3474 = vmatpush3.bf16.msra.mxu1 %v3763_v49  ;;  %v3812_v49 = vld [vmem:[%s4687_s1 + $0x798] sm:$0xff]   ;;  %v3815_v51 = vld [vmem:[%s4687_s1 + $0x720] sm:$0xff]  }
  0xc2   :  { %3503 = vmatprep.subr.bf16.mxu1 %v3766_v52  ;;  %v3817_v52 = vld [vmem:[%s4687_s1 + $0x768] sm:$0xff]  }
  0xc3   :  { %2741 = vmatmul.mubr.bf16.vlgmr.msra.gmra.mrb[20].mxu0 %v672_v50  ;;  %v3814_v50 = vld [vmem:[%s4687_s1 + $0x7e0] sm:$0xff]  }
  0xc4   :  { %3482 = vmatpush3.bf16.msra.mxu0 %v3767_v53  ;;  %2781 = vmatmul.mubr.bf16.vlgmr.msra.gmra.mrb[20].mxu1 %v688_v55  ;;  %v3816_v53 = vld [vmem:[%s4687_s1 + $0x7a0] sm:$0xff]  }
  0xc5   :  { %3483 = vmatprep.subr.bf16.mxu0 %v3769_v56  ;;  %3504 = vmatpush3.bf16.msra.mxu1 %v3768_v54  ;;  %v3818_v54 = vld [vmem:[%s4687_s1 + $0x7e8] sm:$0xff]   ;;  %v2960_v55 = vld [vmem:[#allocation2] ss:$0 sm:$0xff] }
  0xc6   :  { %3505 = vmatprep.subr.bf16.mxu1 %v3770_v57  ;;  %2820 = vmatprep.mubr.bf16.mxu0 %v728_v28  ;;  %v3819_v56 = vld [vmem:[%s4687_s1 + $0x728] sm:$0xff]  }
  0xc7   :  { %2860 = vmatprep.mubr.bf16.mxu1 %v738_v33 }
  0xc8   :  { %3484 = vmatpush3.bf16.msra.mxu0 %v3771_v58  ;;  %v3821_v58 = vld [vmem:[%s4687_s1 + $0x770] sm:$0xff]  }
  0xc9   :  { %3485 = vmatprep.subr.bf16.mxu0 %v3773_v60  ;;  %3506 = vmatpush3.bf16.msra.mxu1 %v3772_v59  ;;  %v3820_v60 = vld [vmem:[%s4687_s1 + $0x7a8] sm:$0xff]  }
  0xca   :  { %3507 = vmatprep.subr.bf16.mxu1 %v3774_v61 }
  0xcc   :  { %3486 = vmatpush3.bf16.msra.mxu0 %v3775_v62 }
  0xcd   :  { %3487 = vmatprep.subr.bf16.mxu0 %v3777_v0  ;;  %3508 = vmatpush3.bf16.msra.mxu1 %v3776_v63  ;;  %v3822_v0 = vld [vmem:[%s4687_s1 + $0x7f0] sm:$0xff]  }
  0xce   :  { %3509 = vmatprep.subr.bf16.mxu1 %v3778_v1  ;;  %v3823_v1 = vld [vmem:[%s4687_s1 + $0x730] sm:$0xff]  }
  0xd0   :  { %3488 = vmatpush3.bf16.msra.mxu0 %v3779_v2 }
  0xd1   :  { %3489 = vmatprep.subr.bf16.mxu0 %v3781_v4  ;;  %3510 = vmatpush3.bf16.msra.mxu1 %v3780_v3 }
  0xd2   :  { %3511 = vmatprep.subr.bf16.mxu1 %v3782_v5 }
  0xd4   :  { %3490 = vmatpush3.bf16.msra.mxu0 %v3783_v6 }
  0xd5   :  { %3491 = vmatprep.subr.bf16.mxu0 %v3785_v8  ;;  %3512 = vmatpush3.bf16.msra.mxu1 %v3784_v7  ;;  %v3825_v7 = vld [vmem:[%s4687_s1 + $0x778] sm:$0xff]  }
  0xd6   :  { %3513 = vmatprep.subr.bf16.mxu1 %v3786_v9  ;;  %v3824_v9 = vld [vmem:[%s4687_s1 + $0x7b0] sm:$0xff]  }
  0xd8   :  { %3492 = vmatpush3.bf16.msra.mxu0 %v3787_v10 }
  0xd9   :  { %3493 = vmatprep.subr.bf16.mxu0 %v3789_v12  ;;  %3514 = vmatpush3.bf16.msra.mxu1 %v3788_v11  ;;  %v3826_v11 = vld [vmem:[%s4687_s1 + $0x7f8] sm:$0xff]  }
  0xda   :  { %3515 = vmatprep.subr.bf16.mxu1 %v3790_v13  ;;  %v3827_v12 = vld [vmem:[%s4687_s1 + $0x738] sm:$0xff]   ;;  %v721_v13 = vrot.slane %v4586_v27, %v3945_v35 }
  0xdc   :  { %3494 = vmatpush3.bf16.msra.mxu0 %v3791_v14  ;;  %v3828_v14 = vld [vmem:[%s4687_s1 + $0x7b8] sm:$0xff]  }
  0xdd   :  { %3495 = vmatprep.subr.bf16.mxu0 %v3793_v16  ;;  %3516 = vmatpush3.bf16.msra.mxu1 %v3792_v15  ;;  %v737_v15 = vcombine.high %v721_v13, %v721_v13 }
  0xde   :  { %3517 = vmatprep.subr.bf16.mxu1 %v3794_v17 }
  0xe0   :  { %3496 = vmatpush3.bf16.msra.mxu0 %v3795_v18 }
  0xe1   :  { %3525 = vmatprep.subr.bf16.mxu0 %v3797_v21  ;;  %3518 = vmatpush3.bf16.msra.mxu1 %v3796_v23 }
  0xe2   :  { %3547 = vmatprep.subr.bf16.mxu1 %v3798_v26 }
  0xe3   :  { %2821 = vmatmul.mubr.bf16.vlgmr.msra.gmra.mrb[24].mxu0 %v714_v25 }
  0xe4   :  { %3526 = vmatpush3.bf16.msra.mxu0 %v3799_v29  ;;  %2861 = vmatmul.mubr.bf16.vlgmr.msra.gmra.mrb[24].mxu1 %v736_v31 }
  0xe5   :  { %3527 = vmatprep.subr.bf16.mxu0 %v3801_v32  ;;  %3548 = vmatpush3.bf16.msra.mxu1 %v3800_v34 }
  0xe6   :  { %2900 = vmatprep.mubr.bf16.mxu0 %v735_v36  ;;  %3549 = vmatprep.subr.bf16.mxu1 %v3802_v37 }
  0xe7   :  { %2940 = vmatprep.mubr.bf16.mxu1 %v739_v39 }
  0xe8   :  { %3528 = vmatpush3.bf16.msra.mxu0 %v3803_v38 }
  0xe9   :  { %3529 = vmatprep.subr.bf16.mxu0 %v3805_v40  ;;  %3550 = vmatpush3.bf16.msra.mxu1 %v3804_v41 }
  0xea   :  { %3551 = vmatprep.subr.bf16.mxu1 %v3806_v42 }
  0xec   :  { %3530 = vmatpush3.bf16.msra.mxu0 %v3807_v43 }
  0xed   :  { %3531 = vmatprep.subr.bf16.mxu0 %v3809_v44  ;;  %3552 = vmatpush3.bf16.msra.mxu1 %v3808_v45 }
  0xee   :  { %3553 = vmatprep.subr.bf16.mxu1 %v3810_v46 }
  0xf0   :  { %3532 = vmatpush3.bf16.msra.mxu0 %v3811_v47 }
  0xf1   :  { %3533 = vmatprep.subr.bf16.mxu0 %v3813_v48  ;;  %3554 = vmatpush3.bf16.msra.mxu1 %v3812_v49 }
  0xf2   :  { %3555 = vmatprep.subr.bf16.mxu1 %v3814_v50 }
  0xf4   :  { %3534 = vmatpush3.bf16.msra.mxu0 %v3815_v51 }
  0xf5   :  { %3535 = vmatprep.subr.bf16.mxu0 %v3817_v52  ;;  %3556 = vmatpush3.bf16.msra.mxu1 %v3816_v53 }
  0xf6   :  { %v3233_v57 = vpop.f32.mrb[0].mxu0  ;;  %3557 = vmatprep.subr.bf16.mxu1 %v3818_v54 }
  0xf7   :  { %v3234_v59 = vpop.f32.mrb[1].mxu0  ;;  %v3255_v61 = vpop.f32.mrb[0].mxu1 }
  0xf8   :  { %v3235_v62 = vadd.f32 %v3234_v59, %v3233_v57  ;;  %v3236_v63 = vpop.f32.mrb[2].mxu0  ;;  %v3256_v2 = vpop.f32.mrb[1].mxu1  ;;  %3536 = vmatpush3.bf16.msra.mxu0 %v3819_v56 }
  0xf9   :  { %v3237_v3 = vpop.f32.mrb[3].mxu0  ;;  %v3257_v5 = vadd.f32 %v3256_v2, %v3255_v61  ;;  %v3258_v6 = vpop.f32.mrb[2].mxu1  ;;  %3537 = vmatprep.subr.bf16.mxu0 %v3821_v58  ;;  %3558 = vmatpush3.bf16.msra.mxu1 %v3820_v60 }
  0xfa   :  { %v2343_v4 = vadd.f32 %v3235_v62, %v2960_v55  ;;  %v3259_v8 = vpop.f32.mrb[3].mxu1  ;;  %3559 = vmatprep.subr.bf16.mxu1 %v3822_v0 }
  0xfc   :  { %v2383_v10 = vadd.f32 %v3257_v5, %v2343_v4  ;;  %3538 = vmatpush3.bf16.msra.mxu0 %v3823_v1 }
  0xfd   :  { %3539 = vmatprep.subr.bf16.mxu0 %v3825_v7  ;;  %3560 = vmatpush3.bf16.msra.mxu1 %v3824_v9 }
  0xfe   :  { %3561 = vmatprep.subr.bf16.mxu1 %v3826_v11 }
 0x100   :  { %3540 = vmatpush3.bf16.msra.mxu0 %v3827_v12 }
 0x101   :  { %3562 = vmatpush3.bf16.msra.mxu1 %v3828_v14 }
 0x103   :  { %2901 = vmatmul.mubr.bf16.vlgmr.msra.gmra.mrb[28].mxu0 %v721_v13 }
 0x104   :  { %2941 = vmatmul.mubr.bf16.vlgmr.msra.gmra.mrb[28].mxu1 %v737_v15 }
 0x116   :  { %v3277_v16 = vpop.f32.mrb[4].mxu0 }
 0x117   :  { %v3278_v17 = vpop.f32.mrb[5].mxu0  ;;  %v3299_v18 = vpop.f32.mrb[4].mxu1 }
 0x118   :  { %v3279_v19 = vadd.f32 %v3278_v17, %v3277_v16  ;;  %v3280_v20 = vpop.f32.mrb[6].mxu0  ;;  %v3300_v21 = vpop.f32.mrb[5].mxu1 }
 0x119   :  { %v3281_v22 = vpop.f32.mrb[7].mxu0  ;;  %v3301_v35 = vadd.f32 %v3300_v21, %v3299_v18  ;;  %v3302_v24 = vpop.f32.mrb[6].mxu1 }
 0x11a   :  { %v2423_v23 = vadd.f32 %v3279_v19, %v2383_v10  ;;  %v3303_v25 = vpop.f32.mrb[7].mxu1 }
 0x11c   :  { %v2463_v26 = vadd.f32 %v3301_v35, %v2423_v23 }
 0x136   :  { %v3321_v27 = vpop.f32.mrb[8].mxu0 }
 0x137   :  { %v3322_v28 = vpop.f32.mrb[9].mxu0  ;;  %v3343_v29 = vpop.f32.mrb[8].mxu1 }
 0x138   :  { %v3323_v30 = vadd.f32 %v3322_v28, %v3321_v27  ;;  %v3324_v31 = vpop.f32.mrb[10].mxu0  ;;  %v3344_v32 = vpop.f32.mrb[9].mxu1 }
 0x139   :  { %v3325_v33 = vpop.f32.mrb[11].mxu0  ;;  %v3345_v36 = vadd.f32 %v3344_v32, %v3343_v29  ;;  %v3346_v37 = vpop.f32.mrb[10].mxu1 }
 0x13a   :  { %v2503_v34 = vadd.f32 %v3323_v30, %v2463_v26  ;;  %v3347_v38 = vpop.f32.mrb[11].mxu1 }
 0x13c   :  { %v2543_v39 = vadd.f32 %v3345_v36, %v2503_v34 }
 0x156   :  { %v3365_v40 = vpop.f32.mrb[12].mxu0 }
 0x157   :  { %v3366_v41 = vpop.f32.mrb[13].mxu0  ;;  %v3387_v42 = vpop.f32.mrb[12].mxu1 }
 0x158   :  { %v3367_v43 = vadd.f32 %v3366_v41, %v3365_v40  ;;  %v3368_v44 = vpop.f32.mrb[14].mxu0  ;;  %v3388_v45 = vpop.f32.mrb[13].mxu1 }
 0x159   :  { %v3369_v46 = vpop.f32.mrb[15].mxu0  ;;  %v3389_v48 = vadd.f32 %v3388_v45, %v3387_v42  ;;  %v3390_v49 = vpop.f32.mrb[14].mxu1 }
 0x15a   :  { %v2583_v47 = vadd.f32 %v3367_v43, %v2543_v39  ;;  %v3391_v50 = vpop.f32.mrb[15].mxu1 }
 0x15c   :  { %v2623_v51 = vadd.f32 %v3389_v48, %v2583_v47 }
 0x176   :  { %v3409_v52 = vpop.f32.mrb[16].mxu0 }
 0x177   :  { %v3410_v53 = vpop.f32.mrb[17].mxu0  ;;  %v3431_v54 = vpop.f32.mrb[16].mxu1 }
 0x178   :  { %v3411_v55 = vadd.f32 %v3410_v53, %v3409_v52  ;;  %v3412_v56 = vpop.f32.mrb[18].mxu0  ;;  %v3432_v57 = vpop.f32.mrb[17].mxu1 }
 0x179   :  { %v3413_v58 = vpop.f32.mrb[19].mxu0  ;;  %v3433_v60 = vadd.f32 %v3432_v57, %v3431_v54  ;;  %v3434_v61 = vpop.f32.mrb[18].mxu1 }
 0x17a   :  { %v2663_v59 = vadd.f32 %v3411_v55, %v2623_v51  ;;  %v3435_v62 = vpop.f32.mrb[19].mxu1 }
 0x17c   :  { %v2703_v63 = vadd.f32 %v3433_v60, %v2663_v59 }
 0x196   :  { %v3453_v0 = vpop.f32.mrb[20].mxu0 }
 0x197   :  { %v3454_v1 = vpop.f32.mrb[21].mxu0  ;;  %v3475_v2 = vpop.f32.mrb[20].mxu1 }
 0x198   :  { %v3455_v3 = vadd.f32 %v3454_v1, %v3453_v0  ;;  %v3456_v4 = vpop.f32.mrb[22].mxu0  ;;  %v3476_v5 = vpop.f32.mrb[21].mxu1 }
 0x199   :  { %v3457_v6 = vpop.f32.mrb[23].mxu0  ;;  %v3477_v8 = vadd.f32 %v3476_v5, %v3475_v2  ;;  %v3478_v9 = vpop.f32.mrb[22].mxu1 }
 0x19a   :  { %v2743_v7 = vadd.f32 %v3455_v3, %v2703_v63  ;;  %v3479_v10 = vpop.f32.mrb[23].mxu1 }
 0x19c   :  { %v2783_v11 = vadd.f32 %v3477_v8, %v2743_v7 }
 0x1b6   :  { %v3497_v12 = vpop.f32.mrb[24].mxu0 }
 0x1b7   :  { %v3498_v13 = vpop.f32.mrb[25].mxu0  ;;  %v3519_v14 = vpop.f32.mrb[24].mxu1 }
 0x1b8   :  { %v3499_v15 = vadd.f32 %v3498_v13, %v3497_v12  ;;  %v3500_v16 = vpop.f32.mrb[26].mxu0  ;;  %v3520_v17 = vpop.f32.mrb[25].mxu1 }
 0x1b9   :  { %v3501_v18 = vpop.f32.mrb[27].mxu0  ;;  %v3521_v20 = vadd.f32 %v3520_v17, %v3519_v14  ;;  %v3522_v21 = vpop.f32.mrb[26].mxu1 }
 0x1ba   :  { %v2823_v19 = vadd.f32 %v3499_v15, %v2783_v11  ;;  %v3523_v22 = vpop.f32.mrb[27].mxu1 }
 0x1bc   :  { %v2863_v23 = vadd.f32 %v3521_v20, %v2823_v19 }
 0x1d6   :  { %v3541_v35 = vpop.f32.mrb[28].mxu0 }
 0x1d7   :  { %v3542_v24 = vpop.f32.mrb[29].mxu0  ;;  %v3563_v25 = vpop.f32.mrb[28].mxu1 }
 0x1d8   :  { %v3543_v26 = vadd.f32 %v3542_v24, %v3541_v35  ;;  %v3544_v27 = vpop.f32.mrb[30].mxu0  ;;  %v3564_v28 = vpop.f32.mrb[29].mxu1 }
 0x1d9   :  { %v3545_v29 = vpop.f32.mrb[31].mxu0  ;;  %v3565_v31 = vadd.f32 %v3564_v28, %v3563_v25  ;;  %v3566_v32 = vpop.f32.mrb[30].mxu1 }
 0x1da   :  { %v2903_v30 = vadd.f32 %v3543_v26, %v2863_v23  ;;  %v3567_v33 = vpop.f32.mrb[31].mxu1 }
 0x1dc   :  { %v2943_v34 = vadd.f32 %v3565_v31, %v2903_v30 }
 0x1de   :  { %v2948_v36 = vsub.f32 0.0, %v2943_v34 }
 0x1e0   :  { %v2949_v37 = vmul.f32 1.442695, %v2948_v36 }
 0x1e2   :  { %3830 = vpow2.f32 %v2949_v37 }
 0x1ec   :  { %v3831_v38 = vpop.eup %3830 }
 0x1ed   :  { %v2951_v39 = vadd.f32 1.0, %v3831_v38 }
 0x1ef   :  { %3832 = vrcp.f32 %v2951_v39 }
 0x1f9   :  { %v3833_v40 = vpop.eup %3832 }
 0x1fa   :  { %2955 = vst.msk [vmem:[%s4690_s3] sm:$0x3] %vm2954_vm0, %v3833_v40 }

</bundles_post_ra>
